<compile_context>
chip_gen: v7x
topology: tpu7x:2x2x1
jax: 0.10.0
libtpu: 0.0.40
codegen_flags: <defaults>
</compile_context>

<pallas_src>
import functools

import numpy as np

import jax
import jax.numpy as jnp
from jax.experimental import pallas as pl
from jax.experimental.pallas import tpu as pltpu

KERNEL_SIZE = 6
PADDING = 1
STRIDE = 4
LRELU_SLOPE = 0.2
BN_EPS = 1e-5
LANE = 128
# Actual per-call VMEM here is ~1-3 MiB; this limit is only a portability guard
# (v7x: 64 MiB physical). Do NOT shrink tiles for v7x — the only v7x-specific lever
# is the >=2-tile grid on layer 0 so both TensorCores get work.
VMEM_LIMIT = 32 * 1024 * 1024


def _round_up(x, m):
    return (x + m - 1) // m * m


def _pad2d(a, rows, cols):
    return jnp.pad(a, ((0, rows - a.shape[0]), (0, cols - a.shape[1])))


# ----------------------------- Pallas kernels ---------------------------------
def _conv_lrelu_kernel(p_ref, w_ref, o_ref):
    """Layer 0: (bm, Kp) @ (Kp, 128) -> LeakyReLU(0.2); store only the real Cout lanes."""
    acc = jnp.dot(p_ref[...], w_ref[...], preferred_element_type=jnp.float32)
    acc = acc[:, :o_ref.shape[1]]                       # drop padded lanes before HBM
    acc = jnp.where(acc >= 0, acc, LRELU_SLOPE * acc)
    o_ref[...] = acc.astype(o_ref.dtype)


def _fused_tail_kernel(p1_ref, w1_ref, b1_ref, sel_ref, w2_ref, b2_ref, w3_ref, o_ref):
    """Fused layers 1+2+3; the a1 / a2 activations never leave VMEM.

    p1_ref : (M1, K1p)     layer-1 im2col patches, rows ordered (n, oh1, ow1), bf16.
    w1_ref : (K1p, C1p)    BN-scale-folded layer-1 weights, bf16.
    b1_ref : (1, C1p)      folded BN bias, f32.
    sel_ref: (T*P, M1)     constant 0/1 gather matrix: row (t, p) selects the a1 row that
                           feeds layer-2 tap t at output pixel p (all-zero row == SAME pad).
    w2_ref : (T, C1p, C2p) per-tap BN-scale-folded layer-2 weights, bf16.
    b2_ref : (1, C2p)      folded BN bias, f32.
    w3_ref : (P, C2p)      layer-3 (Cout=1) weights broadcast to the a2 row order, f32.
    o_ref  : (N, 1)        sigmoid output, f32.
    """
    n = o_ref.shape[0]
    taps = w2_ref.shape[0]

    # ---- layer 1: one lane-dense matmul + folded-BN bias + LeakyReLU ----
    a1 = jnp.dot(p1_ref[...], w1_ref[...], preferred_element_type=jnp.float32)
    a1 = a1 + b1_ref[...]
    a1 = jnp.where(a1 >= 0, a1, LRELU_SLOPE * a1)       # (M1, C1p); padded lanes stay 0

    # ---- layer 2: gather every (tap, output-pixel) row with ONE selection matmul,
    #      then tap-sum matmuls at M = P (>= 8 sublanes), f32 accumulation ----
    g = jnp.dot(sel_ref[...], a1.astype(jnp.bfloat16),
                preferred_element_type=jnp.float32)     # (T*P, C1p)
    rows = g.shape[0] // taps                           # P = layer-2 pixels * N
    acc2 = jnp.zeros((rows, w2_ref.shape[2]), jnp.float32)
    for t in range(taps):                               # static unroll (36 taps)
        g_t = g[t * rows:(t + 1) * rows].astype(jnp.bfloat16)
        acc2 = acc2 + jnp.dot(g_t, w2_ref[t], preferred_element_type=jnp.float32)
    a2 = acc2 + b2_ref[...]
    a2 = jnp.where(a2 >= 0, a2, LRELU_SLOPE * a2)       # (P, C2p)

    # ---- layer 3 (Cout = 1): elementwise multiply + reductions, no tiny matmuls ----
    prod = a2 * w3_ref[...]                             # (P, C2p) f32
    npos = rows // n
    acc3 = prod[0:n]
    for pos in range(1, npos):                          # static unroll (4 positions)
        acc3 = acc3 + prod[pos * n:(pos + 1) * n]
    logit = jnp.sum(acc3, axis=-1, keepdims=True)       # (N, 1)
    sig = pl.reciprocal(1.0 + jnp.exp(-logit), approx=True)   # exp on EUP, approx recip
    o_ref[...] = sig.astype(o_ref.dtype)


# ------------------------------- wrappers --------------------------------------
def _layer0_num_tiles():
    """v7x has two TensorCores -> keep >= 2 parallel M-tiles; v5e/v6e -> one whole-M tile."""
    try:
        kind = jax.devices()[0].device_kind
    except Exception:
        kind = ""
    return 2 if "7" in kind else 1


def conv_lrelu(p, w, cout, out_dtype):
    """p: (M, Kp) bf16, w: (Kp, 128) bf16 -> LeakyReLU(p @ w)[:, :cout] as (M, cout)."""
    m, k = p.shape
    tiles = _layer0_num_tiles()
    if m % tiles != 0 or (m // tiles) % 8 != 0:
        tiles = 1
    bm = m // tiles
    return pl.pallas_call(
        _conv_lrelu_kernel,
        out_shape=jax.ShapeDtypeStruct((m, cout), out_dtype),
        grid=(tiles,),
        in_specs=[
            pl.BlockSpec((bm, k), lambda i: (i, 0)),
            pl.BlockSpec((k, w.shape[1]), lambda i: (0, 0)),
        ],
        out_specs=pl.BlockSpec((bm, cout), lambda i: (i, 0)),
        compiler_params=pltpu.CompilerParams(
            dimension_semantics=("parallel",),          # rows independent (v7x: 2 TCs)
            vmem_limit_bytes=VMEM_LIMIT),
    )(p, w)


def fused_tail(p1, w1f, b1f, sel, w2s, b2f, w3b, n_batch):
    """Single pallas_call for layers 1+2+3. Returns (N, 1) f32 sigmoid outputs."""
    return pl.pallas_call(
        _fused_tail_kernel,
        out_shape=jax.ShapeDtypeStruct((n_batch, 1), jnp.float32),
        grid=(1,),
        in_specs=[
            pl.BlockSpec(p1.shape, lambda i: (0, 0)),
            pl.BlockSpec(w1f.shape, lambda i: (0, 0)),
            pl.BlockSpec(b1f.shape, lambda i: (0, 0)),
            pl.BlockSpec(sel.shape, lambda i: (0, 0)),
            pl.BlockSpec(w2s.shape, lambda i: (0, 0, 0)),
            pl.BlockSpec(b2f.shape, lambda i: (0, 0)),
            pl.BlockSpec(w3b.shape, lambda i: (0, 0)),
        ],
        out_specs=pl.BlockSpec((n_batch, 1), lambda i: (0, 0)),
        compiler_params=pltpu.CompilerParams(
            dimension_semantics=("arbitrary",),
            vmem_limit_bytes=VMEM_LIMIT),
    )(p1, w1f, b1f, sel, w2s, b2f, w3b)


# --------------------------------- glue -----------------------------------------
def _patches_nhwc(x, kh, kw, stride, padding):
    """im2col as a single XLA op. Patch feature order (c, i, j) == torch w.reshape(Cout, -1)."""
    p = jax.lax.conv_general_dilated_patches(
        x, (kh, kw), (stride, stride),
        [(padding, padding), (padding, padding)],
        dimension_numbers=("NHWC", "HWIO", "NHWC"))
    n, ho, wo, k = p.shape
    return p.reshape(n * ho * wo, k), ho, wo


def _prep_weight(w, k_pad, c_pad, scale=None):
    """torch (Cout, Cin, kh, kw) -> (Kp, Cp) bf16 matrix; column order (c, i, j)."""
    cout = w.shape[0]
    wm = w.reshape(cout, -1)
    if scale is not None:
        wm = wm * scale[:, None]                        # fold BN scale
    return _pad2d(wm.T, k_pad, c_pad).astype(jnp.bfloat16)


def _prep_bias(b, c_pad):
    b = b.reshape(1, -1).astype(jnp.float32)
    return jnp.pad(b, ((0, 0), (0, c_pad - b.shape[1])))


def _prep_w2_taps(w, scale, cin_pad, cout_pad):
    """torch (Cout, Cin, kh, kw) -> (kh*kw, Cin_p, Cout_p) bf16, BN scale folded."""
    cout, cin, kh, kw = w.shape
    wm = w * scale[:, None, None, None]
    wm = jnp.transpose(wm, (2, 3, 1, 0)).reshape(kh * kw, cin, cout)
    return jnp.pad(wm, ((0, 0), (0, cin_pad - cin), (0, cout_pad - cout))
                   ).astype(jnp.bfloat16)


def _prep_w3_rows(w3, n_batch, c_pad):
    """torch (1, Cin, kh3, kw3) -> (kh3*kw3*N, Cp) f32, rows ordered (pos, n)."""
    cout3, cin3, kh3, kw3 = w3.shape
    wm = jnp.transpose(w3[0], (1, 2, 0)).reshape(kh3 * kw3, cin3)   # (pos, Cin)
    wm = jnp.repeat(wm, n_batch, axis=0)                            # row = pos*N + n
    return jnp.pad(wm, ((0, 0), (0, c_pad - cin3))).astype(jnp.float32)


def _build_tap_selection(n_batch, h_in, w_in, kh, kw, stride, padding):
    """Constant 0/1 matrix turning the layer-2 im2col gather into one MXU matmul.

    Row (t, p) with t = i*kw + j and p = (oh*wo + ow)*N + n selects the a1 row that feeds
    conv tap (i, j) at output pixel (oh, ow) of image n; rows hitting SAME-padding are zero.
    """
    ho = (h_in + 2 * padding - kh) // stride + 1
    wo = (w_in + 2 * padding - kw) // stride + 1
    npix = ho * wo * n_batch
    sel = np.zeros((kh * kw * npix, n_batch * h_in * w_in), np.float32)
    for i in range(kh):
        for j in range(kw):
            t = i * kw + j
            for oh in range(ho):
                for ow in range(wo):
                    h = stride * oh + i - padding
                    w = stride * ow + j - padding
                    if 0 <= h < h_in and 0 <= w < w_in:
                        for nb in range(n_batch):
                            r_out = t * npix + (oh * wo + ow) * n_batch + nb
                            r_in = (nb * h_in + h) * w_in + w
                            sel[r_out, r_in] = 1.0
    return sel, ho, wo


def _l2norm(v, eps=1e-12):
    return v / (jnp.sqrt(jnp.sum(v * v)) + eps)


def spectral_normalize(w, key, n_iter=1):
    """Power-iteration spectral norm (mimics eval-mode nn.utils.spectral_norm)."""
    # TODO(synk): PyTorch keeps a persistent `u` buffer across forward passes; here `u`
    # is deterministically re-initialized from `key` on every call.
    cout = w.shape[0]
    w_mat = w.reshape(cout, -1)
    u = _l2norm(jax.random.normal(key, (cout,), jnp.float32))
    v = _l2norm(w_mat.T @ u)
    for _ in range(n_iter - 1):
        u = _l2norm(w_mat @ v)
        v = _l2norm(w_mat.T @ u)
    u = _l2norm(w_mat @ v)
    sigma = u @ (w_mat @ v)
    return w / sigma


def discriminator_forward(x_nchw, params, ndf):
    """Eval-mode forward. x: (N, nc, H, W) -> (N, 1, 1, 1)."""
    n = x_nchw.shape[0]
    x = jnp.transpose(x_nchw, (0, 2, 3, 1))            # to NHWC once, stays NHWC

    # ---- layer 0: Conv(nc -> ndf, k=6, s=4, p=1, bias=False) + LeakyReLU(0.2) ----
    c0 = ndf
    p0, ho0, wo0 = _patches_nhwc(x, KERNEL_SIZE, KERNEL_SIZE, STRIDE, PADDING)
    k0p = _round_up(p0.shape[1], LANE)
    w0 = _prep_weight(params["w0"], k0p, LANE)
    p0 = _pad2d(p0, p0.shape[0], k0p).astype(jnp.bfloat16)
    a0 = conv_lrelu(p0, w0, c0, jnp.bfloat16)          # (N*Ho0*Wo0, c0): no lane padding in HBM
    a0 = a0.reshape(n, ho0, wo0, c0)

    # ---- layers 1..3 fused into one pallas_call (a1 / a2 stay resident in VMEM) ----
    c1 = ndf * STRIDE                                   # d_out = stride ** 1
    c2 = ndf * STRIDE * STRIDE                          # d_out = stride ** 2
    c1p, c2p = _round_up(c1, LANE), _round_up(c2, LANE)

    s1 = params["g1"] / jnp.sqrt(params["rv1"] + BN_EPS)
    p1, ho1, wo1 = _patches_nhwc(a0, KERNEL_SIZE, KERNEL_SIZE, STRIDE, PADDING)
    k1p = _round_up(p1.shape[1], LANE)
    w1f = _prep_weight(params["w1"], k1p, c1p, scale=s1)
    b1f = _prep_bias(params["b1"] - params["rm1"] * s1, c1p)
    p1 = _pad2d(p1, p1.shape[0], k1p)                   # already bf16 (a0 is bf16)

    s2 = params["g2"] / jnp.sqrt(params["rv2"] + BN_EPS)
    sel_np, ho2, wo2 = _build_tap_selection(n, ho1, wo1, KERNEL_SIZE, KERNEL_SIZE,
                                            STRIDE, PADDING)
    sel = jnp.asarray(sel_np, jnp.bfloat16)             # trace-time constant (288, 128)
    w2s = _prep_w2_taps(params["w2"], s2, c1p, c2p)
    b2f = _prep_bias(params["b2"] - params["rm2"] * s2, c2p)

    cout3, cin3, kh3, kw3 = params["w3"].shape
    assert cout3 == 1 and (kh3, kw3) == (ho2, wo2), \
        "fused tail assumes the final conv covers the whole layer-2 output map"
    w3b = _prep_w3_rows(params["w3"], n, c2p)

    y = fused_tail(p1, w1f, b1f, sel, w2s, b2f, w3b, n)  # (N, 1)
    return y.reshape(n, cout3, 1, 1)


# ----------------------------- pure-JAX reference --------------------------------
def _reference_forward(x, params):
    def conv(y, w, stride, padding):
        return jax.lax.conv_general_dilated(
            y, jnp.transpose(w, (2, 3, 1, 0)),
            window_strides=(stride, stride),
            padding=[(padding, padding), (padding, padding)],
            dimension_numbers=("NHWC", "HWIO", "NHWC"))

    def bn(y, g, b, rm, rv):
        return (y - rm) * (g / jnp.sqrt(rv + BN_EPS)) + b

    def lrelu(y):
        return jnp.where(y >= 0, y, LRELU_SLOPE * y)

    y = jnp.transpose(x, (0, 2, 3, 1))
    y = lrelu(conv(y, params["w0"], STRIDE, PADDING))
    y = lrelu(bn(conv(y, params["w1"], STRIDE, PADDING),
                 params["g1"], params["b1"], params["rm1"], params["rv1"]))
    y = lrelu(bn(conv(y, params["w2"], STRIDE, PADDING),
                 params["g2"], params["b2"], params["rm2"], params["rv2"]))
    y = jax.nn.sigmoid(conv(y, params["w3"], STRIDE, 0))
    return jnp.transpose(y, (0, 3, 1, 2))


if __name__ == "__main__":
    # TODO(synk): Dropout2d train-mode stochastic channel masking is not modeled
    # (eval-mode identity is used), as it has no deterministic forward semantics.
    N, nc, ndf, H = 2, 3, 4, 128   # spatial chain: 128 -> 32 -> 8 -> 2 -> 1
    key = jax.random.PRNGKey(0)
    ks = jax.random.split(key, 16)

    x = jax.random.normal(ks[0], (N, nc, H, H), jnp.float32)

    w0 = 0.05 * jax.random.normal(ks[1], (ndf, nc, KERNEL_SIZE, KERNEL_SIZE), jnp.float32)
    w1 = spectral_normalize(
        0.05 * jax.random.normal(ks[2], (ndf * 4, ndf, KERNEL_SIZE, KERNEL_SIZE), jnp.float32), ks[3])
    w2 = spectral_normalize(
        0.05 * jax.random.normal(ks[4], (ndf * 16, ndf * 4, KERNEL_SIZE, KERNEL_SIZE), jnp.float32), ks[5])
    w3 = 0.05 * jax.random.normal(ks[6], (1, ndf * 16, 2, 2), jnp.float32)

    g1 = 1.0 + 0.1 * jax.random.normal(ks[7], (ndf * 4,), jnp.float32)
    b1 = 0.1 * jax.random.normal(ks[8], (ndf * 4,), jnp.float32)
    rm1 = 0.1 * jax.random.normal(ks[9], (ndf * 4,), jnp.float32)
    rv1 = 1.0 + 0.1 * jax.random.uniform(ks[10], (ndf * 4,), jnp.float32)

    g2 = 1.0 + 0.1 * jax.random.normal(ks[11], (ndf * 16,), jnp.float32)
    b2 = 0.1 * jax.random.normal(ks[12], (ndf * 16,), jnp.float32)
    rm2 = 0.1 * jax.random.normal(ks[13], (ndf * 16,), jnp.float32)
    rv2 = 1.0 + 0.1 * jax.random.uniform(ks[14], (ndf * 16,), jnp.float32)

    params = dict(w0=w0, w1=w1, w2=w2, w3=w3,
                  g1=g1, b1=b1, rm1=rm1, rv1=rv1,
                  g2=g2, b2=b2, rm2=rm2, rv2=rv2)

    fwd = jax.jit(functools.partial(discriminator_forward, ndf=ndf))
    y = jax.block_until_ready(fwd(x, params))

    assert y.shape == (N, 1, 1, 1), y.shape
    # approx reciprocal in the sigmoid can overshoot 1.0 by a hair; allow tiny slack.
    assert bool(jnp.all((y >= 0.0) & (y <= 1.0 + 1e-2)))

    y_ref = jax.block_until_ready(_reference_forward(x, params))
    max_err = float(jnp.max(jnp.abs(y - y_ref)))
    assert max_err < 2e-2, f"mismatch vs XLA reference: {max_err}"

    print("KERNEL_OK")
</pallas_src>

<mosaic_0001>
module attributes {stable_mosaic.version = 11 : i64} {
  func.func @_conv_lrelu_kernel(%arg0: i32, %arg1: memref<2048x128xbf16, #tpu.memory_space<vmem>>, %arg2: memref<128x128xbf16, #tpu.memory_space<vmem>>, %arg3: memref<2048x4xbf16, #tpu.memory_space<vmem>>) attributes {dimension_semantics = [#tpu.dimension_semantics<parallel>], iteration_bounds = array<i64: 1>, scalar_prefetch = 0 : i64, scratch_operands = 0 : i64, tpu.core_type = #tpu.core_type<tc>, window_params = [{transform_indices = @transform_0, window_bounds = array<i64: 2048, 128>}, {pipeline_mode = #tpu.pipeline_mode<synchronous>, transform_indices = @transform_1, window_bounds = array<i64: 128, 128>}, {transform_indices = @transform_2, window_bounds = array<i64: 2048, 4>}]} {
    %c0 = arith.constant 0 : index
    %c0_0 = arith.constant 0 : index
    %0 = vector.load %arg1[%c0, %c0_0] : memref<2048x128xbf16, #tpu.memory_space<vmem>>, vector<2048x128xbf16>
    %c0_1 = arith.constant 0 : index
    %c0_2 = arith.constant 0 : index
    %1 = vector.load %arg2[%c0_1, %c0_2] : memref<128x128xbf16, #tpu.memory_space<vmem>>, vector<128x128xbf16>
    %cst = arith.constant dense<0.000000e+00> : vector<2048x128xf32>
    %2 = tpu.matmul %0, %1, %cst {dimension_numbers = #tpu.dot_dimension_numbers<[1], [0], [0], [1], [0, 0, 1, 1], [], []>} : vector<2048x128xbf16>, vector<128x128xbf16>, vector<2048x128xf32> -> vector<2048x128xf32>
    %3 = vector.extract_strided_slice %2 {offsets = [0, 0], sizes = [2048, 4], strides = [1, 1]} : vector<2048x128xf32> to vector<2048x4xf32>
    %cst_3 = arith.constant 0.000000e+00 : f32
    %4 = vector.broadcast %cst_3 : f32 to vector<2048x4xf32>
    %5 = arith.cmpf oge, %3, %4 : vector<2048x4xf32>
    %cst_4 = arith.constant 2.000000e-01 : f32
    %6 = vector.broadcast %cst_4 : f32 to vector<2048x4xf32>
    %7 = arith.mulf %6, %3 : vector<2048x4xf32>
    %8 = arith.select %5, %3, %7 : vector<2048x4xi1>, vector<2048x4xf32>
    %9 = arith.truncf %8 : vector<2048x4xf32> to vector<2048x4xbf16>
    %c0_5 = arith.constant 0 : index
    %c0_6 = arith.constant 0 : index
    %10 = vector.load %arg3[%c0_5, %c0_6] : memref<2048x4xbf16, #tpu.memory_space<vmem>>, vector<2048x4xbf16>
    tpu.vector_store %arg3[%c0_5, %c0_6], %9 {strides = array<i32>} : memref<2048x4xbf16, #tpu.memory_space<vmem>>, vector<2048x4xbf16>,
    return
  }
  func.func @transform_0(%arg0: i32) -> (i32, i32) {
    %c0_i32 = arith.constant 0 : i32
    %c0_i32_0 = arith.constant 0 : i32
    return %arg0, %c0_i32 : i32, i32
  }
  func.func @transform_1(%arg0: i32) -> (i32, i32) {
    %c0_i32 = arith.constant 0 : i32
    %c0_i32_0 = arith.constant 0 : i32
    %c0_i32_1 = arith.constant 0 : i32
    return %c0_i32, %c0_i32_0 : i32, i32
  }
  func.func @transform_2(%arg0: i32) -> (i32, i32) {
    %c0_i32 = arith.constant 0 : i32
    %c0_i32_0 = arith.constant 0 : i32
    return %arg0, %c0_i32 : i32, i32
  }
}

module attributes {stable_mosaic.version = 11 : i64} {
  func.func @_fused_tail_kernel(%arg0: i32, %arg1: memref<128x256xbf16, #tpu.memory_space<vmem>>, %arg2: memref<256x128xbf16, #tpu.memory_space<vmem>>, %arg3: memref<1x128xf32, #tpu.memory_space<vmem>>, %arg4: memref<288x128xbf16, #tpu.memory_space<vmem>>, %arg5: memref<36x128x128xbf16, #tpu.memory_space<vmem>>, %arg6: memref<1x128xf32, #tpu.memory_space<vmem>>, %arg7: memref<8x128xf32, #tpu.memory_space<vmem>>, %arg8: memref<2x1xf32, #tpu.memory_space<vmem>>) attributes {dimension_semantics = [#tpu.dimension_semantics<arbitrary>], iteration_bounds = array<i64: 1>, scalar_prefetch = 0 : i64, scratch_operands = 0 : i64, tpu.core_type = #tpu.core_type<tc>, window_params = [{pipeline_mode = #tpu.pipeline_mode<synchronous>, transform_indices = @transform_0, window_bounds = array<i64: 128, 256>}, {pipeline_mode = #tpu.pipeline_mode<synchronous>, transform_indices = @transform_1, window_bounds = array<i64: 256, 128>}, {pipeline_mode = #tpu.pipeline_mode<synchronous>, transform_indices = @transform_2, window_bounds = array<i64: 1, 128>}, {pipeline_mode = #tpu.pipeline_mode<synchronous>, transform_indices = @transform_3, window_bounds = array<i64: 288, 128>}, {pipeline_mode = #tpu.pipeline_mode<synchronous>, transform_indices = @transform_4, window_bounds = array<i64: 36, 128, 128>}, {pipeline_mode = #tpu.pipeline_mode<synchronous>, transform_indices = @transform_5, window_bounds = array<i64: 1, 128>}, {pipeline_mode = #tpu.pipeline_mode<synchronous>, transform_indices = @transform_6, window_bounds = array<i64: 8, 128>}, {pipeline_mode = #tpu.pipeline_mode<synchronous>, transform_indices = @transform_7, window_bounds = array<i64: 2, 1>}]} {
    %c0 = arith.constant 0 : index
    %c0_0 = arith.constant 0 : index
    %0 = vector.load %arg1[%c0, %c0_0] : memref<128x256xbf16, #tpu.memory_space<vmem>>, vector<128x256xbf16>
    %c0_1 = arith.constant 0 : index
    %c0_2 = arith.constant 0 : index
    %1 = vector.load %arg2[%c0_1, %c0_2] : memref<256x128xbf16, #tpu.memory_space<vmem>>, vector<256x128xbf16>
    %cst = arith.constant dense<0.000000e+00> : vector<128x128xf32>
    %2 = tpu.matmul %0, %1, %cst {dimension_numbers = #tpu.dot_dimension_numbers<[1], [0], [0], [1], [0, 0, 1, 1], [], []>} : vector<128x256xbf16>, vector<256x128xbf16>, vector<128x128xf32> -> vector<128x128xf32>
    %c0_3 = arith.constant 0 : index
    %c0_4 = arith.constant 0 : index
    %3 = vector.load %arg3[%c0_3, %c0_4] : memref<1x128xf32, #tpu.memory_space<vmem>>, vector<1x128xf32>
    %4 = vector.broadcast %3 : vector<1x128xf32> to vector<128x128xf32>
    %5 = arith.addf %2, %4 : vector<128x128xf32>
    %cst_5 = arith.constant 0.000000e+00 : f32
    %6 = vector.broadcast %cst_5 : f32 to vector<128x128xf32>
    %7 = arith.cmpf oge, %5, %6 : vector<128x128xf32>
    %cst_6 = arith.constant 2.000000e-01 : f32
    %8 = vector.broadcast %cst_6 : f32 to vector<128x128xf32>
    %9 = arith.mulf %8, %5 : vector<128x128xf32>
    %10 = arith.select %7, %5, %9 : vector<128x128xi1>, vector<128x128xf32>
    %c0_7 = arith.constant 0 : index
    %c0_8 = arith.constant 0 : index
    %11 = vector.load %arg4[%c0_7, %c0_8] : memref<288x128xbf16, #tpu.memory_space<vmem>>, vector<288x128xbf16>
    %12 = arith.truncf %10 : vector<128x128xf32> to vector<128x128xbf16>
    %cst_9 = arith.constant dense<0.000000e+00> : vector<288x128xf32>
    %13 = tpu.matmul %11, %12, %cst_9 {dimension_numbers = #tpu.dot_dimension_numbers<[1], [0], [0], [1], [0, 0, 1, 1], [], []>} : vector<288x128xbf16>, vector<128x128xbf16>, vector<288x128xf32> -> vector<288x128xf32>
    %cst_10 = arith.constant 0.000000e+00 : f32
    %14 = vector.broadcast %cst_10 : f32 to vector<8x128xf32>
    %15 = vector.extract_strided_slice %13 {offsets = [0, 0], sizes = [8, 128], strides = [1, 1]} : vector<288x128xf32> to vector<8x128xf32>
    %16 = arith.truncf %15 : vector<8x128xf32> to vector<8x128xbf16>
    %c0_11 = arith.constant 0 : index
    %c0_12 = arith.constant 0 : index
    %c0_13 = arith.constant 0 : index
    %17 = vector.load %arg5[%c0_11, %c0_12, %c0_13] : memref<36x128x128xbf16, #tpu.memory_space<vmem>>, vector<1x128x128xbf16>
    %18 = vector.shape_cast %17 : vector<1x128x128xbf16> to vector<128x128xbf16>
    %cst_14 = arith.constant dense<0.000000e+00> : vector<8x128xf32>
    %19 = tpu.matmul %16, %18, %cst_14 {dimension_numbers = #tpu.dot_dimension_numbers<[1], [0], [0], [1], [0, 0, 1, 1], [], []>} : vector<8x128xbf16>, vector<128x128xbf16>, vector<8x128xf32> -> vector<8x128xf32>
    %20 = arith.addf %14, %19 : vector<8x128xf32>
    %21 = vector.extract_strided_slice %13 {offsets = [8, 0], sizes = [8, 128], strides = [1, 1]} : vector<288x128xf32> to vector<8x128xf32>
    %22 = arith.truncf %21 : vector<8x128xf32> to vector<8x128xbf16>
    %c1 = arith.constant 1 : index
    %c0_15 = arith.constant 0 : index
    %c0_16 = arith.constant 0 : index
    %23 = vector.load %arg5[%c1, %c0_15, %c0_16] : memref<36x128x128xbf16, #tpu.memory_space<vmem>>, vector<1x128x128xbf16>
    %24 = vector.shape_cast %23 : vector<1x128x128xbf16> to vector<128x128xbf16>
    %cst_17 = arith.constant dense<0.000000e+00> : vector<8x128xf32>
    %25 = tpu.matmul %22, %24, %cst_17 {dimension_numbers = #tpu.dot_dimension_numbers<[1], [0], [0], [1], [0, 0, 1, 1], [], []>} : vector<8x128xbf16>, vector<128x128xbf16>, vector<8x128xf32> -> vector<8x128xf32>
    %26 = arith.addf %20, %25 : vector<8x128xf32>
    %27 = vector.extract_strided_slice %13 {offsets = [16, 0], sizes = [8, 128], strides = [1, 1]} : vector<288x128xf32> to vector<8x128xf32>
    %28 = arith.truncf %27 : vector<8x128xf32> to vector<8x128xbf16>
    %c2 = arith.constant 2 : index
    %c0_18 = arith.constant 0 : index
    %c0_19 = arith.constant 0 : index
    %29 = vector.load %arg5[%c2, %c0_18, %c0_19] : memref<36x128x128xbf16, #tpu.memory_space<vmem>>, vector<1x128x128xbf16>
    %30 = vector.shape_cast %29 : vector<1x128x128xbf16> to vector<128x128xbf16>
    %cst_20 = arith.constant dense<0.000000e+00> : vector<8x128xf32>
    %31 = tpu.matmul %28, %30, %cst_20 {dimension_numbers = #tpu.dot_dimension_numbers<[1], [0], [0], [1], [0, 0, 1, 1], [], []>} : vector<8x128xbf16>, vector<128x128xbf16>, vector<8x128xf32> -> vector<8x128xf32>
    %32 = arith.addf %26, %31 : vector<8x128xf32>
    %33 = vector.extract_strided_slice %13 {offsets = [24, 0], sizes = [8, 128], strides = [1, 1]} : vector<288x128xf32> to vector<8x128xf32>
    %34 = arith.truncf %33 : vector<8x128xf32> to vector<8x128xbf16>
    %c3 = arith.constant 3 : index
    %c0_21 = arith.constant 0 : index
    %c0_22 = arith.constant 0 : index
    %35 = vector.load %arg5[%c3, %c0_21, %c0_22] : memref<36x128x128xbf16, #tpu.memory_space<vmem>>, vector<1x128x128xbf16>
    %36 = vector.shape_cast %35 : vector<1x128x128xbf16> to vector<128x128xbf16>
    %cst_23 = arith.constant dense<0.000000e+00> : vector<8x128xf32>
    %37 = tpu.matmul %34, %36, %cst_23 {dimension_numbers = #tpu.dot_dimension_numbers<[1], [0], [0], [1], [0, 0, 1, 1], [], []>} : vector<8x128xbf16>, vector<128x128xbf16>, vector<8x128xf32> -> vector<8x128xf32>
    %38 = arith.addf %32, %37 : vector<8x128xf32>
    %39 = vector.extract_strided_slice %13 {offsets = [32, 0], sizes = [8, 128], strides = [1, 1]} : vector<288x128xf32> to vector<8x128xf32>
    %40 = arith.truncf %39 : vector<8x128xf32> to vector<8x128xbf16>
    %c4 = arith.constant 4 : index
    %c0_24 = arith.constant 0 : index
    %c0_25 = arith.constant 0 : index
    %41 = vector.load %arg5[%c4, %c0_24, %c0_25] : memref<36x128x128xbf16, #tpu.memory_space<vmem>>, vector<1x128x128xbf16>
    %42 = vector.shape_cast %41 : vector<1x128x128xbf16> to vector<128x128xbf16>
    %cst_26 = arith.constant dense<0.000000e+00> : vector<8x128xf32>
    %43 = tpu.matmul %40, %42, %cst_26 {dimension_numbers = #tpu.dot_dimension_numbers<[1], [0], [0], [1], [0, 0, 1, 1], [], []>} : vector<8x128xbf16>, vector<128x128xbf16>, vector<8x128xf32> -> vector<8x128xf32>
    %44 = arith.addf %38, %43 : vector<8x128xf32>
    %45 = vector.extract_strided_slice %13 {offsets = [40, 0], sizes = [8, 128], strides = [1, 1]} : vector<288x128xf32> to vector<8x128xf32>
    %46 = arith.truncf %45 : vector<8x128xf32> to vector<8x128xbf16>
    %c5 = arith.constant 5 : index
    %c0_27 = arith.constant 0 : index
    %c0_28 = arith.constant 0 : index
    %47 = vector.load %arg5[%c5, %c0_27, %c0_28] : memref<36x128x128xbf16, #tpu.memory_space<vmem>>, vector<1x128x128xbf16>
    %48 = vector.shape_cast %47 : vector<1x128x128xbf16> to vector<128x128xbf16>
    %cst_29 = arith.constant dense<0.000000e+00> : vector<8x128xf32>
    %49 = tpu.matmul %46, %48, %cst_29 {dimension_numbers = #tpu.dot_dimension_numbers<[1], [0], [0], [1], [0, 0, 1, 1], [], []>} : vector<8x128xbf16>, vector<128x128xbf16>, vector<8x128xf32> -> vector<8x128xf32>
    %50 = arith.addf %44, %49 : vector<8x128xf32>
    %51 = vector.extract_strided_slice %13 {offsets = [48, 0], sizes = [8, 128], strides = [1, 1]} : vector<288x128xf32> to vector<8x128xf32>
    %52 = arith.truncf %51 : vector<8x128xf32> to vector<8x128xbf16>
    %c6 = arith.constant 6 : index
    %c0_30 = arith.constant 0 : index
    %c0_31 = arith.constant 0 : index
    %53 = vector.load %arg5[%c6, %c0_30, %c0_31] : memref<36x128x128xbf16, #tpu.memory_space<vmem>>, vector<1x128x128xbf16>
    %54 = vector.shape_cast %53 : vector<1x128x128xbf16> to vector<128x128xbf16>
    %cst_32 = arith.constant dense<0.000000e+00> : vector<8x128xf32>
    %55 = tpu.matmul %52, %54, %cst_32 {dimension_numbers = #tpu.dot_dimension_numbers<[1], [0], [0], [1], [0, 0, 1, 1], [], []>} : vector<8x128xbf16>, vector<128x128xbf16>, vector<8x128xf32> -> vector<8x128xf32>
    %56 = arith.addf %50, %55 : vector<8x128xf32>
    %57 = vector.extract_strided_slice %13 {offsets = [56, 0], sizes = [8, 128], strides = [1, 1]} : vector<288x128xf32> to vector<8x128xf32>
    %58 = arith.truncf %57 : vector<8x128xf32> to vector<8x128xbf16>
    %c7 = arith.constant 7 : index
    %c0_33 = arith.constant 0 : index
    %c0_34 = arith.constant 0 : index
    %59 = vector.load %arg5[%c7, %c0_33, %c0_34] : memref<36x128x128xbf16, #tpu.memory_space<vmem>>, vector<1x128x128xbf16>
    %60 = vector.shape_cast %59 : vector<1x128x128xbf16> to vector<128x128xbf16>
    %cst_35 = arith.constant dense<0.000000e+00> : vector<8x128xf32>
    %61 = tpu.matmul %58, %60, %cst_35 {dimension_numbers = #tpu.dot_dimension_numbers<[1], [0], [0], [1], [0, 0, 1, 1], [], []>} : vector<8x128xbf16>, vector<128x128xbf16>, vector<8x128xf32> -> vector<8x128xf32>
    %62 = arith.addf %56, %61 : vector<8x128xf32>
    %63 = vector.extract_strided_slice %13 {offsets = [64, 0], sizes = [8, 128], strides = [1, 1]} : vector<288x128xf32> to vector<8x128xf32>
    %64 = arith.truncf %63 : vector<8x128xf32> to vector<8x128xbf16>
    %c8 = arith.constant 8 : index
    %c0_36 = arith.constant 0 : index
    %c0_37 = arith.constant 0 : index
    %65 = vector.load %arg5[%c8, %c0_36, %c0_37] : memref<36x128x128xbf16, #tpu.memory_space<vmem>>, vector<1x128x128xbf16>
    %66 = vector.shape_cast %65 : vector<1x128x128xbf16> to vector<128x128xbf16>
    %cst_38 = arith.constant dense<0.000000e+00> : vector<8x128xf32>
    %67 = tpu.matmul %64, %66, %cst_38 {dimension_numbers = #tpu.dot_dimension_numbers<[1], [0], [0], [1], [0, 0, 1, 1], [], []>} : vector<8x128xbf16>, vector<128x128xbf16>, vector<8x128xf32> -> vector<8x128xf32>
    %68 = arith.addf %62, %67 : vector<8x128xf32>
    %69 = vector.extract_strided_slice %13 {offsets = [72, 0], sizes = [8, 128], strides = [1, 1]} : vector<288x128xf32> to vector<8x128xf32>
    %70 = arith.truncf %69 : vector<8x128xf32> to vector<8x128xbf16>
    %c9 = arith.constant 9 : index
    %c0_39 = arith.constant 0 : index
    %c0_40 = arith.constant 0 : index
    %71 = vector.load %arg5[%c9, %c0_39, %c0_40] : memref<36x128x128xbf16, #tpu.memory_space<vmem>>, vector<1x128x128xbf16>
    %72 = vector.shape_cast %71 : vector<1x128x128xbf16> to vector<128x128xbf16>
    %cst_41 = arith.constant dense<0.000000e+00> : vector<8x128xf32>
    %73 = tpu.matmul %70, %72, %cst_41 {dimension_numbers = #tpu.dot_dimension_numbers<[1], [0], [0], [1], [0, 0, 1, 1], [], []>} : vector<8x128xbf16>, vector<128x128xbf16>, vector<8x128xf32> -> vector<8x128xf32>
    %74 = arith.addf %68, %73 : vector<8x128xf32>
    %75 = vector.extract_strided_slice %13 {offsets = [80, 0], sizes = [8, 128], strides = [1, 1]} : vector<288x128xf32> to vector<8x128xf32>
    %76 = arith.truncf %75 : vector<8x128xf32> to vector<8x128xbf16>
    %c10 = arith.constant 10 : index
    %c0_42 = arith.constant 0 : index
    %c0_43 = arith.constant 0 : index
    %77 = vector.load %arg5[%c10, %c0_42, %c0_43] : memref<36x128x128xbf16, #tpu.memory_space<vmem>>, vector<1x128x128xbf16>
    %78 = vector.shape_cast %77 : vector<1x128x128xbf16> to vector<128x128xbf16>
    %cst_44 = arith.constant dense<0.000000e+00> : vector<8x128xf32>
    %79 = tpu.matmul %76, %78, %cst_44 {dimension_numbers = #tpu.dot_dimension_numbers<[1], [0], [0], [1], [0, 0, 1, 1], [], []>} : vector<8x128xbf16>, vector<128x128xbf16>, vector<8x128xf32> -> vector<8x128xf32>
    %80 = arith.addf %74, %79 : vector<8x128xf32>
    %81 = vector.extract_strided_slice %13 {offsets = [88, 0], sizes = [8, 128], strides = [1, 1]} : vector<288x128xf32> to vector<8x128xf32>
    %82 = arith.truncf %81 : vector<8x128xf32> to vector<8x128xbf16>
    %c11 = arith.constant 11 : index
    %c0_45 = arith.constant 0 : index
    %c0_46 = arith.constant 0 : index
    %83 = vector.load %arg5[%c11, %c0_45, %c0_46] : memref<36x128x128xbf16, #tpu.memory_space<vmem>>, vector<1x128x128xbf16>
    %84 = vector.shape_cast %83 : vector<1x128x128xbf16> to vector<128x128xbf16>
    %cst_47 = arith.constant dense<0.000000e+00> : vector<8x128xf32>
    %85 = tpu.matmul %82, %84, %cst_47 {dimension_numbers = #tpu.dot_dimension_numbers<[1], [0], [0], [1], [0, 0, 1, 1], [], []>} : vector<8x128xbf16>, vector<128x128xbf16>, vector<8x128xf32> -> vector<8x128xf32>
    %86 = arith.addf %80, %85 : vector<8x128xf32>
    %87 = vector.extract_strided_slice %13 {offsets = [96, 0], sizes = [8, 128], strides = [1, 1]} : vector<288x128xf32> to vector<8x128xf32>
    %88 = arith.truncf %87 : vector<8x128xf32> to vector<8x128xbf16>
    %c12 = arith.constant 12 : index
    %c0_48 = arith.constant 0 : index
    %c0_49 = arith.constant 0 : index
    %89 = vector.load %arg5[%c12, %c0_48, %c0_49] : memref<36x128x128xbf16, #tpu.memory_space<vmem>>, vector<1x128x128xbf16>
    %90 = vector.shape_cast %89 : vector<1x128x128xbf16> to vector<128x128xbf16>
    %cst_50 = arith.constant dense<0.000000e+00> : vector<8x128xf32>
    %91 = tpu.matmul %88, %90, %cst_50 {dimension_numbers = #tpu.dot_dimension_numbers<[1], [0], [0], [1], [0, 0, 1, 1], [], []>} : vector<8x128xbf16>, vector<128x128xbf16>, vector<8x128xf32> -> vector<8x128xf32>
    %92 = arith.addf %86, %91 : vector<8x128xf32>
    %93 = vector.extract_strided_slice %13 {offsets = [104, 0], sizes = [8, 128], strides = [1, 1]} : vector<288x128xf32> to vector<8x128xf32>
    %94 = arith.truncf %93 : vector<8x128xf32> to vector<8x128xbf16>
    %c13 = arith.constant 13 : index
    %c0_51 = arith.constant 0 : index
    %c0_52 = arith.constant 0 : index
    %95 = vector.load %arg5[%c13, %c0_51, %c0_52] : memref<36x128x128xbf16, #tpu.memory_space<vmem>>, vector<1x128x128xbf16>
    %96 = vector.shape_cast %95 : vector<1x128x128xbf16> to vector<128x128xbf16>
    %cst_53 = arith.constant dense<0.000000e+00> : vector<8x128xf32>
    %97 = tpu.matmul %94, %96, %cst_53 {dimension_numbers = #tpu.dot_dimension_numbers<[1], [0], [0], [1], [0, 0, 1, 1], [], []>} : vector<8x128xbf16>, vector<128x128xbf16>, vector<8x128xf32> -> vector<8x128xf32>
    %98 = arith.addf %92, %97 : vector<8x128xf32>
    %99 = vector.extract_strided_slice %13 {offsets = [112, 0], sizes = [8, 128], strides = [1, 1]} : vector<288x128xf32> to vector<8x128xf32>
    %100 = arith.truncf %99 : vector<8x128xf32> to vector<8x128xbf16>
    %c14 = arith.constant 14 : index
    %c0_54 = arith.constant 0 : index
    %c0_55 = arith.constant 0 : index
    %101 = vector.load %arg5[%c14, %c0_54, %c0_55] : memref<36x128x128xbf16, #tpu.memory_space<vmem>>, vector<1x128x128xbf16>
    %102 = vector.shape_cast %101 : vector<1x128x128xbf16> to vector<128x128xbf16>
    %cst_56 = arith.constant dense<0.000000e+00> : vector<8x128xf32>
    %103 = tpu.matmul %100, %102, %cst_56 {dimension_numbers = #tpu.dot_dimension_numbers<[1], [0], [0], [1], [0, 0, 1, 1], [], []>} : vector<8x128xbf16>, vector<128x128xbf16>, vector<8x128xf32> -> vector<8x128xf32>
    %104 = arith.addf %98, %103 : vector<8x128xf32>
    %105 = vector.extract_strided_slice %13 {offsets = [120, 0], sizes = [8, 128], strides = [1, 1]} : vector<288x128xf32> to vector<8x128xf32>
    %106 = arith.truncf %105 : vector<8x128xf32> to vector<8x128xbf16>
    %c15 = arith.constant 15 : index
    %c0_57 = arith.constant 0 : index
    %c0_58 = arith.constant 0 : index
    %107 = vector.load %arg5[%c15, %c0_57, %c0_58] : memref<36x128x128xbf16, #tpu.memory_space<vmem>>, vector<1x128x128xbf16>
    %108 = vector.shape_cast %107 : vector<1x128x128xbf16> to vector<128x128xbf16>
    %cst_59 = arith.constant dense<0.000000e+00> : vector<8x128xf32>
    %109 = tpu.matmul %106, %108, %cst_59 {dimension_numbers = #tpu.dot_dimension_numbers<[1], [0], [0], [1], [0, 0, 1, 1], [], []>} : vector<8x128xbf16>, vector<128x128xbf16>, vector<8x128xf32> -> vector<8x128xf32>
    %110 = arith.addf %104, %109 : vector<8x128xf32>
    %111 = vector.extract_strided_slice %13 {offsets = [128, 0], sizes = [8, 128], strides = [1, 1]} : vector<288x128xf32> to vector<8x128xf32>
    %112 = arith.truncf %111 : vector<8x128xf32> to vector<8x128xbf16>
    %c16 = arith.constant 16 : index
    %c0_60 = arith.constant 0 : index
    %c0_61 = arith.constant 0 : index
    %113 = vector.load %arg5[%c16, %c0_60, %c0_61] : memref<36x128x128xbf16, #tpu.memory_space<vmem>>, vector<1x128x128xbf16>
    %114 = vector.shape_cast %113 : vector<1x128x128xbf16> to vector<128x128xbf16>
    %cst_62 = arith.constant dense<0.000000e+00> : vector<8x128xf32>
    %115 = tpu.matmul %112, %114, %cst_62 {dimension_numbers = #tpu.dot_dimension_numbers<[1], [0], [0], [1], [0, 0, 1, 1], [], []>} : vector<8x128xbf16>, vector<128x128xbf16>, vector<8x128xf32> -> vector<8x128xf32>
    %116 = arith.addf %110, %115 : vector<8x128xf32>
    %117 = vector.extract_strided_slice %13 {offsets = [136, 0], sizes = [8, 128], strides = [1, 1]} : vector<288x128xf32> to vector<8x128xf32>
    %118 = arith.truncf %117 : vector<8x128xf32> to vector<8x128xbf16>
    %c17 = arith.constant 17 : index
    %c0_63 = arith.constant 0 : index
    %c0_64 = arith.constant 0 : index
    %119 = vector.load %arg5[%c17, %c0_63, %c0_64] : memref<36x128x128xbf16, #tpu.memory_space<vmem>>, vector<1x128x128xbf16>
    %120 = vector.shape_cast %119 : vector<1x128x128xbf16> to vector<128x128xbf16>
    %cst_65 = arith.constant dense<0.000000e+00> : vector<8x128xf32>
    %121 = tpu.matmul %118, %120, %cst_65 {dimension_numbers = #tpu.dot_dimension_numbers<[1], [0], [0], [1], [0, 0, 1, 1], [], []>} : vector<8x128xbf16>, vector<128x128xbf16>, vector<8x128xf32> -> vector<8x128xf32>
    %122 = arith.addf %116, %121 : vector<8x128xf32>
    %123 = vector.extract_strided_slice %13 {offsets = [144, 0], sizes = [8, 128], strides = [1, 1]} : vector<288x128xf32> to vector<8x128xf32>
    %124 = arith.truncf %123 : vector<8x128xf32> to vector<8x128xbf16>
    %c18 = arith.constant 18 : index
    %c0_66 = arith.constant 0 : index
    %c0_67 = arith.constant 0 : index
    %125 = vector.load %arg5[%c18, %c0_66, %c0_67] : memref<36x128x128xbf16, #tpu.memory_space<vmem>>, vector<1x128x128xbf16>
    %126 = vector.shape_cast %125 : vector<1x128x128xbf16> to vector<128x128xbf16>
    %cst_68 = arith.constant dense<0.000000e+00> : vector<8x128xf32>
    %127 = tpu.matmul %124, %126, %cst_68 {dimension_numbers = #tpu.dot_dimension_numbers<[1], [0], [0], [1], [0, 0, 1, 1], [], []>} : vector<8x128xbf16>, vector<128x128xbf16>, vector<8x128xf32> -> vector<8x128xf32>
    %128 = arith.addf %122, %127 : vector<8x128xf32>
    %129 = vector.extract_strided_slice %13 {offsets = [152, 0], sizes = [8, 128], strides = [1, 1]} : vector<288x128xf32> to vector<8x128xf32>
    %130 = arith.truncf %129 : vector<8x128xf32> to vector<8x128xbf16>
    %c19 = arith.constant 19 : index
    %c0_69 = arith.constant 0 : index
    %c0_70 = arith.constant 0 : index
    %131 = vector.load %arg5[%c19, %c0_69, %c0_70] : memref<36x128x128xbf16, #tpu.memory_space<vmem>>, vector<1x128x128xbf16>
    %132 = vector.shape_cast %131 : vector<1x128x128xbf16> to vector<128x128xbf16>
    %cst_71 = arith.constant dense<0.000000e+00> : vector<8x128xf32>
    %133 = tpu.matmul %130, %132, %cst_71 {dimension_numbers = #tpu.dot_dimension_numbers<[1], [0], [0], [1], [0, 0, 1, 1], [], []>} : vector<8x128xbf16>, vector<128x128xbf16>, vector<8x128xf32> -> vector<8x128xf32>
    %134 = arith.addf %128, %133 : vector<8x128xf32>
    %135 = vector.extract_strided_slice %13 {offsets = [160, 0], sizes = [8, 128], strides = [1, 1]} : vector<288x128xf32> to vector<8x128xf32>
    %136 = arith.truncf %135 : vector<8x128xf32> to vector<8x128xbf16>
    %c20 = arith.constant 20 : index
    %c0_72 = arith.constant 0 : index
    %c0_73 = arith.constant 0 : index
    %137 = vector.load %arg5[%c20, %c0_72, %c0_73] : memref<36x128x128xbf16, #tpu.memory_space<vmem>>, vector<1x128x128xbf16>
    %138 = vector.shape_cast %137 : vector<1x128x128xbf16> to vector<128x128xbf16>
    %cst_74 = arith.constant dense<0.000000e+00> : vector<8x128xf32>
    %139 = tpu.matmul %136, %138, %cst_74 {dimension_numbers = #tpu.dot_dimension_numbers<[1], [0], [0], [1], [0, 0, 1, 1], [], []>} : vector<8x128xbf16>, vector<128x128xbf16>, vector<8x128xf32> -> vector<8x128xf32>
    %140 = arith.addf %134, %139 : vector<8x128xf32>
    %141 = vector.extract_strided_slice %13 {offsets = [168, 0], sizes = [8, 128], strides = [1, 1]} : vector<288x128xf32> to vector<8x128xf32>
    %142 = arith.truncf %141 : vector<8x128xf32> to vector<8x128xbf16>
    %c21 = arith.constant 21 : index
    %c0_75 = arith.constant 0 : index
    %c0_76 = arith.constant 0 : index
    %143 = vector.load %arg5[%c21, %c0_75, %c0_76] : memref<36x128x128xbf16, #tpu.memory_space<vmem>>, vector<1x128x128xbf16>
    %144 = vector.shape_cast %143 : vector<1x128x128xbf16> to vector<128x128xbf16>
    %cst_77 = arith.constant dense<0.000000e+00> : vector<8x128xf32>
    %145 = tpu.matmul %142, %144, %cst_77 {dimension_numbers = #tpu.dot_dimension_numbers<[1], [0], [0], [1], [0, 0, 1, 1], [], []>} : vector<8x128xbf16>, vector<128x128xbf16>, vector<8x128xf32> -> vector<8x128xf32>
    %146 = arith.addf %140, %145 : vector<8x128xf32>
    %147 = vector.extract_strided_slice %13 {offsets = [176, 0], sizes = [8, 128], strides = [1, 1]} : vector<288x128xf32> to vector<8x128xf32>
    %148 = arith.truncf %147 : vector<8x128xf32> to vector<8x128xbf16>
    %c22 = arith.constant 22 : index
    %c0_78 = arith.constant 0 : index
    %c0_79 = arith.constant 0 : index
    %149 = vector.load %arg5[%c22, %c0_78, %c0_79] : memref<36x128x128xbf16, #tpu.memory_space<vmem>>, vector<1x128x128xbf16>
    %150 = vector.shape_cast %149 : vector<1x128x128xbf16> to vector<128x128xbf16>
    %cst_80 = arith.constant dense<0.000000e+00> : vector<8x128xf32>
    %151 = tpu.matmul %148, %150, %cst_80 {dimension_numbers = #tpu.dot_dimension_numbers<[1], [0], [0], [1], [0, 0, 1, 1], [], []>} : vector<8x128xbf16>, vector<128x128xbf16>, vector<8x128xf32> -> vector<8x128xf32>
    %152 = arith.addf %146, %151 : vector<8x128xf32>
    %153 = vector.extract_strided_slice %13 {offsets = [184, 0], sizes = [8, 128], strides = [1, 1]} : vector<288x128xf32> to vector<8x128xf32>
    %154 = arith.truncf %153 : vector<8x128xf32> to vector<8x128xbf16>
    %c23 = arith.constant 23 : index
    %c0_81 = arith.constant 0 : index
    %c0_82 = arith.constant 0 : index
    %155 = vector.load %arg5[%c23, %c0_81, %c0_82] : memref<36x128x128xbf16, #tpu.memory_space<vmem>>, vector<1x128x128xbf16>
    %156 = vector.shape_cast %155 : vector<1x128x128xbf16> to vector<128x128xbf16>
    %cst_83 = arith.constant dense<0.000000e+00> : vector<8x128xf32>
    %157 = tpu.matmul %154, %156, %cst_83 {dimension_numbers = #tpu.dot_dimension_numbers<[1], [0], [0], [1], [0, 0, 1, 1], [], []>} : vector<8x128xbf16>, vector<128x128xbf16>, vector<8x128xf32> -> vector<8x128xf32>
    %158 = arith.addf %152, %157 : vector<8x128xf32>
    %159 = vector.extract_strided_slice %13 {offsets = [192, 0], sizes = [8, 128], strides = [1, 1]} : vector<288x128xf32> to vector<8x128xf32>
    %160 = arith.truncf %159 : vector<8x128xf32> to vector<8x128xbf16>
    %c24 = arith.constant 24 : index
    %c0_84 = arith.constant 0 : index
    %c0_85 = arith.constant 0 : index
    %161 = vector.load %arg5[%c24, %c0_84, %c0_85] : memref<36x128x128xbf16, #tpu.memory_space<vmem>>, vector<1x128x128xbf16>
    %162 = vector.shape_cast %161 : vector<1x128x128xbf16> to vector<128x128xbf16>
    %cst_86 = arith.constant dense<0.000000e+00> : vector<8x128xf32>
    %163 = tpu.matmul %160, %162, %cst_86 {dimension_numbers = #tpu.dot_dimension_numbers<[1], [0], [0], [1], [0, 0, 1, 1], [], []>} : vector<8x128xbf16>, vector<128x128xbf16>, vector<8x128xf32> -> vector<8x128xf32>
    %164 = arith.addf %158, %163 : vector<8x128xf32>
    %165 = vector.extract_strided_slice %13 {offsets = [200, 0], sizes = [8, 128], strides = [1, 1]} : vector<288x128xf32> to vector<8x128xf32>
    %166 = arith.truncf %165 : vector<8x128xf32> to vector<8x128xbf16>
    %c25 = arith.constant 25 : index
    %c0_87 = arith.constant 0 : index
    %c0_88 = arith.constant 0 : index
    %167 = vector.load %arg5[%c25, %c0_87, %c0_88] : memref<36x128x128xbf16, #tpu.memory_space<vmem>>, vector<1x128x128xbf16>
    %168 = vector.shape_cast %167 : vector<1x128x128xbf16> to vector<128x128xbf16>
    %cst_89 = arith.constant dense<0.000000e+00> : vector<8x128xf32>
    %169 = tpu.matmul %166, %168, %cst_89 {dimension_numbers = #tpu.dot_dimension_numbers<[1], [0], [0], [1], [0, 0, 1, 1], [], []>} : vector<8x128xbf16>, vector<128x128xbf16>, vector<8x128xf32> -> vector<8x128xf32>
    %170 = arith.addf %164, %169 : vector<8x128xf32>
    %171 = vector.extract_strided_slice %13 {offsets = [208, 0], sizes = [8, 128], strides = [1, 1]} : vector<288x128xf32> to vector<8x128xf32>
    %172 = arith.truncf %171 : vector<8x128xf32> to vector<8x128xbf16>
    %c26 = arith.constant 26 : index
    %c0_90 = arith.constant 0 : index
    %c0_91 = arith.constant 0 : index
    %173 = vector.load %arg5[%c26, %c0_90, %c0_91] : memref<36x128x128xbf16, #tpu.memory_space<vmem>>, vector<1x128x128xbf16>
    %174 = vector.shape_cast %173 : vector<1x128x128xbf16> to vector<128x128xbf16>
    %cst_92 = arith.constant dense<0.000000e+00> : vector<8x128xf32>
    %175 = tpu.matmul %172, %174, %cst_92 {dimension_numbers = #tpu.dot_dimension_numbers<[1], [0], [0], [1], [0, 0, 1, 1], [], []>} : vector<8x128xbf16>, vector<128x128xbf16>, vector<8x128xf32> -> vector<8x128xf32>
    %176 = arith.addf %170, %175 : vector<8x128xf32>
    %177 = vector.extract_strided_slice %13 {offsets = [216, 0], sizes = [8, 128], strides = [1, 1]} : vector<288x128xf32> to vector<8x128xf32>
    %178 = arith.truncf %177 : vector<8x128xf32> to vector<8x128xbf16>
    %c27 = arith.constant 27 : index
    %c0_93 = arith.constant 0 : index
    %c0_94 = arith.constant 0 : index
    %179 = vector.load %arg5[%c27, %c0_93, %c0_94] : memref<36x128x128xbf16, #tpu.memory_space<vmem>>, vector<1x128x128xbf16>
    %180 = vector.shape_cast %179 : vector<1x128x128xbf16> to vector<128x128xbf16>
    %cst_95 = arith.constant dense<0.000000e+00> : vector<8x128xf32>
    %181 = tpu.matmul %178, %180, %cst_95 {dimension_numbers = #tpu.dot_dimension_numbers<[1], [0], [0], [1], [0, 0, 1, 1], [], []>} : vector<8x128xbf16>, vector<128x128xbf16>, vector<8x128xf32> -> vector<8x128xf32>
    %182 = arith.addf %176, %181 : vector<8x128xf32>
    %183 = vector.extract_strided_slice %13 {offsets = [224, 0], sizes = [8, 128], strides = [1, 1]} : vector<288x128xf32> to vector<8x128xf32>
    %184 = arith.truncf %183 : vector<8x128xf32> to vector<8x128xbf16>
    %c28 = arith.constant 28 : index
    %c0_96 = arith.constant 0 : index
    %c0_97 = arith.constant 0 : index
    %185 = vector.load %arg5[%c28, %c0_96, %c0_97] : memref<36x128x128xbf16, #tpu.memory_space<vmem>>, vector<1x128x128xbf16>
    %186 = vector.shape_cast %185 : vector<1x128x128xbf16> to vector<128x128xbf16>
    %cst_98 = arith.constant dense<0.000000e+00> : vector<8x128xf32>
    %187 = tpu.matmul %184, %186, %cst_98 {dimension_numbers = #tpu.dot_dimension_numbers<[1], [0], [0], [1], [0, 0, 1, 1], [], []>} : vector<8x128xbf16>, vector<128x128xbf16>, vector<8x128xf32> -> vector<8x128xf32>
    %188 = arith.addf %182, %187 : vector<8x128xf32>
    %189 = vector.extract_strided_slice %13 {offsets = [232, 0], sizes = [8, 128], strides = [1, 1]} : vector<288x128xf32> to vector<8x128xf32>
    %190 = arith.truncf %189 : vector<8x128xf32> to vector<8x128xbf16>
    %c29 = arith.constant 29 : index
    %c0_99 = arith.constant 0 : index
    %c0_100 = arith.constant 0 : index
    %191 = vector.load %arg5[%c29, %c0_99, %c0_100] : memref<36x128x128xbf16, #tpu.memory_space<vmem>>, vector<1x128x128xbf16>
    %192 = vector.shape_cast %191 : vector<1x128x128xbf16> to vector<128x128xbf16>
    %cst_101 = arith.constant dense<0.000000e+00> : vector<8x128xf32>
    %193 = tpu.matmul %190, %192, %cst_101 {dimension_numbers = #tpu.dot_dimension_numbers<[1], [0], [0], [1], [0, 0, 1, 1], [], []>} : vector<8x128xbf16>, vector<128x128xbf16>, vector<8x128xf32> -> vector<8x128xf32>
    %194 = arith.addf %188, %193 : vector<8x128xf32>
    %195 = vector.extract_strided_slice %13 {offsets = [240, 0], sizes = [8, 128], strides = [1, 1]} : vector<288x128xf32> to vector<8x128xf32>
    %196 = arith.truncf %195 : vector<8x128xf32> to vector<8x128xbf16>
    %c30 = arith.constant 30 : index
    %c0_102 = arith.constant 0 : index
    %c0_103 = arith.constant 0 : index
    %197 = vector.load %arg5[%c30, %c0_102, %c0_103] : memref<36x128x128xbf16, #tpu.memory_space<vmem>>, vector<1x128x128xbf16>
    %198 = vector.shape_cast %197 : vector<1x128x128xbf16> to vector<128x128xbf16>
    %cst_104 = arith.constant dense<0.000000e+00> : vector<8x128xf32>
    %199 = tpu.matmul %196, %198, %cst_104 {dimension_numbers = #tpu.dot_dimension_numbers<[1], [0], [0], [1], [0, 0, 1, 1], [], []>} : vector<8x128xbf16>, vector<128x128xbf16>, vector<8x128xf32> -> vector<8x128xf32>
    %200 = arith.addf %194, %199 : vector<8x128xf32>
    %201 = vector.extract_strided_slice %13 {offsets = [248, 0], sizes = [8, 128], strides = [1, 1]} : vector<288x128xf32> to vector<8x128xf32>
    %202 = arith.truncf %201 : vector<8x128xf32> to vector<8x128xbf16>
    %c31 = arith.constant 31 : index
    %c0_105 = arith.constant 0 : index
    %c0_106 = arith.constant 0 : index
    %203 = vector.load %arg5[%c31, %c0_105, %c0_106] : memref<36x128x128xbf16, #tpu.memory_space<vmem>>, vector<1x128x128xbf16>
    %204 = vector.shape_cast %203 : vector<1x128x128xbf16> to vector<128x128xbf16>
    %cst_107 = arith.constant dense<0.000000e+00> : vector<8x128xf32>
    %205 = tpu.matmul %202, %204, %cst_107 {dimension_numbers = #tpu.dot_dimension_numbers<[1], [0], [0], [1], [0, 0, 1, 1], [], []>} : vector<8x128xbf16>, vector<128x128xbf16>, vector<8x128xf32> -> vector<8x128xf32>
    %206 = arith.addf %200, %205 : vector<8x128xf32>
    %207 = vector.extract_strided_slice %13 {offsets = [256, 0], sizes = [8, 128], strides = [1, 1]} : vector<288x128xf32> to vector<8x128xf32>
    %208 = arith.truncf %207 : vector<8x128xf32> to vector<8x128xbf16>
    %c32 = arith.constant 32 : index
    %c0_108 = arith.constant 0 : index
    %c0_109 = arith.constant 0 : index
    %209 = vector.load %arg5[%c32, %c0_108, %c0_109] : memref<36x128x128xbf16, #tpu.memory_space<vmem>>, vector<1x128x128xbf16>
    %210 = vector.shape_cast %209 : vector<1x128x128xbf16> to vector<128x128xbf16>
    %cst_110 = arith.constant dense<0.000000e+00> : vector<8x128xf32>
    %211 = tpu.matmul %208, %210, %cst_110 {dimension_numbers = #tpu.dot_dimension_numbers<[1], [0], [0], [1], [0, 0, 1, 1], [], []>} : vector<8x128xbf16>, vector<128x128xbf16>, vector<8x128xf32> -> vector<8x128xf32>
    %212 = arith.addf %206, %211 : vector<8x128xf32>
    %213 = vector.extract_strided_slice %13 {offsets = [264, 0], sizes = [8, 128], strides = [1, 1]} : vector<288x128xf32> to vector<8x128xf32>
    %214 = arith.truncf %213 : vector<8x128xf32> to vector<8x128xbf16>
    %c33 = arith.constant 33 : index
    %c0_111 = arith.constant 0 : index
    %c0_112 = arith.constant 0 : index
    %215 = vector.load %arg5[%c33, %c0_111, %c0_112] : memref<36x128x128xbf16, #tpu.memory_space<vmem>>, vector<1x128x128xbf16>
    %216 = vector.shape_cast %215 : vector<1x128x128xbf16> to vector<128x128xbf16>
    %cst_113 = arith.constant dense<0.000000e+00> : vector<8x128xf32>
    %217 = tpu.matmul %214, %216, %cst_113 {dimension_numbers = #tpu.dot_dimension_numbers<[1], [0], [0], [1], [0, 0, 1, 1], [], []>} : vector<8x128xbf16>, vector<128x128xbf16>, vector<8x128xf32> -> vector<8x128xf32>
    %218 = arith.addf %212, %217 : vector<8x128xf32>
    %219 = vector.extract_strided_slice %13 {offsets = [272, 0], sizes = [8, 128], strides = [1, 1]} : vector<288x128xf32> to vector<8x128xf32>
    %220 = arith.truncf %219 : vector<8x128xf32> to vector<8x128xbf16>
    %c34 = arith.constant 34 : index
    %c0_114 = arith.constant 0 : index
    %c0_115 = arith.constant 0 : index
    %221 = vector.load %arg5[%c34, %c0_114, %c0_115] : memref<36x128x128xbf16, #tpu.memory_space<vmem>>, vector<1x128x128xbf16>
    %222 = vector.shape_cast %221 : vector<1x128x128xbf16> to vector<128x128xbf16>
    %cst_116 = arith.constant dense<0.000000e+00> : vector<8x128xf32>
    %223 = tpu.matmul %220, %222, %cst_116 {dimension_numbers = #tpu.dot_dimension_numbers<[1], [0], [0], [1], [0, 0, 1, 1], [], []>} : vector<8x128xbf16>, vector<128x128xbf16>, vector<8x128xf32> -> vector<8x128xf32>
    %224 = arith.addf %218, %223 : vector<8x128xf32>
    %225 = vector.extract_strided_slice %13 {offsets = [280, 0], sizes = [8, 128], strides = [1, 1]} : vector<288x128xf32> to vector<8x128xf32>
    %226 = arith.truncf %225 : vector<8x128xf32> to vector<8x128xbf16>
    %c35 = arith.constant 35 : index
    %c0_117 = arith.constant 0 : index
    %c0_118 = arith.constant 0 : index
    %227 = vector.load %arg5[%c35, %c0_117, %c0_118] : memref<36x128x128xbf16, #tpu.memory_space<vmem>>, vector<1x128x128xbf16>
    %228 = vector.shape_cast %227 : vector<1x128x128xbf16> to vector<128x128xbf16>
    %cst_119 = arith.constant dense<0.000000e+00> : vector<8x128xf32>
    %229 = tpu.matmul %226, %228, %cst_119 {dimension_numbers = #tpu.dot_dimension_numbers<[1], [0], [0], [1], [0, 0, 1, 1], [], []>} : vector<8x128xbf16>, vector<128x128xbf16>, vector<8x128xf32> -> vector<8x128xf32>
    %230 = arith.addf %224, %229 : vector<8x128xf32>
    %c0_120 = arith.constant 0 : index
    %c0_121 = arith.constant 0 : index
    %231 = vector.load %arg6[%c0_120, %c0_121] : memref<1x128xf32, #tpu.memory_space<vmem>>, vector<1x128xf32>
    %232 = vector.broadcast %231 : vector<1x128xf32> to vector<8x128xf32>
    %233 = arith.addf %230, %232 : vector<8x128xf32>
    %cst_122 = arith.constant 0.000000e+00 : f32
    %234 = vector.broadcast %cst_122 : f32 to vector<8x128xf32>
    %235 = arith.cmpf oge, %233, %234 : vector<8x128xf32>
    %cst_123 = arith.constant 2.000000e-01 : f32
    %236 = vector.broadcast %cst_123 : f32 to vector<8x128xf32>
    %237 = arith.mulf %236, %233 : vector<8x128xf32>
    %238 = arith.select %235, %233, %237 : vector<8x128xi1>, vector<8x128xf32>
    %c0_124 = arith.constant 0 : index
    %c0_125 = arith.constant 0 : index
    %239 = vector.load %arg7[%c0_124, %c0_125] : memref<8x128xf32, #tpu.memory_space<vmem>>, vector<8x128xf32>
    %240 = arith.mulf %238, %239 : vector<8x128xf32>
    %241 = vector.extract_strided_slice %240 {offsets = [0, 0], sizes = [2, 128], strides = [1, 1]} : vector<8x128xf32> to vector<2x128xf32>
    %242 = vector.extract_strided_slice %240 {offsets = [2, 0], sizes = [2, 128], strides = [1, 1]} : vector<8x128xf32> to vector<2x128xf32>
    %243 = arith.addf %241, %242 : vector<2x128xf32>
    %244 = vector.extract_strided_slice %240 {offsets = [4, 0], sizes = [2, 128], strides = [1, 1]} : vector<8x128xf32> to vector<2x128xf32>
    %245 = arith.addf %243, %244 : vector<2x128xf32>
    %246 = vector.extract_strided_slice %240 {offsets = [6, 0], sizes = [2, 128], strides = [1, 1]} : vector<8x128xf32> to vector<2x128xf32>
    %247 = arith.addf %245, %246 : vector<2x128xf32>
    %cst_126 = arith.constant dense<0.000000e+00> : vector<2xf32>
    %248 = vector.multi_reduction <add>, %247, %cst_126 [1] : vector<2x128xf32> to vector<2xf32>
    %249 = vector.shape_cast %248 : vector<2xf32> to vector<2x1xf32>
    %cst_127 = arith.constant 0.000000e+00 : f32
    %250 = vector.broadcast %cst_127 : f32 to vector<2x1xf32>
    %251 = arith.subf %250, %249 : vector<2x1xf32>
    %252 = math.exp %251 : vector<2x1xf32>
    %cst_128 = arith.constant 1.000000e+00 : f32
    %253 = vector.broadcast %cst_128 : f32 to vector<2x1xf32>
    %254 = arith.addf %253, %252 : vector<2x1xf32>
    %255 = tpu.reciprocal %254 {approx = true} : vector<2x1xf32> -> vector<2x1xf32>
    %c0_129 = arith.constant 0 : index
    %c0_130 = arith.constant 0 : index
    %256 = vector.load %arg8[%c0_129, %c0_130] : memref<2x1xf32, #tpu.memory_space<vmem>>, vector<2x1xf32>
    tpu.vector_store %arg8[%c0_129, %c0_130], %255 {strides = array<i32>} : memref<2x1xf32, #tpu.memory_space<vmem>>, vector<2x1xf32>,
    return
  }
  func.func @transform_0(%arg0: i32) -> (i32, i32) {
    %c0_i32 = arith.constant 0 : i32
    %c0_i32_0 = arith.constant 0 : i32
    %c0_i32_1 = arith.constant 0 : i32
    return %c0_i32, %c0_i32_0 : i32, i32
  }
  func.func @transform_1(%arg0: i32) -> (i32, i32) {
    %c0_i32 = arith.constant 0 : i32
    %c0_i32_0 = arith.constant 0 : i32
    %c0_i32_1 = arith.constant 0 : i32
    return %c0_i32, %c0_i32_0 : i32, i32
  }
  func.func @transform_2(%arg0: i32) -> (i32, i32) {
    %c0_i32 = arith.constant 0 : i32
    %c0_i32_0 = arith.constant 0 : i32
    %c0_i32_1 = arith.constant 0 : i32
    return %c0_i32, %c0_i32_0 : i32, i32
  }
  func.func @transform_3(%arg0: i32) -> (i32, i32) {
    %c0_i32 = arith.constant 0 : i32
    %c0_i32_0 = arith.constant 0 : i32
    %c0_i32_1 = arith.constant 0 : i32
    return %c0_i32, %c0_i32_0 : i32, i32
  }
  func.func @transform_4(%arg0: i32) -> (i32, i32, i32) {
    %c0_i32 = arith.constant 0 : i32
    %c0_i32_0 = arith.constant 0 : i32
    %c0_i32_1 = arith.constant 0 : i32
    %c0_i32_2 = arith.constant 0 : i32
    return %c0_i32, %c0_i32_0, %c0_i32_1 : i32, i32, i32
  }
  func.func @transform_5(%arg0: i32) -> (i32, i32) {
    %c0_i32 = arith.constant 0 : i32
    %c0_i32_0 = arith.constant 0 : i32
    %c0_i32_1 = arith.constant 0 : i32
    return %c0_i32, %c0_i32_0 : i32, i32
  }
  func.func @transform_6(%arg0: i32) -> (i32, i32) {
    %c0_i32 = arith.constant 0 : i32
    %c0_i32_0 = arith.constant 0 : i32
    %c0_i32_1 = arith.constant 0 : i32
    return %c0_i32, %c0_i32_0 : i32, i32
  }
  func.func @transform_7(%arg0: i32) -> (i32, i32) {
    %c0_i32 = arith.constant 0 : i32
    %c0_i32_0 = arith.constant 0 : i32
    %c0_i32_1 = arith.constant 0 : i32
    return %c0_i32, %c0_i32_0 : i32, i32
  }
}

</mosaic_0001>

<bundles_post_ra>
// kernel: discriminator_forward.2
= control target key start
LH: loop header
LB: loop body
LE: loop exit
PB: predicated region body
PF: predicated region fallthrough
CT: control target
= control target key end

     0   :  { %vm3949_vm2 = vcmask 27648   ;;  %s6868_s1 = inlined_call_operand.vmem [shape: bf16[128,128], index: 1, kind: input, shape index: {}]   ;;  %s6869_s0 = inlined_call_operand.vmem [shape: bf16[2048,128], index: 0, kind: input, shape index: {}]   ;;  %s6870_s2 = inlined_call_operand.vmem [shape: bf16[2048,4], index: 2, kind: output, shape index: {}]  }
   0x1   :  { %v5282_v0 = vld [vmem:[%s6868_s1] sm:$0xff]   ;;  %v5283_v1 = vld [vmem:[%s6868_s1 + $0x8] sm:$0xff]   ;;  %v5284_v2 = vld [vmem:[%s6868_s1 + $0x10] sm:$0xff]  }
   0x2   :  { %4994 = vmatprep.subr.bf16.mxu0 %v5282_v0  ;;  %5266 = vmatprep.subr.bf16.mxu1 %v5282_v0  ;;  %v5285_v3 = vld [vmem:[%s6868_s1 + $0x18] sm:$0xff]   ;;  %v5290_v4 = vld [vmem:[%s6869_s0] sm:$0xff]   ;;  %v5287_v7 = vld [vmem:[%s6868_s1 + $0x28] sm:$0xff]  }
   0x3   :  { %4995 = vmatpush3.bf16.msra.mxu0 %v5282_v0  ;;  %5274 = vmatpush3.bf16.msra.mxu1 %v5282_v0  ;;  %v5291_v5 = vld [vmem:[%s6869_s0 + $0x200] sm:$0xff]   ;;  %v5288_v8 = vld [vmem:[%s6868_s1 + $0x30] sm:$0xff]   ;;  %v5289_v9 = vld [vmem:[%s6868_s1 + $0x38] sm:$0xff]  }
   0x4   :  { %4996 = vmatprep.subr.bf16.mxu0 %v5283_v1  ;;  %5267 = vmatprep.subr.bf16.mxu1 %v5283_v1  ;;  %v5286_v6 = vld [vmem:[%s6868_s1 + $0x20] sm:$0xff]   ;;  %v5292_v10 = vld [vmem:[%s6869_s0 + $0x8] sm:$0xff]   ;;  %v5294_v12 = vld [vmem:[%s6869_s0 + $0x10] sm:$0xff]  }
   0x5   :  { %5010 = vmatprep.mubr.bf16.mxu0 %v5290_v4  ;;  %5138 = vmatprep.mubr.bf16.mxu1 %v5291_v5  ;;  %v5293_v11 = vld [vmem:[%s6869_s0 + $0x208] sm:$0xff]   ;;  %v5295_v13 = vld [vmem:[%s6869_s0 + $0x210] sm:$0xff]   ;;  %v5296_v14 = vld [vmem:[%s6869_s0 + $0x18] sm:$0xff]  }
   0x6   :  { %v5297_v15 = vld [vmem:[%s6869_s0 + $0x218] sm:$0xff]   ;;  %v5298_v16 = vld [vmem:[%s6869_s0 + $0x20] sm:$0xff]   ;;  %v5300_v18 = vld [vmem:[%s6869_s0 + $0x28] sm:$0xff]  }
   0x7   :  { %4997 = vmatpush3.bf16.msra.mxu0 %v5283_v1  ;;  %5275 = vmatpush3.bf16.msra.mxu1 %v5283_v1  ;;  %v5299_v17 = vld [vmem:[%s6869_s0 + $0x220] sm:$0xff]   ;;  %v5301_v19 = vld [vmem:[%s6869_s0 + $0x228] sm:$0xff]   ;;  %v5302_v20 = vld [vmem:[%s6869_s0 + $0x30] sm:$0xff]  }
   0x8   :  { %4998 = vmatprep.subr.bf16.mxu0 %v5284_v2  ;;  %5268 = vmatprep.subr.bf16.mxu1 %v5284_v2  ;;  %v5303_v21 = vld [vmem:[%s6869_s0 + $0x230] sm:$0xff]   ;;  %v5304_v22 = vld [vmem:[%s6869_s0 + $0x38] sm:$0xff]   ;;  %v5306_v24 = vld [vmem:[%s6869_s0 + $0x40] sm:$0xff]  }
   0x9   :  { %v5305_v23 = vld [vmem:[%s6869_s0 + $0x238] sm:$0xff]   ;;  %v5307_v25 = vld [vmem:[%s6869_s0 + $0x240] sm:$0xff]   ;;  %v5308_v26 = vld [vmem:[%s6869_s0 + $0x48] sm:$0xff]  }
   0xa   :  { %v5309_v27 = vld [vmem:[%s6869_s0 + $0x248] sm:$0xff]   ;;  %v5310_v28 = vld [vmem:[%s6869_s0 + $0x50] sm:$0xff]   ;;  %v5312_v30 = vld [vmem:[%s6869_s0 + $0x58] sm:$0xff]  }
   0xb   :  { %4999 = vmatpush3.bf16.msra.mxu0 %v5284_v2  ;;  %5276 = vmatpush3.bf16.msra.mxu1 %v5284_v2  ;;  %v5311_v29 = vld [vmem:[%s6869_s0 + $0x250] sm:$0xff]   ;;  %v5313_v31 = vld [vmem:[%s6869_s0 + $0x258] sm:$0xff]   ;;  %v5314_v32 = vld [vmem:[%s6869_s0 + $0x60] sm:$0xff]  }
   0xc   :  { %5000 = vmatprep.subr.bf16.mxu0 %v5285_v3  ;;  %5269 = vmatprep.subr.bf16.mxu1 %v5285_v3  ;;  %v5315_v33 = vld [vmem:[%s6869_s0 + $0x260] sm:$0xff]   ;;  %v5316_v34 = vld [vmem:[%s6869_s0 + $0x68] sm:$0xff]   ;;  %v5318_v36 = vld [vmem:[%s6869_s0 + $0x70] sm:$0xff]  }
   0xd   :  { %v5317_v35 = vld [vmem:[%s6869_s0 + $0x268] sm:$0xff]   ;;  %v5319_v37 = vld [vmem:[%s6869_s0 + $0x270] sm:$0xff]   ;;  %v5320_v38 = vld [vmem:[%s6869_s0 + $0x78] sm:$0xff]  }
   0xe   :  { %v5321_v39 = vld [vmem:[%s6869_s0 + $0x278] sm:$0xff]   ;;  %v5322_v40 = vld [vmem:[%s6869_s0 + $0x80] sm:$0xff]   ;;  %v5324_v42 = vld [vmem:[%s6869_s0 + $0x88] sm:$0xff]  }
   0xf   :  { %5001 = vmatpush3.bf16.msra.mxu0 %v5285_v3  ;;  %5277 = vmatpush3.bf16.msra.mxu1 %v5285_v3  ;;  %v5323_v41 = vld [vmem:[%s6869_s0 + $0x280] sm:$0xff]   ;;  %v5325_v43 = vld [vmem:[%s6869_s0 + $0x288] sm:$0xff]   ;;  %v5326_v44 = vld [vmem:[%s6869_s0 + $0x90] sm:$0xff]  }
  0x10   :  { %5002 = vmatprep.subr.bf16.mxu0 %v5286_v6  ;;  %5270 = vmatprep.subr.bf16.mxu1 %v5286_v6  ;;  %v5327_v45 = vld [vmem:[%s6869_s0 + $0x290] sm:$0xff]   ;;  %v5328_v46 = vld [vmem:[%s6869_s0 + $0x98] sm:$0xff]   ;;  %v5330_v48 = vld [vmem:[%s6869_s0 + $0xa0] sm:$0xff]  }
  0x11   :  { %v5329_v47 = vld [vmem:[%s6869_s0 + $0x298] sm:$0xff]   ;;  %v5331_v49 = vld [vmem:[%s6869_s0 + $0x2a0] sm:$0xff]   ;;  %v5332_v50 = vld [vmem:[%s6869_s0 + $0xa8] sm:$0xff]  }
  0x12   :  { %v5333_v51 = vld [vmem:[%s6869_s0 + $0x2a8] sm:$0xff]   ;;  %v5334_v52 = vld [vmem:[%s6869_s0 + $0xb0] sm:$0xff]   ;;  %v5336_v54 = vld [vmem:[%s6869_s0 + $0xb8] sm:$0xff]  }
  0x13   :  { %5003 = vmatpush3.bf16.msra.mxu0 %v5286_v6  ;;  %5278 = vmatpush3.bf16.msra.mxu1 %v5286_v6  ;;  %v5335_v53 = vld [vmem:[%s6869_s0 + $0x2b0] sm:$0xff]   ;;  %v5337_v55 = vld [vmem:[%s6869_s0 + $0x2b8] sm:$0xff]   ;;  %v5338_v56 = vld [vmem:[%s6869_s0 + $0xc0] sm:$0xff]  }
  0x14   :  { %5004 = vmatprep.subr.bf16.mxu0 %v5287_v7  ;;  %5271 = vmatprep.subr.bf16.mxu1 %v5287_v7  ;;  %v5339_v57 = vld [vmem:[%s6869_s0 + $0x2c0] sm:$0xff]   ;;  %v5340_v58 = vld [vmem:[%s6869_s0 + $0xc8] sm:$0xff]   ;;  %v5342_v60 = vld [vmem:[%s6869_s0 + $0xd0] sm:$0xff]  }
  0x15   :  { %v5341_v59 = vld [vmem:[%s6869_s0 + $0x2c8] sm:$0xff]   ;;  %v5343_v61 = vld [vmem:[%s6869_s0 + $0x2d0] sm:$0xff]   ;;  %v5344_v62 = vld [vmem:[%s6869_s0 + $0xd8] sm:$0xff]  }
  0x16   :  { %v5345_v63 = vld [vmem:[%s6869_s0 + $0x2d8] sm:$0xff]   ;;  %v5346_v0 = vld [vmem:[%s6869_s0 + $0xe0] sm:$0xff]   ;;  %v5348_v2 = vld [vmem:[%s6869_s0 + $0xe8] sm:$0xff]  }
  0x17   :  { %5005 = vmatpush3.bf16.msra.mxu0 %v5287_v7  ;;  %5279 = vmatpush3.bf16.msra.mxu1 %v5287_v7  ;;  %v5347_v1 = vld [vmem:[%s6869_s0 + $0x2e0] sm:$0xff]   ;;  %v5349_v3 = vld [vmem:[%s6869_s0 + $0x2e8] sm:$0xff]   ;;  %v5350_v4 = vld [vmem:[%s6869_s0 + $0xf0] sm:$0xff]  }
  0x18   :  { %5006 = vmatprep.subr.bf16.mxu0 %v5288_v8  ;;  %5272 = vmatprep.subr.bf16.mxu1 %v5288_v8  ;;  %v5351_v5 = vld [vmem:[%s6869_s0 + $0x2f0] sm:$0xff]   ;;  %v5352_v6 = vld [vmem:[%s6869_s0 + $0xf8] sm:$0xff]  }
  0x19   :  { %v5353_v7 = vld [vmem:[%s6869_s0 + $0x2f8] sm:$0xff]  }
  0x1b   :  { %5007 = vmatpush3.bf16.msra.mxu0 %v5288_v8  ;;  %5280 = vmatpush3.bf16.msra.mxu1 %v5288_v8  ;;  %v5354_v8 = vld [vmem:[%s6869_s0 + $0x100] sm:$0xff]  }
  0x1c   :  { %5008 = vmatprep.subr.bf16.mxu0 %v5289_v9  ;;  %5273 = vmatprep.subr.bf16.mxu1 %v5289_v9 }
  0x1f   :  { %5009 = vmatpush3.bf16.msra.mxu0 %v5289_v9  ;;  %5281 = vmatpush3.bf16.msra.mxu1 %v5289_v9  ;;  %v5355_v9 = vld [vmem:[%s6869_s0 + $0x300] sm:$0xff]  }
  0x22   :  { %5011 = vmatmul.mubr.bf16.vlgmr.msra.gmra.mrb[0].mxu0 %v5292_v10  ;;  %5139 = vmatmul.mubr.bf16.vlgmr.msra.gmra.mrb[0].mxu1 %v5293_v11  ;;  %v5356_v10 = vld [vmem:[%s6869_s0 + $0x108] sm:$0xff]  }
  0x23   :  { %5014 = vmatprep.mubr.bf16.mxu0 %v5294_v12  ;;  %5142 = vmatprep.mubr.bf16.mxu1 %v5295_v13  ;;  %v5357_v11 = vld [vmem:[%s6869_s0 + $0x308] sm:$0xff]   ;;  %v5358_v12 = vld [vmem:[%s6869_s0 + $0x110] sm:$0xff]  }
  0x24   :  { %v5359_v13 = vld [vmem:[%s6869_s0 + $0x310] sm:$0xff]  }
  0x2a   :  { %5015 = vmatmul.mubr.bf16.gmra.mrb[4].mxu0 %v5296_v14  ;;  %5143 = vmatmul.mubr.bf16.gmra.mrb[4].mxu1 %v5297_v15  ;;  %v5360_v14 = vld [vmem:[%s6869_s0 + $0x118] sm:$0xff]  }
  0x2b   :  { %5018 = vmatprep.mubr.bf16.mxu0 %v5298_v16  ;;  %5146 = vmatprep.mubr.bf16.mxu1 %v5299_v17  ;;  %v5361_v15 = vld [vmem:[%s6869_s0 + $0x318] sm:$0xff]   ;;  %v5362_v16 = vld [vmem:[%s6869_s0 + $0x120] sm:$0xff]  }
  0x2c   :  { %v5363_v17 = vld [vmem:[%s6869_s0 + $0x320] sm:$0xff]  }
  0x32   :  { %5019 = vmatmul.mubr.bf16.gmra.mrb[8].mxu0 %v5300_v18  ;;  %5147 = vmatmul.mubr.bf16.gmra.mrb[8].mxu1 %v5301_v19  ;;  %v5364_v18 = vld [vmem:[%s6869_s0 + $0x128] sm:$0xff]  }
  0x33   :  { %5022 = vmatprep.mubr.bf16.mxu0 %v5302_v20  ;;  %5150 = vmatprep.mubr.bf16.mxu1 %v5303_v21  ;;  %v5365_v19 = vld [vmem:[%s6869_s0 + $0x328] sm:$0xff]   ;;  %v5366_v20 = vld [vmem:[%s6869_s0 + $0x130] sm:$0xff]  }
  0x34   :  { %v5367_v21 = vld [vmem:[%s6869_s0 + $0x330] sm:$0xff]  }
  0x3a   :  { %5023 = vmatmul.mubr.bf16.gmra.mrb[12].mxu0 %v5304_v22  ;;  %5151 = vmatmul.mubr.bf16.gmra.mrb[12].mxu1 %v5305_v23  ;;  %v5368_v22 = vld [vmem:[%s6869_s0 + $0x138] sm:$0xff]  }
  0x3b   :  { %5026 = vmatprep.mubr.bf16.mxu0 %v5306_v24  ;;  %5154 = vmatprep.mubr.bf16.mxu1 %v5307_v25  ;;  %v5369_v23 = vld [vmem:[%s6869_s0 + $0x338] sm:$0xff]   ;;  %v5370_v24 = vld [vmem:[%s6869_s0 + $0x140] sm:$0xff]  }
  0x3c   :  { %v5371_v25 = vld [vmem:[%s6869_s0 + $0x340] sm:$0xff]  }
  0x42   :  { %5027 = vmatmul.mubr.bf16.gmra.mrb[16].mxu0 %v5308_v26  ;;  %5155 = vmatmul.mubr.bf16.gmra.mrb[16].mxu1 %v5309_v27  ;;  %v5372_v26 = vld [vmem:[%s6869_s0 + $0x148] sm:$0xff]  }
  0x43   :  { %5030 = vmatprep.mubr.bf16.mxu0 %v5310_v28  ;;  %5158 = vmatprep.mubr.bf16.mxu1 %v5311_v29  ;;  %v5373_v27 = vld [vmem:[%s6869_s0 + $0x348] sm:$0xff]   ;;  %v5374_v28 = vld [vmem:[%s6869_s0 + $0x150] sm:$0xff]  }
  0x44   :  { %v5375_v29 = vld [vmem:[%s6869_s0 + $0x350] sm:$0xff]  }
  0x4a   :  { %5031 = vmatmul.mubr.bf16.gmra.mrb[20].mxu0 %v5312_v30  ;;  %5159 = vmatmul.mubr.bf16.gmra.mrb[20].mxu1 %v5313_v31  ;;  %v5376_v30 = vld [vmem:[%s6869_s0 + $0x158] sm:$0xff]  }
  0x4b   :  { %5034 = vmatprep.mubr.bf16.mxu0 %v5314_v32  ;;  %5162 = vmatprep.mubr.bf16.mxu1 %v5315_v33  ;;  %v5377_v31 = vld [vmem:[%s6869_s0 + $0x358] sm:$0xff]   ;;  %v5378_v32 = vld [vmem:[%s6869_s0 + $0x160] sm:$0xff]  }
  0x4c   :  { %v5379_v33 = vld [vmem:[%s6869_s0 + $0x360] sm:$0xff]  }
  0x52   :  { %5035 = vmatmul.mubr.bf16.gmra.mrb[24].mxu0 %v5316_v34  ;;  %5163 = vmatmul.mubr.bf16.gmra.mrb[24].mxu1 %v5317_v35  ;;  %v5380_v34 = vld [vmem:[%s6869_s0 + $0x168] sm:$0xff]  }
  0x53   :  { %5038 = vmatprep.mubr.bf16.mxu0 %v5318_v36  ;;  %5166 = vmatprep.mubr.bf16.mxu1 %v5319_v37  ;;  %v5381_v35 = vld [vmem:[%s6869_s0 + $0x368] sm:$0xff]   ;;  %v5382_v36 = vld [vmem:[%s6869_s0 + $0x170] sm:$0xff]  }
  0x54   :  { %v5383_v37 = vld [vmem:[%s6869_s0 + $0x370] sm:$0xff]  }
  0x5a   :  { %5039 = vmatmul.mubr.bf16.gmra.mrb[28].mxu0 %v5320_v38  ;;  %5167 = vmatmul.mubr.bf16.gmra.mrb[28].mxu1 %v5321_v39  ;;  %v5384_v38 = vld [vmem:[%s6869_s0 + $0x178] sm:$0xff]  }
  0x5b   :  { %5042 = vmatprep.mubr.bf16.mxu0 %v5322_v40  ;;  %5170 = vmatprep.mubr.bf16.mxu1 %v5323_v41  ;;  %v5385_v39 = vld [vmem:[%s6869_s0 + $0x378] sm:$0xff]   ;;  %v5386_v40 = vld [vmem:[%s6869_s0 + $0x180] sm:$0xff]  }
  0x5c   :  { %v5387_v41 = vld [vmem:[%s6869_s0 + $0x380] sm:$0xff]  }
  0x62   :  { %5043 = vmatmul.mubr.bf16.gmra.mrb[32].mxu0 %v5324_v42  ;;  %5171 = vmatmul.mubr.bf16.gmra.mrb[32].mxu1 %v5325_v43  ;;  %v5388_v42 = vld [vmem:[%s6869_s0 + $0x188] sm:$0xff]  }
  0x63   :  { %5046 = vmatprep.mubr.bf16.mxu0 %v5326_v44  ;;  %5174 = vmatprep.mubr.bf16.mxu1 %v5327_v45  ;;  %v5389_v43 = vld [vmem:[%s6869_s0 + $0x388] sm:$0xff]   ;;  %v5390_v44 = vld [vmem:[%s6869_s0 + $0x190] sm:$0xff]  }
  0x64   :  { %v5391_v45 = vld [vmem:[%s6869_s0 + $0x390] sm:$0xff]  }
  0x6a   :  { %5047 = vmatmul.mubr.bf16.gmra.mrb[36].mxu0 %v5328_v46  ;;  %5175 = vmatmul.mubr.bf16.gmra.mrb[36].mxu1 %v5329_v47  ;;  %v5392_v46 = vld [vmem:[%s6869_s0 + $0x198] sm:$0xff]  }
  0x6b   :  { %5050 = vmatprep.mubr.bf16.mxu0 %v5330_v48  ;;  %5178 = vmatprep.mubr.bf16.mxu1 %v5331_v49  ;;  %v5393_v47 = vld [vmem:[%s6869_s0 + $0x398] sm:$0xff]   ;;  %v5394_v48 = vld [vmem:[%s6869_s0 + $0x1a0] sm:$0xff]  }
  0x6c   :  { %v5395_v49 = vld [vmem:[%s6869_s0 + $0x3a0] sm:$0xff]  }
  0x72   :  { %5051 = vmatmul.mubr.bf16.gmra.mrb[40].mxu0 %v5332_v50  ;;  %5179 = vmatmul.mubr.bf16.gmra.mrb[40].mxu1 %v5333_v51  ;;  %v5396_v50 = vld [vmem:[%s6869_s0 + $0x1a8] sm:$0xff]  }
  0x73   :  { %5054 = vmatprep.mubr.bf16.mxu0 %v5334_v52  ;;  %5182 = vmatprep.mubr.bf16.mxu1 %v5335_v53  ;;  %v5397_v51 = vld [vmem:[%s6869_s0 + $0x3a8] sm:$0xff]   ;;  %v5398_v52 = vld [vmem:[%s6869_s0 + $0x1b0] sm:$0xff]  }
  0x74   :  { %v5399_v53 = vld [vmem:[%s6869_s0 + $0x3b0] sm:$0xff]  }
  0x7a   :  { %5055 = vmatmul.mubr.bf16.gmra.mrb[44].mxu0 %v5336_v54  ;;  %5183 = vmatmul.mubr.bf16.gmra.mrb[44].mxu1 %v5337_v55 }
  0x7b   :  { %5058 = vmatprep.mubr.bf16.mxu0 %v5338_v56  ;;  %5186 = vmatprep.mubr.bf16.mxu1 %v5339_v57  ;;  %v5400_v56 = vld [vmem:[%s6869_s0 + $0x1b8] sm:$0xff]  }
  0x7c   :  { %v5401_v57 = vld [vmem:[%s6869_s0 + $0x3b8] sm:$0xff]  }
  0x82   :  { %5059 = vmatmul.mubr.bf16.gmra.mrb[48].mxu0 %v5340_v58  ;;  %5187 = vmatmul.mubr.bf16.gmra.mrb[48].mxu1 %v5341_v59 }
  0x83   :  { %5062 = vmatprep.mubr.bf16.mxu0 %v5342_v60  ;;  %5190 = vmatprep.mubr.bf16.mxu1 %v5343_v61 }
  0x8a   :  { %5063 = vmatmul.mubr.bf16.gmra.mrb[52].mxu0 %v5344_v62  ;;  %5191 = vmatmul.mubr.bf16.gmra.mrb[52].mxu1 %v5345_v63  ;;  %v5402_v62 = vld [vmem:[%s6869_s0 + $0x1c0] sm:$0xff]  }
  0x8b   :  { %5066 = vmatprep.mubr.bf16.mxu0 %v5346_v0  ;;  %5194 = vmatprep.mubr.bf16.mxu1 %v5347_v1  ;;  %v5403_v63 = vld [vmem:[%s6869_s0 + $0x3c0] sm:$0xff]  }
  0x92   :  { %5067 = vmatmul.mubr.bf16.gmra.mrb[56].mxu0 %v5348_v2  ;;  %5195 = vmatmul.mubr.bf16.gmra.mrb[56].mxu1 %v5349_v3 }
  0x93   :  { %5070 = vmatprep.mubr.bf16.mxu0 %v5350_v4  ;;  %5198 = vmatprep.mubr.bf16.mxu1 %v5351_v5 }
  0x9a   :  { %5071 = vmatmul.mubr.bf16.gmra.mrb[60].mxu0 %v5352_v6  ;;  %5199 = vmatmul.mubr.bf16.gmra.mrb[60].mxu1 %v5353_v7 }
  0x9b   :  { %5074 = vmatprep.mubr.bf16.mxu0 %v5354_v8  ;;  %5202 = vmatprep.mubr.bf16.mxu1 %v5355_v9 }
  0xa2   :  { %5075 = vmatmul.mubr.bf16.gmra.mrb[64].mxu0 %v5356_v10  ;;  %5203 = vmatmul.mubr.bf16.gmra.mrb[64].mxu1 %v5357_v11 }
  0xa3   :  { %5078 = vmatprep.mubr.bf16.mxu0 %v5358_v12  ;;  %5206 = vmatprep.mubr.bf16.mxu1 %v5359_v13 }
  0xaa   :  { %5079 = vmatmul.mubr.bf16.gmra.mrb[68].mxu0 %v5360_v14  ;;  %5207 = vmatmul.mubr.bf16.gmra.mrb[68].mxu1 %v5361_v15 }
  0xab   :  { %5082 = vmatprep.mubr.bf16.mxu0 %v5362_v16  ;;  %5210 = vmatprep.mubr.bf16.mxu1 %v5363_v17 }
  0xb2   :  { %5083 = vmatmul.mubr.bf16.gmra.mrb[72].mxu0 %v5364_v18  ;;  %5211 = vmatmul.mubr.bf16.gmra.mrb[72].mxu1 %v5365_v19 }
  0xb3   :  { %5086 = vmatprep.mubr.bf16.mxu0 %v5366_v20  ;;  %5214 = vmatprep.mubr.bf16.mxu1 %v5367_v21 }
  0xba   :  { %5087 = vmatmul.mubr.bf16.gmra.mrb[76].mxu0 %v5368_v22  ;;  %5215 = vmatmul.mubr.bf16.gmra.mrb[76].mxu1 %v5369_v23  ;;  %v5404_v23 = vld [vmem:[%s6869_s0 + $0x1c8] sm:$0xff]  }
  0xbb   :  { %5090 = vmatprep.mubr.bf16.mxu0 %v5370_v24  ;;  %5218 = vmatprep.mubr.bf16.mxu1 %v5371_v25  ;;  %v5405_v24 = vld [vmem:[%s6869_s0 + $0x3c8] sm:$0xff]  }
  0xc2   :  { %5091 = vmatmul.mubr.bf16.gmra.mrb[80].mxu0 %v5372_v26  ;;  %5219 = vmatmul.mubr.bf16.gmra.mrb[80].mxu1 %v5373_v27 }
  0xc3   :  { %5094 = vmatprep.mubr.bf16.mxu0 %v5374_v28  ;;  %5222 = vmatprep.mubr.bf16.mxu1 %v5375_v29 }
  0xca   :  { %5095 = vmatmul.mubr.bf16.gmra.mrb[84].mxu0 %v5376_v30  ;;  %5223 = vmatmul.mubr.bf16.gmra.mrb[84].mxu1 %v5377_v31  ;;  %v5406_v30 = vld [vmem:[%s6869_s0 + $0x1d0] sm:$0xff]  }
  0xcb   :  { %5098 = vmatprep.mubr.bf16.mxu0 %v5378_v32  ;;  %5226 = vmatprep.mubr.bf16.mxu1 %v5379_v33 }
  0xd2   :  { %5099 = vmatmul.mubr.bf16.gmra.mrb[88].mxu0 %v5380_v34  ;;  %5227 = vmatmul.mubr.bf16.gmra.mrb[88].mxu1 %v5381_v35 }
  0xd3   :  { %5102 = vmatprep.mubr.bf16.mxu0 %v5382_v36  ;;  %5230 = vmatprep.mubr.bf16.mxu1 %v5383_v37  ;;  %v5407_v36 = vld [vmem:[%s6869_s0 + $0x3d0] sm:$0xff]  }
  0xda   :  { %5103 = vmatmul.mubr.bf16.gmra.mrb[92].mxu0 %v5384_v38  ;;  %5231 = vmatmul.mubr.bf16.gmra.mrb[92].mxu1 %v5385_v39 }
  0xdb   :  { %5106 = vmatprep.mubr.bf16.mxu0 %v5386_v40  ;;  %5234 = vmatprep.mubr.bf16.mxu1 %v5387_v41 }
  0xe2   :  { %5107 = vmatmul.mubr.bf16.gmra.mrb[96].mxu0 %v5388_v42  ;;  %5235 = vmatmul.mubr.bf16.gmra.mrb[96].mxu1 %v5389_v43 }
  0xe3   :  { %5110 = vmatprep.mubr.bf16.mxu0 %v5390_v44  ;;  %5238 = vmatprep.mubr.bf16.mxu1 %v5391_v45 }
  0xea   :  { %5111 = vmatmul.mubr.bf16.gmra.mrb[100].mxu0 %v5392_v46  ;;  %5239 = vmatmul.mubr.bf16.gmra.mrb[100].mxu1 %v5393_v47 }
  0xeb   :  { %5114 = vmatprep.mubr.bf16.mxu0 %v5394_v48  ;;  %5242 = vmatprep.mubr.bf16.mxu1 %v5395_v49 }
  0xf2   :  { %5115 = vmatmul.mubr.bf16.gmra.mrb[104].mxu0 %v5396_v50  ;;  %5243 = vmatmul.mubr.bf16.gmra.mrb[104].mxu1 %v5397_v51 }
  0xf3   :  { %5118 = vmatprep.mubr.bf16.mxu0 %v5398_v52  ;;  %5246 = vmatprep.mubr.bf16.mxu1 %v5399_v53 }
  0xf5   :  { %v5012_v54 = vpop.f32.mrb[0].mxu0  ;;  %v5140_v55 = vpop.f32.mrb[0].mxu1 }
  0xf6   :  { %vm2159_vm0 = vcmp.ge.f32.partialorder %v5012_v54, 0.0  ;;  %v2415_v58 = vmul.f32 0.2, %v5012_v54  ;;  %vm2287_vm1 = vcmp.ge.f32.partialorder %v5140_v55, 0.0  ;;  %v2543_v59 = vmul.f32 0.2, %v5140_v55 }
  0xf7   :  { %v1134_v60 = vpop.f32.mrb[1].mxu0  ;;  %v1646_v61 = vpop.f32.mrb[1].mxu1 }
  0xf8   :  { %v2671_v0 = vsel %vm2159_vm0, %v5012_v54, %v2415_v58  ;;  %v2799_v1 = vsel %vm2287_vm1, %v5140_v55, %v2543_v59  ;;  %vm2157_vm3 = vcmp.ge.f32.partialorder %v1134_v60, 0.0  ;;  %v2413_v2 = vmul.f32 0.2, %v1134_v60  ;;  %v5013_v3 = vpop.f32.mrb[2].mxu0  ;;  %v5141_v4 = vpop.f32.mrb[2].mxu1  ;;  %v5408_v54 = vld [vmem:[%s6869_s0 + $0x1d8] sm:$0xff]  }
  0xf9   :  { %v4604_v5 = vpack.c.bf16 %v2671_v0, %v2671_v0  ;;  %v4732_v6 = vpack.c.bf16 %v2799_v1, %v2799_v1  ;;  %vm2285_vm4 = vcmp.ge.f32.partialorder %v1646_v61, 0.0  ;;  %v2541_v7 = vmul.f32 0.2, %v1646_v61  ;;  %v1137_v8 = vpop.f32.mrb[3].mxu0  ;;  %v1649_v9 = vpop.f32.mrb[3].mxu1 }
  0xfa   :  { %v2669_v10 = vsel %vm2157_vm3, %v1134_v60, %v2413_v2  ;;  %vm2160_vm5 = vcmp.ge.f32.partialorder %v5013_v3, 0.0  ;;  %v2416_v11 = vmul.f32 0.2, %v5013_v3  ;;  %vm2288_vm6 = vcmp.ge.f32.partialorder %v5141_v4, 0.0  ;;  %5119 = vmatmul.mubr.bf16.gmra.mrb[108].mxu0 %v5400_v56  ;;  %5247 = vmatmul.mubr.bf16.gmra.mrb[108].mxu1 %v5401_v57  ;;  %v5409_v60 = vld [vmem:[%s6869_s0 + $0x3d8] sm:$0xff]   ;;  %v5410_v2 = vld [vmem:[%s6869_s0 + $0x1e0] sm:$0xff]  }
  0xfb   :  { %3952 = vst.msk [vmem:[%s6870_s2 + $0x8] sm:$0xf] %vm3949_vm2, %v4604_v5  ;;  %4080 = vst.msk [vmem:[%s6870_s2 + $0x208] sm:$0xf] %vm3949_vm2, %v4732_v6  ;;  %v4602_v12 = vpack.c.bf16 %v2669_v10, %v2669_v10  ;;  %v2797_v13 = vsel %vm2285_vm4, %v1646_v61, %v2541_v7  ;;  %v2544_v14 = vmul.f32 0.2, %v5141_v4  ;;  %5122 = vmatprep.mubr.bf16.mxu0 %v5402_v62  ;;  %5250 = vmatprep.mubr.bf16.mxu1 %v5403_v63 }
  0xfc   :  { %vm2158_vm7 = vcmp.ge.f32.partialorder %v1137_v8, 0.0  ;;  %v4730_v15 = vpack.c.bf16 %v2797_v13, %v2797_v13  ;;  %v2672_v16 = vsel %vm2160_vm5, %v5013_v3, %v2416_v11  ;;  %v2414_v17 = vmul.f32 0.2, %v1137_v8 }
  0xfd   :  { %vm2286_vm8 = vcmp.ge.f32.partialorder %v1649_v9, 0.0  ;;  %3950 = vst.msk [vmem:[%s6870_s2] sm:$0xf] %vm3949_vm2, %v4602_v12  ;;  %v4605_v18 = vpack.c.bf16 %v2672_v16, %v2672_v16  ;;  %v2800_v19 = vsel %vm2288_vm6, %v5141_v4, %v2544_v14  ;;  %v2542_v20 = vmul.f32 0.2, %v1649_v9  ;;  %v5016_v21 = vpop.f32.mrb[4].mxu0 }
  0xfe   :  { %v5144_v22 = vpop.f32.mrb[4].mxu1  ;;  %4078 = vst.msk [vmem:[%s6870_s2 + $0x200] sm:$0xf] %vm3949_vm2, %v4730_v15  ;;  %v4733_v25 = vpack.c.bf16 %v2800_v19, %v2800_v19  ;;  %v2670_v26 = vsel %vm2158_vm7, %v1137_v8, %v2414_v17  ;;  %vm2163_vm9 = vcmp.ge.f32.partialorder %v5016_v21, 0.0  ;;  %v2419_v27 = vmul.f32 0.2, %v5016_v21 }
  0xff   :  { %v1150_v28 = vpop.f32.mrb[5].mxu0  ;;  %v1662_v29 = vpop.f32.mrb[5].mxu1  ;;  %3953 = vst.msk [vmem:[%s6870_s2 + $0xc] sm:$0xf] %vm3949_vm2, %v4605_v18  ;;  %v4603_v31 = vpack.c.bf16 %v2670_v26, %v2670_v26  ;;  %v2798_v32 = vsel %vm2286_vm8, %v1649_v9, %v2542_v20  ;;  %vm2291_vm10 = vcmp.ge.f32.partialorder %v5144_v22, 0.0  ;;  %v5411_v8 = vld [vmem:[%s6869_s0 + $0x3e0] sm:$0xff]  }
 0x100   :  { %v2547_v33 = vmul.f32 0.2, %v5144_v22  ;;  %v5017_v34 = vpop.f32.mrb[6].mxu0  ;;  %v5145_v35 = vpop.f32.mrb[6].mxu1  ;;  %4081 = vst.msk [vmem:[%s6870_s2 + $0x20c] sm:$0xf] %vm3949_vm2, %v4733_v25  ;;  %v4731_v37 = vpack.c.bf16 %v2798_v32, %v2798_v32  ;;  %v2675_v38 = vsel %vm2163_vm9, %v5016_v21, %v2419_v27 }
 0x101   :  { %vm2161_vm11 = vcmp.ge.f32.partialorder %v1150_v28, 0.0  ;;  %v2417_v39 = vmul.f32 0.2, %v1150_v28  ;;  %v1153_v40 = vpop.f32.mrb[7].mxu0  ;;  %v1665_v41 = vpop.f32.mrb[7].mxu1  ;;  %v4608_v42 = vpack.c.bf16 %v2675_v38, %v2675_v38  ;;  %vm2289_vm12 = vcmp.ge.f32.partialorder %v1662_v29, 0.0 }
 0x102   :  { %3951 = vst.msk [vmem:[%s6870_s2 + $0x4] sm:$0xf] %vm3949_vm2, %v4603_v31  ;;  %v2803_v43 = vsel %vm2291_vm10, %v5144_v22, %v2547_v33  ;;  %v2545_v44 = vmul.f32 0.2, %v1662_v29  ;;  %4079 = vst.msk [vmem:[%s6870_s2 + $0x204] sm:$0xf] %vm3949_vm2, %v4731_v37  ;;  %5123 = vmatmul.mubr.bf16.gmra.mrb[112].mxu0 %v5404_v23  ;;  %5251 = vmatmul.mubr.bf16.gmra.mrb[112].mxu1 %v5405_v24 }
 0x103   :  { %v4736_v45 = vpack.c.bf16 %v2803_v43, %v2803_v43  ;;  %v2673_v46 = vsel %vm2161_vm11, %v1150_v28, %v2417_v39  ;;  %vm2164_vm13 = vcmp.ge.f32.partialorder %v5017_v34, 0.0  ;;  %v2420_v47 = vmul.f32 0.2, %v5017_v34  ;;  %3956 = vst.msk [vmem:[%s6870_s2 + $0x18] sm:$0xf] %vm3949_vm2, %v4608_v42  ;;  %5126 = vmatprep.mubr.bf16.mxu0 %v5406_v30  ;;  %5254 = vmatprep.mubr.bf16.mxu1 %v5407_v36  ;;  %v5412_v26 = vld [vmem:[%s6869_s0 + $0x1e8] sm:$0xff]  }
 0x104   :  { %v4606_v48 = vpack.c.bf16 %v2673_v46, %v2673_v46  ;;  %v2801_v49 = vsel %vm2289_vm12, %v1662_v29, %v2545_v44  ;;  %vm2292_vm14 = vcmp.ge.f32.partialorder %v5145_v35, 0.0  ;;  %v2548_v50 = vmul.f32 0.2, %v5145_v35  ;;  %v5413_v32 = vld [vmem:[%s6869_s0 + $0x3e8] sm:$0xff]   ;;  %v5414_v38 = vld [vmem:[%s6869_s0 + $0x1f0] sm:$0xff]  }
 0x105   :  { %4084 = vst.msk [vmem:[%s6870_s2 + $0x218] sm:$0xf] %vm3949_vm2, %v4736_v45  ;;  %v4734_v51 = vpack.c.bf16 %v2801_v49, %v2801_v49  ;;  %v2676_v52 = vsel %vm2164_vm13, %v5017_v34, %v2420_v47  ;;  %vm2162_vm15 = vcmp.ge.f32.partialorder %v1153_v40, 0.0  ;;  %v2418_v53 = vmul.f32 0.2, %v1153_v40  ;;  %v5020_v58 = vpop.f32.mrb[8].mxu0 }
 0x106   :  { %3954 = vst.msk [vmem:[%s6870_s2 + $0x10] sm:$0xf] %vm3949_vm2, %v4606_v48  ;;  %v4609_v55 = vpack.c.bf16 %v2676_v52, %v2676_v52  ;;  %v2804_v56 = vsel %vm2292_vm14, %v5145_v35, %v2548_v50  ;;  %vm2290_vm0 = vcmp.ge.f32.partialorder %v1665_v41, 0.0  ;;  %v2546_v57 = vmul.f32 0.2, %v1665_v41  ;;  %v5148_v59 = vpop.f32.mrb[8].mxu1 }
 0x107   :  { %4082 = vst.msk [vmem:[%s6870_s2 + $0x210] sm:$0xf] %vm3949_vm2, %v4734_v51  ;;  %v4737_v61 = vpack.c.bf16 %v2804_v56, %v2804_v56  ;;  %v2674_v62 = vsel %vm2162_vm15, %v1153_v40, %v2418_v53  ;;  %vm2167_vm1 = vcmp.ge.f32.partialorder %v5020_v58, 0.0  ;;  %v2423_v63 = vmul.f32 0.2, %v5020_v58  ;;  %v1166_v0 = vpop.f32.mrb[9].mxu0 }
 0x108   :  { %v1678_v1 = vpop.f32.mrb[9].mxu1  ;;  %3957 = vst.msk [vmem:[%s6870_s2 + $0x1c] sm:$0xf] %vm3949_vm2, %v4609_v55  ;;  %v4607_v3 = vpack.c.bf16 %v2674_v62, %v2674_v62  ;;  %v2802_v4 = vsel %vm2290_vm0, %v1665_v41, %v2546_v57  ;;  %vm2295_vm3 = vcmp.ge.f32.partialorder %v5148_v59, 0.0  ;;  %v2551_v5 = vmul.f32 0.2, %v5148_v59 }
 0x109   :  { %v5021_v6 = vpop.f32.mrb[10].mxu0  ;;  %v5149_v7 = vpop.f32.mrb[10].mxu1  ;;  %4085 = vst.msk [vmem:[%s6870_s2 + $0x21c] sm:$0xf] %vm3949_vm2, %v4737_v61  ;;  %v4735_v9 = vpack.c.bf16 %v2802_v4, %v2802_v4  ;;  %v2679_v10 = vsel %vm2167_vm1, %v5020_v58, %v2423_v63  ;;  %vm2165_vm4 = vcmp.ge.f32.partialorder %v1166_v0, 0.0  ;;  %vm2293_vm5 = vcmp.ge.f32.partialorder %v1678_v1, 0.0 }
 0x10a   :  { %v2421_v11 = vmul.f32 0.2, %v1166_v0  ;;  %v1169_v12 = vpop.f32.mrb[11].mxu0  ;;  %v1681_v13 = vpop.f32.mrb[11].mxu1  ;;  %3955 = vst.msk [vmem:[%s6870_s2 + $0x14] sm:$0xf] %vm3949_vm2, %v4607_v3  ;;  %v4612_v14 = vpack.c.bf16 %v2679_v10, %v2679_v10  ;;  %v2807_v15 = vsel %vm2295_vm3, %v5148_v59, %v2551_v5  ;;  %5127 = vmatmul.mubr.bf16.gmra.mrb[116].mxu0 %v5408_v54  ;;  %5255 = vmatmul.mubr.bf16.gmra.mrb[116].mxu1 %v5409_v60 }
 0x10b   :  { %v2549_v16 = vmul.f32 0.2, %v1678_v1  ;;  %4083 = vst.msk [vmem:[%s6870_s2 + $0x214] sm:$0xf] %vm3949_vm2, %v4735_v9  ;;  %v4740_v17 = vpack.c.bf16 %v2807_v15, %v2807_v15  ;;  %vm2168_vm6 = vcmp.ge.f32.partialorder %v5021_v6, 0.0  ;;  %vm2296_vm7 = vcmp.ge.f32.partialorder %v5149_v7, 0.0  ;;  %5130 = vmatprep.mubr.bf16.mxu0 %v5410_v2  ;;  %5258 = vmatprep.mubr.bf16.mxu1 %v5411_v8 }
 0x10c   :  { %v2677_v18 = vsel %vm2165_vm4, %v1166_v0, %v2421_v11  ;;  %v2424_v19 = vmul.f32 0.2, %v5021_v6  ;;  %3960 = vst.msk [vmem:[%s6870_s2 + $0x28] sm:$0xf] %vm3949_vm2, %v4612_v14  ;;  %v2552_v22 = vmul.f32 0.2, %v5149_v7 }
 0x10d   :  { %v4610_v20 = vpack.c.bf16 %v2677_v18, %v2677_v18  ;;  %v2805_v21 = vsel %vm2293_vm5, %v1678_v1, %v2549_v16  ;;  %4088 = vst.msk [vmem:[%s6870_s2 + $0x228] sm:$0xf] %vm3949_vm2, %v4740_v17  ;;  %vm2166_vm8 = vcmp.ge.f32.partialorder %v1169_v12, 0.0  ;;  %v2422_v25 = vmul.f32 0.2, %v1169_v12  ;;  %v5024_v30 = vpop.f32.mrb[12].mxu0 }
 0x10e   :  { %v4738_v23 = vpack.c.bf16 %v2805_v21, %v2805_v21  ;;  %v2680_v24 = vsel %vm2168_vm6, %v5021_v6, %v2424_v19  ;;  %v2808_v28 = vsel %vm2296_vm7, %v5149_v7, %v2552_v22  ;;  %vm2294_vm9 = vcmp.ge.f32.partialorder %v1681_v13, 0.0  ;;  %v5152_v31 = vpop.f32.mrb[12].mxu1  ;;  %v1182_v36 = vpop.f32.mrb[13].mxu0  ;;  %v5415_v44 = vld [vmem:[%s6869_s0 + $0x3f0] sm:$0xff]   ;;  %v5416_v3 = vld [vmem:[%s6869_s0 + $0x1f8] sm:$0xff]  }
 0x10f   :  { %3958 = vst.msk [vmem:[%s6870_s2 + $0x20] sm:$0xf] %vm3949_vm2, %v4610_v20  ;;  %v4613_v27 = vpack.c.bf16 %v2680_v24, %v2680_v24  ;;  %v2550_v29 = vmul.f32 0.2, %v1681_v13  ;;  %v4741_v33 = vpack.c.bf16 %v2808_v28, %v2808_v28  ;;  %v2678_v34 = vsel %vm2166_vm8, %v1169_v12, %v2422_v25  ;;  %v1694_v37 = vpop.f32.mrb[13].mxu1  ;;  %v5025_v42 = vpop.f32.mrb[14].mxu0 }
 0x110   :  { %4086 = vst.msk [vmem:[%s6870_s2 + $0x220] sm:$0xf] %vm3949_vm2, %v4738_v23  ;;  %vm2171_vm10 = vcmp.ge.f32.partialorder %v5024_v30, 0.0  ;;  %v2427_v35 = vmul.f32 0.2, %v5024_v30  ;;  %v4611_v39 = vpack.c.bf16 %v2678_v34, %v2678_v34  ;;  %vm2299_vm11 = vcmp.ge.f32.partialorder %v5152_v31, 0.0 }
 0x111   :  { %3961 = vst.msk [vmem:[%s6870_s2 + $0x2c] sm:$0xf] %vm3949_vm2, %v4613_v27  ;;  %v2806_v40 = vsel %vm2294_vm9, %v1681_v13, %v2550_v29  ;;  %v2555_v41 = vmul.f32 0.2, %v5152_v31  ;;  %v5153_v43 = vpop.f32.mrb[14].mxu1  ;;  %vm2169_vm12 = vcmp.ge.f32.partialorder %v1182_v36, 0.0 }
 0x112   :  { %4089 = vst.msk [vmem:[%s6870_s2 + $0x22c] sm:$0xf] %vm3949_vm2, %v4741_v33  ;;  %v4739_v45 = vpack.c.bf16 %v2806_v40, %v2806_v40  ;;  %v2683_v46 = vsel %vm2171_vm10, %v5024_v30, %v2427_v35  ;;  %v2425_v47 = vmul.f32 0.2, %v1182_v36  ;;  %v1185_v48 = vpop.f32.mrb[15].mxu0  ;;  %v1697_v49 = vpop.f32.mrb[15].mxu1  ;;  %5131 = vmatmul.mubr.bf16.gmra.mrb[120].mxu0 %v5412_v26  ;;  %5259 = vmatmul.mubr.bf16.gmra.mrb[120].mxu1 %v5413_v32 }
 0x113   :  { %3959 = vst.msk [vmem:[%s6870_s2 + $0x24] sm:$0xf] %vm3949_vm2, %v4611_v39  ;;  %v4616_v50 = vpack.c.bf16 %v2683_v46, %v2683_v46  ;;  %v2811_v51 = vsel %vm2299_vm11, %v5152_v31, %v2555_v41  ;;  %vm2297_vm13 = vcmp.ge.f32.partialorder %v1694_v37, 0.0  ;;  %v2553_v52 = vmul.f32 0.2, %v1694_v37  ;;  %5134 = vmatprep.mubr.bf16.mxu0 %v5414_v38  ;;  %5262 = vmatprep.mubr.bf16.mxu1 %v5415_v44  ;;  %v5417_v9 = vld [vmem:[%s6869_s0 + $0x3f8] sm:$0xff]  }
 0x114   :  { %4087 = vst.msk [vmem:[%s6870_s2 + $0x224] sm:$0xf] %vm3949_vm2, %v4739_v45  ;;  %v4744_v53 = vpack.c.bf16 %v2811_v51, %v2811_v51  ;;  %v2681_v54 = vsel %vm2169_vm12, %v1182_v36, %v2425_v47  ;;  %vm2172_vm14 = vcmp.ge.f32.partialorder %v5025_v42, 0.0  ;;  %v2428_v55 = vmul.f32 0.2, %v5025_v42 }
 0x115   :  { %3964 = vst.msk [vmem:[%s6870_s2 + $0x38] sm:$0xf] %vm3949_vm2, %v4616_v50  ;;  %v4614_v56 = vpack.c.bf16 %v2681_v54, %v2681_v54  ;;  %v2809_v57 = vsel %vm2297_vm13, %v1694_v37, %v2553_v52  ;;  %vm2300_vm15 = vcmp.ge.f32.partialorder %v5153_v43, 0.0  ;;  %v2556_v58 = vmul.f32 0.2, %v5153_v43  ;;  %v5028_v1 = vpop.f32.mrb[16].mxu0 }
 0x116   :  { %4092 = vst.msk [vmem:[%s6870_s2 + $0x238] sm:$0xf] %vm3949_vm2, %v4744_v53  ;;  %v4742_v59 = vpack.c.bf16 %v2809_v57, %v2809_v57  ;;  %v2684_v60 = vsel %vm2172_vm14, %v5025_v42, %v2428_v55  ;;  %vm2170_vm0 = vcmp.ge.f32.partialorder %v1185_v48, 0.0  ;;  %v2426_v61 = vmul.f32 0.2, %v1185_v48  ;;  %v5156_v2 = vpop.f32.mrb[16].mxu1 }
 0x117   :  { %3962 = vst.msk [vmem:[%s6870_s2 + $0x30] sm:$0xf] %vm3949_vm2, %v4614_v56  ;;  %v4617_v62 = vpack.c.bf16 %v2684_v60, %v2684_v60  ;;  %v2812_v63 = vsel %vm2300_vm15, %v5153_v43, %v2556_v58  ;;  %vm2298_vm1 = vcmp.ge.f32.partialorder %v1697_v49, 0.0  ;;  %v2554_v0 = vmul.f32 0.2, %v1697_v49  ;;  %v1198_v7 = vpop.f32.mrb[17].mxu0 }
 0x118   :  { %4090 = vst.msk [vmem:[%s6870_s2 + $0x230] sm:$0xf] %vm3949_vm2, %v4742_v59  ;;  %v4745_v4 = vpack.c.bf16 %v2812_v63, %v2812_v63  ;;  %v2682_v5 = vsel %vm2170_vm0, %v1185_v48, %v2426_v61  ;;  %vm2175_vm3 = vcmp.ge.f32.partialorder %v5028_v1, 0.0  ;;  %v2431_v6 = vmul.f32 0.2, %v5028_v1  ;;  %v1710_v8 = vpop.f32.mrb[17].mxu1 }
 0x119   :  { %3965 = vst.msk [vmem:[%s6870_s2 + $0x3c] sm:$0xf] %vm3949_vm2, %v4617_v62  ;;  %v4615_v10 = vpack.c.bf16 %v2682_v5, %v2682_v5  ;;  %v2810_v11 = vsel %vm2298_vm1, %v1697_v49, %v2554_v0  ;;  %vm2303_vm4 = vcmp.ge.f32.partialorder %v5156_v2, 0.0  ;;  %v2559_v12 = vmul.f32 0.2, %v5156_v2  ;;  %v5029_v13 = vpop.f32.mrb[18].mxu0 }
 0x11a   :  { %v5157_v14 = vpop.f32.mrb[18].mxu1  ;;  %4093 = vst.msk [vmem:[%s6870_s2 + $0x23c] sm:$0xf] %vm3949_vm2, %v4745_v4  ;;  %v4743_v15 = vpack.c.bf16 %v2810_v11, %v2810_v11  ;;  %v2687_v16 = vsel %vm2175_vm3, %v5028_v1, %v2431_v6  ;;  %vm2173_vm5 = vcmp.ge.f32.partialorder %v1198_v7, 0.0  ;;  %v2429_v17 = vmul.f32 0.2, %v1198_v7  ;;  %5135 = vmatmul.mubr.bf16.gmra.mrb[124].mxu0 %v5416_v3  ;;  %5263 = vmatmul.mubr.bf16.gmra.mrb[124].mxu1 %v5417_v9 }
 0x11b   :  { %v1201_v18 = vpop.f32.mrb[19].mxu0  ;;  %v1713_v19 = vpop.f32.mrb[19].mxu1  ;;  %3963 = vst.msk [vmem:[%s6870_s2 + $0x34] sm:$0xf] %vm3949_vm2, %v4615_v10  ;;  %v4620_v20 = vpack.c.bf16 %v2687_v16, %v2687_v16  ;;  %v2815_v21 = vsel %vm2303_vm4, %v5156_v2, %v2559_v12  ;;  %vm2301_vm6 = vcmp.ge.f32.partialorder %v1710_v8, 0.0  ;;  %vm2176_vm7 = vcmp.ge.f32.partialorder %v5029_v13, 0.0 }
 0x11c   :  { %v2557_v22 = vmul.f32 0.2, %v1710_v8  ;;  %4091 = vst.msk [vmem:[%s6870_s2 + $0x234] sm:$0xf] %vm3949_vm2, %v4743_v15  ;;  %v4748_v23 = vpack.c.bf16 %v2815_v21, %v2815_v21  ;;  %v2685_v24 = vsel %vm2173_vm5, %v1198_v7, %v2429_v17  ;;  %v2432_v25 = vmul.f32 0.2, %v5029_v13 }
 0x11d   :  { %3968 = vst.msk [vmem:[%s6870_s2 + $0x48] sm:$0xf] %vm3949_vm2, %v4620_v20  ;;  %v4618_v26 = vpack.c.bf16 %v2685_v24, %v2685_v24  ;;  %vm2304_vm8 = vcmp.ge.f32.partialorder %v5157_v14, 0.0  ;;  %v2560_v28 = vmul.f32 0.2, %v5157_v14  ;;  %vm2174_vm9 = vcmp.ge.f32.partialorder %v1201_v18, 0.0 }
 0x11e   :  { %v2813_v27 = vsel %vm2301_vm6, %v1710_v8, %v2557_v22  ;;  %4096 = vst.msk [vmem:[%s6870_s2 + $0x248] sm:$0xf] %vm3949_vm2, %v4748_v23  ;;  %v2688_v30 = vsel %vm2176_vm7, %v5029_v13, %v2432_v25  ;;  %v2430_v31 = vmul.f32 0.2, %v1201_v18  ;;  %vm2302_vm10 = vcmp.ge.f32.partialorder %v1713_v19, 0.0  ;;  %v5032_v35 = vpop.f32.mrb[20].mxu0 }
 0x11f   :  { %v4746_v29 = vpack.c.bf16 %v2813_v27, %v2813_v27  ;;  %3966 = vst.msk [vmem:[%s6870_s2 + $0x40] sm:$0xf] %vm3949_vm2, %v4618_v26  ;;  %v4621_v32 = vpack.c.bf16 %v2688_v30, %v2688_v30  ;;  %v2816_v33 = vsel %vm2304_vm8, %v5157_v14, %v2560_v28  ;;  %v2558_v34 = vmul.f32 0.2, %v1713_v19  ;;  %v5160_v36 = vpop.f32.mrb[20].mxu1  ;;  %v1214_v40 = vpop.f32.mrb[21].mxu0 }
 0x120   :  { %v4749_v37 = vpack.c.bf16 %v2816_v33, %v2816_v33  ;;  %v2686_v38 = vsel %vm2174_vm9, %v1201_v18, %v2430_v31  ;;  %vm2179_vm11 = vcmp.ge.f32.partialorder %v5032_v35, 0.0  ;;  %v2435_v39 = vmul.f32 0.2, %v5032_v35  ;;  %v1726_v41 = vpop.f32.mrb[21].mxu1  ;;  %v5033_v45 = vpop.f32.mrb[22].mxu0 }
 0x121   :  { %4094 = vst.msk [vmem:[%s6870_s2 + $0x240] sm:$0xf] %vm3949_vm2, %v4746_v29  ;;  %3969 = vst.msk [vmem:[%s6870_s2 + $0x4c] sm:$0xf] %vm3949_vm2, %v4621_v32  ;;  %v4619_v42 = vpack.c.bf16 %v2686_v38, %v2686_v38  ;;  %v2814_v43 = vsel %vm2302_vm10, %v1713_v19, %v2558_v34  ;;  %vm2307_vm12 = vcmp.ge.f32.partialorder %v5160_v36, 0.0  ;;  %v5161_v46 = vpop.f32.mrb[22].mxu1 }
 0x122   :  { %v2563_v44 = vmul.f32 0.2, %v5160_v36  ;;  %4097 = vst.msk [vmem:[%s6870_s2 + $0x24c] sm:$0xf] %vm3949_vm2, %v4749_v37  ;;  %v4747_v47 = vpack.c.bf16 %v2814_v43, %v2814_v43  ;;  %v2691_v48 = vsel %vm2179_vm11, %v5032_v35, %v2435_v39  ;;  %vm2177_vm13 = vcmp.ge.f32.partialorder %v1214_v40, 0.0  ;;  %v1217_v50 = vpop.f32.mrb[23].mxu0 }
 0x123   :  { %v2433_v49 = vmul.f32 0.2, %v1214_v40  ;;  %v1729_v51 = vpop.f32.mrb[23].mxu1  ;;  %3967 = vst.msk [vmem:[%s6870_s2 + $0x44] sm:$0xf] %vm3949_vm2, %v4619_v42  ;;  %v4624_v52 = vpack.c.bf16 %v2691_v48, %v2691_v48  ;;  %vm2305_vm14 = vcmp.ge.f32.partialorder %v1726_v41, 0.0 }
 0x124   :  { %v2819_v53 = vsel %vm2307_vm12, %v5160_v36, %v2563_v44  ;;  %v2561_v54 = vmul.f32 0.2, %v1726_v41  ;;  %4095 = vst.msk [vmem:[%s6870_s2 + $0x244] sm:$0xf] %vm3949_vm2, %v4747_v47  ;;  %vm2180_vm15 = vcmp.ge.f32.partialorder %v5033_v45, 0.0  ;;  %vm2308_vm0 = vcmp.ge.f32.partialorder %v5161_v46, 0.0 }
 0x125   :  { %v4752_v55 = vpack.c.bf16 %v2819_v53, %v2819_v53  ;;  %v2689_v56 = vsel %vm2177_vm13, %v1214_v40, %v2433_v49  ;;  %v2436_v57 = vmul.f32 0.2, %v5033_v45  ;;  %3972 = vst.msk [vmem:[%s6870_s2 + $0x58] sm:$0xf] %vm3949_vm2, %v4624_v52  ;;  %v2564_v60 = vmul.f32 0.2, %v5161_v46 }
 0x126   :  { %v4622_v58 = vpack.c.bf16 %v2689_v56, %v2689_v56  ;;  %v2817_v59 = vsel %vm2305_vm14, %v1726_v41, %v2561_v54  ;;  %vm2178_vm1 = vcmp.ge.f32.partialorder %v1217_v50, 0.0  ;;  %v2434_v63 = vmul.f32 0.2, %v1217_v50  ;;  %v5036_v3 = vpop.f32.mrb[24].mxu0  ;;  %v5164_v4 = vpop.f32.mrb[24].mxu1 }
 0x127   :  { %4100 = vst.msk [vmem:[%s6870_s2 + $0x258] sm:$0xf] %vm3949_vm2, %v4752_v55  ;;  %v4750_v61 = vpack.c.bf16 %v2817_v59, %v2817_v59  ;;  %v2692_v62 = vsel %vm2180_vm15, %v5033_v45, %v2436_v57  ;;  %v2820_v1 = vsel %vm2308_vm0, %v5161_v46, %v2564_v60  ;;  %vm2306_vm3 = vcmp.ge.f32.partialorder %v1729_v51, 0.0  ;;  %v1230_v8 = vpop.f32.mrb[25].mxu0  ;;  %v1742_v9 = vpop.f32.mrb[25].mxu1 }
 0x128   :  { %3970 = vst.msk [vmem:[%s6870_s2 + $0x50] sm:$0xf] %vm3949_vm2, %v4622_v58  ;;  %v4625_v0 = vpack.c.bf16 %v2692_v62, %v2692_v62  ;;  %v2562_v2 = vmul.f32 0.2, %v1729_v51  ;;  %v4753_v5 = vpack.c.bf16 %v2820_v1, %v2820_v1  ;;  %v2690_v6 = vsel %vm2178_vm1, %v1217_v50, %v2434_v63  ;;  %v5037_v13 = vpop.f32.mrb[26].mxu0  ;;  %v5165_v14 = vpop.f32.mrb[26].mxu1 }
 0x129   :  { %4098 = vst.msk [vmem:[%s6870_s2 + $0x250] sm:$0xf] %vm3949_vm2, %v4750_v61  ;;  %vm2183_vm4 = vcmp.ge.f32.partialorder %v5036_v3, 0.0  ;;  %v2439_v7 = vmul.f32 0.2, %v5036_v3  ;;  %v4623_v10 = vpack.c.bf16 %v2690_v6, %v2690_v6  ;;  %vm2311_vm5 = vcmp.ge.f32.partialorder %v5164_v4, 0.0 }
 0x12a   :  { %3973 = vst.msk [vmem:[%s6870_s2 + $0x5c] sm:$0xf] %vm3949_vm2, %v4625_v0  ;;  %v2818_v11 = vsel %vm2306_vm3, %v1729_v51, %v2562_v2  ;;  %v2567_v12 = vmul.f32 0.2, %v5164_v4  ;;  %4101 = vst.msk [vmem:[%s6870_s2 + $0x25c] sm:$0xf] %vm3949_vm2, %v4753_v5 }
 0x12b   :  { %v4751_v15 = vpack.c.bf16 %v2818_v11, %v2818_v11  ;;  %v2695_v16 = vsel %vm2183_vm4, %v5036_v3, %v2439_v7  ;;  %vm2181_vm6 = vcmp.ge.f32.partialorder %v1230_v8, 0.0  ;;  %v2437_v17 = vmul.f32 0.2, %v1230_v8  ;;  %v1233_v18 = vpop.f32.mrb[27].mxu0  ;;  %v1745_v19 = vpop.f32.mrb[27].mxu1 }
 0x12c   :  { %3971 = vst.msk [vmem:[%s6870_s2 + $0x54] sm:$0xf] %vm3949_vm2, %v4623_v10  ;;  %v4628_v20 = vpack.c.bf16 %v2695_v16, %v2695_v16  ;;  %v2823_v21 = vsel %vm2311_vm5, %v5164_v4, %v2567_v12  ;;  %vm2309_vm7 = vcmp.ge.f32.partialorder %v1742_v9, 0.0  ;;  %v2565_v22 = vmul.f32 0.2, %v1742_v9 }
 0x12d   :  { %4099 = vst.msk [vmem:[%s6870_s2 + $0x254] sm:$0xf] %vm3949_vm2, %v4751_v15  ;;  %v4756_v23 = vpack.c.bf16 %v2823_v21, %v2823_v21  ;;  %v2693_v24 = vsel %vm2181_vm6, %v1230_v8, %v2437_v17  ;;  %vm2184_vm8 = vcmp.ge.f32.partialorder %v5037_v13, 0.0  ;;  %v2440_v25 = vmul.f32 0.2, %v5037_v13  ;;  %v5040_v35 = vpop.f32.mrb[28].mxu0 }
 0x12e   :  { %3976 = vst.msk [vmem:[%s6870_s2 + $0x68] sm:$0xf] %vm3949_vm2, %v4628_v20  ;;  %v4626_v26 = vpack.c.bf16 %v2693_v24, %v2693_v24  ;;  %v2821_v27 = vsel %vm2309_vm7, %v1742_v9, %v2565_v22  ;;  %vm2312_vm9 = vcmp.ge.f32.partialorder %v5165_v14, 0.0  ;;  %v2568_v28 = vmul.f32 0.2, %v5165_v14  ;;  %v5168_v36 = vpop.f32.mrb[28].mxu1 }
 0x12f   :  { %4104 = vst.msk [vmem:[%s6870_s2 + $0x268] sm:$0xf] %vm3949_vm2, %v4756_v23  ;;  %v4754_v29 = vpack.c.bf16 %v2821_v27, %v2821_v27  ;;  %v2696_v30 = vsel %vm2184_vm8, %v5037_v13, %v2440_v25  ;;  %vm2182_vm10 = vcmp.ge.f32.partialorder %v1233_v18, 0.0  ;;  %v2438_v31 = vmul.f32 0.2, %v1233_v18  ;;  %v1246_v40 = vpop.f32.mrb[29].mxu0 }
 0x130   :  { %3974 = vst.msk [vmem:[%s6870_s2 + $0x60] sm:$0xf] %vm3949_vm2, %v4626_v26  ;;  %v4629_v32 = vpack.c.bf16 %v2696_v30, %v2696_v30  ;;  %v2824_v33 = vsel %vm2312_vm9, %v5165_v14, %v2568_v28  ;;  %vm2310_vm11 = vcmp.ge.f32.partialorder %v1745_v19, 0.0  ;;  %v2566_v34 = vmul.f32 0.2, %v1745_v19  ;;  %v1758_v41 = vpop.f32.mrb[29].mxu1 }
 0x131   :  { %4102 = vst.msk [vmem:[%s6870_s2 + $0x260] sm:$0xf] %vm3949_vm2, %v4754_v29  ;;  %v4757_v37 = vpack.c.bf16 %v2824_v33, %v2824_v33  ;;  %v2694_v38 = vsel %vm2182_vm10, %v1233_v18, %v2438_v31  ;;  %vm2187_vm12 = vcmp.ge.f32.partialorder %v5040_v35, 0.0  ;;  %v2443_v39 = vmul.f32 0.2, %v5040_v35  ;;  %v5041_v45 = vpop.f32.mrb[30].mxu0 }
 0x132   :  { %3977 = vst.msk [vmem:[%s6870_s2 + $0x6c] sm:$0xf] %vm3949_vm2, %v4629_v32  ;;  %v4627_v42 = vpack.c.bf16 %v2694_v38, %v2694_v38  ;;  %v2822_v43 = vsel %vm2310_vm11, %v1745_v19, %v2566_v34  ;;  %vm2315_vm13 = vcmp.ge.f32.partialorder %v5168_v36, 0.0  ;;  %v2571_v44 = vmul.f32 0.2, %v5168_v36  ;;  %v5169_v46 = vpop.f32.mrb[30].mxu1 }
 0x133   :  { %4105 = vst.msk [vmem:[%s6870_s2 + $0x26c] sm:$0xf] %vm3949_vm2, %v4757_v37  ;;  %v4755_v47 = vpack.c.bf16 %v2822_v43, %v2822_v43  ;;  %v2699_v48 = vsel %vm2187_vm12, %v5040_v35, %v2443_v39  ;;  %vm2185_vm14 = vcmp.ge.f32.partialorder %v1246_v40, 0.0  ;;  %v2441_v49 = vmul.f32 0.2, %v1246_v40  ;;  %v1249_v50 = vpop.f32.mrb[31].mxu0 }
 0x134   :  { %v1761_v51 = vpop.f32.mrb[31].mxu1  ;;  %3975 = vst.msk [vmem:[%s6870_s2 + $0x64] sm:$0xf] %vm3949_vm2, %v4627_v42  ;;  %v4632_v52 = vpack.c.bf16 %v2699_v48, %v2699_v48  ;;  %v2827_v53 = vsel %vm2315_vm13, %v5168_v36, %v2571_v44  ;;  %vm2313_vm15 = vcmp.ge.f32.partialorder %v1758_v41, 0.0  ;;  %v2569_v54 = vmul.f32 0.2, %v1758_v41 }
 0x135   :  { %4103 = vst.msk [vmem:[%s6870_s2 + $0x264] sm:$0xf] %vm3949_vm2, %v4755_v47  ;;  %v4760_v55 = vpack.c.bf16 %v2827_v53, %v2827_v53  ;;  %v2697_v56 = vsel %vm2185_vm14, %v1246_v40, %v2441_v49  ;;  %vm2188_vm0 = vcmp.ge.f32.partialorder %v5041_v45, 0.0  ;;  %v2444_v57 = vmul.f32 0.2, %v5041_v45  ;;  %v5044_v3 = vpop.f32.mrb[32].mxu0 }
 0x136   :  { %3980 = vst.msk [vmem:[%s6870_s2 + $0x78] sm:$0xf] %vm3949_vm2, %v4632_v52  ;;  %v4630_v58 = vpack.c.bf16 %v2697_v56, %v2697_v56  ;;  %v2825_v59 = vsel %vm2313_vm15, %v1758_v41, %v2569_v54  ;;  %vm2316_vm1 = vcmp.ge.f32.partialorder %v5169_v46, 0.0  ;;  %v2572_v60 = vmul.f32 0.2, %v5169_v46  ;;  %v5172_v4 = vpop.f32.mrb[32].mxu1 }
 0x137   :  { %4108 = vst.msk [vmem:[%s6870_s2 + $0x278] sm:$0xf] %vm3949_vm2, %v4760_v55  ;;  %v4758_v61 = vpack.c.bf16 %v2825_v59, %v2825_v59  ;;  %v2700_v62 = vsel %vm2188_vm0, %v5041_v45, %v2444_v57  ;;  %vm2186_vm3 = vcmp.ge.f32.partialorder %v1249_v50, 0.0  ;;  %v2442_v63 = vmul.f32 0.2, %v1249_v50  ;;  %v1262_v8 = vpop.f32.mrb[33].mxu0 }
 0x138   :  { %3978 = vst.msk [vmem:[%s6870_s2 + $0x70] sm:$0xf] %vm3949_vm2, %v4630_v58  ;;  %v4633_v0 = vpack.c.bf16 %v2700_v62, %v2700_v62  ;;  %v2828_v1 = vsel %vm2316_vm1, %v5169_v46, %v2572_v60  ;;  %vm2314_vm4 = vcmp.ge.f32.partialorder %v1761_v51, 0.0  ;;  %v2570_v2 = vmul.f32 0.2, %v1761_v51  ;;  %v1774_v9 = vpop.f32.mrb[33].mxu1 }
 0x139   :  { %4106 = vst.msk [vmem:[%s6870_s2 + $0x270] sm:$0xf] %vm3949_vm2, %v4758_v61  ;;  %v4761_v5 = vpack.c.bf16 %v2828_v1, %v2828_v1  ;;  %v2698_v6 = vsel %vm2186_vm3, %v1249_v50, %v2442_v63  ;;  %vm2191_vm5 = vcmp.ge.f32.partialorder %v5044_v3, 0.0  ;;  %v2447_v7 = vmul.f32 0.2, %v5044_v3  ;;  %v5045_v13 = vpop.f32.mrb[34].mxu0 }
 0x13a   :  { %3981 = vst.msk [vmem:[%s6870_s2 + $0x7c] sm:$0xf] %vm3949_vm2, %v4633_v0  ;;  %v4631_v10 = vpack.c.bf16 %v2698_v6, %v2698_v6  ;;  %v2826_v11 = vsel %vm2314_vm4, %v1761_v51, %v2570_v2  ;;  %vm2319_vm6 = vcmp.ge.f32.partialorder %v5172_v4, 0.0  ;;  %v2575_v12 = vmul.f32 0.2, %v5172_v4  ;;  %v5173_v14 = vpop.f32.mrb[34].mxu1 }
 0x13b   :  { %4109 = vst.msk [vmem:[%s6870_s2 + $0x27c] sm:$0xf] %vm3949_vm2, %v4761_v5  ;;  %v4759_v15 = vpack.c.bf16 %v2826_v11, %v2826_v11  ;;  %v2703_v16 = vsel %vm2191_vm5, %v5044_v3, %v2447_v7  ;;  %vm2189_vm7 = vcmp.ge.f32.partialorder %v1262_v8, 0.0  ;;  %v2445_v17 = vmul.f32 0.2, %v1262_v8  ;;  %v1265_v18 = vpop.f32.mrb[35].mxu0 }
 0x13c   :  { %v1777_v19 = vpop.f32.mrb[35].mxu1  ;;  %3979 = vst.msk [vmem:[%s6870_s2 + $0x74] sm:$0xf] %vm3949_vm2, %v4631_v10  ;;  %v4636_v20 = vpack.c.bf16 %v2703_v16, %v2703_v16  ;;  %v2831_v21 = vsel %vm2319_vm6, %v5172_v4, %v2575_v12  ;;  %vm2317_vm8 = vcmp.ge.f32.partialorder %v1774_v9, 0.0  ;;  %v2573_v22 = vmul.f32 0.2, %v1774_v9 }
 0x13d   :  { %4107 = vst.msk [vmem:[%s6870_s2 + $0x274] sm:$0xf] %vm3949_vm2, %v4759_v15  ;;  %v4764_v23 = vpack.c.bf16 %v2831_v21, %v2831_v21  ;;  %v2701_v24 = vsel %vm2189_vm7, %v1262_v8, %v2445_v17  ;;  %vm2192_vm9 = vcmp.ge.f32.partialorder %v5045_v13, 0.0  ;;  %v2448_v25 = vmul.f32 0.2, %v5045_v13  ;;  %v5048_v35 = vpop.f32.mrb[36].mxu0 }
 0x13e   :  { %3984 = vst.msk [vmem:[%s6870_s2 + $0x88] sm:$0xf] %vm3949_vm2, %v4636_v20  ;;  %v4634_v26 = vpack.c.bf16 %v2701_v24, %v2701_v24  ;;  %v2829_v27 = vsel %vm2317_vm8, %v1774_v9, %v2573_v22  ;;  %vm2320_vm10 = vcmp.ge.f32.partialorder %v5173_v14, 0.0  ;;  %v2576_v28 = vmul.f32 0.2, %v5173_v14  ;;  %v5176_v36 = vpop.f32.mrb[36].mxu1 }
 0x13f   :  { %4112 = vst.msk [vmem:[%s6870_s2 + $0x288] sm:$0xf] %vm3949_vm2, %v4764_v23  ;;  %v4762_v29 = vpack.c.bf16 %v2829_v27, %v2829_v27  ;;  %v2704_v30 = vsel %vm2192_vm9, %v5045_v13, %v2448_v25  ;;  %vm2190_vm11 = vcmp.ge.f32.partialorder %v1265_v18, 0.0  ;;  %v2446_v31 = vmul.f32 0.2, %v1265_v18  ;;  %v1278_v40 = vpop.f32.mrb[37].mxu0 }
 0x140   :  { %3982 = vst.msk [vmem:[%s6870_s2 + $0x80] sm:$0xf] %vm3949_vm2, %v4634_v26  ;;  %v4637_v32 = vpack.c.bf16 %v2704_v30, %v2704_v30  ;;  %v2832_v33 = vsel %vm2320_vm10, %v5173_v14, %v2576_v28  ;;  %vm2318_vm12 = vcmp.ge.f32.partialorder %v1777_v19, 0.0  ;;  %v2574_v34 = vmul.f32 0.2, %v1777_v19  ;;  %v1790_v41 = vpop.f32.mrb[37].mxu1 }
 0x141   :  { %4110 = vst.msk [vmem:[%s6870_s2 + $0x280] sm:$0xf] %vm3949_vm2, %v4762_v29  ;;  %v4765_v37 = vpack.c.bf16 %v2832_v33, %v2832_v33  ;;  %v2702_v38 = vsel %vm2190_vm11, %v1265_v18, %v2446_v31  ;;  %vm2195_vm13 = vcmp.ge.f32.partialorder %v5048_v35, 0.0  ;;  %v2451_v39 = vmul.f32 0.2, %v5048_v35  ;;  %v5049_v45 = vpop.f32.mrb[38].mxu0 }
 0x142   :  { %3985 = vst.msk [vmem:[%s6870_s2 + $0x8c] sm:$0xf] %vm3949_vm2, %v4637_v32  ;;  %v4635_v42 = vpack.c.bf16 %v2702_v38, %v2702_v38  ;;  %v2830_v43 = vsel %vm2318_vm12, %v1777_v19, %v2574_v34  ;;  %vm2323_vm14 = vcmp.ge.f32.partialorder %v5176_v36, 0.0  ;;  %v2579_v44 = vmul.f32 0.2, %v5176_v36  ;;  %v5177_v46 = vpop.f32.mrb[38].mxu1 }
 0x143   :  { %4113 = vst.msk [vmem:[%s6870_s2 + $0x28c] sm:$0xf] %vm3949_vm2, %v4765_v37  ;;  %v4763_v47 = vpack.c.bf16 %v2830_v43, %v2830_v43  ;;  %v2707_v48 = vsel %vm2195_vm13, %v5048_v35, %v2451_v39  ;;  %vm2193_vm15 = vcmp.ge.f32.partialorder %v1278_v40, 0.0  ;;  %v2449_v49 = vmul.f32 0.2, %v1278_v40  ;;  %v1281_v50 = vpop.f32.mrb[39].mxu0 }
 0x144   :  { %v1793_v51 = vpop.f32.mrb[39].mxu1  ;;  %3983 = vst.msk [vmem:[%s6870_s2 + $0x84] sm:$0xf] %vm3949_vm2, %v4635_v42  ;;  %v4640_v52 = vpack.c.bf16 %v2707_v48, %v2707_v48  ;;  %v2835_v53 = vsel %vm2323_vm14, %v5176_v36, %v2579_v44  ;;  %vm2321_vm0 = vcmp.ge.f32.partialorder %v1790_v41, 0.0  ;;  %v2577_v54 = vmul.f32 0.2, %v1790_v41 }
 0x145   :  { %4111 = vst.msk [vmem:[%s6870_s2 + $0x284] sm:$0xf] %vm3949_vm2, %v4763_v47  ;;  %v4768_v55 = vpack.c.bf16 %v2835_v53, %v2835_v53  ;;  %v2705_v56 = vsel %vm2193_vm15, %v1278_v40, %v2449_v49  ;;  %vm2196_vm1 = vcmp.ge.f32.partialorder %v5049_v45, 0.0  ;;  %v2452_v57 = vmul.f32 0.2, %v5049_v45  ;;  %v5052_v3 = vpop.f32.mrb[40].mxu0 }
 0x146   :  { %3988 = vst.msk [vmem:[%s6870_s2 + $0x98] sm:$0xf] %vm3949_vm2, %v4640_v52  ;;  %v4638_v58 = vpack.c.bf16 %v2705_v56, %v2705_v56  ;;  %v2833_v59 = vsel %vm2321_vm0, %v1790_v41, %v2577_v54  ;;  %vm2324_vm3 = vcmp.ge.f32.partialorder %v5177_v46, 0.0  ;;  %v2580_v60 = vmul.f32 0.2, %v5177_v46  ;;  %v5180_v4 = vpop.f32.mrb[40].mxu1 }
 0x147   :  { %4116 = vst.msk [vmem:[%s6870_s2 + $0x298] sm:$0xf] %vm3949_vm2, %v4768_v55  ;;  %v4766_v61 = vpack.c.bf16 %v2833_v59, %v2833_v59  ;;  %v2708_v62 = vsel %vm2196_vm1, %v5049_v45, %v2452_v57  ;;  %vm2194_vm4 = vcmp.ge.f32.partialorder %v1281_v50, 0.0  ;;  %v2450_v63 = vmul.f32 0.2, %v1281_v50  ;;  %v1294_v8 = vpop.f32.mrb[41].mxu0 }
 0x148   :  { %3986 = vst.msk [vmem:[%s6870_s2 + $0x90] sm:$0xf] %vm3949_vm2, %v4638_v58  ;;  %v4641_v0 = vpack.c.bf16 %v2708_v62, %v2708_v62  ;;  %v2836_v1 = vsel %vm2324_vm3, %v5177_v46, %v2580_v60  ;;  %vm2322_vm5 = vcmp.ge.f32.partialorder %v1793_v51, 0.0  ;;  %v2578_v2 = vmul.f32 0.2, %v1793_v51  ;;  %v1806_v9 = vpop.f32.mrb[41].mxu1 }
 0x149   :  { %4114 = vst.msk [vmem:[%s6870_s2 + $0x290] sm:$0xf] %vm3949_vm2, %v4766_v61  ;;  %v4769_v5 = vpack.c.bf16 %v2836_v1, %v2836_v1  ;;  %v2706_v6 = vsel %vm2194_vm4, %v1281_v50, %v2450_v63  ;;  %vm2199_vm6 = vcmp.ge.f32.partialorder %v5052_v3, 0.0  ;;  %v2455_v7 = vmul.f32 0.2, %v5052_v3  ;;  %v5053_v13 = vpop.f32.mrb[42].mxu0 }
 0x14a   :  { %3989 = vst.msk [vmem:[%s6870_s2 + $0x9c] sm:$0xf] %vm3949_vm2, %v4641_v0  ;;  %v4639_v10 = vpack.c.bf16 %v2706_v6, %v2706_v6  ;;  %v2834_v11 = vsel %vm2322_vm5, %v1793_v51, %v2578_v2  ;;  %vm2327_vm7 = vcmp.ge.f32.partialorder %v5180_v4, 0.0  ;;  %v2583_v12 = vmul.f32 0.2, %v5180_v4  ;;  %v5181_v14 = vpop.f32.mrb[42].mxu1 }
 0x14b   :  { %4117 = vst.msk [vmem:[%s6870_s2 + $0x29c] sm:$0xf] %vm3949_vm2, %v4769_v5  ;;  %v4767_v15 = vpack.c.bf16 %v2834_v11, %v2834_v11  ;;  %v2711_v16 = vsel %vm2199_vm6, %v5052_v3, %v2455_v7  ;;  %vm2197_vm8 = vcmp.ge.f32.partialorder %v1294_v8, 0.0  ;;  %v2453_v17 = vmul.f32 0.2, %v1294_v8  ;;  %v1297_v18 = vpop.f32.mrb[43].mxu0 }
 0x14c   :  { %v1809_v19 = vpop.f32.mrb[43].mxu1  ;;  %3987 = vst.msk [vmem:[%s6870_s2 + $0x94] sm:$0xf] %vm3949_vm2, %v4639_v10  ;;  %v4644_v20 = vpack.c.bf16 %v2711_v16, %v2711_v16  ;;  %v2839_v21 = vsel %vm2327_vm7, %v5180_v4, %v2583_v12  ;;  %vm2325_vm9 = vcmp.ge.f32.partialorder %v1806_v9, 0.0  ;;  %v2581_v22 = vmul.f32 0.2, %v1806_v9 }
 0x14d   :  { %4115 = vst.msk [vmem:[%s6870_s2 + $0x294] sm:$0xf] %vm3949_vm2, %v4767_v15  ;;  %v4772_v23 = vpack.c.bf16 %v2839_v21, %v2839_v21  ;;  %v2709_v24 = vsel %vm2197_vm8, %v1294_v8, %v2453_v17  ;;  %vm2200_vm10 = vcmp.ge.f32.partialorder %v5053_v13, 0.0  ;;  %v2456_v25 = vmul.f32 0.2, %v5053_v13  ;;  %v5056_v35 = vpop.f32.mrb[44].mxu0 }
 0x14e   :  { %3992 = vst.msk [vmem:[%s6870_s2 + $0xa8] sm:$0xf] %vm3949_vm2, %v4644_v20  ;;  %v4642_v26 = vpack.c.bf16 %v2709_v24, %v2709_v24  ;;  %v2837_v27 = vsel %vm2325_vm9, %v1806_v9, %v2581_v22  ;;  %vm2328_vm11 = vcmp.ge.f32.partialorder %v5181_v14, 0.0  ;;  %v2584_v28 = vmul.f32 0.2, %v5181_v14  ;;  %v5184_v36 = vpop.f32.mrb[44].mxu1 }
 0x14f   :  { %4120 = vst.msk [vmem:[%s6870_s2 + $0x2a8] sm:$0xf] %vm3949_vm2, %v4772_v23  ;;  %v4770_v29 = vpack.c.bf16 %v2837_v27, %v2837_v27  ;;  %v2712_v30 = vsel %vm2200_vm10, %v5053_v13, %v2456_v25  ;;  %vm2198_vm12 = vcmp.ge.f32.partialorder %v1297_v18, 0.0  ;;  %v2454_v31 = vmul.f32 0.2, %v1297_v18  ;;  %v1310_v40 = vpop.f32.mrb[45].mxu0 }
 0x150   :  { %3990 = vst.msk [vmem:[%s6870_s2 + $0xa0] sm:$0xf] %vm3949_vm2, %v4642_v26  ;;  %v4645_v32 = vpack.c.bf16 %v2712_v30, %v2712_v30  ;;  %v2840_v33 = vsel %vm2328_vm11, %v5181_v14, %v2584_v28  ;;  %vm2326_vm13 = vcmp.ge.f32.partialorder %v1809_v19, 0.0  ;;  %v2582_v34 = vmul.f32 0.2, %v1809_v19  ;;  %v1822_v41 = vpop.f32.mrb[45].mxu1 }
 0x151   :  { %4118 = vst.msk [vmem:[%s6870_s2 + $0x2a0] sm:$0xf] %vm3949_vm2, %v4770_v29  ;;  %v4773_v37 = vpack.c.bf16 %v2840_v33, %v2840_v33  ;;  %v2710_v38 = vsel %vm2198_vm12, %v1297_v18, %v2454_v31  ;;  %vm2203_vm14 = vcmp.ge.f32.partialorder %v5056_v35, 0.0  ;;  %v2459_v39 = vmul.f32 0.2, %v5056_v35  ;;  %v5057_v45 = vpop.f32.mrb[46].mxu0 }
 0x152   :  { %3993 = vst.msk [vmem:[%s6870_s2 + $0xac] sm:$0xf] %vm3949_vm2, %v4645_v32  ;;  %v4643_v42 = vpack.c.bf16 %v2710_v38, %v2710_v38  ;;  %v2838_v43 = vsel %vm2326_vm13, %v1809_v19, %v2582_v34  ;;  %vm2331_vm15 = vcmp.ge.f32.partialorder %v5184_v36, 0.0  ;;  %v2587_v44 = vmul.f32 0.2, %v5184_v36  ;;  %v5185_v46 = vpop.f32.mrb[46].mxu1 }
 0x153   :  { %4121 = vst.msk [vmem:[%s6870_s2 + $0x2ac] sm:$0xf] %vm3949_vm2, %v4773_v37  ;;  %v4771_v47 = vpack.c.bf16 %v2838_v43, %v2838_v43  ;;  %v2715_v48 = vsel %vm2203_vm14, %v5056_v35, %v2459_v39  ;;  %vm2201_vm0 = vcmp.ge.f32.partialorder %v1310_v40, 0.0  ;;  %v2457_v49 = vmul.f32 0.2, %v1310_v40  ;;  %v1313_v50 = vpop.f32.mrb[47].mxu0 }
 0x154   :  { %v1825_v51 = vpop.f32.mrb[47].mxu1  ;;  %3991 = vst.msk [vmem:[%s6870_s2 + $0xa4] sm:$0xf] %vm3949_vm2, %v4643_v42  ;;  %v4648_v52 = vpack.c.bf16 %v2715_v48, %v2715_v48  ;;  %v2843_v53 = vsel %vm2331_vm15, %v5184_v36, %v2587_v44  ;;  %vm2329_vm1 = vcmp.ge.f32.partialorder %v1822_v41, 0.0  ;;  %v2585_v54 = vmul.f32 0.2, %v1822_v41 }
 0x155   :  { %4119 = vst.msk [vmem:[%s6870_s2 + $0x2a4] sm:$0xf] %vm3949_vm2, %v4771_v47  ;;  %v4776_v55 = vpack.c.bf16 %v2843_v53, %v2843_v53  ;;  %v2713_v56 = vsel %vm2201_vm0, %v1310_v40, %v2457_v49  ;;  %vm2204_vm3 = vcmp.ge.f32.partialorder %v5057_v45, 0.0  ;;  %v2460_v57 = vmul.f32 0.2, %v5057_v45  ;;  %v5060_v3 = vpop.f32.mrb[48].mxu0 }
 0x156   :  { %3996 = vst.msk [vmem:[%s6870_s2 + $0xb8] sm:$0xf] %vm3949_vm2, %v4648_v52  ;;  %v4646_v58 = vpack.c.bf16 %v2713_v56, %v2713_v56  ;;  %v2841_v59 = vsel %vm2329_vm1, %v1822_v41, %v2585_v54  ;;  %vm2332_vm4 = vcmp.ge.f32.partialorder %v5185_v46, 0.0  ;;  %v2588_v60 = vmul.f32 0.2, %v5185_v46  ;;  %v5188_v4 = vpop.f32.mrb[48].mxu1 }
 0x157   :  { %4124 = vst.msk [vmem:[%s6870_s2 + $0x2b8] sm:$0xf] %vm3949_vm2, %v4776_v55  ;;  %v4774_v61 = vpack.c.bf16 %v2841_v59, %v2841_v59  ;;  %v2716_v62 = vsel %vm2204_vm3, %v5057_v45, %v2460_v57  ;;  %vm2202_vm5 = vcmp.ge.f32.partialorder %v1313_v50, 0.0  ;;  %v2458_v63 = vmul.f32 0.2, %v1313_v50  ;;  %v1326_v8 = vpop.f32.mrb[49].mxu0 }
 0x158   :  { %3994 = vst.msk [vmem:[%s6870_s2 + $0xb0] sm:$0xf] %vm3949_vm2, %v4646_v58  ;;  %v4649_v0 = vpack.c.bf16 %v2716_v62, %v2716_v62  ;;  %v2844_v1 = vsel %vm2332_vm4, %v5185_v46, %v2588_v60  ;;  %vm2330_vm6 = vcmp.ge.f32.partialorder %v1825_v51, 0.0  ;;  %v2586_v2 = vmul.f32 0.2, %v1825_v51  ;;  %v1838_v9 = vpop.f32.mrb[49].mxu1 }
 0x159   :  { %4122 = vst.msk [vmem:[%s6870_s2 + $0x2b0] sm:$0xf] %vm3949_vm2, %v4774_v61  ;;  %v4777_v5 = vpack.c.bf16 %v2844_v1, %v2844_v1  ;;  %v2714_v6 = vsel %vm2202_vm5, %v1313_v50, %v2458_v63  ;;  %vm2207_vm7 = vcmp.ge.f32.partialorder %v5060_v3, 0.0  ;;  %v2463_v7 = vmul.f32 0.2, %v5060_v3  ;;  %v5061_v13 = vpop.f32.mrb[50].mxu0 }
 0x15a   :  { %3997 = vst.msk [vmem:[%s6870_s2 + $0xbc] sm:$0xf] %vm3949_vm2, %v4649_v0  ;;  %v4647_v10 = vpack.c.bf16 %v2714_v6, %v2714_v6  ;;  %v2842_v11 = vsel %vm2330_vm6, %v1825_v51, %v2586_v2  ;;  %vm2335_vm8 = vcmp.ge.f32.partialorder %v5188_v4, 0.0  ;;  %v2591_v12 = vmul.f32 0.2, %v5188_v4  ;;  %v5189_v14 = vpop.f32.mrb[50].mxu1 }
 0x15b   :  { %4125 = vst.msk [vmem:[%s6870_s2 + $0x2bc] sm:$0xf] %vm3949_vm2, %v4777_v5  ;;  %v4775_v15 = vpack.c.bf16 %v2842_v11, %v2842_v11  ;;  %v2719_v16 = vsel %vm2207_vm7, %v5060_v3, %v2463_v7  ;;  %vm2205_vm9 = vcmp.ge.f32.partialorder %v1326_v8, 0.0  ;;  %v2461_v17 = vmul.f32 0.2, %v1326_v8  ;;  %v1329_v18 = vpop.f32.mrb[51].mxu0 }
 0x15c   :  { %v1841_v19 = vpop.f32.mrb[51].mxu1  ;;  %3995 = vst.msk [vmem:[%s6870_s2 + $0xb4] sm:$0xf] %vm3949_vm2, %v4647_v10  ;;  %v4652_v20 = vpack.c.bf16 %v2719_v16, %v2719_v16  ;;  %v2847_v21 = vsel %vm2335_vm8, %v5188_v4, %v2591_v12  ;;  %vm2333_vm10 = vcmp.ge.f32.partialorder %v1838_v9, 0.0  ;;  %v2589_v22 = vmul.f32 0.2, %v1838_v9 }
 0x15d   :  { %4123 = vst.msk [vmem:[%s6870_s2 + $0x2b4] sm:$0xf] %vm3949_vm2, %v4775_v15  ;;  %v4780_v23 = vpack.c.bf16 %v2847_v21, %v2847_v21  ;;  %v2717_v24 = vsel %vm2205_vm9, %v1326_v8, %v2461_v17  ;;  %vm2208_vm11 = vcmp.ge.f32.partialorder %v5061_v13, 0.0  ;;  %v2464_v25 = vmul.f32 0.2, %v5061_v13  ;;  %v5064_v35 = vpop.f32.mrb[52].mxu0 }
 0x15e   :  { %4000 = vst.msk [vmem:[%s6870_s2 + $0xc8] sm:$0xf] %vm3949_vm2, %v4652_v20  ;;  %v4650_v26 = vpack.c.bf16 %v2717_v24, %v2717_v24  ;;  %v2845_v27 = vsel %vm2333_vm10, %v1838_v9, %v2589_v22  ;;  %vm2336_vm12 = vcmp.ge.f32.partialorder %v5189_v14, 0.0  ;;  %v2592_v28 = vmul.f32 0.2, %v5189_v14  ;;  %v5192_v36 = vpop.f32.mrb[52].mxu1 }
 0x15f   :  { %4128 = vst.msk [vmem:[%s6870_s2 + $0x2c8] sm:$0xf] %vm3949_vm2, %v4780_v23  ;;  %v4778_v29 = vpack.c.bf16 %v2845_v27, %v2845_v27  ;;  %v2720_v30 = vsel %vm2208_vm11, %v5061_v13, %v2464_v25  ;;  %vm2206_vm13 = vcmp.ge.f32.partialorder %v1329_v18, 0.0  ;;  %v2462_v31 = vmul.f32 0.2, %v1329_v18  ;;  %v1342_v40 = vpop.f32.mrb[53].mxu0 }
 0x160   :  { %3998 = vst.msk [vmem:[%s6870_s2 + $0xc0] sm:$0xf] %vm3949_vm2, %v4650_v26  ;;  %v4653_v32 = vpack.c.bf16 %v2720_v30, %v2720_v30  ;;  %v2848_v33 = vsel %vm2336_vm12, %v5189_v14, %v2592_v28  ;;  %vm2334_vm14 = vcmp.ge.f32.partialorder %v1841_v19, 0.0  ;;  %v2590_v34 = vmul.f32 0.2, %v1841_v19  ;;  %v1854_v41 = vpop.f32.mrb[53].mxu1 }
 0x161   :  { %4126 = vst.msk [vmem:[%s6870_s2 + $0x2c0] sm:$0xf] %vm3949_vm2, %v4778_v29  ;;  %v4781_v37 = vpack.c.bf16 %v2848_v33, %v2848_v33  ;;  %v2718_v38 = vsel %vm2206_vm13, %v1329_v18, %v2462_v31  ;;  %vm2211_vm15 = vcmp.ge.f32.partialorder %v5064_v35, 0.0  ;;  %v2467_v39 = vmul.f32 0.2, %v5064_v35  ;;  %v5065_v45 = vpop.f32.mrb[54].mxu0 }
 0x162   :  { %4001 = vst.msk [vmem:[%s6870_s2 + $0xcc] sm:$0xf] %vm3949_vm2, %v4653_v32  ;;  %v4651_v42 = vpack.c.bf16 %v2718_v38, %v2718_v38  ;;  %v2846_v43 = vsel %vm2334_vm14, %v1841_v19, %v2590_v34  ;;  %vm2339_vm0 = vcmp.ge.f32.partialorder %v5192_v36, 0.0  ;;  %v2595_v44 = vmul.f32 0.2, %v5192_v36  ;;  %v5193_v46 = vpop.f32.mrb[54].mxu1 }
 0x163   :  { %4129 = vst.msk [vmem:[%s6870_s2 + $0x2cc] sm:$0xf] %vm3949_vm2, %v4781_v37  ;;  %v4779_v47 = vpack.c.bf16 %v2846_v43, %v2846_v43  ;;  %v2723_v48 = vsel %vm2211_vm15, %v5064_v35, %v2467_v39  ;;  %vm2209_vm1 = vcmp.ge.f32.partialorder %v1342_v40, 0.0  ;;  %v2465_v49 = vmul.f32 0.2, %v1342_v40  ;;  %v1345_v50 = vpop.f32.mrb[55].mxu0 }
 0x164   :  { %v1857_v51 = vpop.f32.mrb[55].mxu1  ;;  %3999 = vst.msk [vmem:[%s6870_s2 + $0xc4] sm:$0xf] %vm3949_vm2, %v4651_v42  ;;  %v4656_v52 = vpack.c.bf16 %v2723_v48, %v2723_v48  ;;  %v2851_v53 = vsel %vm2339_vm0, %v5192_v36, %v2595_v44  ;;  %vm2337_vm3 = vcmp.ge.f32.partialorder %v1854_v41, 0.0  ;;  %v2593_v54 = vmul.f32 0.2, %v1854_v41 }
 0x165   :  { %4127 = vst.msk [vmem:[%s6870_s2 + $0x2c4] sm:$0xf] %vm3949_vm2, %v4779_v47  ;;  %v4784_v55 = vpack.c.bf16 %v2851_v53, %v2851_v53  ;;  %v2721_v56 = vsel %vm2209_vm1, %v1342_v40, %v2465_v49  ;;  %vm2212_vm4 = vcmp.ge.f32.partialorder %v5065_v45, 0.0  ;;  %v2468_v57 = vmul.f32 0.2, %v5065_v45  ;;  %v5068_v3 = vpop.f32.mrb[56].mxu0 }
 0x166   :  { %4004 = vst.msk [vmem:[%s6870_s2 + $0xd8] sm:$0xf] %vm3949_vm2, %v4656_v52  ;;  %v4654_v58 = vpack.c.bf16 %v2721_v56, %v2721_v56  ;;  %v2849_v59 = vsel %vm2337_vm3, %v1854_v41, %v2593_v54  ;;  %vm2340_vm5 = vcmp.ge.f32.partialorder %v5193_v46, 0.0  ;;  %v2596_v60 = vmul.f32 0.2, %v5193_v46  ;;  %v5196_v4 = vpop.f32.mrb[56].mxu1 }
 0x167   :  { %4132 = vst.msk [vmem:[%s6870_s2 + $0x2d8] sm:$0xf] %vm3949_vm2, %v4784_v55  ;;  %v4782_v61 = vpack.c.bf16 %v2849_v59, %v2849_v59  ;;  %v2724_v62 = vsel %vm2212_vm4, %v5065_v45, %v2468_v57  ;;  %vm2210_vm6 = vcmp.ge.f32.partialorder %v1345_v50, 0.0  ;;  %v2466_v63 = vmul.f32 0.2, %v1345_v50  ;;  %v1358_v8 = vpop.f32.mrb[57].mxu0 }
 0x168   :  { %4002 = vst.msk [vmem:[%s6870_s2 + $0xd0] sm:$0xf] %vm3949_vm2, %v4654_v58  ;;  %v4657_v0 = vpack.c.bf16 %v2724_v62, %v2724_v62  ;;  %v2852_v1 = vsel %vm2340_vm5, %v5193_v46, %v2596_v60  ;;  %vm2338_vm7 = vcmp.ge.f32.partialorder %v1857_v51, 0.0  ;;  %v2594_v2 = vmul.f32 0.2, %v1857_v51  ;;  %v1870_v9 = vpop.f32.mrb[57].mxu1 }
 0x169   :  { %4130 = vst.msk [vmem:[%s6870_s2 + $0x2d0] sm:$0xf] %vm3949_vm2, %v4782_v61  ;;  %v4785_v5 = vpack.c.bf16 %v2852_v1, %v2852_v1  ;;  %v2722_v6 = vsel %vm2210_vm6, %v1345_v50, %v2466_v63  ;;  %vm2215_vm8 = vcmp.ge.f32.partialorder %v5068_v3, 0.0  ;;  %v2471_v7 = vmul.f32 0.2, %v5068_v3  ;;  %v5069_v13 = vpop.f32.mrb[58].mxu0 }
 0x16a   :  { %4005 = vst.msk [vmem:[%s6870_s2 + $0xdc] sm:$0xf] %vm3949_vm2, %v4657_v0  ;;  %v4655_v10 = vpack.c.bf16 %v2722_v6, %v2722_v6  ;;  %v2850_v11 = vsel %vm2338_vm7, %v1857_v51, %v2594_v2  ;;  %vm2343_vm9 = vcmp.ge.f32.partialorder %v5196_v4, 0.0  ;;  %v2599_v12 = vmul.f32 0.2, %v5196_v4  ;;  %v5197_v14 = vpop.f32.mrb[58].mxu1 }
 0x16b   :  { %4133 = vst.msk [vmem:[%s6870_s2 + $0x2dc] sm:$0xf] %vm3949_vm2, %v4785_v5  ;;  %v4783_v15 = vpack.c.bf16 %v2850_v11, %v2850_v11  ;;  %v2727_v16 = vsel %vm2215_vm8, %v5068_v3, %v2471_v7  ;;  %vm2213_vm10 = vcmp.ge.f32.partialorder %v1358_v8, 0.0  ;;  %v2469_v17 = vmul.f32 0.2, %v1358_v8  ;;  %v1361_v18 = vpop.f32.mrb[59].mxu0 }
 0x16c   :  { %v1873_v19 = vpop.f32.mrb[59].mxu1  ;;  %4003 = vst.msk [vmem:[%s6870_s2 + $0xd4] sm:$0xf] %vm3949_vm2, %v4655_v10  ;;  %v4660_v20 = vpack.c.bf16 %v2727_v16, %v2727_v16  ;;  %v2855_v21 = vsel %vm2343_vm9, %v5196_v4, %v2599_v12  ;;  %vm2341_vm11 = vcmp.ge.f32.partialorder %v1870_v9, 0.0  ;;  %v2597_v22 = vmul.f32 0.2, %v1870_v9 }
 0x16d   :  { %4131 = vst.msk [vmem:[%s6870_s2 + $0x2d4] sm:$0xf] %vm3949_vm2, %v4783_v15  ;;  %v4788_v23 = vpack.c.bf16 %v2855_v21, %v2855_v21  ;;  %v2725_v24 = vsel %vm2213_vm10, %v1358_v8, %v2469_v17  ;;  %vm2216_vm12 = vcmp.ge.f32.partialorder %v5069_v13, 0.0  ;;  %v2472_v25 = vmul.f32 0.2, %v5069_v13  ;;  %v5072_v35 = vpop.f32.mrb[60].mxu0 }
 0x16e   :  { %4008 = vst.msk [vmem:[%s6870_s2 + $0xe8] sm:$0xf] %vm3949_vm2, %v4660_v20  ;;  %v4658_v26 = vpack.c.bf16 %v2725_v24, %v2725_v24  ;;  %v2853_v27 = vsel %vm2341_vm11, %v1870_v9, %v2597_v22  ;;  %vm2344_vm13 = vcmp.ge.f32.partialorder %v5197_v14, 0.0  ;;  %v2600_v28 = vmul.f32 0.2, %v5197_v14  ;;  %v5200_v36 = vpop.f32.mrb[60].mxu1 }
 0x16f   :  { %4136 = vst.msk [vmem:[%s6870_s2 + $0x2e8] sm:$0xf] %vm3949_vm2, %v4788_v23  ;;  %v4786_v29 = vpack.c.bf16 %v2853_v27, %v2853_v27  ;;  %v2728_v30 = vsel %vm2216_vm12, %v5069_v13, %v2472_v25  ;;  %vm2214_vm14 = vcmp.ge.f32.partialorder %v1361_v18, 0.0  ;;  %v2470_v31 = vmul.f32 0.2, %v1361_v18  ;;  %v1374_v40 = vpop.f32.mrb[61].mxu0 }
 0x170   :  { %4006 = vst.msk [vmem:[%s6870_s2 + $0xe0] sm:$0xf] %vm3949_vm2, %v4658_v26  ;;  %v4661_v32 = vpack.c.bf16 %v2728_v30, %v2728_v30  ;;  %v2856_v33 = vsel %vm2344_vm13, %v5197_v14, %v2600_v28  ;;  %vm2342_vm15 = vcmp.ge.f32.partialorder %v1873_v19, 0.0  ;;  %v2598_v34 = vmul.f32 0.2, %v1873_v19  ;;  %v1886_v41 = vpop.f32.mrb[61].mxu1 }
 0x171   :  { %4134 = vst.msk [vmem:[%s6870_s2 + $0x2e0] sm:$0xf] %vm3949_vm2, %v4786_v29  ;;  %v4789_v37 = vpack.c.bf16 %v2856_v33, %v2856_v33  ;;  %v2726_v38 = vsel %vm2214_vm14, %v1361_v18, %v2470_v31  ;;  %vm2219_vm0 = vcmp.ge.f32.partialorder %v5072_v35, 0.0  ;;  %v2475_v39 = vmul.f32 0.2, %v5072_v35  ;;  %v5073_v45 = vpop.f32.mrb[62].mxu0 }
 0x172   :  { %4009 = vst.msk [vmem:[%s6870_s2 + $0xec] sm:$0xf] %vm3949_vm2, %v4661_v32  ;;  %v4659_v42 = vpack.c.bf16 %v2726_v38, %v2726_v38  ;;  %v2854_v43 = vsel %vm2342_vm15, %v1873_v19, %v2598_v34  ;;  %vm2347_vm1 = vcmp.ge.f32.partialorder %v5200_v36, 0.0  ;;  %v2603_v44 = vmul.f32 0.2, %v5200_v36  ;;  %v5201_v46 = vpop.f32.mrb[62].mxu1 }
 0x173   :  { %4137 = vst.msk [vmem:[%s6870_s2 + $0x2ec] sm:$0xf] %vm3949_vm2, %v4789_v37  ;;  %v4787_v47 = vpack.c.bf16 %v2854_v43, %v2854_v43  ;;  %v2731_v48 = vsel %vm2219_vm0, %v5072_v35, %v2475_v39  ;;  %vm2217_vm3 = vcmp.ge.f32.partialorder %v1374_v40, 0.0  ;;  %v2473_v49 = vmul.f32 0.2, %v1374_v40  ;;  %v1377_v50 = vpop.f32.mrb[63].mxu0 }
 0x174   :  { %v1889_v51 = vpop.f32.mrb[63].mxu1  ;;  %4007 = vst.msk [vmem:[%s6870_s2 + $0xe4] sm:$0xf] %vm3949_vm2, %v4659_v42  ;;  %v4664_v52 = vpack.c.bf16 %v2731_v48, %v2731_v48  ;;  %v2859_v53 = vsel %vm2347_vm1, %v5200_v36, %v2603_v44  ;;  %vm2345_vm4 = vcmp.ge.f32.partialorder %v1886_v41, 0.0  ;;  %v2601_v54 = vmul.f32 0.2, %v1886_v41 }
 0x175   :  { %4135 = vst.msk [vmem:[%s6870_s2 + $0x2e4] sm:$0xf] %vm3949_vm2, %v4787_v47  ;;  %v4792_v55 = vpack.c.bf16 %v2859_v53, %v2859_v53  ;;  %v2729_v56 = vsel %vm2217_vm3, %v1374_v40, %v2473_v49  ;;  %vm2220_vm5 = vcmp.ge.f32.partialorder %v5073_v45, 0.0  ;;  %v2476_v57 = vmul.f32 0.2, %v5073_v45  ;;  %v5076_v3 = vpop.f32.mrb[64].mxu0 }
 0x176   :  { %4012 = vst.msk [vmem:[%s6870_s2 + $0xf8] sm:$0xf] %vm3949_vm2, %v4664_v52  ;;  %v4662_v58 = vpack.c.bf16 %v2729_v56, %v2729_v56  ;;  %v2857_v59 = vsel %vm2345_vm4, %v1886_v41, %v2601_v54  ;;  %vm2348_vm6 = vcmp.ge.f32.partialorder %v5201_v46, 0.0  ;;  %v2604_v60 = vmul.f32 0.2, %v5201_v46  ;;  %v5204_v4 = vpop.f32.mrb[64].mxu1 }
 0x177   :  { %4140 = vst.msk [vmem:[%s6870_s2 + $0x2f8] sm:$0xf] %vm3949_vm2, %v4792_v55  ;;  %v4790_v61 = vpack.c.bf16 %v2857_v59, %v2857_v59  ;;  %v2732_v62 = vsel %vm2220_vm5, %v5073_v45, %v2476_v57  ;;  %vm2218_vm7 = vcmp.ge.f32.partialorder %v1377_v50, 0.0  ;;  %v2474_v63 = vmul.f32 0.2, %v1377_v50  ;;  %v1390_v8 = vpop.f32.mrb[65].mxu0 }
 0x178   :  { %4010 = vst.msk [vmem:[%s6870_s2 + $0xf0] sm:$0xf] %vm3949_vm2, %v4662_v58  ;;  %v4665_v0 = vpack.c.bf16 %v2732_v62, %v2732_v62  ;;  %v2860_v1 = vsel %vm2348_vm6, %v5201_v46, %v2604_v60  ;;  %vm2346_vm8 = vcmp.ge.f32.partialorder %v1889_v51, 0.0  ;;  %v2602_v2 = vmul.f32 0.2, %v1889_v51  ;;  %v1902_v9 = vpop.f32.mrb[65].mxu1 }
 0x179   :  { %4138 = vst.msk [vmem:[%s6870_s2 + $0x2f0] sm:$0xf] %vm3949_vm2, %v4790_v61  ;;  %v4793_v5 = vpack.c.bf16 %v2860_v1, %v2860_v1  ;;  %v2730_v6 = vsel %vm2218_vm7, %v1377_v50, %v2474_v63  ;;  %vm2223_vm9 = vcmp.ge.f32.partialorder %v5076_v3, 0.0  ;;  %v2479_v7 = vmul.f32 0.2, %v5076_v3  ;;  %v5077_v13 = vpop.f32.mrb[66].mxu0 }
 0x17a   :  { %4013 = vst.msk [vmem:[%s6870_s2 + $0xfc] sm:$0xf] %vm3949_vm2, %v4665_v0  ;;  %v4663_v10 = vpack.c.bf16 %v2730_v6, %v2730_v6  ;;  %v2858_v11 = vsel %vm2346_vm8, %v1889_v51, %v2602_v2  ;;  %vm2351_vm10 = vcmp.ge.f32.partialorder %v5204_v4, 0.0  ;;  %v2607_v12 = vmul.f32 0.2, %v5204_v4  ;;  %v5205_v14 = vpop.f32.mrb[66].mxu1 }
 0x17b   :  { %4141 = vst.msk [vmem:[%s6870_s2 + $0x2fc] sm:$0xf] %vm3949_vm2, %v4793_v5  ;;  %v4791_v15 = vpack.c.bf16 %v2858_v11, %v2858_v11  ;;  %v2735_v16 = vsel %vm2223_vm9, %v5076_v3, %v2479_v7  ;;  %vm2221_vm11 = vcmp.ge.f32.partialorder %v1390_v8, 0.0  ;;  %v2477_v17 = vmul.f32 0.2, %v1390_v8  ;;  %v1393_v18 = vpop.f32.mrb[67].mxu0 }
 0x17c   :  { %v1905_v19 = vpop.f32.mrb[67].mxu1  ;;  %4011 = vst.msk [vmem:[%s6870_s2 + $0xf4] sm:$0xf] %vm3949_vm2, %v4663_v10  ;;  %v4668_v20 = vpack.c.bf16 %v2735_v16, %v2735_v16  ;;  %v2863_v21 = vsel %vm2351_vm10, %v5204_v4, %v2607_v12  ;;  %vm2349_vm12 = vcmp.ge.f32.partialorder %v1902_v9, 0.0  ;;  %v2605_v22 = vmul.f32 0.2, %v1902_v9 }
 0x17d   :  { %4139 = vst.msk [vmem:[%s6870_s2 + $0x2f4] sm:$0xf] %vm3949_vm2, %v4791_v15  ;;  %v4796_v23 = vpack.c.bf16 %v2863_v21, %v2863_v21  ;;  %v2733_v24 = vsel %vm2221_vm11, %v1390_v8, %v2477_v17  ;;  %vm2224_vm13 = vcmp.ge.f32.partialorder %v5077_v13, 0.0  ;;  %v2480_v25 = vmul.f32 0.2, %v5077_v13  ;;  %v5080_v35 = vpop.f32.mrb[68].mxu0 }
 0x17e   :  { %4016 = vst.msk [vmem:[%s6870_s2 + $0x108] sm:$0xf] %vm3949_vm2, %v4668_v20  ;;  %v4666_v26 = vpack.c.bf16 %v2733_v24, %v2733_v24  ;;  %v2861_v27 = vsel %vm2349_vm12, %v1902_v9, %v2605_v22  ;;  %vm2352_vm14 = vcmp.ge.f32.partialorder %v5205_v14, 0.0  ;;  %v2608_v28 = vmul.f32 0.2, %v5205_v14  ;;  %v5208_v36 = vpop.f32.mrb[68].mxu1 }
 0x17f   :  { %4144 = vst.msk [vmem:[%s6870_s2 + $0x308] sm:$0xf] %vm3949_vm2, %v4796_v23  ;;  %v4794_v29 = vpack.c.bf16 %v2861_v27, %v2861_v27  ;;  %v2736_v30 = vsel %vm2224_vm13, %v5077_v13, %v2480_v25  ;;  %vm2222_vm15 = vcmp.ge.f32.partialorder %v1393_v18, 0.0  ;;  %v2478_v31 = vmul.f32 0.2, %v1393_v18  ;;  %v1406_v40 = vpop.f32.mrb[69].mxu0 }
 0x180   :  { %4014 = vst.msk [vmem:[%s6870_s2 + $0x100] sm:$0xf] %vm3949_vm2, %v4666_v26  ;;  %v4669_v32 = vpack.c.bf16 %v2736_v30, %v2736_v30  ;;  %v2864_v33 = vsel %vm2352_vm14, %v5205_v14, %v2608_v28  ;;  %vm2350_vm0 = vcmp.ge.f32.partialorder %v1905_v19, 0.0  ;;  %v2606_v34 = vmul.f32 0.2, %v1905_v19  ;;  %v1918_v41 = vpop.f32.mrb[69].mxu1 }
 0x181   :  { %4142 = vst.msk [vmem:[%s6870_s2 + $0x300] sm:$0xf] %vm3949_vm2, %v4794_v29  ;;  %v4797_v37 = vpack.c.bf16 %v2864_v33, %v2864_v33  ;;  %v2734_v38 = vsel %vm2222_vm15, %v1393_v18, %v2478_v31  ;;  %vm2227_vm1 = vcmp.ge.f32.partialorder %v5080_v35, 0.0  ;;  %v2483_v39 = vmul.f32 0.2, %v5080_v35  ;;  %v5081_v45 = vpop.f32.mrb[70].mxu0 }
 0x182   :  { %4017 = vst.msk [vmem:[%s6870_s2 + $0x10c] sm:$0xf] %vm3949_vm2, %v4669_v32  ;;  %v4667_v42 = vpack.c.bf16 %v2734_v38, %v2734_v38  ;;  %v2862_v43 = vsel %vm2350_vm0, %v1905_v19, %v2606_v34  ;;  %vm2355_vm3 = vcmp.ge.f32.partialorder %v5208_v36, 0.0  ;;  %v2611_v44 = vmul.f32 0.2, %v5208_v36  ;;  %v5209_v46 = vpop.f32.mrb[70].mxu1 }
 0x183   :  { %4145 = vst.msk [vmem:[%s6870_s2 + $0x30c] sm:$0xf] %vm3949_vm2, %v4797_v37  ;;  %v4795_v47 = vpack.c.bf16 %v2862_v43, %v2862_v43  ;;  %v2739_v48 = vsel %vm2227_vm1, %v5080_v35, %v2483_v39  ;;  %vm2225_vm4 = vcmp.ge.f32.partialorder %v1406_v40, 0.0  ;;  %v2481_v49 = vmul.f32 0.2, %v1406_v40  ;;  %v1409_v50 = vpop.f32.mrb[71].mxu0 }
 0x184   :  { %v1921_v51 = vpop.f32.mrb[71].mxu1  ;;  %4015 = vst.msk [vmem:[%s6870_s2 + $0x104] sm:$0xf] %vm3949_vm2, %v4667_v42  ;;  %v4672_v52 = vpack.c.bf16 %v2739_v48, %v2739_v48  ;;  %v2867_v53 = vsel %vm2355_vm3, %v5208_v36, %v2611_v44  ;;  %vm2353_vm5 = vcmp.ge.f32.partialorder %v1918_v41, 0.0  ;;  %v2609_v54 = vmul.f32 0.2, %v1918_v41 }
 0x185   :  { %4143 = vst.msk [vmem:[%s6870_s2 + $0x304] sm:$0xf] %vm3949_vm2, %v4795_v47  ;;  %v4800_v55 = vpack.c.bf16 %v2867_v53, %v2867_v53  ;;  %v2737_v56 = vsel %vm2225_vm4, %v1406_v40, %v2481_v49  ;;  %vm2228_vm6 = vcmp.ge.f32.partialorder %v5081_v45, 0.0  ;;  %v2484_v57 = vmul.f32 0.2, %v5081_v45  ;;  %v5084_v3 = vpop.f32.mrb[72].mxu0 }
 0x186   :  { %4020 = vst.msk [vmem:[%s6870_s2 + $0x118] sm:$0xf] %vm3949_vm2, %v4672_v52  ;;  %v4670_v58 = vpack.c.bf16 %v2737_v56, %v2737_v56  ;;  %v2865_v59 = vsel %vm2353_vm5, %v1918_v41, %v2609_v54  ;;  %vm2356_vm7 = vcmp.ge.f32.partialorder %v5209_v46, 0.0  ;;  %v2612_v60 = vmul.f32 0.2, %v5209_v46  ;;  %v5212_v4 = vpop.f32.mrb[72].mxu1 }
 0x187   :  { %4148 = vst.msk [vmem:[%s6870_s2 + $0x318] sm:$0xf] %vm3949_vm2, %v4800_v55  ;;  %v4798_v61 = vpack.c.bf16 %v2865_v59, %v2865_v59  ;;  %v2740_v62 = vsel %vm2228_vm6, %v5081_v45, %v2484_v57  ;;  %vm2226_vm8 = vcmp.ge.f32.partialorder %v1409_v50, 0.0  ;;  %v2482_v63 = vmul.f32 0.2, %v1409_v50  ;;  %v1422_v8 = vpop.f32.mrb[73].mxu0 }
 0x188   :  { %4018 = vst.msk [vmem:[%s6870_s2 + $0x110] sm:$0xf] %vm3949_vm2, %v4670_v58  ;;  %v4673_v0 = vpack.c.bf16 %v2740_v62, %v2740_v62  ;;  %v2868_v1 = vsel %vm2356_vm7, %v5209_v46, %v2612_v60  ;;  %vm2354_vm9 = vcmp.ge.f32.partialorder %v1921_v51, 0.0  ;;  %v2610_v2 = vmul.f32 0.2, %v1921_v51  ;;  %v1934_v9 = vpop.f32.mrb[73].mxu1 }
 0x189   :  { %4146 = vst.msk [vmem:[%s6870_s2 + $0x310] sm:$0xf] %vm3949_vm2, %v4798_v61  ;;  %v4801_v5 = vpack.c.bf16 %v2868_v1, %v2868_v1  ;;  %v2738_v6 = vsel %vm2226_vm8, %v1409_v50, %v2482_v63  ;;  %vm2231_vm10 = vcmp.ge.f32.partialorder %v5084_v3, 0.0  ;;  %v2487_v7 = vmul.f32 0.2, %v5084_v3  ;;  %v5085_v13 = vpop.f32.mrb[74].mxu0 }
 0x18a   :  { %4021 = vst.msk [vmem:[%s6870_s2 + $0x11c] sm:$0xf] %vm3949_vm2, %v4673_v0  ;;  %v4671_v10 = vpack.c.bf16 %v2738_v6, %v2738_v6  ;;  %v2866_v11 = vsel %vm2354_vm9, %v1921_v51, %v2610_v2  ;;  %vm2359_vm11 = vcmp.ge.f32.partialorder %v5212_v4, 0.0  ;;  %v2615_v12 = vmul.f32 0.2, %v5212_v4  ;;  %v5213_v14 = vpop.f32.mrb[74].mxu1 }
 0x18b   :  { %4149 = vst.msk [vmem:[%s6870_s2 + $0x31c] sm:$0xf] %vm3949_vm2, %v4801_v5  ;;  %v4799_v15 = vpack.c.bf16 %v2866_v11, %v2866_v11  ;;  %v2743_v16 = vsel %vm2231_vm10, %v5084_v3, %v2487_v7  ;;  %vm2229_vm12 = vcmp.ge.f32.partialorder %v1422_v8, 0.0  ;;  %v2485_v17 = vmul.f32 0.2, %v1422_v8  ;;  %v1425_v18 = vpop.f32.mrb[75].mxu0 }
 0x18c   :  { %v1937_v19 = vpop.f32.mrb[75].mxu1  ;;  %4019 = vst.msk [vmem:[%s6870_s2 + $0x114] sm:$0xf] %vm3949_vm2, %v4671_v10  ;;  %v4676_v20 = vpack.c.bf16 %v2743_v16, %v2743_v16  ;;  %v2871_v21 = vsel %vm2359_vm11, %v5212_v4, %v2615_v12  ;;  %vm2357_vm13 = vcmp.ge.f32.partialorder %v1934_v9, 0.0  ;;  %v2613_v22 = vmul.f32 0.2, %v1934_v9 }
 0x18d   :  { %4147 = vst.msk [vmem:[%s6870_s2 + $0x314] sm:$0xf] %vm3949_vm2, %v4799_v15  ;;  %v4804_v23 = vpack.c.bf16 %v2871_v21, %v2871_v21  ;;  %v2741_v24 = vsel %vm2229_vm12, %v1422_v8, %v2485_v17  ;;  %vm2232_vm14 = vcmp.ge.f32.partialorder %v5085_v13, 0.0  ;;  %v2488_v25 = vmul.f32 0.2, %v5085_v13  ;;  %v5088_v35 = vpop.f32.mrb[76].mxu0 }
 0x18e   :  { %4024 = vst.msk [vmem:[%s6870_s2 + $0x128] sm:$0xf] %vm3949_vm2, %v4676_v20  ;;  %v4674_v26 = vpack.c.bf16 %v2741_v24, %v2741_v24  ;;  %v2869_v27 = vsel %vm2357_vm13, %v1934_v9, %v2613_v22  ;;  %vm2360_vm15 = vcmp.ge.f32.partialorder %v5213_v14, 0.0  ;;  %v2616_v28 = vmul.f32 0.2, %v5213_v14  ;;  %v5216_v36 = vpop.f32.mrb[76].mxu1 }
 0x18f   :  { %4152 = vst.msk [vmem:[%s6870_s2 + $0x328] sm:$0xf] %vm3949_vm2, %v4804_v23  ;;  %v4802_v29 = vpack.c.bf16 %v2869_v27, %v2869_v27  ;;  %v2744_v30 = vsel %vm2232_vm14, %v5085_v13, %v2488_v25  ;;  %vm2230_vm0 = vcmp.ge.f32.partialorder %v1425_v18, 0.0  ;;  %v2486_v31 = vmul.f32 0.2, %v1425_v18  ;;  %v1438_v40 = vpop.f32.mrb[77].mxu0 }
 0x190   :  { %4022 = vst.msk [vmem:[%s6870_s2 + $0x120] sm:$0xf] %vm3949_vm2, %v4674_v26  ;;  %v4677_v32 = vpack.c.bf16 %v2744_v30, %v2744_v30  ;;  %v2872_v33 = vsel %vm2360_vm15, %v5213_v14, %v2616_v28  ;;  %vm2358_vm1 = vcmp.ge.f32.partialorder %v1937_v19, 0.0  ;;  %v2614_v34 = vmul.f32 0.2, %v1937_v19  ;;  %v1950_v41 = vpop.f32.mrb[77].mxu1 }
 0x191   :  { %4150 = vst.msk [vmem:[%s6870_s2 + $0x320] sm:$0xf] %vm3949_vm2, %v4802_v29  ;;  %v4805_v37 = vpack.c.bf16 %v2872_v33, %v2872_v33  ;;  %v2742_v38 = vsel %vm2230_vm0, %v1425_v18, %v2486_v31  ;;  %vm2235_vm3 = vcmp.ge.f32.partialorder %v5088_v35, 0.0  ;;  %v2491_v39 = vmul.f32 0.2, %v5088_v35  ;;  %v5089_v45 = vpop.f32.mrb[78].mxu0 }
 0x192   :  { %4025 = vst.msk [vmem:[%s6870_s2 + $0x12c] sm:$0xf] %vm3949_vm2, %v4677_v32  ;;  %v4675_v42 = vpack.c.bf16 %v2742_v38, %v2742_v38  ;;  %v2870_v43 = vsel %vm2358_vm1, %v1937_v19, %v2614_v34  ;;  %vm2363_vm4 = vcmp.ge.f32.partialorder %v5216_v36, 0.0  ;;  %v2619_v44 = vmul.f32 0.2, %v5216_v36  ;;  %v5217_v46 = vpop.f32.mrb[78].mxu1 }
 0x193   :  { %4153 = vst.msk [vmem:[%s6870_s2 + $0x32c] sm:$0xf] %vm3949_vm2, %v4805_v37  ;;  %v4803_v47 = vpack.c.bf16 %v2870_v43, %v2870_v43  ;;  %v2747_v48 = vsel %vm2235_vm3, %v5088_v35, %v2491_v39  ;;  %vm2233_vm5 = vcmp.ge.f32.partialorder %v1438_v40, 0.0  ;;  %v2489_v49 = vmul.f32 0.2, %v1438_v40  ;;  %v1441_v50 = vpop.f32.mrb[79].mxu0 }
 0x194   :  { %v1953_v51 = vpop.f32.mrb[79].mxu1  ;;  %4023 = vst.msk [vmem:[%s6870_s2 + $0x124] sm:$0xf] %vm3949_vm2, %v4675_v42  ;;  %v4680_v52 = vpack.c.bf16 %v2747_v48, %v2747_v48  ;;  %v2875_v53 = vsel %vm2363_vm4, %v5216_v36, %v2619_v44  ;;  %vm2361_vm6 = vcmp.ge.f32.partialorder %v1950_v41, 0.0  ;;  %v2617_v54 = vmul.f32 0.2, %v1950_v41 }
 0x195   :  { %4151 = vst.msk [vmem:[%s6870_s2 + $0x324] sm:$0xf] %vm3949_vm2, %v4803_v47  ;;  %v4808_v55 = vpack.c.bf16 %v2875_v53, %v2875_v53  ;;  %v2745_v56 = vsel %vm2233_vm5, %v1438_v40, %v2489_v49  ;;  %vm2236_vm7 = vcmp.ge.f32.partialorder %v5089_v45, 0.0  ;;  %v2492_v57 = vmul.f32 0.2, %v5089_v45  ;;  %v5092_v3 = vpop.f32.mrb[80].mxu0 }
 0x196   :  { %4028 = vst.msk [vmem:[%s6870_s2 + $0x138] sm:$0xf] %vm3949_vm2, %v4680_v52  ;;  %v4678_v58 = vpack.c.bf16 %v2745_v56, %v2745_v56  ;;  %v2873_v59 = vsel %vm2361_vm6, %v1950_v41, %v2617_v54  ;;  %vm2364_vm8 = vcmp.ge.f32.partialorder %v5217_v46, 0.0  ;;  %v2620_v60 = vmul.f32 0.2, %v5217_v46  ;;  %v5220_v4 = vpop.f32.mrb[80].mxu1 }
 0x197   :  { %4156 = vst.msk [vmem:[%s6870_s2 + $0x338] sm:$0xf] %vm3949_vm2, %v4808_v55  ;;  %v4806_v61 = vpack.c.bf16 %v2873_v59, %v2873_v59  ;;  %v2748_v62 = vsel %vm2236_vm7, %v5089_v45, %v2492_v57  ;;  %vm2234_vm9 = vcmp.ge.f32.partialorder %v1441_v50, 0.0  ;;  %v2490_v63 = vmul.f32 0.2, %v1441_v50  ;;  %v1454_v8 = vpop.f32.mrb[81].mxu0 }
 0x198   :  { %4026 = vst.msk [vmem:[%s6870_s2 + $0x130] sm:$0xf] %vm3949_vm2, %v4678_v58  ;;  %v4681_v0 = vpack.c.bf16 %v2748_v62, %v2748_v62  ;;  %v2876_v1 = vsel %vm2364_vm8, %v5217_v46, %v2620_v60  ;;  %vm2362_vm10 = vcmp.ge.f32.partialorder %v1953_v51, 0.0  ;;  %v2618_v2 = vmul.f32 0.2, %v1953_v51  ;;  %v1966_v9 = vpop.f32.mrb[81].mxu1 }
 0x199   :  { %4154 = vst.msk [vmem:[%s6870_s2 + $0x330] sm:$0xf] %vm3949_vm2, %v4806_v61  ;;  %v4809_v5 = vpack.c.bf16 %v2876_v1, %v2876_v1  ;;  %v2746_v6 = vsel %vm2234_vm9, %v1441_v50, %v2490_v63  ;;  %vm2239_vm11 = vcmp.ge.f32.partialorder %v5092_v3, 0.0  ;;  %v2495_v7 = vmul.f32 0.2, %v5092_v3  ;;  %v5093_v13 = vpop.f32.mrb[82].mxu0 }
 0x19a   :  { %4029 = vst.msk [vmem:[%s6870_s2 + $0x13c] sm:$0xf] %vm3949_vm2, %v4681_v0  ;;  %v4679_v10 = vpack.c.bf16 %v2746_v6, %v2746_v6  ;;  %v2874_v11 = vsel %vm2362_vm10, %v1953_v51, %v2618_v2  ;;  %vm2367_vm12 = vcmp.ge.f32.partialorder %v5220_v4, 0.0  ;;  %v2623_v12 = vmul.f32 0.2, %v5220_v4  ;;  %v5221_v14 = vpop.f32.mrb[82].mxu1 }
 0x19b   :  { %4157 = vst.msk [vmem:[%s6870_s2 + $0x33c] sm:$0xf] %vm3949_vm2, %v4809_v5  ;;  %v4807_v15 = vpack.c.bf16 %v2874_v11, %v2874_v11  ;;  %v2751_v16 = vsel %vm2239_vm11, %v5092_v3, %v2495_v7  ;;  %vm2237_vm13 = vcmp.ge.f32.partialorder %v1454_v8, 0.0  ;;  %v2493_v17 = vmul.f32 0.2, %v1454_v8  ;;  %v1457_v18 = vpop.f32.mrb[83].mxu0 }
 0x19c   :  { %v1969_v19 = vpop.f32.mrb[83].mxu1  ;;  %4027 = vst.msk [vmem:[%s6870_s2 + $0x134] sm:$0xf] %vm3949_vm2, %v4679_v10  ;;  %v4684_v20 = vpack.c.bf16 %v2751_v16, %v2751_v16  ;;  %v2879_v21 = vsel %vm2367_vm12, %v5220_v4, %v2623_v12  ;;  %vm2365_vm14 = vcmp.ge.f32.partialorder %v1966_v9, 0.0  ;;  %v2621_v22 = vmul.f32 0.2, %v1966_v9 }
 0x19d   :  { %4155 = vst.msk [vmem:[%s6870_s2 + $0x334] sm:$0xf] %vm3949_vm2, %v4807_v15  ;;  %v4812_v23 = vpack.c.bf16 %v2879_v21, %v2879_v21  ;;  %v2749_v24 = vsel %vm2237_vm13, %v1454_v8, %v2493_v17  ;;  %vm2240_vm15 = vcmp.ge.f32.partialorder %v5093_v13, 0.0  ;;  %v2496_v25 = vmul.f32 0.2, %v5093_v13  ;;  %v5096_v35 = vpop.f32.mrb[84].mxu0 }
 0x19e   :  { %4032 = vst.msk [vmem:[%s6870_s2 + $0x148] sm:$0xf] %vm3949_vm2, %v4684_v20  ;;  %v4682_v26 = vpack.c.bf16 %v2749_v24, %v2749_v24  ;;  %v2877_v27 = vsel %vm2365_vm14, %v1966_v9, %v2621_v22  ;;  %vm2368_vm0 = vcmp.ge.f32.partialorder %v5221_v14, 0.0  ;;  %v2624_v28 = vmul.f32 0.2, %v5221_v14  ;;  %v5224_v36 = vpop.f32.mrb[84].mxu1 }
 0x19f   :  { %4160 = vst.msk [vmem:[%s6870_s2 + $0x348] sm:$0xf] %vm3949_vm2, %v4812_v23  ;;  %v4810_v29 = vpack.c.bf16 %v2877_v27, %v2877_v27  ;;  %v2752_v30 = vsel %vm2240_vm15, %v5093_v13, %v2496_v25  ;;  %vm2238_vm1 = vcmp.ge.f32.partialorder %v1457_v18, 0.0  ;;  %v2494_v31 = vmul.f32 0.2, %v1457_v18  ;;  %v1470_v40 = vpop.f32.mrb[85].mxu0 }
 0x1a0   :  { %4030 = vst.msk [vmem:[%s6870_s2 + $0x140] sm:$0xf] %vm3949_vm2, %v4682_v26  ;;  %v4685_v32 = vpack.c.bf16 %v2752_v30, %v2752_v30  ;;  %v2880_v33 = vsel %vm2368_vm0, %v5221_v14, %v2624_v28  ;;  %vm2366_vm3 = vcmp.ge.f32.partialorder %v1969_v19, 0.0  ;;  %v2622_v34 = vmul.f32 0.2, %v1969_v19  ;;  %v1982_v41 = vpop.f32.mrb[85].mxu1 }
 0x1a1   :  { %4158 = vst.msk [vmem:[%s6870_s2 + $0x340] sm:$0xf] %vm3949_vm2, %v4810_v29  ;;  %v4813_v37 = vpack.c.bf16 %v2880_v33, %v2880_v33  ;;  %v2750_v38 = vsel %vm2238_vm1, %v1457_v18, %v2494_v31  ;;  %vm2243_vm4 = vcmp.ge.f32.partialorder %v5096_v35, 0.0  ;;  %v2499_v39 = vmul.f32 0.2, %v5096_v35  ;;  %v5097_v45 = vpop.f32.mrb[86].mxu0 }
 0x1a2   :  { %4033 = vst.msk [vmem:[%s6870_s2 + $0x14c] sm:$0xf] %vm3949_vm2, %v4685_v32  ;;  %v4683_v42 = vpack.c.bf16 %v2750_v38, %v2750_v38  ;;  %v2878_v43 = vsel %vm2366_vm3, %v1969_v19, %v2622_v34  ;;  %vm2371_vm5 = vcmp.ge.f32.partialorder %v5224_v36, 0.0  ;;  %v2627_v44 = vmul.f32 0.2, %v5224_v36  ;;  %v5225_v46 = vpop.f32.mrb[86].mxu1 }
 0x1a3   :  { %4161 = vst.msk [vmem:[%s6870_s2 + $0x34c] sm:$0xf] %vm3949_vm2, %v4813_v37  ;;  %v4811_v47 = vpack.c.bf16 %v2878_v43, %v2878_v43  ;;  %v2755_v48 = vsel %vm2243_vm4, %v5096_v35, %v2499_v39  ;;  %vm2241_vm6 = vcmp.ge.f32.partialorder %v1470_v40, 0.0  ;;  %v2497_v49 = vmul.f32 0.2, %v1470_v40  ;;  %v1473_v50 = vpop.f32.mrb[87].mxu0 }
 0x1a4   :  { %v1985_v51 = vpop.f32.mrb[87].mxu1  ;;  %4031 = vst.msk [vmem:[%s6870_s2 + $0x144] sm:$0xf] %vm3949_vm2, %v4683_v42  ;;  %v4688_v52 = vpack.c.bf16 %v2755_v48, %v2755_v48  ;;  %v2883_v53 = vsel %vm2371_vm5, %v5224_v36, %v2627_v44  ;;  %vm2369_vm7 = vcmp.ge.f32.partialorder %v1982_v41, 0.0  ;;  %v2625_v54 = vmul.f32 0.2, %v1982_v41 }
 0x1a5   :  { %4159 = vst.msk [vmem:[%s6870_s2 + $0x344] sm:$0xf] %vm3949_vm2, %v4811_v47  ;;  %v4816_v55 = vpack.c.bf16 %v2883_v53, %v2883_v53  ;;  %v2753_v56 = vsel %vm2241_vm6, %v1470_v40, %v2497_v49  ;;  %vm2244_vm8 = vcmp.ge.f32.partialorder %v5097_v45, 0.0  ;;  %v2500_v57 = vmul.f32 0.2, %v5097_v45  ;;  %v5100_v3 = vpop.f32.mrb[88].mxu0 }
 0x1a6   :  { %4036 = vst.msk [vmem:[%s6870_s2 + $0x158] sm:$0xf] %vm3949_vm2, %v4688_v52  ;;  %v4686_v58 = vpack.c.bf16 %v2753_v56, %v2753_v56  ;;  %v2881_v59 = vsel %vm2369_vm7, %v1982_v41, %v2625_v54  ;;  %vm2372_vm9 = vcmp.ge.f32.partialorder %v5225_v46, 0.0  ;;  %v2628_v60 = vmul.f32 0.2, %v5225_v46  ;;  %v5228_v4 = vpop.f32.mrb[88].mxu1 }
 0x1a7   :  { %4164 = vst.msk [vmem:[%s6870_s2 + $0x358] sm:$0xf] %vm3949_vm2, %v4816_v55  ;;  %v4814_v61 = vpack.c.bf16 %v2881_v59, %v2881_v59  ;;  %v2756_v62 = vsel %vm2244_vm8, %v5097_v45, %v2500_v57  ;;  %vm2242_vm10 = vcmp.ge.f32.partialorder %v1473_v50, 0.0  ;;  %v2498_v63 = vmul.f32 0.2, %v1473_v50  ;;  %v1486_v8 = vpop.f32.mrb[89].mxu0 }
 0x1a8   :  { %4034 = vst.msk [vmem:[%s6870_s2 + $0x150] sm:$0xf] %vm3949_vm2, %v4686_v58  ;;  %v4689_v0 = vpack.c.bf16 %v2756_v62, %v2756_v62  ;;  %v2884_v1 = vsel %vm2372_vm9, %v5225_v46, %v2628_v60  ;;  %vm2370_vm11 = vcmp.ge.f32.partialorder %v1985_v51, 0.0  ;;  %v2626_v2 = vmul.f32 0.2, %v1985_v51  ;;  %v1998_v9 = vpop.f32.mrb[89].mxu1 }
 0x1a9   :  { %4162 = vst.msk [vmem:[%s6870_s2 + $0x350] sm:$0xf] %vm3949_vm2, %v4814_v61  ;;  %v4817_v5 = vpack.c.bf16 %v2884_v1, %v2884_v1  ;;  %v2754_v6 = vsel %vm2242_vm10, %v1473_v50, %v2498_v63  ;;  %vm2247_vm12 = vcmp.ge.f32.partialorder %v5100_v3, 0.0  ;;  %v2503_v7 = vmul.f32 0.2, %v5100_v3  ;;  %v5101_v13 = vpop.f32.mrb[90].mxu0 }
 0x1aa   :  { %4037 = vst.msk [vmem:[%s6870_s2 + $0x15c] sm:$0xf] %vm3949_vm2, %v4689_v0  ;;  %v4687_v10 = vpack.c.bf16 %v2754_v6, %v2754_v6  ;;  %v2882_v11 = vsel %vm2370_vm11, %v1985_v51, %v2626_v2  ;;  %vm2375_vm13 = vcmp.ge.f32.partialorder %v5228_v4, 0.0  ;;  %v2631_v12 = vmul.f32 0.2, %v5228_v4  ;;  %v5229_v14 = vpop.f32.mrb[90].mxu1 }
 0x1ab   :  { %4165 = vst.msk [vmem:[%s6870_s2 + $0x35c] sm:$0xf] %vm3949_vm2, %v4817_v5  ;;  %v4815_v15 = vpack.c.bf16 %v2882_v11, %v2882_v11  ;;  %v2759_v16 = vsel %vm2247_vm12, %v5100_v3, %v2503_v7  ;;  %vm2245_vm14 = vcmp.ge.f32.partialorder %v1486_v8, 0.0  ;;  %v2501_v17 = vmul.f32 0.2, %v1486_v8  ;;  %v1489_v18 = vpop.f32.mrb[91].mxu0 }
 0x1ac   :  { %v2001_v19 = vpop.f32.mrb[91].mxu1  ;;  %4035 = vst.msk [vmem:[%s6870_s2 + $0x154] sm:$0xf] %vm3949_vm2, %v4687_v10  ;;  %v4692_v20 = vpack.c.bf16 %v2759_v16, %v2759_v16  ;;  %v2887_v21 = vsel %vm2375_vm13, %v5228_v4, %v2631_v12  ;;  %vm2373_vm15 = vcmp.ge.f32.partialorder %v1998_v9, 0.0  ;;  %v2629_v22 = vmul.f32 0.2, %v1998_v9 }
 0x1ad   :  { %4163 = vst.msk [vmem:[%s6870_s2 + $0x354] sm:$0xf] %vm3949_vm2, %v4815_v15  ;;  %v4820_v23 = vpack.c.bf16 %v2887_v21, %v2887_v21  ;;  %v2757_v24 = vsel %vm2245_vm14, %v1486_v8, %v2501_v17  ;;  %vm2248_vm0 = vcmp.ge.f32.partialorder %v5101_v13, 0.0  ;;  %v2504_v25 = vmul.f32 0.2, %v5101_v13  ;;  %v5104_v35 = vpop.f32.mrb[92].mxu0 }
 0x1ae   :  { %4040 = vst.msk [vmem:[%s6870_s2 + $0x168] sm:$0xf] %vm3949_vm2, %v4692_v20  ;;  %v4690_v26 = vpack.c.bf16 %v2757_v24, %v2757_v24  ;;  %v2885_v27 = vsel %vm2373_vm15, %v1998_v9, %v2629_v22  ;;  %vm2376_vm1 = vcmp.ge.f32.partialorder %v5229_v14, 0.0  ;;  %v2632_v28 = vmul.f32 0.2, %v5229_v14  ;;  %v5232_v36 = vpop.f32.mrb[92].mxu1 }
 0x1af   :  { %4168 = vst.msk [vmem:[%s6870_s2 + $0x368] sm:$0xf] %vm3949_vm2, %v4820_v23  ;;  %v4818_v29 = vpack.c.bf16 %v2885_v27, %v2885_v27  ;;  %v2760_v30 = vsel %vm2248_vm0, %v5101_v13, %v2504_v25  ;;  %vm2246_vm3 = vcmp.ge.f32.partialorder %v1489_v18, 0.0  ;;  %v2502_v31 = vmul.f32 0.2, %v1489_v18  ;;  %v1502_v40 = vpop.f32.mrb[93].mxu0 }
 0x1b0   :  { %4038 = vst.msk [vmem:[%s6870_s2 + $0x160] sm:$0xf] %vm3949_vm2, %v4690_v26  ;;  %v4693_v32 = vpack.c.bf16 %v2760_v30, %v2760_v30  ;;  %v2888_v33 = vsel %vm2376_vm1, %v5229_v14, %v2632_v28  ;;  %vm2374_vm4 = vcmp.ge.f32.partialorder %v2001_v19, 0.0  ;;  %v2630_v34 = vmul.f32 0.2, %v2001_v19  ;;  %v2014_v41 = vpop.f32.mrb[93].mxu1 }
 0x1b1   :  { %4166 = vst.msk [vmem:[%s6870_s2 + $0x360] sm:$0xf] %vm3949_vm2, %v4818_v29  ;;  %v4821_v37 = vpack.c.bf16 %v2888_v33, %v2888_v33  ;;  %v2758_v38 = vsel %vm2246_vm3, %v1489_v18, %v2502_v31  ;;  %vm2251_vm5 = vcmp.ge.f32.partialorder %v5104_v35, 0.0  ;;  %v2507_v39 = vmul.f32 0.2, %v5104_v35  ;;  %v5105_v45 = vpop.f32.mrb[94].mxu0 }
 0x1b2   :  { %4041 = vst.msk [vmem:[%s6870_s2 + $0x16c] sm:$0xf] %vm3949_vm2, %v4693_v32  ;;  %v4691_v42 = vpack.c.bf16 %v2758_v38, %v2758_v38  ;;  %v2886_v43 = vsel %vm2374_vm4, %v2001_v19, %v2630_v34  ;;  %vm2379_vm6 = vcmp.ge.f32.partialorder %v5232_v36, 0.0  ;;  %v2635_v44 = vmul.f32 0.2, %v5232_v36  ;;  %v5233_v46 = vpop.f32.mrb[94].mxu1 }
 0x1b3   :  { %4169 = vst.msk [vmem:[%s6870_s2 + $0x36c] sm:$0xf] %vm3949_vm2, %v4821_v37  ;;  %v4819_v47 = vpack.c.bf16 %v2886_v43, %v2886_v43  ;;  %v2763_v48 = vsel %vm2251_vm5, %v5104_v35, %v2507_v39  ;;  %vm2249_vm7 = vcmp.ge.f32.partialorder %v1502_v40, 0.0  ;;  %v2505_v49 = vmul.f32 0.2, %v1502_v40  ;;  %v1505_v50 = vpop.f32.mrb[95].mxu0 }
 0x1b4   :  { %v2017_v51 = vpop.f32.mrb[95].mxu1  ;;  %4039 = vst.msk [vmem:[%s6870_s2 + $0x164] sm:$0xf] %vm3949_vm2, %v4691_v42  ;;  %v4696_v52 = vpack.c.bf16 %v2763_v48, %v2763_v48  ;;  %v2891_v53 = vsel %vm2379_vm6, %v5232_v36, %v2635_v44  ;;  %vm2377_vm8 = vcmp.ge.f32.partialorder %v2014_v41, 0.0  ;;  %v2633_v54 = vmul.f32 0.2, %v2014_v41 }
 0x1b5   :  { %4167 = vst.msk [vmem:[%s6870_s2 + $0x364] sm:$0xf] %vm3949_vm2, %v4819_v47  ;;  %v4824_v55 = vpack.c.bf16 %v2891_v53, %v2891_v53  ;;  %v2761_v56 = vsel %vm2249_vm7, %v1502_v40, %v2505_v49  ;;  %vm2252_vm9 = vcmp.ge.f32.partialorder %v5105_v45, 0.0  ;;  %v2508_v57 = vmul.f32 0.2, %v5105_v45  ;;  %v5108_v3 = vpop.f32.mrb[96].mxu0 }
 0x1b6   :  { %4044 = vst.msk [vmem:[%s6870_s2 + $0x178] sm:$0xf] %vm3949_vm2, %v4696_v52  ;;  %v4694_v58 = vpack.c.bf16 %v2761_v56, %v2761_v56  ;;  %v2889_v59 = vsel %vm2377_vm8, %v2014_v41, %v2633_v54  ;;  %vm2380_vm10 = vcmp.ge.f32.partialorder %v5233_v46, 0.0  ;;  %v2636_v60 = vmul.f32 0.2, %v5233_v46  ;;  %v5236_v4 = vpop.f32.mrb[96].mxu1 }
 0x1b7   :  { %4172 = vst.msk [vmem:[%s6870_s2 + $0x378] sm:$0xf] %vm3949_vm2, %v4824_v55  ;;  %v4822_v61 = vpack.c.bf16 %v2889_v59, %v2889_v59  ;;  %v2764_v62 = vsel %vm2252_vm9, %v5105_v45, %v2508_v57  ;;  %vm2250_vm11 = vcmp.ge.f32.partialorder %v1505_v50, 0.0  ;;  %v2506_v63 = vmul.f32 0.2, %v1505_v50  ;;  %v1518_v8 = vpop.f32.mrb[97].mxu0 }
 0x1b8   :  { %4042 = vst.msk [vmem:[%s6870_s2 + $0x170] sm:$0xf] %vm3949_vm2, %v4694_v58  ;;  %v4697_v0 = vpack.c.bf16 %v2764_v62, %v2764_v62  ;;  %v2892_v1 = vsel %vm2380_vm10, %v5233_v46, %v2636_v60  ;;  %vm2378_vm12 = vcmp.ge.f32.partialorder %v2017_v51, 0.0  ;;  %v2634_v2 = vmul.f32 0.2, %v2017_v51  ;;  %v2030_v9 = vpop.f32.mrb[97].mxu1 }
 0x1b9   :  { %4170 = vst.msk [vmem:[%s6870_s2 + $0x370] sm:$0xf] %vm3949_vm2, %v4822_v61  ;;  %v4825_v5 = vpack.c.bf16 %v2892_v1, %v2892_v1  ;;  %v2762_v6 = vsel %vm2250_vm11, %v1505_v50, %v2506_v63  ;;  %vm2255_vm13 = vcmp.ge.f32.partialorder %v5108_v3, 0.0  ;;  %v2511_v7 = vmul.f32 0.2, %v5108_v3  ;;  %v5109_v13 = vpop.f32.mrb[98].mxu0 }
 0x1ba   :  { %4045 = vst.msk [vmem:[%s6870_s2 + $0x17c] sm:$0xf] %vm3949_vm2, %v4697_v0  ;;  %v4695_v10 = vpack.c.bf16 %v2762_v6, %v2762_v6  ;;  %v2890_v11 = vsel %vm2378_vm12, %v2017_v51, %v2634_v2  ;;  %vm2383_vm14 = vcmp.ge.f32.partialorder %v5236_v4, 0.0  ;;  %v2639_v12 = vmul.f32 0.2, %v5236_v4  ;;  %v5237_v14 = vpop.f32.mrb[98].mxu1 }
 0x1bb   :  { %4173 = vst.msk [vmem:[%s6870_s2 + $0x37c] sm:$0xf] %vm3949_vm2, %v4825_v5  ;;  %v4823_v15 = vpack.c.bf16 %v2890_v11, %v2890_v11  ;;  %v2767_v16 = vsel %vm2255_vm13, %v5108_v3, %v2511_v7  ;;  %vm2253_vm15 = vcmp.ge.f32.partialorder %v1518_v8, 0.0  ;;  %v2509_v17 = vmul.f32 0.2, %v1518_v8  ;;  %v1521_v18 = vpop.f32.mrb[99].mxu0 }
 0x1bc   :  { %v2033_v19 = vpop.f32.mrb[99].mxu1  ;;  %4043 = vst.msk [vmem:[%s6870_s2 + $0x174] sm:$0xf] %vm3949_vm2, %v4695_v10  ;;  %v4700_v20 = vpack.c.bf16 %v2767_v16, %v2767_v16  ;;  %v2895_v21 = vsel %vm2383_vm14, %v5236_v4, %v2639_v12  ;;  %vm2381_vm0 = vcmp.ge.f32.partialorder %v2030_v9, 0.0  ;;  %v2637_v22 = vmul.f32 0.2, %v2030_v9 }
 0x1bd   :  { %4171 = vst.msk [vmem:[%s6870_s2 + $0x374] sm:$0xf] %vm3949_vm2, %v4823_v15  ;;  %v4828_v23 = vpack.c.bf16 %v2895_v21, %v2895_v21  ;;  %v2765_v24 = vsel %vm2253_vm15, %v1518_v8, %v2509_v17  ;;  %vm2256_vm1 = vcmp.ge.f32.partialorder %v5109_v13, 0.0  ;;  %v2512_v25 = vmul.f32 0.2, %v5109_v13  ;;  %v5112_v35 = vpop.f32.mrb[100].mxu0 }
 0x1be   :  { %4048 = vst.msk [vmem:[%s6870_s2 + $0x188] sm:$0xf] %vm3949_vm2, %v4700_v20  ;;  %v4698_v26 = vpack.c.bf16 %v2765_v24, %v2765_v24  ;;  %v2893_v27 = vsel %vm2381_vm0, %v2030_v9, %v2637_v22  ;;  %vm2384_vm3 = vcmp.ge.f32.partialorder %v5237_v14, 0.0  ;;  %v2640_v28 = vmul.f32 0.2, %v5237_v14  ;;  %v5240_v36 = vpop.f32.mrb[100].mxu1 }
 0x1bf   :  { %4176 = vst.msk [vmem:[%s6870_s2 + $0x388] sm:$0xf] %vm3949_vm2, %v4828_v23  ;;  %v4826_v29 = vpack.c.bf16 %v2893_v27, %v2893_v27  ;;  %v2768_v30 = vsel %vm2256_vm1, %v5109_v13, %v2512_v25  ;;  %vm2254_vm4 = vcmp.ge.f32.partialorder %v1521_v18, 0.0  ;;  %v2510_v31 = vmul.f32 0.2, %v1521_v18  ;;  %v1534_v40 = vpop.f32.mrb[101].mxu0 }
 0x1c0   :  { %4046 = vst.msk [vmem:[%s6870_s2 + $0x180] sm:$0xf] %vm3949_vm2, %v4698_v26  ;;  %v4701_v32 = vpack.c.bf16 %v2768_v30, %v2768_v30  ;;  %v2896_v33 = vsel %vm2384_vm3, %v5237_v14, %v2640_v28  ;;  %vm2382_vm5 = vcmp.ge.f32.partialorder %v2033_v19, 0.0  ;;  %v2638_v34 = vmul.f32 0.2, %v2033_v19  ;;  %v2046_v41 = vpop.f32.mrb[101].mxu1 }
 0x1c1   :  { %4174 = vst.msk [vmem:[%s6870_s2 + $0x380] sm:$0xf] %vm3949_vm2, %v4826_v29  ;;  %v4829_v37 = vpack.c.bf16 %v2896_v33, %v2896_v33  ;;  %v2766_v38 = vsel %vm2254_vm4, %v1521_v18, %v2510_v31  ;;  %vm2259_vm6 = vcmp.ge.f32.partialorder %v5112_v35, 0.0  ;;  %v2515_v39 = vmul.f32 0.2, %v5112_v35  ;;  %v5113_v45 = vpop.f32.mrb[102].mxu0 }
 0x1c2   :  { %4049 = vst.msk [vmem:[%s6870_s2 + $0x18c] sm:$0xf] %vm3949_vm2, %v4701_v32  ;;  %v4699_v42 = vpack.c.bf16 %v2766_v38, %v2766_v38  ;;  %v2894_v43 = vsel %vm2382_vm5, %v2033_v19, %v2638_v34  ;;  %vm2387_vm7 = vcmp.ge.f32.partialorder %v5240_v36, 0.0  ;;  %v2643_v44 = vmul.f32 0.2, %v5240_v36  ;;  %v5241_v46 = vpop.f32.mrb[102].mxu1 }
 0x1c3   :  { %4177 = vst.msk [vmem:[%s6870_s2 + $0x38c] sm:$0xf] %vm3949_vm2, %v4829_v37  ;;  %v4827_v47 = vpack.c.bf16 %v2894_v43, %v2894_v43  ;;  %v2771_v48 = vsel %vm2259_vm6, %v5112_v35, %v2515_v39  ;;  %vm2257_vm8 = vcmp.ge.f32.partialorder %v1534_v40, 0.0  ;;  %v2513_v49 = vmul.f32 0.2, %v1534_v40  ;;  %v1537_v50 = vpop.f32.mrb[103].mxu0 }
 0x1c4   :  { %v2049_v51 = vpop.f32.mrb[103].mxu1  ;;  %4047 = vst.msk [vmem:[%s6870_s2 + $0x184] sm:$0xf] %vm3949_vm2, %v4699_v42  ;;  %v4704_v52 = vpack.c.bf16 %v2771_v48, %v2771_v48  ;;  %v2899_v53 = vsel %vm2387_vm7, %v5240_v36, %v2643_v44  ;;  %vm2385_vm9 = vcmp.ge.f32.partialorder %v2046_v41, 0.0  ;;  %v2641_v54 = vmul.f32 0.2, %v2046_v41 }
 0x1c5   :  { %4175 = vst.msk [vmem:[%s6870_s2 + $0x384] sm:$0xf] %vm3949_vm2, %v4827_v47  ;;  %v4832_v55 = vpack.c.bf16 %v2899_v53, %v2899_v53  ;;  %v2769_v56 = vsel %vm2257_vm8, %v1534_v40, %v2513_v49  ;;  %vm2260_vm10 = vcmp.ge.f32.partialorder %v5113_v45, 0.0  ;;  %v2516_v57 = vmul.f32 0.2, %v5113_v45  ;;  %v5116_v3 = vpop.f32.mrb[104].mxu0 }
 0x1c6   :  { %4052 = vst.msk [vmem:[%s6870_s2 + $0x198] sm:$0xf] %vm3949_vm2, %v4704_v52  ;;  %v4702_v58 = vpack.c.bf16 %v2769_v56, %v2769_v56  ;;  %v2897_v59 = vsel %vm2385_vm9, %v2046_v41, %v2641_v54  ;;  %vm2388_vm11 = vcmp.ge.f32.partialorder %v5241_v46, 0.0  ;;  %v2644_v60 = vmul.f32 0.2, %v5241_v46  ;;  %v5244_v4 = vpop.f32.mrb[104].mxu1 }
 0x1c7   :  { %4180 = vst.msk [vmem:[%s6870_s2 + $0x398] sm:$0xf] %vm3949_vm2, %v4832_v55  ;;  %v4830_v61 = vpack.c.bf16 %v2897_v59, %v2897_v59  ;;  %v2772_v62 = vsel %vm2260_vm10, %v5113_v45, %v2516_v57  ;;  %vm2258_vm12 = vcmp.ge.f32.partialorder %v1537_v50, 0.0  ;;  %v2514_v63 = vmul.f32 0.2, %v1537_v50  ;;  %v1550_v8 = vpop.f32.mrb[105].mxu0 }
 0x1c8   :  { %4050 = vst.msk [vmem:[%s6870_s2 + $0x190] sm:$0xf] %vm3949_vm2, %v4702_v58  ;;  %v4705_v0 = vpack.c.bf16 %v2772_v62, %v2772_v62  ;;  %v2900_v1 = vsel %vm2388_vm11, %v5241_v46, %v2644_v60  ;;  %vm2386_vm13 = vcmp.ge.f32.partialorder %v2049_v51, 0.0  ;;  %v2642_v2 = vmul.f32 0.2, %v2049_v51  ;;  %v2062_v9 = vpop.f32.mrb[105].mxu1 }
 0x1c9   :  { %4178 = vst.msk [vmem:[%s6870_s2 + $0x390] sm:$0xf] %vm3949_vm2, %v4830_v61  ;;  %v4833_v5 = vpack.c.bf16 %v2900_v1, %v2900_v1  ;;  %v2770_v6 = vsel %vm2258_vm12, %v1537_v50, %v2514_v63  ;;  %vm2263_vm14 = vcmp.ge.f32.partialorder %v5116_v3, 0.0  ;;  %v2519_v7 = vmul.f32 0.2, %v5116_v3  ;;  %v5117_v13 = vpop.f32.mrb[106].mxu0 }
 0x1ca   :  { %4053 = vst.msk [vmem:[%s6870_s2 + $0x19c] sm:$0xf] %vm3949_vm2, %v4705_v0  ;;  %v4703_v10 = vpack.c.bf16 %v2770_v6, %v2770_v6  ;;  %v2898_v11 = vsel %vm2386_vm13, %v2049_v51, %v2642_v2  ;;  %vm2391_vm15 = vcmp.ge.f32.partialorder %v5244_v4, 0.0  ;;  %v2647_v12 = vmul.f32 0.2, %v5244_v4  ;;  %v5245_v14 = vpop.f32.mrb[106].mxu1 }
 0x1cb   :  { %4181 = vst.msk [vmem:[%s6870_s2 + $0x39c] sm:$0xf] %vm3949_vm2, %v4833_v5  ;;  %v4831_v15 = vpack.c.bf16 %v2898_v11, %v2898_v11  ;;  %v2775_v16 = vsel %vm2263_vm14, %v5116_v3, %v2519_v7  ;;  %vm2261_vm0 = vcmp.ge.f32.partialorder %v1550_v8, 0.0  ;;  %v2517_v17 = vmul.f32 0.2, %v1550_v8  ;;  %v1553_v18 = vpop.f32.mrb[107].mxu0 }
 0x1cc   :  { %v2065_v19 = vpop.f32.mrb[107].mxu1  ;;  %4051 = vst.msk [vmem:[%s6870_s2 + $0x194] sm:$0xf] %vm3949_vm2, %v4703_v10  ;;  %v4708_v20 = vpack.c.bf16 %v2775_v16, %v2775_v16  ;;  %v2903_v21 = vsel %vm2391_vm15, %v5244_v4, %v2647_v12  ;;  %vm2389_vm1 = vcmp.ge.f32.partialorder %v2062_v9, 0.0  ;;  %v2645_v22 = vmul.f32 0.2, %v2062_v9 }
 0x1cd   :  { %4179 = vst.msk [vmem:[%s6870_s2 + $0x394] sm:$0xf] %vm3949_vm2, %v4831_v15  ;;  %v4836_v23 = vpack.c.bf16 %v2903_v21, %v2903_v21  ;;  %v2773_v24 = vsel %vm2261_vm0, %v1550_v8, %v2517_v17  ;;  %vm2264_vm3 = vcmp.ge.f32.partialorder %v5117_v13, 0.0  ;;  %v2520_v25 = vmul.f32 0.2, %v5117_v13  ;;  %v5120_v35 = vpop.f32.mrb[108].mxu0 }
 0x1ce   :  { %4056 = vst.msk [vmem:[%s6870_s2 + $0x1a8] sm:$0xf] %vm3949_vm2, %v4708_v20  ;;  %v4706_v26 = vpack.c.bf16 %v2773_v24, %v2773_v24  ;;  %v2901_v27 = vsel %vm2389_vm1, %v2062_v9, %v2645_v22  ;;  %vm2392_vm4 = vcmp.ge.f32.partialorder %v5245_v14, 0.0  ;;  %v2648_v28 = vmul.f32 0.2, %v5245_v14  ;;  %v5248_v36 = vpop.f32.mrb[108].mxu1 }
 0x1cf   :  { %4184 = vst.msk [vmem:[%s6870_s2 + $0x3a8] sm:$0xf] %vm3949_vm2, %v4836_v23  ;;  %v4834_v29 = vpack.c.bf16 %v2901_v27, %v2901_v27  ;;  %v2776_v30 = vsel %vm2264_vm3, %v5117_v13, %v2520_v25  ;;  %vm2262_vm5 = vcmp.ge.f32.partialorder %v1553_v18, 0.0  ;;  %v2518_v31 = vmul.f32 0.2, %v1553_v18  ;;  %v1566_v40 = vpop.f32.mrb[109].mxu0 }
 0x1d0   :  { %4054 = vst.msk [vmem:[%s6870_s2 + $0x1a0] sm:$0xf] %vm3949_vm2, %v4706_v26  ;;  %v4709_v32 = vpack.c.bf16 %v2776_v30, %v2776_v30  ;;  %v2904_v33 = vsel %vm2392_vm4, %v5245_v14, %v2648_v28  ;;  %vm2390_vm6 = vcmp.ge.f32.partialorder %v2065_v19, 0.0  ;;  %v2646_v34 = vmul.f32 0.2, %v2065_v19  ;;  %v2078_v41 = vpop.f32.mrb[109].mxu1 }
 0x1d1   :  { %4182 = vst.msk [vmem:[%s6870_s2 + $0x3a0] sm:$0xf] %vm3949_vm2, %v4834_v29  ;;  %v4837_v37 = vpack.c.bf16 %v2904_v33, %v2904_v33  ;;  %v2774_v38 = vsel %vm2262_vm5, %v1553_v18, %v2518_v31  ;;  %vm2267_vm7 = vcmp.ge.f32.partialorder %v5120_v35, 0.0  ;;  %v2523_v39 = vmul.f32 0.2, %v5120_v35  ;;  %v5121_v45 = vpop.f32.mrb[110].mxu0 }
 0x1d2   :  { %4057 = vst.msk [vmem:[%s6870_s2 + $0x1ac] sm:$0xf] %vm3949_vm2, %v4709_v32  ;;  %v4707_v42 = vpack.c.bf16 %v2774_v38, %v2774_v38  ;;  %v2902_v43 = vsel %vm2390_vm6, %v2065_v19, %v2646_v34  ;;  %vm2395_vm8 = vcmp.ge.f32.partialorder %v5248_v36, 0.0  ;;  %v2651_v44 = vmul.f32 0.2, %v5248_v36  ;;  %v5249_v46 = vpop.f32.mrb[110].mxu1 }
 0x1d3   :  { %4185 = vst.msk [vmem:[%s6870_s2 + $0x3ac] sm:$0xf] %vm3949_vm2, %v4837_v37  ;;  %v4835_v47 = vpack.c.bf16 %v2902_v43, %v2902_v43  ;;  %v2779_v48 = vsel %vm2267_vm7, %v5120_v35, %v2523_v39  ;;  %vm2265_vm9 = vcmp.ge.f32.partialorder %v1566_v40, 0.0  ;;  %v2521_v49 = vmul.f32 0.2, %v1566_v40  ;;  %v1569_v50 = vpop.f32.mrb[111].mxu0 }
 0x1d4   :  { %v2081_v51 = vpop.f32.mrb[111].mxu1  ;;  %4055 = vst.msk [vmem:[%s6870_s2 + $0x1a4] sm:$0xf] %vm3949_vm2, %v4707_v42  ;;  %v4712_v52 = vpack.c.bf16 %v2779_v48, %v2779_v48  ;;  %v2907_v53 = vsel %vm2395_vm8, %v5248_v36, %v2651_v44  ;;  %vm2393_vm10 = vcmp.ge.f32.partialorder %v2078_v41, 0.0  ;;  %v2649_v54 = vmul.f32 0.2, %v2078_v41 }
 0x1d5   :  { %4183 = vst.msk [vmem:[%s6870_s2 + $0x3a4] sm:$0xf] %vm3949_vm2, %v4835_v47  ;;  %v4840_v55 = vpack.c.bf16 %v2907_v53, %v2907_v53  ;;  %v2777_v56 = vsel %vm2265_vm9, %v1566_v40, %v2521_v49  ;;  %vm2268_vm11 = vcmp.ge.f32.partialorder %v5121_v45, 0.0  ;;  %v2524_v57 = vmul.f32 0.2, %v5121_v45  ;;  %v5124_v3 = vpop.f32.mrb[112].mxu0 }
 0x1d6   :  { %4060 = vst.msk [vmem:[%s6870_s2 + $0x1b8] sm:$0xf] %vm3949_vm2, %v4712_v52  ;;  %v4710_v58 = vpack.c.bf16 %v2777_v56, %v2777_v56  ;;  %v2905_v59 = vsel %vm2393_vm10, %v2078_v41, %v2649_v54  ;;  %vm2396_vm12 = vcmp.ge.f32.partialorder %v5249_v46, 0.0  ;;  %v2652_v60 = vmul.f32 0.2, %v5249_v46  ;;  %v5252_v4 = vpop.f32.mrb[112].mxu1 }
 0x1d7   :  { %4188 = vst.msk [vmem:[%s6870_s2 + $0x3b8] sm:$0xf] %vm3949_vm2, %v4840_v55  ;;  %v4838_v61 = vpack.c.bf16 %v2905_v59, %v2905_v59  ;;  %v2780_v62 = vsel %vm2268_vm11, %v5121_v45, %v2524_v57  ;;  %vm2266_vm13 = vcmp.ge.f32.partialorder %v1569_v50, 0.0  ;;  %v2522_v63 = vmul.f32 0.2, %v1569_v50  ;;  %v1582_v8 = vpop.f32.mrb[113].mxu0 }
 0x1d8   :  { %4058 = vst.msk [vmem:[%s6870_s2 + $0x1b0] sm:$0xf] %vm3949_vm2, %v4710_v58  ;;  %v4713_v0 = vpack.c.bf16 %v2780_v62, %v2780_v62  ;;  %v2908_v1 = vsel %vm2396_vm12, %v5249_v46, %v2652_v60  ;;  %vm2394_vm14 = vcmp.ge.f32.partialorder %v2081_v51, 0.0  ;;  %v2650_v2 = vmul.f32 0.2, %v2081_v51  ;;  %v2094_v9 = vpop.f32.mrb[113].mxu1 }
 0x1d9   :  { %4186 = vst.msk [vmem:[%s6870_s2 + $0x3b0] sm:$0xf] %vm3949_vm2, %v4838_v61  ;;  %v4841_v5 = vpack.c.bf16 %v2908_v1, %v2908_v1  ;;  %v2778_v6 = vsel %vm2266_vm13, %v1569_v50, %v2522_v63  ;;  %vm2271_vm15 = vcmp.ge.f32.partialorder %v5124_v3, 0.0  ;;  %v2527_v7 = vmul.f32 0.2, %v5124_v3  ;;  %v5125_v13 = vpop.f32.mrb[114].mxu0 }
 0x1da   :  { %4061 = vst.msk [vmem:[%s6870_s2 + $0x1bc] sm:$0xf] %vm3949_vm2, %v4713_v0  ;;  %v4711_v10 = vpack.c.bf16 %v2778_v6, %v2778_v6  ;;  %v2906_v11 = vsel %vm2394_vm14, %v2081_v51, %v2650_v2  ;;  %vm2399_vm0 = vcmp.ge.f32.partialorder %v5252_v4, 0.0  ;;  %v2655_v12 = vmul.f32 0.2, %v5252_v4  ;;  %v5253_v14 = vpop.f32.mrb[114].mxu1 }
 0x1db   :  { %4189 = vst.msk [vmem:[%s6870_s2 + $0x3bc] sm:$0xf] %vm3949_vm2, %v4841_v5  ;;  %v4839_v15 = vpack.c.bf16 %v2906_v11, %v2906_v11  ;;  %v2783_v16 = vsel %vm2271_vm15, %v5124_v3, %v2527_v7  ;;  %vm2269_vm1 = vcmp.ge.f32.partialorder %v1582_v8, 0.0  ;;  %v2525_v17 = vmul.f32 0.2, %v1582_v8  ;;  %v1585_v18 = vpop.f32.mrb[115].mxu0 }
 0x1dc   :  { %v2097_v19 = vpop.f32.mrb[115].mxu1  ;;  %4059 = vst.msk [vmem:[%s6870_s2 + $0x1b4] sm:$0xf] %vm3949_vm2, %v4711_v10  ;;  %v4716_v20 = vpack.c.bf16 %v2783_v16, %v2783_v16  ;;  %v2911_v21 = vsel %vm2399_vm0, %v5252_v4, %v2655_v12  ;;  %vm2397_vm3 = vcmp.ge.f32.partialorder %v2094_v9, 0.0  ;;  %v2653_v22 = vmul.f32 0.2, %v2094_v9 }
 0x1dd   :  { %4187 = vst.msk [vmem:[%s6870_s2 + $0x3b4] sm:$0xf] %vm3949_vm2, %v4839_v15  ;;  %v4844_v23 = vpack.c.bf16 %v2911_v21, %v2911_v21  ;;  %v2781_v24 = vsel %vm2269_vm1, %v1582_v8, %v2525_v17  ;;  %vm2272_vm4 = vcmp.ge.f32.partialorder %v5125_v13, 0.0  ;;  %v2528_v25 = vmul.f32 0.2, %v5125_v13  ;;  %v5128_v35 = vpop.f32.mrb[116].mxu0 }
 0x1de   :  { %4064 = vst.msk [vmem:[%s6870_s2 + $0x1c8] sm:$0xf] %vm3949_vm2, %v4716_v20  ;;  %v4714_v26 = vpack.c.bf16 %v2781_v24, %v2781_v24  ;;  %v2909_v27 = vsel %vm2397_vm3, %v2094_v9, %v2653_v22  ;;  %vm2400_vm5 = vcmp.ge.f32.partialorder %v5253_v14, 0.0  ;;  %v2656_v28 = vmul.f32 0.2, %v5253_v14  ;;  %v5256_v36 = vpop.f32.mrb[116].mxu1 }
 0x1df   :  { %4192 = vst.msk [vmem:[%s6870_s2 + $0x3c8] sm:$0xf] %vm3949_vm2, %v4844_v23  ;;  %v4842_v29 = vpack.c.bf16 %v2909_v27, %v2909_v27  ;;  %v2784_v30 = vsel %vm2272_vm4, %v5125_v13, %v2528_v25  ;;  %vm2270_vm6 = vcmp.ge.f32.partialorder %v1585_v18, 0.0  ;;  %v2526_v31 = vmul.f32 0.2, %v1585_v18  ;;  %v1598_v40 = vpop.f32.mrb[117].mxu0 }
 0x1e0   :  { %4062 = vst.msk [vmem:[%s6870_s2 + $0x1c0] sm:$0xf] %vm3949_vm2, %v4714_v26  ;;  %v4717_v32 = vpack.c.bf16 %v2784_v30, %v2784_v30  ;;  %v2912_v33 = vsel %vm2400_vm5, %v5253_v14, %v2656_v28  ;;  %vm2398_vm7 = vcmp.ge.f32.partialorder %v2097_v19, 0.0  ;;  %v2654_v34 = vmul.f32 0.2, %v2097_v19  ;;  %v2110_v41 = vpop.f32.mrb[117].mxu1 }
 0x1e1   :  { %4190 = vst.msk [vmem:[%s6870_s2 + $0x3c0] sm:$0xf] %vm3949_vm2, %v4842_v29  ;;  %v4845_v37 = vpack.c.bf16 %v2912_v33, %v2912_v33  ;;  %v2782_v38 = vsel %vm2270_vm6, %v1585_v18, %v2526_v31  ;;  %vm2275_vm8 = vcmp.ge.f32.partialorder %v5128_v35, 0.0  ;;  %v2531_v39 = vmul.f32 0.2, %v5128_v35  ;;  %v5129_v45 = vpop.f32.mrb[118].mxu0 }
 0x1e2   :  { %4065 = vst.msk [vmem:[%s6870_s2 + $0x1cc] sm:$0xf] %vm3949_vm2, %v4717_v32  ;;  %v4715_v42 = vpack.c.bf16 %v2782_v38, %v2782_v38  ;;  %v2910_v43 = vsel %vm2398_vm7, %v2097_v19, %v2654_v34  ;;  %vm2403_vm9 = vcmp.ge.f32.partialorder %v5256_v36, 0.0  ;;  %v2659_v44 = vmul.f32 0.2, %v5256_v36  ;;  %v5257_v46 = vpop.f32.mrb[118].mxu1 }
 0x1e3   :  { %4193 = vst.msk [vmem:[%s6870_s2 + $0x3cc] sm:$0xf] %vm3949_vm2, %v4845_v37  ;;  %v4843_v47 = vpack.c.bf16 %v2910_v43, %v2910_v43  ;;  %v2787_v48 = vsel %vm2275_vm8, %v5128_v35, %v2531_v39  ;;  %vm2273_vm10 = vcmp.ge.f32.partialorder %v1598_v40, 0.0  ;;  %v2529_v49 = vmul.f32 0.2, %v1598_v40  ;;  %v1601_v50 = vpop.f32.mrb[119].mxu0 }
 0x1e4   :  { %v2113_v51 = vpop.f32.mrb[119].mxu1  ;;  %4063 = vst.msk [vmem:[%s6870_s2 + $0x1c4] sm:$0xf] %vm3949_vm2, %v4715_v42  ;;  %v4720_v52 = vpack.c.bf16 %v2787_v48, %v2787_v48  ;;  %v2915_v53 = vsel %vm2403_vm9, %v5256_v36, %v2659_v44  ;;  %vm2401_vm11 = vcmp.ge.f32.partialorder %v2110_v41, 0.0  ;;  %v2657_v54 = vmul.f32 0.2, %v2110_v41 }
 0x1e5   :  { %4191 = vst.msk [vmem:[%s6870_s2 + $0x3c4] sm:$0xf] %vm3949_vm2, %v4843_v47  ;;  %v4848_v55 = vpack.c.bf16 %v2915_v53, %v2915_v53  ;;  %v2785_v56 = vsel %vm2273_vm10, %v1598_v40, %v2529_v49  ;;  %vm2276_vm12 = vcmp.ge.f32.partialorder %v5129_v45, 0.0  ;;  %v2532_v57 = vmul.f32 0.2, %v5129_v45  ;;  %v5132_v3 = vpop.f32.mrb[120].mxu0 }
 0x1e6   :  { %4068 = vst.msk [vmem:[%s6870_s2 + $0x1d8] sm:$0xf] %vm3949_vm2, %v4720_v52  ;;  %v4718_v58 = vpack.c.bf16 %v2785_v56, %v2785_v56  ;;  %v2913_v59 = vsel %vm2401_vm11, %v2110_v41, %v2657_v54  ;;  %vm2404_vm13 = vcmp.ge.f32.partialorder %v5257_v46, 0.0  ;;  %v2660_v60 = vmul.f32 0.2, %v5257_v46  ;;  %v5260_v4 = vpop.f32.mrb[120].mxu1 }
 0x1e7   :  { %4196 = vst.msk [vmem:[%s6870_s2 + $0x3d8] sm:$0xf] %vm3949_vm2, %v4848_v55  ;;  %v4846_v61 = vpack.c.bf16 %v2913_v59, %v2913_v59  ;;  %v2788_v62 = vsel %vm2276_vm12, %v5129_v45, %v2532_v57  ;;  %vm2274_vm14 = vcmp.ge.f32.partialorder %v1601_v50, 0.0  ;;  %v2530_v63 = vmul.f32 0.2, %v1601_v50  ;;  %v1614_v8 = vpop.f32.mrb[121].mxu0 }
 0x1e8   :  { %4066 = vst.msk [vmem:[%s6870_s2 + $0x1d0] sm:$0xf] %vm3949_vm2, %v4718_v58  ;;  %v4721_v0 = vpack.c.bf16 %v2788_v62, %v2788_v62  ;;  %v2916_v1 = vsel %vm2404_vm13, %v5257_v46, %v2660_v60  ;;  %vm2402_vm15 = vcmp.ge.f32.partialorder %v2113_v51, 0.0  ;;  %v2658_v2 = vmul.f32 0.2, %v2113_v51  ;;  %v2126_v9 = vpop.f32.mrb[121].mxu1 }
 0x1e9   :  { %4194 = vst.msk [vmem:[%s6870_s2 + $0x3d0] sm:$0xf] %vm3949_vm2, %v4846_v61  ;;  %v4849_v5 = vpack.c.bf16 %v2916_v1, %v2916_v1  ;;  %v2786_v6 = vsel %vm2274_vm14, %v1601_v50, %v2530_v63  ;;  %vm2279_vm0 = vcmp.ge.f32.partialorder %v5132_v3, 0.0  ;;  %v2535_v7 = vmul.f32 0.2, %v5132_v3  ;;  %v5133_v13 = vpop.f32.mrb[122].mxu0 }
 0x1ea   :  { %4069 = vst.msk [vmem:[%s6870_s2 + $0x1dc] sm:$0xf] %vm3949_vm2, %v4721_v0  ;;  %v4719_v10 = vpack.c.bf16 %v2786_v6, %v2786_v6  ;;  %v2914_v11 = vsel %vm2402_vm15, %v2113_v51, %v2658_v2  ;;  %vm2407_vm1 = vcmp.ge.f32.partialorder %v5260_v4, 0.0  ;;  %v2663_v12 = vmul.f32 0.2, %v5260_v4  ;;  %v5261_v14 = vpop.f32.mrb[122].mxu1 }
 0x1eb   :  { %4197 = vst.msk [vmem:[%s6870_s2 + $0x3dc] sm:$0xf] %vm3949_vm2, %v4849_v5  ;;  %v4847_v15 = vpack.c.bf16 %v2914_v11, %v2914_v11  ;;  %v2791_v16 = vsel %vm2279_vm0, %v5132_v3, %v2535_v7  ;;  %vm2277_vm3 = vcmp.ge.f32.partialorder %v1614_v8, 0.0  ;;  %v2533_v17 = vmul.f32 0.2, %v1614_v8  ;;  %v1617_v18 = vpop.f32.mrb[123].mxu0 }
 0x1ec   :  { %v2129_v19 = vpop.f32.mrb[123].mxu1  ;;  %4067 = vst.msk [vmem:[%s6870_s2 + $0x1d4] sm:$0xf] %vm3949_vm2, %v4719_v10  ;;  %v4724_v20 = vpack.c.bf16 %v2791_v16, %v2791_v16  ;;  %v2919_v21 = vsel %vm2407_vm1, %v5260_v4, %v2663_v12  ;;  %vm2405_vm4 = vcmp.ge.f32.partialorder %v2126_v9, 0.0  ;;  %v2661_v22 = vmul.f32 0.2, %v2126_v9 }
 0x1ed   :  { %4195 = vst.msk [vmem:[%s6870_s2 + $0x3d4] sm:$0xf] %vm3949_vm2, %v4847_v15  ;;  %v4852_v23 = vpack.c.bf16 %v2919_v21, %v2919_v21  ;;  %v2789_v24 = vsel %vm2277_vm3, %v1614_v8, %v2533_v17  ;;  %vm2280_vm5 = vcmp.ge.f32.partialorder %v5133_v13, 0.0  ;;  %v2536_v25 = vmul.f32 0.2, %v5133_v13  ;;  %v5136_v35 = vpop.f32.mrb[124].mxu0 }
 0x1ee   :  { %4072 = vst.msk [vmem:[%s6870_s2 + $0x1e8] sm:$0xf] %vm3949_vm2, %v4724_v20  ;;  %v4722_v26 = vpack.c.bf16 %v2789_v24, %v2789_v24  ;;  %v2917_v27 = vsel %vm2405_vm4, %v2126_v9, %v2661_v22  ;;  %vm2408_vm6 = vcmp.ge.f32.partialorder %v5261_v14, 0.0  ;;  %v2664_v28 = vmul.f32 0.2, %v5261_v14  ;;  %v5264_v36 = vpop.f32.mrb[124].mxu1 }
 0x1ef   :  { %4200 = vst.msk [vmem:[%s6870_s2 + $0x3e8] sm:$0xf] %vm3949_vm2, %v4852_v23  ;;  %v4850_v29 = vpack.c.bf16 %v2917_v27, %v2917_v27  ;;  %v2792_v30 = vsel %vm2280_vm5, %v5133_v13, %v2536_v25  ;;  %vm2278_vm7 = vcmp.ge.f32.partialorder %v1617_v18, 0.0  ;;  %v2534_v31 = vmul.f32 0.2, %v1617_v18  ;;  %v1630_v40 = vpop.f32.mrb[125].mxu0 }
 0x1f0   :  { %4070 = vst.msk [vmem:[%s6870_s2 + $0x1e0] sm:$0xf] %vm3949_vm2, %v4722_v26  ;;  %v4725_v32 = vpack.c.bf16 %v2792_v30, %v2792_v30  ;;  %v2920_v33 = vsel %vm2408_vm6, %v5261_v14, %v2664_v28  ;;  %vm2406_vm8 = vcmp.ge.f32.partialorder %v2129_v19, 0.0  ;;  %v2662_v34 = vmul.f32 0.2, %v2129_v19  ;;  %v2142_v41 = vpop.f32.mrb[125].mxu1 }
 0x1f1   :  { %4198 = vst.msk [vmem:[%s6870_s2 + $0x3e0] sm:$0xf] %vm3949_vm2, %v4850_v29  ;;  %v4853_v37 = vpack.c.bf16 %v2920_v33, %v2920_v33  ;;  %v2790_v38 = vsel %vm2278_vm7, %v1617_v18, %v2534_v31  ;;  %vm2283_vm9 = vcmp.ge.f32.partialorder %v5136_v35, 0.0  ;;  %v2539_v39 = vmul.f32 0.2, %v5136_v35  ;;  %v5137_v45 = vpop.f32.mrb[126].mxu0 }
 0x1f2   :  { %4073 = vst.msk [vmem:[%s6870_s2 + $0x1ec] sm:$0xf] %vm3949_vm2, %v4725_v32  ;;  %v4723_v42 = vpack.c.bf16 %v2790_v38, %v2790_v38  ;;  %v2918_v43 = vsel %vm2406_vm8, %v2129_v19, %v2662_v34  ;;  %vm2411_vm10 = vcmp.ge.f32.partialorder %v5264_v36, 0.0  ;;  %v2667_v44 = vmul.f32 0.2, %v5264_v36  ;;  %v5265_v46 = vpop.f32.mrb[126].mxu1 }
 0x1f3   :  { %4201 = vst.msk [vmem:[%s6870_s2 + $0x3ec] sm:$0xf] %vm3949_vm2, %v4853_v37  ;;  %v4851_v47 = vpack.c.bf16 %v2918_v43, %v2918_v43  ;;  %v2795_v48 = vsel %vm2283_vm9, %v5136_v35, %v2539_v39  ;;  %vm2281_vm11 = vcmp.ge.f32.partialorder %v1630_v40, 0.0  ;;  %v2537_v49 = vmul.f32 0.2, %v1630_v40  ;;  %v1633_v50 = vpop.f32.mrb[127].mxu0 }
 0x1f4   :  { %v2145_v51 = vpop.f32.mrb[127].mxu1  ;;  %4071 = vst.msk [vmem:[%s6870_s2 + $0x1e4] sm:$0xf] %vm3949_vm2, %v4723_v42  ;;  %v4728_v52 = vpack.c.bf16 %v2795_v48, %v2795_v48  ;;  %v2923_v53 = vsel %vm2411_vm10, %v5264_v36, %v2667_v44  ;;  %vm2409_vm12 = vcmp.ge.f32.partialorder %v2142_v41, 0.0  ;;  %v2665_v54 = vmul.f32 0.2, %v2142_v41 }
 0x1f5   :  { %4199 = vst.msk [vmem:[%s6870_s2 + $0x3e4] sm:$0xf] %vm3949_vm2, %v4851_v47  ;;  %v4856_v55 = vpack.c.bf16 %v2923_v53, %v2923_v53  ;;  %v2793_v56 = vsel %vm2281_vm11, %v1630_v40, %v2537_v49  ;;  %vm2284_vm13 = vcmp.ge.f32.partialorder %v5137_v45, 0.0  ;;  %v2540_v57 = vmul.f32 0.2, %v5137_v45 }
 0x1f6   :  { %4076 = vst.msk [vmem:[%s6870_s2 + $0x1f8] sm:$0xf] %vm3949_vm2, %v4728_v52  ;;  %v4726_v58 = vpack.c.bf16 %v2793_v56, %v2793_v56  ;;  %v2921_v59 = vsel %vm2409_vm12, %v2142_v41, %v2665_v54  ;;  %vm2412_vm14 = vcmp.ge.f32.partialorder %v5265_v46, 0.0  ;;  %v2668_v60 = vmul.f32 0.2, %v5265_v46 }
 0x1f7   :  { %4204 = vst.msk [vmem:[%s6870_s2 + $0x3f8] sm:$0xf] %vm3949_vm2, %v4856_v55  ;;  %v4854_v61 = vpack.c.bf16 %v2921_v59, %v2921_v59  ;;  %v2796_v62 = vsel %vm2284_vm13, %v5137_v45, %v2540_v57  ;;  %vm2282_vm15 = vcmp.ge.f32.partialorder %v1633_v50, 0.0  ;;  %v2538_v63 = vmul.f32 0.2, %v1633_v50 }
 0x1f8   :  { %4074 = vst.msk [vmem:[%s6870_s2 + $0x1f0] sm:$0xf] %vm3949_vm2, %v4726_v58  ;;  %v4729_v0 = vpack.c.bf16 %v2796_v62, %v2796_v62  ;;  %v2924_v1 = vsel %vm2412_vm14, %v5265_v46, %v2668_v60  ;;  %vm2410_vm0 = vcmp.ge.f32.partialorder %v2145_v51, 0.0  ;;  %v2666_v2 = vmul.f32 0.2, %v2145_v51 }
 0x1f9   :  { %4202 = vst.msk [vmem:[%s6870_s2 + $0x3f0] sm:$0xf] %vm3949_vm2, %v4854_v61  ;;  %v4857_v3 = vpack.c.bf16 %v2924_v1, %v2924_v1  ;;  %v2794_v4 = vsel %vm2282_vm15, %v1633_v50, %v2538_v63 }
 0x1fa   :  { %4077 = vst.msk [vmem:[%s6870_s2 + $0x1fc] sm:$0xf] %vm3949_vm2, %v4729_v0  ;;  %v4727_v5 = vpack.c.bf16 %v2794_v4, %v2794_v4  ;;  %v2922_v6 = vsel %vm2410_vm0, %v2145_v51, %v2666_v2 }
 0x1fb   :  { %4205 = vst.msk [vmem:[%s6870_s2 + $0x3fc] sm:$0xf] %vm3949_vm2, %v4857_v3  ;;  %v4855_v7 = vpack.c.bf16 %v2922_v6, %v2922_v6 }
 0x1fc   :  { %4075 = vst.msk [vmem:[%s6870_s2 + $0x1f4] sm:$0xf] %vm3949_vm2, %v4727_v5 }
 0x1fd   :  { %4203 = vst.msk [vmem:[%s6870_s2 + $0x3f4] sm:$0xf] %vm3949_vm2, %v4855_v7 }

// kernel: discriminator_forward.3
= control target key start
LH: loop header
LB: loop body
LE: loop exit
PB: predicated region body
PF: predicated region fallthrough
CT: control target
= control target key end

     0   :  { %v7057_v33 = vmov 0.0   ;;  %s8642_s1 = inlined_call_operand.vmem [shape: bf16[256,128], index: 1, kind: input, shape index: {}]   ;;  %s8643_s0 = inlined_call_operand.vmem [shape: bf16[128,256], index: 0, kind: input, shape index: {}]   ;;  %s8644_s3 = inlined_call_operand.vmem [shape: bf16[288,128], index: 3, kind: input, shape index: {}]   ;;  %s8645_s4 = inlined_call_operand.vmem [shape: bf16[36,128,128], index: 4, kind: input, shape index: {}]   ;;  %s8646_s2 = inlined_call_operand.vmem [shape: f32[1,128], index: 2, kind: input, shape index: {}]   ;;  %s8647_s5 = inlined_call_operand.vmem [shape: f32[1,128], index: 5, kind: input, shape index: {}]   ;;  %s8648_s6 = inlined_call_operand.vmem [shape: f32[8,128], index: 6, kind: input, shape index: {}]   ;;  %s8649_s7 = inlined_call_operand.vmem [shape: f32[2,1], index: 7, kind: output, shape index: {}]  }
   0x1   :  { %v6707_v0 = vld [vmem:[%s8642_s1 + $0x40] sm:$0xff]   ;;  %v6709_v2 = vld [vmem:[%s8642_s1 + $0x48] sm:$0xff]   ;;  %v6711_v4 = vld [vmem:[%s8642_s1 + $0x50] sm:$0xff]  }
   0x2   :  { %v6708_v1 = vld [vmem:[%s8642_s1] sm:$0xff]   ;;  %5519 = vmatprep.subr.bf16.mxu0 %v6707_v0  ;;  %v6710_v3 = vld [vmem:[%s8642_s1 + $0x8] sm:$0xff]   ;;  %v6712_v5 = vld [vmem:[%s8642_s1 + $0x10] sm:$0xff]  }
   0x3   :  { %5520 = vmatpush3.bf16.msra.mxu0 %v6708_v1  ;;  %v6713_v6 = vld [vmem:[%s8642_s1 + $0x58] sm:$0xff]   ;;  %v6715_v8 = vld [vmem:[%s8642_s1 + $0x60] sm:$0xff]   ;;  %v6717_v10 = vld [vmem:[%s8642_s1 + $0x68] sm:$0xff]  }
   0x4   :  { %5521 = vmatprep.subr.bf16.mxu0 %v6709_v2  ;;  %v6714_v7 = vld [vmem:[%s8642_s1 + $0x18] sm:$0xff]   ;;  %v6716_v9 = vld [vmem:[%s8642_s1 + $0x20] sm:$0xff]   ;;  %v6718_v12 = vld [vmem:[%s8642_s1 + $0x28] sm:$0xff]  }
   0x5   :  { %v6725_v11 = vld [vmem:[%s8643_s0 + $0x4] ss:$8 sps:$4 sm:$0xff]   ;;  %v6719_v13 = vld [vmem:[%s8642_s1 + $0x70] sm:$0xff]   ;;  %v6721_v15 = vld [vmem:[%s8642_s1 + $0x78] sm:$0xff]  }
   0x6   :  { %290 = vmatprep.mubr.bf16.mxu0 %v6725_v11  ;;  %v6720_v14 = vld [vmem:[%s8642_s1 + $0x30] sm:$0xff]   ;;  %v6722_v16 = vld [vmem:[%s8642_s1 + $0x38] sm:$0xff]   ;;  %v6723_v17 = vld [vmem:[%s8643_s0] ss:$8 sps:$4 sm:$0xff]  }
   0x7   :  { %5522 = vmatpush3.bf16.msra.mxu0 %v6710_v3  ;;  %v6726_v18 = vld [vmem:[%s8643_s0 + $0x14] ss:$8 sps:$4 sm:$0xff]   ;;  %v6728_v19 = vld [vmem:[%s8643_s0 + $0x10] ss:$8 sps:$4 sm:$0xff]   ;;  %v6729_v20 = vld [vmem:[%s8643_s0 + $0x24] ss:$8 sps:$4 sm:$0xff]  }
   0x8   :  { %5523 = vmatprep.subr.bf16.mxu0 %v6711_v4  ;;  %v6731_v21 = vld [vmem:[%s8643_s0 + $0x20] ss:$8 sps:$4 sm:$0xff]   ;;  %v6732_v22 = vld [vmem:[%s8643_s0 + $0x34] ss:$8 sps:$4 sm:$0xff]   ;;  %v6734_v23 = vld [vmem:[%s8643_s0 + $0x30] ss:$8 sps:$4 sm:$0xff]  }
   0x9   :  { %v6735_v24 = vld [vmem:[%s8643_s0 + $0x44] ss:$8 sps:$4 sm:$0xff]   ;;  %v6737_v25 = vld [vmem:[%s8643_s0 + $0x40] ss:$8 sps:$4 sm:$0xff]   ;;  %v6738_v26 = vld [vmem:[%s8643_s0 + $0x54] ss:$8 sps:$4 sm:$0xff]  }
   0xa   :  { %v6740_v27 = vld [vmem:[%s8643_s0 + $0x50] ss:$8 sps:$4 sm:$0xff]   ;;  %v6741_v28 = vld [vmem:[%s8643_s0 + $0x64] ss:$8 sps:$4 sm:$0xff]   ;;  %v6743_v29 = vld [vmem:[%s8643_s0 + $0x60] ss:$8 sps:$4 sm:$0xff]  }
   0xb   :  { %5524 = vmatpush3.bf16.msra.mxu0 %v6712_v5  ;;  %v6744_v30 = vld [vmem:[%s8643_s0 + $0x74] ss:$8 sps:$4 sm:$0xff]   ;;  %v6746_v31 = vld [vmem:[%s8643_s0 + $0x70] ss:$8 sps:$4 sm:$0xff]   ;;  %v6747_v32 = vld [vmem:[%s8644_s3] sm:$0xff]  }
   0xc   :  { %5525 = vmatprep.subr.bf16.mxu0 %v6713_v6  ;;  %5949 = vmatprep.mubr.bf16.mxu1 %v6747_v32  ;;  %v6754_v34 = vld [vmem:[%s8645_s4 + $0x40] sm:$0xff]   ;;  %v6756_v35 = vld [vmem:[%s8645_s4 + $0x48] sm:$0xff]   ;;  %v6760_v36 = vld [vmem:[%s8645_s4 + $0x50] sm:$0xff]  }
   0xd   :  { %v6764_v37 = vld [vmem:[%s8645_s4 + $0x58] sm:$0xff]   ;;  %v6768_v38 = vld [vmem:[%s8645_s4 + $0x60] sm:$0xff]   ;;  %v6772_v39 = vld [vmem:[%s8645_s4 + $0x68] sm:$0xff]  }
   0xe   :  { %v7226_v41 = vld [vmem:[%s8646_s2] ss:$0 sm:$0xff]  ;;  %v6775_v43 = vld [vmem:[%s8645_s4 + $0x70] sm:$0xff]   ;;  %v6779_v54 = vld [vmem:[%s8645_s4 + $0x78] sm:$0xff]  }
   0xf   :  { %5526 = vmatpush3.bf16.msra.mxu0 %v6714_v7 }
  0x10   :  { %5527 = vmatprep.subr.bf16.mxu0 %v6715_v8 }
  0x13   :  { %5528 = vmatpush3.bf16.msra.mxu0 %v6716_v9 }
  0x14   :  { %5529 = vmatprep.subr.bf16.mxu0 %v6717_v10 }
  0x17   :  { %5530 = vmatpush3.bf16.msra.mxu0 %v6718_v12 }
  0x18   :  { %5531 = vmatprep.subr.bf16.mxu0 %v6719_v13 }
  0x1b   :  { %5532 = vmatpush3.bf16.msra.mxu0 %v6720_v14 }
  0x1c   :  { %5533 = vmatprep.subr.bf16.mxu0 %v6721_v15 }
  0x1f   :  { %5534 = vmatpush3.bf16.msra.mxu0 %v6722_v16 }
  0x20   :  { %5985 = vmatprep.subr.bf16.mxu0 %v7057_v33 }
  0x22   :  { %291 = vmatmul.mubr.bf16.vlgmr.msra.gmra.mrb[0].mxu0 %v6723_v17 }
  0x23   :  { %298 = vmatprep.mubr.bf16.mxu0 %v6726_v18  ;;  %5986 = vmatpush3.bf16.msra.mxu0 %v6754_v34 }
  0x24   :  { %5987 = vmatprep.subr.bf16.mxu0 %v7057_v33 }
  0x27   :  { %5988 = vmatpush3.bf16.msra.mxu0 %v6756_v35 }
  0x28   :  { %5989 = vmatprep.subr.bf16.mxu0 %v7057_v33 }
  0x2a   :  { %299 = vmatmul.mubr.bf16.gmra.mrb[4].mxu0 %v6728_v19 }
  0x2b   :  { %306 = vmatprep.mubr.bf16.mxu0 %v6729_v20  ;;  %5990 = vmatpush3.bf16.msra.mxu0 %v6760_v36 }
  0x2c   :  { %5991 = vmatprep.subr.bf16.mxu0 %v7057_v33 }
  0x2f   :  { %5992 = vmatpush3.bf16.msra.mxu0 %v6764_v37 }
  0x30   :  { %5993 = vmatprep.subr.bf16.mxu0 %v7057_v33 }
  0x32   :  { %307 = vmatmul.mubr.bf16.gmra.mrb[8].mxu0 %v6731_v21 }
  0x33   :  { %314 = vmatprep.mubr.bf16.mxu0 %v6732_v22  ;;  %5994 = vmatpush3.bf16.msra.mxu0 %v6768_v38 }
  0x34   :  { %5995 = vmatprep.subr.bf16.mxu0 %v7057_v33 }
  0x37   :  { %5996 = vmatpush3.bf16.msra.mxu0 %v6772_v39 }
  0x38   :  { %5997 = vmatprep.subr.bf16.mxu0 %v7057_v33 }
  0x3a   :  { %315 = vmatmul.mubr.bf16.gmra.mrb[12].mxu0 %v6734_v23 }
  0x3b   :  { %322 = vmatprep.mubr.bf16.mxu0 %v6735_v24  ;;  %5998 = vmatpush3.bf16.msra.mxu0 %v6775_v43 }
  0x3c   :  { %5999 = vmatprep.subr.bf16.mxu0 %v7057_v33 }
  0x3f   :  { %6000 = vmatpush3.bf16.msra.mxu0 %v6779_v54 }
  0x40   :  { %6025 = vmatprep.subr.bf16.mxu0 %v7057_v33 }
  0x42   :  { %323 = vmatmul.mubr.bf16.gmra.mrb[16].mxu0 %v6737_v25 }
  0x43   :  { %330 = vmatprep.mubr.bf16.mxu0 %v6738_v26 }
  0x4a   :  { %331 = vmatmul.mubr.bf16.gmra.mrb[20].mxu0 %v6740_v27 }
  0x4b   :  { %338 = vmatprep.mubr.bf16.mxu0 %v6741_v28 }
  0x52   :  { %339 = vmatmul.mubr.bf16.gmra.mrb[24].mxu0 %v6743_v29 }
  0x53   :  { %346 = vmatprep.mubr.bf16.mxu0 %v6744_v30 }
  0x5a   :  { %347 = vmatmul.mubr.bf16.gmra.mrb[28].mxu0 %v6746_v31 }
  0xf5   :  { %v5535_v40 = vpop.f32.mrb[0].mxu0 }
  0xf6   :  { %v5536_v42 = vpop.f32.mrb[1].mxu0 }
  0xf7   :  { %v5537_v44 = vadd.f32 %v5536_v42, %v5535_v40  ;;  %v5538_v45 = vpop.f32.mrb[2].mxu0 }
  0xf8   :  { %v5539_v46 = vpop.f32.mrb[3].mxu0 }
  0xf9   :  { %v293_v47 = vadd.f32 %v5537_v44, %v7226_v41  ;;  %v5540_v48 = vadd.f32 %v5539_v46, %v5538_v45 }
  0xfb   :  { %v296_v49 = vadd.f32 %v5540_v48, %v7226_v41  ;;  %vm355_vm0 = vcmp.ge.f32.partialorder %v293_v47, 0.0  ;;  %v371_v50 = vmul.f32 0.2, %v293_v47 }
  0xfd   :  { %v5541_v51 = vpop.f32.mrb[4].mxu0  ;;  %vm356_vm1 = vcmp.ge.f32.partialorder %v296_v49, 0.0  ;;  %v372_v52 = vmul.f32 0.2, %v296_v49  ;;  %v387_v57 = vsel %vm355_vm0, %v293_v47, %v371_v50  ;;  %vm7058_vm0 = vmmov 0  }
  0xfe   :  { %v5542_v53 = vpop.f32.mrb[5].mxu0  ;;  %6001 = vmatprep.mubr.msk.bf16.mxu0 %vm7058_vm0, %v7057_v33 }
  0xff   :  { %v5543_v55 = vadd.f32 %v5542_v53, %v5541_v51  ;;  %v5544_v56 = vpop.f32.mrb[6].mxu0  ;;  %v388_v58 = vsel %vm356_vm1, %v296_v49, %v372_v52 }
 0x100   :  { %v5545_v59 = vpop.f32.mrb[7].mxu0  ;;  %v439_v60 = vpack.c.bf16 %v388_v58, %v387_v57 }
 0x101   :  { %v301_v61 = vadd.f32 %v5543_v55, %v7226_v41  ;;  %v5546_v62 = vadd.f32 %v5545_v59, %v5544_v56 }
 0x102   :  { %5933 = vmatprep.subr.bf16.mxu1 %v439_v60 }
 0x103   :  { %vm357_vm2 = vcmp.ge.f32.partialorder %v301_v61, 0.0  ;;  %v373_v63 = vmul.f32 0.2, %v301_v61  ;;  %v304_v0 = vadd.f32 %v5546_v62, %v7226_v41  ;;  %5934 = vmatpush3.bf16.msra.mxu1 %v439_v60 }
 0x105   :  { %vm358_vm3 = vcmp.ge.f32.partialorder %v304_v0, 0.0  ;;  %v374_v1 = vmul.f32 0.2, %v304_v0  ;;  %v5547_v2 = vpop.f32.mrb[8].mxu0  ;;  %v389_v6 = vsel %vm357_vm2, %v301_v61, %v373_v63  ;;  %vm4604_vm2 = vcmask 1041408  }
 0x106   :  { %v5548_v3 = vpop.f32.mrb[9].mxu0 }
 0x107   :  { %v5549_v4 = vadd.f32 %v5548_v3, %v5547_v2  ;;  %v5550_v5 = vpop.f32.mrb[10].mxu0  ;;  %v390_v7 = vsel %vm358_vm3, %v304_v0, %v374_v1  ;;  %vm4613_vm3 = vcmask 1024  }
 0x108   :  { %v5551_v8 = vpop.f32.mrb[11].mxu0  ;;  %v440_v9 = vpack.c.bf16 %v390_v7, %v389_v6 }
 0x109   :  { %v309_v10 = vadd.f32 %v5549_v4, %v7226_v41  ;;  %v5552_v11 = vadd.f32 %v5551_v8, %v5550_v5 }
 0x10a   :  { %5935 = vmatprep.subr.bf16.mxu1 %v440_v9 }
 0x10b   :  { %vm359_vm4 = vcmp.ge.f32.partialorder %v309_v10, 0.0  ;;  %v375_v12 = vmul.f32 0.2, %v309_v10  ;;  %v312_v13 = vadd.f32 %v5552_v11, %v7226_v41  ;;  %5936 = vmatpush3.bf16.msra.mxu1 %v440_v9 }
 0x10d   :  { %vm360_vm5 = vcmp.ge.f32.partialorder %v312_v13, 0.0  ;;  %v376_v14 = vmul.f32 0.2, %v312_v13  ;;  %v5553_v15 = vpop.f32.mrb[12].mxu0  ;;  %v391_v19 = vsel %vm359_vm4, %v309_v10, %v375_v12 }
 0x10e   :  { %v5554_v16 = vpop.f32.mrb[13].mxu0 }
 0x10f   :  { %v5555_v17 = vadd.f32 %v5554_v16, %v5553_v15  ;;  %v5556_v18 = vpop.f32.mrb[14].mxu0  ;;  %v392_v20 = vsel %vm360_vm5, %v312_v13, %v376_v14 }
 0x110   :  { %v5557_v21 = vpop.f32.mrb[15].mxu0  ;;  %v441_v22 = vpack.c.bf16 %v392_v20, %v391_v19 }
 0x111   :  { %v317_v23 = vadd.f32 %v5555_v17, %v7226_v41  ;;  %v5558_v24 = vadd.f32 %v5557_v21, %v5556_v18  ;;  %v6748_v21 = vld [vmem:[%s8644_s3 + $0x8] sm:$0xff]  }
 0x112   :  { %5937 = vmatprep.subr.bf16.mxu1 %v441_v22 }
 0x113   :  { %vm361_vm6 = vcmp.ge.f32.partialorder %v317_v23, 0.0  ;;  %v377_v25 = vmul.f32 0.2, %v317_v23  ;;  %v320_v26 = vadd.f32 %v5558_v24, %v7226_v41  ;;  %5938 = vmatpush3.bf16.msra.mxu1 %v441_v22  ;;  %v6749_v22 = vld [vmem:[%s8644_s3 + $0x10] sm:$0xff]   ;;  %v6750_v24 = vld [vmem:[%s8644_s3 + $0x18] sm:$0xff]  }
 0x115   :  { %vm362_vm7 = vcmp.ge.f32.partialorder %v320_v26, 0.0  ;;  %v378_v27 = vmul.f32 0.2, %v320_v26  ;;  %v5559_v28 = vpop.f32.mrb[16].mxu0  ;;  %v393_v32 = vsel %vm361_vm6, %v317_v23, %v377_v25  ;;  %v6753_v23 = vld [vmem:[%s8645_s4] sm:$0xff]  }
 0x116   :  { %v5560_v29 = vpop.f32.mrb[17].mxu0  ;;  %v6751_v25 = vld [vmem:[%s8644_s3 + $0x20] sm:$0xff]  }
 0x117   :  { %v5561_v30 = vadd.f32 %v5560_v29, %v5559_v28  ;;  %v5562_v31 = vpop.f32.mrb[18].mxu0  ;;  %v394_v34 = vsel %vm362_vm7, %v320_v26, %v378_v27  ;;  %v6757_v26 = vld [vmem:[%s8645_s4 + $0x10] sm:$0xff]   ;;  %v6762_v27 = vld [vmem:[%s8645_s4 + $0x18] sm:$0xff]   ;;  %v6752_v28 = vld [vmem:[%s8644_s3 + $0x28] sm:$0xff]  }
 0x118   :  { %v5563_v35 = vpop.f32.mrb[19].mxu0  ;;  %v442_v36 = vpack.c.bf16 %v394_v34, %v393_v32  ;;  %v6758_v29 = vld [vmem:[%s8644_s3 + $0x30] sm:$0xff]   ;;  %v6759_v32 = vld [vmem:[%s8644_s3 + $0x38] sm:$0xff]   ;;  %v6761_v34 = vld [vmem:[%s8644_s3 + $0x40] sm:$0xff]  }
 0x119   :  { %v325_v37 = vadd.f32 %v5561_v30, %v7226_v41  ;;  %v5564_v38 = vadd.f32 %v5563_v35, %v5562_v31  ;;  %v6767_v30 = vld [vmem:[%s8645_s4 + $0x20] sm:$0xff]   ;;  %v6771_v31 = vld [vmem:[%s8645_s4 + $0x28] sm:$0xff]   ;;  %v6776_v35 = vld [vmem:[%s8645_s4 + $0x30] sm:$0xff]  }
 0x11a   :  { %5939 = vmatprep.subr.bf16.mxu1 %v442_v36 }
 0x11b   :  { %vm363_vm8 = vcmp.ge.f32.partialorder %v325_v37, 0.0  ;;  %v379_v39 = vmul.f32 0.2, %v325_v37  ;;  %v328_v40 = vadd.f32 %v5564_v38, %v7226_v41  ;;  %5940 = vmatpush3.bf16.msra.mxu1 %v442_v36  ;;  %v6780_v36 = vld [vmem:[%s8645_s4 + $0x38] sm:$0xff]   ;;  %v6765_v38 = vld [vmem:[%s8644_s3 + $0x50] sm:$0xff]  }
 0x11d   :  { %vm364_vm9 = vcmp.ge.f32.partialorder %v328_v40, 0.0  ;;  %v380_v42 = vmul.f32 0.2, %v328_v40  ;;  %v5565_v43 = vpop.f32.mrb[20].mxu0  ;;  %v395_v47 = vsel %vm363_vm8, %v325_v37, %v379_v39  ;;  %v6763_v37 = vld [vmem:[%s8644_s3 + $0x48] sm:$0xff]   ;;  %v6766_v39 = vld [vmem:[%s8644_s3 + $0x58] sm:$0xff]  }
 0x11e   :  { %v5566_v44 = vpop.f32.mrb[21].mxu0 }
 0x11f   :  { %v5567_v45 = vadd.f32 %v5566_v44, %v5565_v43  ;;  %v5568_v46 = vpop.f32.mrb[22].mxu0  ;;  %v396_v48 = vsel %vm364_vm9, %v328_v40, %v380_v42  ;;  %v6769_v40 = vld [vmem:[%s8644_s3 + $0x60] sm:$0xff]   ;;  %v6770_v42 = vld [vmem:[%s8644_s3 + $0x68] sm:$0xff]   ;;  %v6773_v43 = vld [vmem:[%s8644_s3 + $0x70] sm:$0xff]  }
 0x120   :  { %v5569_v49 = vpop.f32.mrb[23].mxu0  ;;  %v443_v50 = vpack.c.bf16 %v396_v48, %v395_v47  ;;  %v6774_v44 = vld [vmem:[%s8644_s3 + $0x78] sm:$0xff]  }
 0x121   :  { %v333_v51 = vadd.f32 %v5567_v45, %v7226_v41  ;;  %v5570_v52 = vadd.f32 %v5569_v49, %v5568_v46  ;;  %v6777_v45 = vld [vmem:[%s8644_s3 + $0x80] sm:$0xff]   ;;  %v6778_v46 = vld [vmem:[%s8644_s3 + $0x88] sm:$0xff]  }
 0x122   :  { %5941 = vmatprep.subr.bf16.mxu1 %v443_v50  ;;  %v6781_v49 = vld [vmem:[%s8645_s4 + $0xc0] sm:$0xff]  }
 0x123   :  { %vm365_vm10 = vcmp.ge.f32.partialorder %v333_v51, 0.0  ;;  %v381_v53 = vmul.f32 0.2, %v333_v51  ;;  %v336_v54 = vadd.f32 %v5570_v52, %v7226_v41  ;;  %5942 = vmatpush3.bf16.msra.mxu1 %v443_v50 }
 0x125   :  { %vm366_vm11 = vcmp.ge.f32.partialorder %v336_v54, 0.0  ;;  %v382_v55 = vmul.f32 0.2, %v336_v54  ;;  %v5571_v56 = vpop.f32.mrb[24].mxu0  ;;  %v397_v60 = vsel %vm365_vm10, %v333_v51, %v381_v53  ;;  %v6782_v53 = vld [vmem:[%s8645_s4 + $0x80] sm:$0xff]  }
 0x126   :  { %v5572_v57 = vpop.f32.mrb[25].mxu0 }
 0x127   :  { %v5573_v58 = vadd.f32 %v5572_v57, %v5571_v56  ;;  %v5574_v59 = vpop.f32.mrb[26].mxu0  ;;  %v398_v61 = vsel %vm366_vm11, %v336_v54, %v382_v55  ;;  %v6783_v55 = vld [vmem:[%s8645_s4 + $0xc8] sm:$0xff]  }
 0x128   :  { %v5575_v62 = vpop.f32.mrb[27].mxu0  ;;  %v444_v63 = vpack.c.bf16 %v398_v61, %v397_v60  ;;  %v6784_v56 = vld [vmem:[%s8645_s4 + $0x88] sm:$0xff]   ;;  %v6786_v61 = vld [vmem:[%s8645_s4 + $0x90] sm:$0xff]  }
 0x129   :  { %v341_v0 = vadd.f32 %v5573_v58, %v7226_v41  ;;  %v5576_v1 = vadd.f32 %v5575_v62, %v5574_v59  ;;  %v6785_v58 = vld [vmem:[%s8645_s4 + $0xd0] sm:$0xff]  }
 0x12a   :  { %5943 = vmatprep.subr.bf16.mxu1 %v444_v63 }
 0x12b   :  { %vm367_vm12 = vcmp.ge.f32.partialorder %v341_v0, 0.0  ;;  %v383_v2 = vmul.f32 0.2, %v341_v0  ;;  %v344_v3 = vadd.f32 %v5576_v1, %v7226_v41  ;;  %5944 = vmatpush3.bf16.msra.mxu1 %v444_v63  ;;  %v6787_v63 = vld [vmem:[%s8645_s4 + $0xd8] sm:$0xff]  }
 0x12d   :  { %vm368_vm13 = vcmp.ge.f32.partialorder %v344_v3, 0.0  ;;  %v384_v4 = vmul.f32 0.2, %v344_v3  ;;  %v5577_v5 = vpop.f32.mrb[28].mxu0  ;;  %v399_v9 = vsel %vm367_vm12, %v341_v0, %v383_v2  ;;  %v6788_v0 = vld [vmem:[%s8645_s4 + $0x98] sm:$0xff]   ;;  %v6789_v2 = vld [vmem:[%s8645_s4 + $0xe0] sm:$0xff]  }
 0x12e   :  { %v5578_v6 = vpop.f32.mrb[29].mxu0 }
 0x12f   :  { %v5579_v7 = vadd.f32 %v5578_v6, %v5577_v5  ;;  %v5580_v8 = vpop.f32.mrb[30].mxu0  ;;  %v400_v10 = vsel %vm368_vm13, %v344_v3, %v384_v4  ;;  %v6790_v5 = vld [vmem:[%s8645_s4 + $0xa0] sm:$0xff]  }
 0x130   :  { %v5581_v11 = vpop.f32.mrb[31].mxu0  ;;  %v445_v12 = vpack.c.bf16 %v400_v10, %v399_v9  ;;  %v6793_v9 = vld [vmem:[%s8645_s4 + $0xf0] sm:$0xff]  }
 0x131   :  { %v349_v13 = vadd.f32 %v5579_v7, %v7226_v41  ;;  %v5582_v14 = vadd.f32 %v5581_v11, %v5580_v8  ;;  %v6791_v7 = vld [vmem:[%s8645_s4 + $0xe8] sm:$0xff]   ;;  %v6794_v10 = vld [vmem:[%s8645_s4 + $0xb0] sm:$0xff]   ;;  %v6795_v11 = vld [vmem:[%s8645_s4 + $0xf8] sm:$0xff]  }
 0x132   :  { %5945 = vmatprep.subr.bf16.mxu1 %v445_v12  ;;  %v6792_v8 = vld [vmem:[%s8645_s4 + $0xa8] sm:$0xff]  }
 0x133   :  { %vm369_vm14 = vcmp.ge.f32.partialorder %v349_v13, 0.0  ;;  %v385_v15 = vmul.f32 0.2, %v349_v13  ;;  %v352_v16 = vadd.f32 %v5582_v14, %v7226_v41  ;;  %5946 = vmatpush3.bf16.msra.mxu1 %v445_v12  ;;  %v6755_v41 = vld [vmem:[%s8645_s4 + $0x8] sm:$0xff]   ;;  %v6796_v12 = vld [vmem:[%s8645_s4 + $0xb8] sm:$0xff]  }
 0x135   :  { %vm370_vm15 = vcmp.ge.f32.partialorder %v352_v16, 0.0  ;;  %v386_v17 = vmul.f32 0.2, %v352_v16  ;;  %v401_v18 = vsel %vm369_vm14, %v349_v13, %v385_v15  ;;  %v6797_v13 = vld [vmem:[%s8645_s4 + $0x140] sm:$0xff]  }
 0x136   :  { %v6798_v15 = vld [vmem:[%s8645_s4 + $0x100] sm:$0xff]  }
 0x137   :  { %v402_v19 = vsel %vm370_vm15, %v352_v16, %v386_v17  ;;  %v6799_v17 = vld [vmem:[%s8645_s4 + $0x148] sm:$0xff]  }
 0x138   :  { %v446_v20 = vpack.c.bf16 %v402_v19, %v401_v18  ;;  %v6800_v18 = vld [vmem:[%s8645_s4 + $0x108] sm:$0xff]  }
 0x13a   :  { %5947 = vmatprep.subr.bf16.mxu1 %v446_v20 }
 0x13b   :  { %5948 = vmatpush3.bf16.msra.mxu1 %v446_v20  ;;  %v6801_v20 = vld [vmem:[%s8645_s4 + $0x150] sm:$0xff]  }
 0x13c   :  { %6005 = vmatprep.subr.bf16.mxu1 %v7057_v33 }
 0x13e   :  { %5950 = vmatmul.mubr.bf16.vlgmr.msra.gmra.mrb[0].mxu1 %v6748_v21 }
 0x13f   :  { %5953 = vmatprep.mubr.bf16.mxu1 %v6749_v22  ;;  %6006 = vmatpush3.bf16.msra.mxu1 %v6753_v23  ;;  %v6802_v23 = vld [vmem:[%s8645_s4 + $0x110] sm:$0xff]  }
 0x140   :  { %6007 = vmatprep.subr.bf16.mxu1 %v7057_v33 }
 0x143   :  { %6008 = vmatpush3.bf16.msra.mxu1 %v6755_v41 }
 0x144   :  { %6009 = vmatprep.subr.bf16.mxu1 %v7057_v33 }
 0x146   :  { %5954 = vmatmul.mubr.bf16.gmra.mrb[4].mxu1 %v6750_v24  ;;  %v6803_v24 = vld [vmem:[%s8645_s4 + $0x158] sm:$0xff]  }
 0x147   :  { %5957 = vmatprep.mubr.bf16.mxu1 %v6751_v25  ;;  %6010 = vmatpush3.bf16.msra.mxu1 %v6757_v26  ;;  %v6804_v25 = vld [vmem:[%s8645_s4 + $0x118] sm:$0xff]  }
 0x148   :  { %6011 = vmatprep.subr.bf16.mxu1 %v7057_v33 }
 0x14b   :  { %6012 = vmatpush3.bf16.msra.mxu1 %v6762_v27  ;;  %v6805_v27 = vld [vmem:[%s8645_s4 + $0x160] sm:$0xff]  }
 0x14c   :  { %6013 = vmatprep.subr.bf16.mxu1 %v7057_v33 }
 0x14e   :  { %5958 = vmatmul.mubr.bf16.gmra.mrb[8].mxu1 %v6752_v28 }
 0x14f   :  { %5961 = vmatprep.mubr.bf16.mxu1 %v6758_v29  ;;  %6014 = vmatpush3.bf16.msra.mxu1 %v6767_v30  ;;  %v6806_v30 = vld [vmem:[%s8645_s4 + $0x120] sm:$0xff]  }
 0x150   :  { %6015 = vmatprep.subr.bf16.mxu1 %v7057_v33 }
 0x153   :  { %6016 = vmatpush3.bf16.msra.mxu1 %v6771_v31 }
 0x154   :  { %6017 = vmatprep.subr.bf16.mxu1 %v7057_v33 }
 0x156   :  { %5962 = vmatmul.mubr.bf16.gmra.mrb[12].mxu1 %v6759_v32  ;;  %v6807_v32 = vld [vmem:[%s8645_s4 + $0x168] sm:$0xff]  }
 0x157   :  { %5965 = vmatprep.mubr.bf16.mxu1 %v6761_v34  ;;  %6018 = vmatpush3.bf16.msra.mxu1 %v6776_v35  ;;  %v6808_v34 = vld [vmem:[%s8645_s4 + $0x128] sm:$0xff]  }
 0x158   :  { %6019 = vmatprep.subr.bf16.mxu1 %v7057_v33 }
 0x15b   :  { %6020 = vmatpush3.bf16.msra.mxu1 %v6780_v36  ;;  %v6809_v36 = vld [vmem:[%s8645_s4 + $0x170] sm:$0xff]  }
 0x15c   :  { %6045 = vmatprep.subr.bf16.mxu1 %v7057_v33 }
 0x15e   :  { %5966 = vmatmul.mubr.bf16.gmra.mrb[16].mxu1 %v6763_v37 }
 0x15f   :  { %5969 = vmatprep.mubr.bf16.mxu1 %v6765_v38 }
 0x166   :  { %5970 = vmatmul.mubr.bf16.gmra.mrb[20].mxu1 %v6766_v39  ;;  %v6810_v39 = vld [vmem:[%s8645_s4 + $0x130] sm:$0xff]  }
 0x167   :  { %5973 = vmatprep.mubr.bf16.mxu1 %v6769_v40 }
 0x16e   :  { %5974 = vmatmul.mubr.bf16.gmra.mrb[24].mxu1 %v6770_v42  ;;  %v6811_v42 = vld [vmem:[%s8645_s4 + $0x178] sm:$0xff]  }
 0x16f   :  { %5977 = vmatprep.mubr.bf16.mxu1 %v6773_v43  ;;  %v6812_v43 = vld [vmem:[%s8645_s4 + $0x138] sm:$0xff]  }
 0x176   :  { %5978 = vmatmul.mubr.bf16.gmra.mrb[28].mxu1 %v6774_v44 }
 0x177   :  { %5981 = vmatprep.mubr.bf16.mxu1 %v6777_v45 }
 0x17e   :  { %5982 = vmatmul.mubr.bf16.gmra.mrb[32].mxu1 %v6778_v46  ;;  %v6813_v46 = vld [vmem:[%s8645_s4 + $0x1c0] sm:$0xff]  }
 0x17f   :  { %6021 = vmatprep.mubr.msk.bf16.mxu1 %vm7058_vm0, %v7057_v33 }
 0x211   :  { %v7340_v47 = vpop.f32.mrb[0].mxu1 }
 0x212   :  { %v589_v48 = vpop.f32.mrb[1].mxu1  ;;  %v943_v16 = vpack.c.bf16 %v7340_v47, %v7340_v47 }
 0x213   :  { %v732_v50 = vpack.c.bf16 %v589_v48, %v589_v48  ;;  %v7345_v51 = vpop.f32.mrb[2].mxu1 }
 0x214   :  { %v592_v52 = vpop.f32.mrb[3].mxu1  ;;  %v1050_v14 = vpack.c.bf16 %v7345_v51, %v7345_v51 }
 0x215   :  { %v749_v54 = vpack.c.bf16 %v592_v52, %v592_v52  ;;  %6022 = vmatmul.mubr.bf16.vlgmr.msra.gmra.mrb[36].mxu1 %v732_v50  ;;  %v6814_v50 = vld [vmem:[%s8645_s4 + $0x180] sm:$0xff]   ;;  %v6815_v52 = vld [vmem:[%s8645_s4 + $0x1c8] sm:$0xff]  }
 0x216   :  { %6046 = vmatpush3.bf16.msra.mxu1 %v6781_v49  ;;  %6061 = vmatprep.mubr.msk.bf16.mxu1 %vm7058_vm0, %v7057_v33 }
 0x217   :  { %6002 = vmatmul.mubr.bf16.vlgmr.msra.gmra.mrb[32].mxu0 %v749_v54  ;;  %6047 = vmatprep.subr.bf16.mxu1 %v7057_v33 }
 0x218   :  { %6026 = vmatpush3.bf16.msra.mxu0 %v6782_v53  ;;  %6041 = vmatprep.mubr.msk.bf16.mxu0 %vm7058_vm0, %v7057_v33  ;;  %v6816_v53 = vld [vmem:[%s8645_s4 + $0x188] sm:$0xff]  }
 0x219   :  { %6027 = vmatprep.subr.bf16.mxu0 %v7057_v33  ;;  %v7362_v57 = vpop.f32.mrb[4].mxu1 }
 0x21a   :  { %6048 = vmatpush3.bf16.msra.mxu1 %v6783_v55  ;;  %v7367_v59 = vpop.f32.mrb[5].mxu1  ;;  %v6817_v55 = vld [vmem:[%s8645_s4 + $0x1d0] sm:$0xff]  }
 0x21b   :  { %6049 = vmatprep.subr.bf16.mxu1 %v7057_v33  ;;  %v7370_v60 = vpop.f32.mrb[6].mxu1  ;;  %v1157_v48 = vpack.c.bf16 %v7367_v59, %v7367_v59  ;;  %v6818_v59 = vld [vmem:[%s8645_s4 + $0x190] sm:$0xff]  }
 0x21c   :  { %6028 = vmatpush3.bf16.msra.mxu0 %v6784_v56  ;;  %v7375_v62 = vpop.f32.mrb[7].mxu1 }
 0x21d   :  { %6029 = vmatprep.subr.bf16.mxu0 %v7057_v33  ;;  %v1264_v45 = vpack.c.bf16 %v7375_v62, %v7375_v62  ;;  %v6819_v62 = vld [vmem:[%s8645_s4 + $0x1d8] sm:$0xff]  }
 0x21e   :  { %6050 = vmatpush3.bf16.msra.mxu1 %v6785_v58 }
 0x21f   :  { %6051 = vmatprep.subr.bf16.mxu1 %v7057_v33 }
 0x220   :  { %6030 = vmatpush3.bf16.msra.mxu0 %v6786_v61 }
 0x221   :  { %6031 = vmatprep.subr.bf16.mxu0 %v7057_v33  ;;  %v7386_v1 = vpop.f32.mrb[8].mxu1 }
 0x222   :  { %6052 = vmatpush3.bf16.msra.mxu1 %v6787_v63  ;;  %v7391_v3 = vpop.f32.mrb[9].mxu1  ;;  %v6820_v63 = vld [vmem:[%s8645_s4 + $0x198] sm:$0xff]  }
 0x223   :  { %6053 = vmatprep.subr.bf16.mxu1 %v7057_v33  ;;  %v7394_v4 = vpop.f32.mrb[10].mxu1 }
 0x224   :  { %6032 = vmatpush3.bf16.msra.mxu0 %v6788_v0  ;;  %v7399_v6 = vpop.f32.mrb[11].mxu1 }
 0x225   :  { %6033 = vmatprep.subr.bf16.mxu0 %v7057_v33 }
 0x226   :  { %6054 = vmatpush3.bf16.msra.mxu1 %v6789_v2  ;;  %v6821_v2 = vld [vmem:[%s8645_s4 + $0x1e0] sm:$0xff]  }
 0x227   :  { %6055 = vmatprep.subr.bf16.mxu1 %v7057_v33 }
 0x228   :  { %6034 = vmatpush3.bf16.msra.mxu0 %v6790_v5 }
 0x229   :  { %6035 = vmatprep.subr.bf16.mxu0 %v7057_v33  ;;  %v7449_v19 = vpop.f32.mrb[12].mxu1 }
 0x22a   :  { %6056 = vmatpush3.bf16.msra.mxu1 %v6791_v7  ;;  %v7455_v21 = vpop.f32.mrb[13].mxu1 }
 0x22b   :  { %6057 = vmatprep.subr.bf16.mxu1 %v7057_v33  ;;  %v7458_v22 = vpop.f32.mrb[14].mxu1 }
 0x22c   :  { %6036 = vmatpush3.bf16.msra.mxu0 %v6792_v8  ;;  %v7463_v41 = vpop.f32.mrb[15].mxu1  ;;  %v6822_v8 = vld [vmem:[%s8645_s4 + $0x1a0] sm:$0xff]  }
 0x22d   :  { %6037 = vmatprep.subr.bf16.mxu0 %v7057_v33 }
 0x22e   :  { %6058 = vmatpush3.bf16.msra.mxu1 %v6793_v9 }
 0x22f   :  { %6059 = vmatprep.subr.bf16.mxu1 %v7057_v33 }
 0x230   :  { %6038 = vmatpush3.bf16.msra.mxu0 %v6794_v10  ;;  %v6823_v10 = vld [vmem:[%s8645_s4 + $0x1e8] sm:$0xff]  }
 0x231   :  { %6039 = vmatprep.subr.bf16.mxu0 %v7057_v33  ;;  %v7473_v26 = vpop.f32.mrb[16].mxu1 }
 0x232   :  { %6060 = vmatpush3.bf16.msra.mxu1 %v6795_v11  ;;  %v7479_v28 = vpop.f32.mrb[17].mxu1  ;;  %v6824_v11 = vld [vmem:[%s8645_s4 + $0x1a8] sm:$0xff]  }
 0x233   :  { %6085 = vmatprep.subr.bf16.mxu1 %v7057_v33  ;;  %v7482_v29 = vpop.f32.mrb[18].mxu1 }
 0x234   :  { %6040 = vmatpush3.bf16.msra.mxu0 %v6796_v12  ;;  %v7487_v31 = vpop.f32.mrb[19].mxu1  ;;  %v6825_v12 = vld [vmem:[%s8645_s4 + $0x1f0] sm:$0xff]  }
 0x235   :  { %6062 = vmatmul.mubr.bf16.vlgmr.msra.gmra.mrb[40].mxu1 %v1050_v14  ;;  %6065 = vmatprep.subr.bf16.mxu0 %v7057_v33  ;;  %v6827_v14 = vld [vmem:[%s8645_s4 + $0x1f8] sm:$0xff]  }
 0x236   :  { %6086 = vmatpush3.bf16.msra.mxu1 %v6797_v13  ;;  %6101 = vmatprep.mubr.msk.bf16.mxu1 %vm7058_vm0, %v7057_v33  ;;  %v6826_v13 = vld [vmem:[%s8645_s4 + $0x1b0] sm:$0xff]  }
 0x237   :  { %6042 = vmatmul.mubr.bf16.vlgmr.msra.gmra.mrb[36].mxu0 %v943_v16  ;;  %6087 = vmatprep.subr.bf16.mxu1 %v7057_v33  ;;  %v6829_v16 = vld [vmem:[%s8645_s4 + $0x240] sm:$0xff]  }
 0x238   :  { %6066 = vmatpush3.bf16.msra.mxu0 %v6798_v15  ;;  %6081 = vmatprep.mubr.msk.bf16.mxu0 %vm7058_vm0, %v7057_v33  ;;  %v6828_v15 = vld [vmem:[%s8645_s4 + $0x1b8] sm:$0xff]  }
 0x239   :  { %6067 = vmatprep.subr.bf16.mxu0 %v7057_v33  ;;  %v7497_v35 = vpop.f32.mrb[20].mxu1 }
 0x23a   :  { %6088 = vmatpush3.bf16.msra.mxu1 %v6799_v17  ;;  %v7503_v37 = vpop.f32.mrb[21].mxu1  ;;  %v1478_v17 = vpack.c.bf16 %v7370_v60, %v7370_v60  ;;  %v6832_v60 = vld [vmem:[%s8645_s4 + $0x208] sm:$0xff]  }
 0x23b   :  { %6089 = vmatprep.subr.bf16.mxu1 %v7057_v33  ;;  %v7506_v38 = vpop.f32.mrb[22].mxu1 }
 0x23c   :  { %6068 = vmatpush3.bf16.msra.mxu0 %v6800_v18  ;;  %v7511_v40 = vpop.f32.mrb[23].mxu1  ;;  %v6830_v18 = vld [vmem:[%s8645_s4 + $0x200] sm:$0xff]  }
 0x23d   :  { %6069 = vmatprep.subr.bf16.mxu0 %v7057_v33 }
 0x23e   :  { %6090 = vmatpush3.bf16.msra.mxu1 %v6801_v20  ;;  %v1371_v20 = vpack.c.bf16 %v7362_v57, %v7362_v57  ;;  %v6833_v57 = vld [vmem:[%s8645_s4 + $0x250] sm:$0xff]  }
 0x23f   :  { %6091 = vmatprep.subr.bf16.mxu1 %v7057_v33 }
 0x240   :  { %6070 = vmatpush3.bf16.msra.mxu0 %v6802_v23  ;;  %v6831_v23 = vld [vmem:[%s8645_s4 + $0x248] sm:$0xff]  }
 0x241   :  { %6071 = vmatprep.subr.bf16.mxu0 %v7057_v33  ;;  %v7521_v44 = vpop.f32.mrb[24].mxu1 }
 0x242   :  { %6092 = vmatpush3.bf16.msra.mxu1 %v6803_v24  ;;  %v7529_v47 = vpop.f32.mrb[25].mxu1  ;;  %v6834_v24 = vld [vmem:[%s8645_s4 + $0x210] sm:$0xff]  }
 0x243   :  { %6093 = vmatprep.subr.bf16.mxu1 %v7057_v33  ;;  %v7534_v49 = vpop.f32.mrb[26].mxu1 }
 0x244   :  { %6072 = vmatpush3.bf16.msra.mxu0 %v6804_v25  ;;  %v7539_v51 = vpop.f32.mrb[27].mxu1  ;;  %v6835_v25 = vld [vmem:[%s8645_s4 + $0x258] sm:$0xff]  }
 0x245   :  { %6073 = vmatprep.subr.bf16.mxu0 %v7057_v33 }
 0x246   :  { %6094 = vmatpush3.bf16.msra.mxu1 %v6805_v27  ;;  %v6836_v27 = vld [vmem:[%s8645_s4 + $0x218] sm:$0xff]  }
 0x247   :  { %6095 = vmatprep.subr.bf16.mxu1 %v7057_v33 }
 0x248   :  { %6074 = vmatpush3.bf16.msra.mxu0 %v6806_v30  ;;  %v6837_v30 = vld [vmem:[%s8645_s4 + $0x260] sm:$0xff]  }
 0x249   :  { %6075 = vmatprep.subr.bf16.mxu0 %v7057_v33  ;;  %v7553_v54 = vpop.f32.mrb[28].mxu1 }
 0x24a   :  { %6096 = vmatpush3.bf16.msra.mxu1 %v6807_v32  ;;  %v7559_v56 = vpop.f32.mrb[29].mxu1  ;;  %v6838_v32 = vld [vmem:[%s8645_s4 + $0x220] sm:$0xff]  }
 0x24b   :  { %6097 = vmatprep.subr.bf16.mxu1 %v7057_v33  ;;  %v7562_v58 = vpop.f32.mrb[30].mxu1 }
 0x24c   :  { %6076 = vmatpush3.bf16.msra.mxu0 %v6808_v34  ;;  %v7567_v61 = vpop.f32.mrb[31].mxu1  ;;  %v6839_v34 = vld [vmem:[%s8645_s4 + $0x268] sm:$0xff]  }
 0x24d   :  { %6077 = vmatprep.subr.bf16.mxu0 %v7057_v33 }
 0x24e   :  { %6098 = vmatpush3.bf16.msra.mxu1 %v6809_v36  ;;  %v6840_v36 = vld [vmem:[%s8645_s4 + $0x228] sm:$0xff]  }
 0x24f   :  { %6099 = vmatprep.subr.bf16.mxu1 %v7057_v33 }
 0x250   :  { %6078 = vmatpush3.bf16.msra.mxu0 %v6810_v39  ;;  %v6841_v39 = vld [vmem:[%s8645_s4 + $0x270] sm:$0xff]  }
 0x251   :  { %6079 = vmatprep.subr.bf16.mxu0 %v7057_v33  ;;  %v7577_v0 = vpop.f32.mrb[32].mxu1 }
 0x252   :  { %6100 = vmatpush3.bf16.msra.mxu1 %v6811_v42  ;;  %v7583_v5 = vpop.f32.mrb[33].mxu1  ;;  %v6842_v42 = vld [vmem:[%s8645_s4 + $0x230] sm:$0xff]  }
 0x253   :  { %6125 = vmatprep.subr.bf16.mxu1 %v7057_v33  ;;  %v7586_v7 = vpop.f32.mrb[34].mxu1 }
 0x254   :  { %6080 = vmatpush3.bf16.msra.mxu0 %v6812_v43  ;;  %v7591_v9 = vpop.f32.mrb[35].mxu1  ;;  %v6843_v43 = vld [vmem:[%s8645_s4 + $0x278] sm:$0xff]  }
 0x255   :  { %6102 = vmatmul.mubr.bf16.vlgmr.msra.gmra.mrb[44].mxu1 %v1264_v45  ;;  %6105 = vmatprep.subr.bf16.mxu0 %v7057_v33  ;;  %v6844_v45 = vld [vmem:[%s8645_s4 + $0x238] sm:$0xff]  }
 0x256   :  { %6126 = vmatpush3.bf16.msra.mxu1 %v6813_v46  ;;  %6141 = vmatprep.mubr.msk.bf16.mxu1 %vm7058_vm0, %v7057_v33  ;;  %v1692_v46 = vpack.c.bf16 %v7399_v6, %v7399_v6  ;;  %v6847_v6 = vld [vmem:[%s8645_s4 + $0x2c8] sm:$0xff]  }
 0x257   :  { %6082 = vmatmul.mubr.bf16.vlgmr.msra.gmra.mrb[40].mxu0 %v1157_v48  ;;  %6127 = vmatprep.subr.bf16.mxu1 %v7057_v33  ;;  %v6845_v48 = vld [vmem:[%s8645_s4 + $0x2c0] sm:$0xff]  }
 0x258   :  { %6106 = vmatpush3.bf16.msra.mxu0 %v6814_v50  ;;  %6121 = vmatprep.mubr.msk.bf16.mxu0 %vm7058_vm0, %v7057_v33  ;;  %v1585_v50 = vpack.c.bf16 %v7391_v3, %v7391_v3  ;;  %v6848_v3 = vld [vmem:[%s8645_s4 + $0x288] sm:$0xff]  }
 0x259   :  { %6107 = vmatprep.subr.bf16.mxu0 %v7057_v33 }
 0x25a   :  { %6128 = vmatpush3.bf16.msra.mxu1 %v6815_v52  ;;  %v6846_v52 = vld [vmem:[%s8645_s4 + $0x280] sm:$0xff]  }
 0x25b   :  { %6129 = vmatprep.subr.bf16.mxu1 %v7057_v33 }
 0x25c   :  { %6108 = vmatpush3.bf16.msra.mxu0 %v6816_v53  ;;  %v6849_v53 = vld [vmem:[%s8645_s4 + $0x2d0] sm:$0xff]  }
 0x25d   :  { %6109 = vmatprep.subr.bf16.mxu0 %v7057_v33 }
 0x25e   :  { %6130 = vmatpush3.bf16.msra.mxu1 %v6817_v55  ;;  %v6850_v55 = vld [vmem:[%s8645_s4 + $0x290] sm:$0xff]  }
 0x25f   :  { %6131 = vmatprep.subr.bf16.mxu1 %v7057_v33 }
 0x260   :  { %6110 = vmatpush3.bf16.msra.mxu0 %v6818_v59  ;;  %v6851_v59 = vld [vmem:[%s8645_s4 + $0x2d8] sm:$0xff]  }
 0x261   :  { %6111 = vmatprep.subr.bf16.mxu0 %v7057_v33 }
 0x262   :  { %6132 = vmatpush3.bf16.msra.mxu1 %v6819_v62  ;;  %v6852_v62 = vld [vmem:[%s8645_s4 + $0x298] sm:$0xff]  }
 0x263   :  { %6133 = vmatprep.subr.bf16.mxu1 %v7057_v33 }
 0x264   :  { %6112 = vmatpush3.bf16.msra.mxu0 %v6820_v63  ;;  %v6853_v63 = vld [vmem:[%s8645_s4 + $0x2e0] sm:$0xff]  }
 0x265   :  { %6113 = vmatprep.subr.bf16.mxu0 %v7057_v33 }
 0x266   :  { %6134 = vmatpush3.bf16.msra.mxu1 %v6821_v2  ;;  %v6854_v2 = vld [vmem:[%s8645_s4 + $0x2a0] sm:$0xff]  }
 0x267   :  { %6135 = vmatprep.subr.bf16.mxu1 %v7057_v33 }
 0x268   :  { %6114 = vmatpush3.bf16.msra.mxu0 %v6822_v8  ;;  %v6855_v8 = vld [vmem:[%s8645_s4 + $0x2e8] sm:$0xff]  }
 0x269   :  { %6115 = vmatprep.subr.bf16.mxu0 %v7057_v33 }
 0x26a   :  { %6136 = vmatpush3.bf16.msra.mxu1 %v6823_v10  ;;  %v6856_v10 = vld [vmem:[%s8645_s4 + $0x2a8] sm:$0xff]  }
 0x26b   :  { %6137 = vmatprep.subr.bf16.mxu1 %v7057_v33 }
 0x26c   :  { %6116 = vmatpush3.bf16.msra.mxu0 %v6824_v11  ;;  %v6857_v11 = vld [vmem:[%s8645_s4 + $0x2f0] sm:$0xff]  }
 0x26d   :  { %6117 = vmatprep.subr.bf16.mxu0 %v7057_v33 }
 0x26e   :  { %6138 = vmatpush3.bf16.msra.mxu1 %v6825_v12  ;;  %v6858_v12 = vld [vmem:[%s8645_s4 + $0x2b0] sm:$0xff]  }
 0x26f   :  { %6139 = vmatprep.subr.bf16.mxu1 %v7057_v33 }
 0x270   :  { %6118 = vmatpush3.bf16.msra.mxu0 %v6826_v13  ;;  %v6859_v13 = vld [vmem:[%s8645_s4 + $0x2f8] sm:$0xff]  }
 0x271   :  { %6119 = vmatprep.subr.bf16.mxu0 %v7057_v33 }
 0x272   :  { %6140 = vmatpush3.bf16.msra.mxu1 %v6827_v14  ;;  %v6860_v14 = vld [vmem:[%s8645_s4 + $0x2b8] sm:$0xff]  }
 0x273   :  { %6165 = vmatprep.subr.bf16.mxu1 %v7057_v33 }
 0x274   :  { %6120 = vmatpush3.bf16.msra.mxu0 %v6828_v15  ;;  %v6861_v15 = vld [vmem:[%s8645_s4 + $0x340] sm:$0xff]  }
 0x275   :  { %6142 = vmatmul.mubr.bf16.vlgmr.msra.gmra.mrb[48].mxu1 %v1478_v17  ;;  %6145 = vmatprep.subr.bf16.mxu0 %v7057_v33  ;;  %v6862_v17 = vld [vmem:[%s8645_s4 + $0x300] sm:$0xff]  }
 0x276   :  { %6166 = vmatpush3.bf16.msra.mxu1 %v6829_v16  ;;  %6181 = vmatprep.mubr.msk.bf16.mxu1 %vm7058_vm0, %v7057_v33  ;;  %v1906_v16 = vpack.c.bf16 %v7394_v4, %v7394_v4  ;;  %v6864_v4 = vld [vmem:[%s8645_s4 + $0x308] sm:$0xff]  }
 0x277   :  { %6122 = vmatmul.mubr.bf16.vlgmr.msra.gmra.mrb[44].mxu0 %v1371_v20  ;;  %6167 = vmatprep.subr.bf16.mxu1 %v7057_v33  ;;  %v6863_v20 = vld [vmem:[%s8645_s4 + $0x348] sm:$0xff]  }
 0x278   :  { %6146 = vmatpush3.bf16.msra.mxu0 %v6830_v18  ;;  %6161 = vmatprep.mubr.msk.bf16.mxu0 %vm7058_vm0, %v7057_v33  ;;  %v1799_v18 = vpack.c.bf16 %v7386_v1, %v7386_v1  ;;  %v6865_v1 = vld [vmem:[%s8645_s4 + $0x350] sm:$0xff]  }
 0x279   :  { %6147 = vmatprep.subr.bf16.mxu0 %v7057_v33 }
 0x27a   :  { %6168 = vmatpush3.bf16.msra.mxu1 %v6831_v23  ;;  %v6866_v23 = vld [vmem:[%s8645_s4 + $0x310] sm:$0xff]  }
 0x27b   :  { %6169 = vmatprep.subr.bf16.mxu1 %v7057_v33 }
 0x27c   :  { %6148 = vmatpush3.bf16.msra.mxu0 %v6832_v60  ;;  %v6867_v60 = vld [vmem:[%s8645_s4 + $0x358] sm:$0xff]  }
 0x27d   :  { %6149 = vmatprep.subr.bf16.mxu0 %v7057_v33 }
 0x27e   :  { %6170 = vmatpush3.bf16.msra.mxu1 %v6833_v57  ;;  %v6868_v57 = vld [vmem:[%s8645_s4 + $0x318] sm:$0xff]  }
 0x27f   :  { %6171 = vmatprep.subr.bf16.mxu1 %v7057_v33 }
 0x280   :  { %6150 = vmatpush3.bf16.msra.mxu0 %v6834_v24  ;;  %v6869_v24 = vld [vmem:[%s8645_s4 + $0x360] sm:$0xff]  }
 0x281   :  { %6151 = vmatprep.subr.bf16.mxu0 %v7057_v33 }
 0x282   :  { %6172 = vmatpush3.bf16.msra.mxu1 %v6835_v25  ;;  %v6870_v25 = vld [vmem:[%s8645_s4 + $0x320] sm:$0xff]  }
 0x283   :  { %6173 = vmatprep.subr.bf16.mxu1 %v7057_v33 }
 0x284   :  { %6152 = vmatpush3.bf16.msra.mxu0 %v6836_v27  ;;  %v6871_v27 = vld [vmem:[%s8645_s4 + $0x368] sm:$0xff]  }
 0x285   :  { %6153 = vmatprep.subr.bf16.mxu0 %v7057_v33 }
 0x286   :  { %6174 = vmatpush3.bf16.msra.mxu1 %v6837_v30  ;;  %v6872_v30 = vld [vmem:[%s8645_s4 + $0x328] sm:$0xff]  }
 0x287   :  { %6175 = vmatprep.subr.bf16.mxu1 %v7057_v33 }
 0x288   :  { %6154 = vmatpush3.bf16.msra.mxu0 %v6838_v32  ;;  %v6873_v32 = vld [vmem:[%s8645_s4 + $0x370] sm:$0xff]  }
 0x289   :  { %6155 = vmatprep.subr.bf16.mxu0 %v7057_v33 }
 0x28a   :  { %6176 = vmatpush3.bf16.msra.mxu1 %v6839_v34  ;;  %v6874_v34 = vld [vmem:[%s8645_s4 + $0x330] sm:$0xff]  }
 0x28b   :  { %6177 = vmatprep.subr.bf16.mxu1 %v7057_v33 }
 0x28c   :  { %6156 = vmatpush3.bf16.msra.mxu0 %v6840_v36  ;;  %v6875_v36 = vld [vmem:[%s8645_s4 + $0x378] sm:$0xff]  }
 0x28d   :  { %6157 = vmatprep.subr.bf16.mxu0 %v7057_v33 }
 0x28e   :  { %6178 = vmatpush3.bf16.msra.mxu1 %v6841_v39  ;;  %v6876_v39 = vld [vmem:[%s8645_s4 + $0x338] sm:$0xff]  }
 0x28f   :  { %6179 = vmatprep.subr.bf16.mxu1 %v7057_v33 }
 0x290   :  { %6158 = vmatpush3.bf16.msra.mxu0 %v6842_v42  ;;  %v6877_v42 = vld [vmem:[%s8645_s4 + $0x3c0] sm:$0xff]  }
 0x291   :  { %6159 = vmatprep.subr.bf16.mxu0 %v7057_v33 }
 0x292   :  { %6180 = vmatpush3.bf16.msra.mxu1 %v6843_v43  ;;  %v2120_v43 = vpack.c.bf16 %v7463_v41, %v7463_v41  ;;  %v6880_v41 = vld [vmem:[%s8645_s4 + $0x388] sm:$0xff]  }
 0x293   :  { %6205 = vmatprep.subr.bf16.mxu1 %v7057_v33 }
 0x294   :  { %6160 = vmatpush3.bf16.msra.mxu0 %v6844_v45  ;;  %v6878_v45 = vld [vmem:[%s8645_s4 + $0x380] sm:$0xff]  }
 0x295   :  { %6182 = vmatmul.mubr.bf16.vlgmr.msra.gmra.mrb[52].mxu1 %v1692_v46  ;;  %6185 = vmatprep.subr.bf16.mxu0 %v7057_v33  ;;  %v2013_v46 = vpack.c.bf16 %v7455_v21, %v7455_v21  ;;  %v6881_v21 = vld [vmem:[%s8645_s4 + $0x3d0] sm:$0xff]  }
 0x296   :  { %6206 = vmatpush3.bf16.msra.mxu1 %v6845_v48  ;;  %6221 = vmatprep.mubr.msk.bf16.mxu1 %vm7058_vm0, %v7057_v33  ;;  %v6879_v48 = vld [vmem:[%s8645_s4 + $0x3c8] sm:$0xff]  }
 0x297   :  { %6162 = vmatmul.mubr.bf16.vlgmr.msra.gmra.mrb[48].mxu0 %v1585_v50  ;;  %6207 = vmatprep.subr.bf16.mxu1 %v7057_v33  ;;  %v6882_v50 = vld [vmem:[%s8645_s4 + $0x390] sm:$0xff]  }
 0x298   :  { %6186 = vmatpush3.bf16.msra.mxu0 %v6846_v52  ;;  %6201 = vmatprep.mubr.msk.bf16.mxu0 %vm7058_vm0, %v7057_v33  ;;  %v6883_v52 = vld [vmem:[%s8645_s4 + $0x3d8] sm:$0xff]  }
 0x299   :  { %6187 = vmatprep.subr.bf16.mxu0 %v7057_v33 }
 0x29a   :  { %6208 = vmatpush3.bf16.msra.mxu1 %v6847_v6  ;;  %v6884_v6 = vld [vmem:[%s8645_s4 + $0x398] sm:$0xff]  }
 0x29b   :  { %6209 = vmatprep.subr.bf16.mxu1 %v7057_v33 }
 0x29c   :  { %6188 = vmatpush3.bf16.msra.mxu0 %v6848_v3  ;;  %v6885_v3 = vld [vmem:[%s8645_s4 + $0x3e0] sm:$0xff]  }
 0x29d   :  { %6189 = vmatprep.subr.bf16.mxu0 %v7057_v33 }
 0x29e   :  { %6210 = vmatpush3.bf16.msra.mxu1 %v6849_v53  ;;  %v6886_v53 = vld [vmem:[%s8645_s4 + $0x3a0] sm:$0xff]  }
 0x29f   :  { %6211 = vmatprep.subr.bf16.mxu1 %v7057_v33 }
 0x2a0   :  { %6190 = vmatpush3.bf16.msra.mxu0 %v6850_v55  ;;  %v6887_v55 = vld [vmem:[%s8645_s4 + $0x3e8] sm:$0xff]  }
 0x2a1   :  { %6191 = vmatprep.subr.bf16.mxu0 %v7057_v33 }
 0x2a2   :  { %6212 = vmatpush3.bf16.msra.mxu1 %v6851_v59 }
 0x2a3   :  { %6213 = vmatprep.subr.bf16.mxu1 %v7057_v33 }
 0x2a4   :  { %6192 = vmatpush3.bf16.msra.mxu0 %v6852_v62  ;;  %v6888_v62 = vld [vmem:[%s8645_s4 + $0x3a8] sm:$0xff]  }
 0x2a5   :  { %6193 = vmatprep.subr.bf16.mxu0 %v7057_v33 }
 0x2a6   :  { %6214 = vmatpush3.bf16.msra.mxu1 %v6853_v63 }
 0x2a7   :  { %6215 = vmatprep.subr.bf16.mxu1 %v7057_v33 }
 0x2a8   :  { %6194 = vmatpush3.bf16.msra.mxu0 %v6854_v2 }
 0x2a9   :  { %6195 = vmatprep.subr.bf16.mxu0 %v7057_v33 }
 0x2aa   :  { %6216 = vmatpush3.bf16.msra.mxu1 %v6855_v8 }
 0x2ab   :  { %6217 = vmatprep.subr.bf16.mxu1 %v7057_v33 }
 0x2ac   :  { %6196 = vmatpush3.bf16.msra.mxu0 %v6856_v10  ;;  %v6889_v10 = vld [vmem:[%s8645_s4 + $0x3f0] sm:$0xff]  }
 0x2ad   :  { %6197 = vmatprep.subr.bf16.mxu0 %v7057_v33 }
 0x2ae   :  { %6218 = vmatpush3.bf16.msra.mxu1 %v6857_v11 }
 0x2af   :  { %6219 = vmatprep.subr.bf16.mxu1 %v7057_v33 }
 0x2b0   :  { %6198 = vmatpush3.bf16.msra.mxu0 %v6858_v12 }
 0x2b1   :  { %6199 = vmatprep.subr.bf16.mxu0 %v7057_v33 }
 0x2b2   :  { %6220 = vmatpush3.bf16.msra.mxu1 %v6859_v13 }
 0x2b3   :  { %6245 = vmatprep.subr.bf16.mxu1 %v7057_v33 }
 0x2b4   :  { %6200 = vmatpush3.bf16.msra.mxu0 %v6860_v14 }
 0x2b5   :  { %6222 = vmatmul.mubr.bf16.vlgmr.msra.gmra.mrb[56].mxu1 %v1906_v16  ;;  %6225 = vmatprep.subr.bf16.mxu0 %v7057_v33 }
 0x2b6   :  { %6246 = vmatpush3.bf16.msra.mxu1 %v6861_v15  ;;  %6261 = vmatprep.mubr.msk.bf16.mxu1 %vm7058_vm0, %v7057_v33  ;;  %v6890_v15 = vld [vmem:[%s8645_s4 + $0x3b0] sm:$0xff]  }
 0x2b7   :  { %6202 = vmatmul.mubr.bf16.vlgmr.msra.gmra.mrb[52].mxu0 %v1799_v18  ;;  %6247 = vmatprep.subr.bf16.mxu1 %v7057_v33  ;;  %v6892_v18 = vld [vmem:[%s8645_s4 + $0x3b8] sm:$0xff]  }
 0x2b8   :  { %6226 = vmatpush3.bf16.msra.mxu0 %v6862_v17  ;;  %6241 = vmatprep.mubr.msk.bf16.mxu0 %vm7058_vm0, %v7057_v33  ;;  %v6891_v17 = vld [vmem:[%s8645_s4 + $0x3f8] sm:$0xff]  }
 0x2b9   :  { %6227 = vmatprep.subr.bf16.mxu0 %v7057_v33 }
 0x2ba   :  { %6248 = vmatpush3.bf16.msra.mxu1 %v6863_v20  ;;  %v6893_v20 = vld [vmem:[%s8645_s4 + $0x440] sm:$0xff]  }
 0x2bb   :  { %6249 = vmatprep.subr.bf16.mxu1 %v7057_v33 }
 0x2bc   :  { %6228 = vmatpush3.bf16.msra.mxu0 %v6864_v4  ;;  %v2334_v4 = vpack.c.bf16 %v7458_v22, %v7458_v22  ;;  %v6896_v22 = vld [vmem:[%s8645_s4 + $0x408] sm:$0xff]  }
 0x2bd   :  { %6229 = vmatprep.subr.bf16.mxu0 %v7057_v33 }
 0x2be   :  { %6250 = vmatpush3.bf16.msra.mxu1 %v6865_v1  ;;  %v6894_v1 = vld [vmem:[%s8645_s4 + $0x400] sm:$0xff]  }
 0x2bf   :  { %6251 = vmatprep.subr.bf16.mxu1 %v7057_v33 }
 0x2c0   :  { %6230 = vmatpush3.bf16.msra.mxu0 %v6866_v23  ;;  %v2227_v23 = vpack.c.bf16 %v7449_v19, %v7449_v19  ;;  %v6897_v19 = vld [vmem:[%s8645_s4 + $0x450] sm:$0xff]  }
 0x2c1   :  { %6231 = vmatprep.subr.bf16.mxu0 %v7057_v33 }
 0x2c2   :  { %6252 = vmatpush3.bf16.msra.mxu1 %v6867_v60  ;;  %v6895_v60 = vld [vmem:[%s8645_s4 + $0x448] sm:$0xff]  }
 0x2c3   :  { %6253 = vmatprep.subr.bf16.mxu1 %v7057_v33 }
 0x2c4   :  { %6232 = vmatpush3.bf16.msra.mxu0 %v6868_v57  ;;  %v6898_v57 = vld [vmem:[%s8645_s4 + $0x410] sm:$0xff]  }
 0x2c5   :  { %6233 = vmatprep.subr.bf16.mxu0 %v7057_v33 }
 0x2c6   :  { %6254 = vmatpush3.bf16.msra.mxu1 %v6869_v24  ;;  %v6899_v24 = vld [vmem:[%s8645_s4 + $0x458] sm:$0xff]  }
 0x2c7   :  { %6255 = vmatprep.subr.bf16.mxu1 %v7057_v33 }
 0x2c8   :  { %6234 = vmatpush3.bf16.msra.mxu0 %v6870_v25  ;;  %v6900_v25 = vld [vmem:[%s8645_s4 + $0x418] sm:$0xff]  }
 0x2c9   :  { %6235 = vmatprep.subr.bf16.mxu0 %v7057_v33 }
 0x2ca   :  { %6256 = vmatpush3.bf16.msra.mxu1 %v6871_v27  ;;  %v6901_v27 = vld [vmem:[%s8645_s4 + $0x460] sm:$0xff]  }
 0x2cb   :  { %6257 = vmatprep.subr.bf16.mxu1 %v7057_v33 }
 0x2cc   :  { %6236 = vmatpush3.bf16.msra.mxu0 %v6872_v30  ;;  %v6902_v30 = vld [vmem:[%s8645_s4 + $0x420] sm:$0xff]  }
 0x2cd   :  { %6237 = vmatprep.subr.bf16.mxu0 %v7057_v33 }
 0x2ce   :  { %6258 = vmatpush3.bf16.msra.mxu1 %v6873_v32  ;;  %v6903_v32 = vld [vmem:[%s8645_s4 + $0x468] sm:$0xff]  }
 0x2cf   :  { %6259 = vmatprep.subr.bf16.mxu1 %v7057_v33 }
 0x2d0   :  { %6238 = vmatpush3.bf16.msra.mxu0 %v6874_v34 }
 0x2d1   :  { %6239 = vmatprep.subr.bf16.mxu0 %v7057_v33 }
 0x2d2   :  { %6260 = vmatpush3.bf16.msra.mxu1 %v6875_v36  ;;  %v6904_v36 = vld [vmem:[%s8645_s4 + $0x428] sm:$0xff]  }
 0x2d3   :  { %6285 = vmatprep.subr.bf16.mxu1 %v7057_v33 }
 0x2d4   :  { %6240 = vmatpush3.bf16.msra.mxu0 %v6876_v39 }
 0x2d5   :  { %6262 = vmatmul.mubr.bf16.vlgmr.msra.gmra.mrb[60].mxu1 %v2120_v43  ;;  %6265 = vmatprep.subr.bf16.mxu0 %v7057_v33 }
 0x2d6   :  { %6286 = vmatpush3.bf16.msra.mxu1 %v6877_v42  ;;  %6301 = vmatprep.mubr.msk.bf16.mxu1 %vm7058_vm0, %v7057_v33 }
 0x2d7   :  { %6242 = vmatmul.mubr.bf16.vlgmr.msra.gmra.mrb[56].mxu0 %v2013_v46  ;;  %6287 = vmatprep.subr.bf16.mxu1 %v7057_v33 }
 0x2d8   :  { %6266 = vmatpush3.bf16.msra.mxu0 %v6878_v45  ;;  %6281 = vmatprep.mubr.msk.bf16.mxu0 %vm7058_vm0, %v7057_v33  ;;  %v6905_v45 = vld [vmem:[%s8645_s4 + $0x470] sm:$0xff]  }
 0x2d9   :  { %6267 = vmatprep.subr.bf16.mxu0 %v7057_v33 }
 0x2da   :  { %6288 = vmatpush3.bf16.msra.mxu1 %v6879_v48 }
 0x2db   :  { %6289 = vmatprep.subr.bf16.mxu1 %v7057_v33 }
 0x2dc   :  { %6268 = vmatpush3.bf16.msra.mxu0 %v6880_v41 }
 0x2dd   :  { %6269 = vmatprep.subr.bf16.mxu0 %v7057_v33 }
 0x2de   :  { %6290 = vmatpush3.bf16.msra.mxu1 %v6881_v21 }
 0x2df   :  { %6291 = vmatprep.subr.bf16.mxu1 %v7057_v33 }
 0x2e0   :  { %6270 = vmatpush3.bf16.msra.mxu0 %v6882_v50  ;;  %v6906_v50 = vld [vmem:[%s8645_s4 + $0x430] sm:$0xff]  }
 0x2e1   :  { %6271 = vmatprep.subr.bf16.mxu0 %v7057_v33 }
 0x2e2   :  { %6292 = vmatpush3.bf16.msra.mxu1 %v6883_v52 }
 0x2e3   :  { %6293 = vmatprep.subr.bf16.mxu1 %v7057_v33 }
 0x2e4   :  { %6272 = vmatpush3.bf16.msra.mxu0 %v6884_v6 }
 0x2e5   :  { %6273 = vmatprep.subr.bf16.mxu0 %v7057_v33 }
 0x2e6   :  { %6294 = vmatpush3.bf16.msra.mxu1 %v6885_v3  ;;  %v6907_v3 = vld [vmem:[%s8645_s4 + $0x478] sm:$0xff]  }
 0x2e7   :  { %6295 = vmatprep.subr.bf16.mxu1 %v7057_v33 }
 0x2e8   :  { %6274 = vmatpush3.bf16.msra.mxu0 %v6886_v53  ;;  %v937_v59 = vpop.f32.mrb[36].mxu1  ;;  %v6908_v53 = vld [vmem:[%s8645_s4 + $0x438] sm:$0xff]  }
 0x2e9   :  { %v6023_v63 = vpop.f32.mrb[37].mxu1  ;;  %6275 = vmatprep.subr.bf16.mxu0 %v7057_v33 }
 0x2ea   :  { %6296 = vmatpush3.bf16.msra.mxu1 %v6887_v55  ;;  %v849_v2 = vpop.f32.mrb[32].mxu0  ;;  %v940_v8 = vpop.f32.mrb[38].mxu1  ;;  %v6909_v55 = vld [vmem:[%s8645_s4 + $0x4c0] sm:$0xff]   ;;  %v2441_v63 = vpack.c.bf16 %v7479_v28, %v7479_v28  ;;  %v6913_v28 = vld [vmem:[%s8645_s4 + $0x4d0] sm:$0xff]  }
 0x2eb   :  { %v7893_v11 = vadd.f32 %v937_v59, %v849_v2  ;;  %v6003_v12 = vpop.f32.mrb[33].mxu0  ;;  %v6024_v13 = vpop.f32.mrb[39].mxu1  ;;  %6297 = vmatprep.subr.bf16.mxu1 %v7057_v33  ;;  %v2548_v59 = vpack.c.bf16 %v7487_v31, %v7487_v31  ;;  %v6911_v2 = vld [vmem:[%s8645_s4 + $0x4c8] sm:$0xff]   ;;  %v6914_v8 = vld [vmem:[%s8645_s4 + $0x490] sm:$0xff]  }
 0x2ec   :  { %6276 = vmatpush3.bf16.msra.mxu0 %v6888_v62  ;;  %v852_v14 = vpop.f32.mrb[34].mxu0  ;;  %v6910_v62 = vld [vmem:[%s8645_s4 + $0x480] sm:$0xff]   ;;  %v6912_v31 = vld [vmem:[%s8645_s4 + $0x488] sm:$0xff]  }
 0x2ed   :  { %v6004_v16 = vpop.f32.mrb[35].mxu0  ;;  %6277 = vmatprep.subr.bf16.mxu0 %v7057_v33  ;;  %v6917_v12 = vld [vmem:[%s8645_s4 + $0x4e0] sm:$0xff]   ;;  %v6919_v14 = vld [vmem:[%s8645_s4 + $0x4e8] sm:$0xff]  }
 0x2ee   :  { %6298 = vmatpush3.bf16.msra.mxu1 %v6889_v10  ;;  %v6915_v10 = vld [vmem:[%s8645_s4 + $0x4d8] sm:$0xff]   ;;  %v6918_v13 = vld [vmem:[%s8645_s4 + $0x4a0] sm:$0xff]   ;;  %v6920_v16 = vld [vmem:[%s8645_s4 + $0x4a8] sm:$0xff]  }
 0x2ef   :  { %6299 = vmatprep.subr.bf16.mxu1 %v7057_v33 }
 0x2f0   :  { %6278 = vmatpush3.bf16.msra.mxu0 %v6890_v15 }
 0x2f1   :  { %6279 = vmatprep.subr.bf16.mxu0 %v7057_v33 }
 0x2f2   :  { %6300 = vmatpush3.bf16.msra.mxu1 %v6891_v17 }
 0x2f3   :  { %6325 = vmatprep.subr.bf16.mxu1 %v7057_v33 }
 0x2f4   :  { %6280 = vmatpush3.bf16.msra.mxu0 %v6892_v18 }
 0x2f5   :  { %6302 = vmatmul.mubr.bf16.vlgmr.msra.gmra.mrb[64].mxu1 %v2334_v4  ;;  %6305 = vmatprep.subr.bf16.mxu0 %v7057_v33  ;;  %v6921_v4 = vld [vmem:[%s8645_s4 + $0x4f0] sm:$0xff]  }
 0x2f6   :  { %6326 = vmatpush3.bf16.msra.mxu1 %v6893_v20  ;;  %6341 = vmatprep.mubr.msk.bf16.mxu1 %vm7058_vm0, %v7057_v33 }
 0x2f7   :  { %6282 = vmatmul.mubr.bf16.vlgmr.msra.gmra.mrb[60].mxu0 %v2227_v23  ;;  %6327 = vmatprep.subr.bf16.mxu1 %v7057_v33 }
 0x2f8   :  { %6306 = vmatpush3.bf16.msra.mxu0 %v6894_v1  ;;  %6321 = vmatprep.mubr.msk.bf16.mxu0 %vm7058_vm0, %v7057_v33 }
 0x2f9   :  { %6307 = vmatprep.subr.bf16.mxu0 %v7057_v33 }
 0x2fa   :  { %6328 = vmatpush3.bf16.msra.mxu1 %v6895_v60 }
 0x2fb   :  { %6329 = vmatprep.subr.bf16.mxu1 %v7057_v33 }
 0x2fc   :  { %6308 = vmatpush3.bf16.msra.mxu0 %v6896_v22 }
 0x2fd   :  { %6309 = vmatprep.subr.bf16.mxu0 %v7057_v33 }
 0x2fe   :  { %6330 = vmatpush3.bf16.msra.mxu1 %v6897_v19  ;;  %v6922_v19 = vld [vmem:[%s8645_s4 + $0x4b0] sm:$0xff]  }
 0x2ff   :  { %6331 = vmatprep.subr.bf16.mxu1 %v7057_v33 }
 0x300   :  { %6310 = vmatpush3.bf16.msra.mxu0 %v6898_v57 }
 0x301   :  { %6311 = vmatprep.subr.bf16.mxu0 %v7057_v33 }
 0x302   :  { %6332 = vmatpush3.bf16.msra.mxu1 %v6899_v24 }
 0x303   :  { %6333 = vmatprep.subr.bf16.mxu1 %v7057_v33 }
 0x304   :  { %6312 = vmatpush3.bf16.msra.mxu0 %v6900_v25  ;;  %v6923_v25 = vld [vmem:[%s8645_s4 + $0x4f8] sm:$0xff]  }
 0x305   :  { %6313 = vmatprep.subr.bf16.mxu0 %v7057_v33 }
 0x306   :  { %6334 = vmatpush3.bf16.msra.mxu1 %v6901_v27  ;;  %v6924_v27 = vld [vmem:[%s8645_s4 + $0x4b8] sm:$0xff]  }
 0x307   :  { %6335 = vmatprep.subr.bf16.mxu1 %v7057_v33 }
 0x308   :  { %v1150_v34 = vpop.f32.mrb[40].mxu1  ;;  %6314 = vmatpush3.bf16.msra.mxu0 %v6902_v30  ;;  %v6925_v30 = vld [vmem:[%s8645_s4 + $0x540] sm:$0xff]  }
 0x309   :  { %v6063_v39 = vpop.f32.mrb[41].mxu1  ;;  %6315 = vmatprep.subr.bf16.mxu0 %v7057_v33 }
 0x30a   :  { %v1043_v42 = vpop.f32.mrb[36].mxu0  ;;  %v1153_v43 = vpop.f32.mrb[42].mxu1  ;;  %6336 = vmatpush3.bf16.msra.mxu1 %v6903_v32  ;;  %v2762_v32 = vpack.c.bf16 %v7482_v29, %v7482_v29  ;;  %v6927_v39 = vld [vmem:[%s8645_s4 + $0x548] sm:$0xff]  }
 0x30b   :  { %v1049_v46 = vadd.f32 %v1043_v42, %v7893_v11  ;;  %v6043_v48 = vpop.f32.mrb[37].mxu0  ;;  %v6064_v41 = vpop.f32.mrb[43].mxu1  ;;  %6337 = vmatprep.subr.bf16.mxu1 %v7057_v33  ;;  %v6916_v11 = vld [vmem:[%s8645_s4 + $0x498] sm:$0xff]   ;;  %v6928_v29 = vld [vmem:[%s8645_s4 + $0x508] sm:$0xff]   ;;  %v6930_v42 = vld [vmem:[%s8645_s4 + $0x510] sm:$0xff]  }
 0x30c   :  { %v1046_v21 = vpop.f32.mrb[38].mxu0  ;;  %6316 = vmatpush3.bf16.msra.mxu0 %v6904_v36  ;;  %v2655_v36 = vpack.c.bf16 %v7473_v26, %v7473_v26  ;;  %v6929_v26 = vld [vmem:[%s8645_s4 + $0x550] sm:$0xff]   ;;  %v6931_v43 = vld [vmem:[%s8645_s4 + $0x558] sm:$0xff]   ;;  %v6934_v48 = vld [vmem:[%s8645_s4 + $0x520] sm:$0xff]  }
 0x30d   :  { %v6044_v52 = vpop.f32.mrb[39].mxu0  ;;  %6317 = vmatprep.subr.bf16.mxu0 %v7057_v33  ;;  %v1156_v6 = vadd.f32 %v1150_v34, %v1049_v46  ;;  %v6926_v34 = vld [vmem:[%s8645_s4 + $0x500] sm:$0xff]   ;;  %v6935_v41 = vld [vmem:[%s8645_s4 + $0x568] sm:$0xff]  }
 0x30e   :  { %6338 = vmatpush3.bf16.msra.mxu1 %v6905_v45  ;;  %v6932_v45 = vld [vmem:[%s8645_s4 + $0x518] sm:$0xff]   ;;  %v6933_v46 = vld [vmem:[%s8645_s4 + $0x560] sm:$0xff]  }
 0x30f   :  { %6339 = vmatprep.subr.bf16.mxu1 %v7057_v33 }
 0x310   :  { %6318 = vmatpush3.bf16.msra.mxu0 %v6906_v50  ;;  %v6936_v50 = vld [vmem:[%s8645_s4 + $0x528] sm:$0xff]  }
 0x311   :  { %6319 = vmatprep.subr.bf16.mxu0 %v7057_v33 }
 0x312   :  { %6340 = vmatpush3.bf16.msra.mxu1 %v6907_v3 }
 0x313   :  { %6365 = vmatprep.subr.bf16.mxu1 %v7057_v33 }
 0x314   :  { %6320 = vmatpush3.bf16.msra.mxu0 %v6908_v53  ;;  %v6937_v53 = vld [vmem:[%s8645_s4 + $0x570] sm:$0xff]  }
 0x315   :  { %6342 = vmatmul.mubr.bf16.vlgmr.msra.gmra.mrb[68].mxu1 %v2548_v59  ;;  %6345 = vmatprep.subr.bf16.mxu0 %v7057_v33 }
 0x316   :  { %6366 = vmatpush3.bf16.msra.mxu1 %v6909_v55  ;;  %6381 = vmatprep.mubr.msk.bf16.mxu1 %vm7058_vm0, %v7057_v33 }
 0x317   :  { %6322 = vmatmul.mubr.bf16.vlgmr.msra.gmra.mrb[64].mxu0 %v2441_v63  ;;  %6367 = vmatprep.subr.bf16.mxu1 %v7057_v33 }
 0x318   :  { %6346 = vmatpush3.bf16.msra.mxu0 %v6910_v62  ;;  %6361 = vmatprep.mubr.msk.bf16.mxu0 %vm7058_vm0, %v7057_v33 }
 0x319   :  { %6347 = vmatprep.subr.bf16.mxu0 %v7057_v33 }
 0x31a   :  { %6368 = vmatpush3.bf16.msra.mxu1 %v6911_v2  ;;  %v6938_v2 = vld [vmem:[%s8645_s4 + $0x530] sm:$0xff]  }
 0x31b   :  { %6369 = vmatprep.subr.bf16.mxu1 %v7057_v33 }
 0x31c   :  { %6348 = vmatpush3.bf16.msra.mxu0 %v6912_v31 }
 0x31d   :  { %6349 = vmatprep.subr.bf16.mxu0 %v7057_v33 }
 0x31e   :  { %6370 = vmatpush3.bf16.msra.mxu1 %v6913_v28 }
 0x31f   :  { %6371 = vmatprep.subr.bf16.mxu1 %v7057_v33 }
 0x320   :  { %6350 = vmatpush3.bf16.msra.mxu0 %v6914_v8  ;;  %v6939_v8 = vld [vmem:[%s8645_s4 + $0x578] sm:$0xff]  }
 0x321   :  { %6351 = vmatprep.subr.bf16.mxu0 %v7057_v33 }
 0x322   :  { %6372 = vmatpush3.bf16.msra.mxu1 %v6915_v10  ;;  %v6940_v10 = vld [vmem:[%s8645_s4 + $0x538] sm:$0xff]  }
 0x323   :  { %6373 = vmatprep.subr.bf16.mxu1 %v7057_v33 }
 0x324   :  { %6352 = vmatpush3.bf16.msra.mxu0 %v6916_v11  ;;  %v6941_v11 = vld [vmem:[%s8645_s4 + $0x5c0] sm:$0xff]  }
 0x325   :  { %6353 = vmatprep.subr.bf16.mxu0 %v7057_v33 }
 0x326   :  { %6374 = vmatpush3.bf16.msra.mxu1 %v6917_v12  ;;  %v2976_v12 = vpack.c.bf16 %v7511_v40, %v7511_v40  ;;  %v6944_v40 = vld [vmem:[%s8645_s4 + $0x588] sm:$0xff]  }
 0x327   :  { %6375 = vmatprep.subr.bf16.mxu1 %v7057_v33 }
 0x328   :  { %v1364_v15 = vpop.f32.mrb[44].mxu1  ;;  %6354 = vmatpush3.bf16.msra.mxu0 %v6918_v13  ;;  %v6942_v13 = vld [vmem:[%s8645_s4 + $0x580] sm:$0xff]  }
 0x329   :  { %v6103_v17 = vpop.f32.mrb[45].mxu1  ;;  %6355 = vmatprep.subr.bf16.mxu0 %v7057_v33 }
 0x32a   :  { %v1257_v18 = vpop.f32.mrb[40].mxu0  ;;  %v1367_v20 = vpop.f32.mrb[46].mxu1  ;;  %6376 = vmatpush3.bf16.msra.mxu1 %v6919_v14  ;;  %v2869_v14 = vpack.c.bf16 %v7503_v37, %v7503_v37  ;;  %v6945_v37 = vld [vmem:[%s8645_s4 + $0x5d0] sm:$0xff]   ;;  %v6947_v17 = vld [vmem:[%s8645_s4 + $0x5d8] sm:$0xff]  }
 0x32b   :  { %v1263_v1 = vadd.f32 %v1257_v18, %v1156_v6  ;;  %v6083_v23 = vpop.f32.mrb[41].mxu0  ;;  %v6104_v60 = vpop.f32.mrb[47].mxu1  ;;  %6377 = vmatprep.subr.bf16.mxu1 %v7057_v33  ;;  %v6948_v18 = vld [vmem:[%s8645_s4 + $0x598] sm:$0xff]   ;;  %v6949_v20 = vld [vmem:[%s8645_s4 + $0x5e0] sm:$0xff]  }
 0x32c   :  { %v1260_v22 = vpop.f32.mrb[42].mxu0  ;;  %6356 = vmatpush3.bf16.msra.mxu0 %v6920_v16  ;;  %v6946_v16 = vld [vmem:[%s8645_s4 + $0x590] sm:$0xff]   ;;  %v6952_v60 = vld [vmem:[%s8645_s4 + $0x5a8] sm:$0xff]  }
 0x32d   :  { %v6084_v57 = vpop.f32.mrb[43].mxu0  ;;  %6357 = vmatprep.subr.bf16.mxu0 %v7057_v33  ;;  %v1370_v24 = vadd.f32 %v1364_v15, %v1263_v1  ;;  %v6943_v15 = vld [vmem:[%s8645_s4 + $0x5c8] sm:$0xff]  }
 0x32e   :  { %6378 = vmatpush3.bf16.msra.mxu1 %v6921_v4  ;;  %v6950_v4 = vld [vmem:[%s8645_s4 + $0x5a0] sm:$0xff]   ;;  %v6951_v1 = vld [vmem:[%s8645_s4 + $0x5e8] sm:$0xff]  }
 0x32f   :  { %6379 = vmatprep.subr.bf16.mxu1 %v7057_v33 }
 0x330   :  { %6358 = vmatpush3.bf16.msra.mxu0 %v6922_v19 }
 0x331   :  { %6359 = vmatprep.subr.bf16.mxu0 %v7057_v33 }
 0x332   :  { %6380 = vmatpush3.bf16.msra.mxu1 %v6923_v25 }
 0x333   :  { %6405 = vmatprep.subr.bf16.mxu1 %v7057_v33 }
 0x334   :  { %6360 = vmatpush3.bf16.msra.mxu0 %v6924_v27 }
 0x335   :  { %6382 = vmatmul.mubr.bf16.vlgmr.msra.gmra.mrb[72].mxu1 %v2762_v32  ;;  %6385 = vmatprep.subr.bf16.mxu0 %v7057_v33 }
 0x336   :  { %6406 = vmatpush3.bf16.msra.mxu1 %v6925_v30  ;;  %6421 = vmatprep.mubr.msk.bf16.mxu1 %vm7058_vm0, %v7057_v33 }
 0x337   :  { %6362 = vmatmul.mubr.bf16.vlgmr.msra.gmra.mrb[68].mxu0 %v2655_v36  ;;  %6407 = vmatprep.subr.bf16.mxu1 %v7057_v33 }
 0x338   :  { %6386 = vmatpush3.bf16.msra.mxu0 %v6926_v34  ;;  %6401 = vmatprep.mubr.msk.bf16.mxu0 %vm7058_vm0, %v7057_v33  ;;  %v6954_v34 = vld [vmem:[%s8645_s4 + $0x5b0] sm:$0xff]  }
 0x339   :  { %6387 = vmatprep.subr.bf16.mxu0 %v7057_v33 }
 0x33a   :  { %6408 = vmatpush3.bf16.msra.mxu1 %v6927_v39 }
 0x33b   :  { %6409 = vmatprep.subr.bf16.mxu1 %v7057_v33 }
 0x33c   :  { %6388 = vmatpush3.bf16.msra.mxu0 %v6928_v29  ;;  %v6955_v29 = vld [vmem:[%s8645_s4 + $0x5f8] sm:$0xff]  }
 0x33d   :  { %6389 = vmatprep.subr.bf16.mxu0 %v7057_v33 }
 0x33e   :  { %6410 = vmatpush3.bf16.msra.mxu1 %v6929_v26  ;;  %v6956_v26 = vld [vmem:[%s8645_s4 + $0x5b8] sm:$0xff]  }
 0x33f   :  { %6411 = vmatprep.subr.bf16.mxu1 %v7057_v33 }
 0x340   :  { %6390 = vmatpush3.bf16.msra.mxu0 %v6930_v42  ;;  %v6957_v42 = vld [vmem:[%s8645_s4 + $0x640] sm:$0xff]  }
 0x341   :  { %6391 = vmatprep.subr.bf16.mxu0 %v7057_v33 }
 0x342   :  { %6412 = vmatpush3.bf16.msra.mxu1 %v6931_v43  ;;  %v3190_v43 = vpack.c.bf16 %v7506_v38, %v7506_v38  ;;  %v6960_v38 = vld [vmem:[%s8645_s4 + $0x608] sm:$0xff]  }
 0x343   :  { %6413 = vmatprep.subr.bf16.mxu1 %v7057_v33 }
 0x344   :  { %6392 = vmatpush3.bf16.msra.mxu0 %v6932_v45  ;;  %v6958_v45 = vld [vmem:[%s8645_s4 + $0x600] sm:$0xff]  }
 0x345   :  { %6393 = vmatprep.subr.bf16.mxu0 %v7057_v33 }
 0x346   :  { %6414 = vmatpush3.bf16.msra.mxu1 %v6933_v46  ;;  %v3083_v46 = vpack.c.bf16 %v7497_v35, %v7497_v35  ;;  %v6961_v35 = vld [vmem:[%s8645_s4 + $0x650] sm:$0xff]  }
 0x347   :  { %6415 = vmatprep.subr.bf16.mxu1 %v7057_v33 }
 0x348   :  { %v1578_v21 = vpop.f32.mrb[48].mxu1  ;;  %6394 = vmatpush3.bf16.msra.mxu0 %v6934_v48  ;;  %v6959_v48 = vld [vmem:[%s8645_s4 + $0x648] sm:$0xff]  }
 0x349   :  { %v6143_v52 = vpop.f32.mrb[49].mxu1  ;;  %6395 = vmatprep.subr.bf16.mxu0 %v7057_v33 }
 0x34a   :  { %v1471_v6 = vpop.f32.mrb[44].mxu0  ;;  %v1581_v3 = vpop.f32.mrb[50].mxu1  ;;  %6416 = vmatpush3.bf16.msra.mxu1 %v6935_v41  ;;  %v6962_v41 = vld [vmem:[%s8645_s4 + $0x610] sm:$0xff]   ;;  %v6965_v52 = vld [vmem:[%s8645_s4 + $0x660] sm:$0xff]  }
 0x34b   :  { %v1477_v55 = vadd.f32 %v1471_v6, %v1370_v24  ;;  %v6123_v59 = vpop.f32.mrb[45].mxu0  ;;  %v6144_v62 = vpop.f32.mrb[51].mxu1  ;;  %6417 = vmatprep.subr.bf16.mxu1 %v7057_v33  ;;  %v6953_v24 = vld [vmem:[%s8645_s4 + $0x5f0] sm:$0xff]   ;;  %v6966_v6 = vld [vmem:[%s8645_s4 + $0x620] sm:$0xff]   ;;  %v6967_v3 = vld [vmem:[%s8645_s4 + $0x668] sm:$0xff]  }
 0x34c   :  { %v1474_v63 = vpop.f32.mrb[46].mxu0  ;;  %6396 = vmatpush3.bf16.msra.mxu0 %v6936_v50  ;;  %v6964_v50 = vld [vmem:[%s8645_s4 + $0x618] sm:$0xff]  }
 0x34d   :  { %v6124_v31 = vpop.f32.mrb[47].mxu0  ;;  %6397 = vmatprep.subr.bf16.mxu0 %v7057_v33  ;;  %v1584_v28 = vadd.f32 %v1578_v21, %v1477_v55  ;;  %v6963_v21 = vld [vmem:[%s8645_s4 + $0x658] sm:$0xff]   ;;  %v6968_v55 = vld [vmem:[%s8645_s4 + $0x628] sm:$0xff]  }
 0x34e   :  { %6418 = vmatpush3.bf16.msra.mxu1 %v6937_v53 }
 0x34f   :  { %6419 = vmatprep.subr.bf16.mxu1 %v7057_v33 }
 0x350   :  { %6398 = vmatpush3.bf16.msra.mxu0 %v6938_v2  ;;  %v6969_v2 = vld [vmem:[%s8645_s4 + $0x670] sm:$0xff]  }
 0x351   :  { %6399 = vmatprep.subr.bf16.mxu0 %v7057_v33 }
 0x352   :  { %6420 = vmatpush3.bf16.msra.mxu1 %v6939_v8 }
 0x353   :  { %6445 = vmatprep.subr.bf16.mxu1 %v7057_v33 }
 0x354   :  { %6400 = vmatpush3.bf16.msra.mxu0 %v6940_v10 }
 0x355   :  { %6422 = vmatmul.mubr.bf16.vlgmr.msra.gmra.mrb[76].mxu1 %v2976_v12  ;;  %6425 = vmatprep.subr.bf16.mxu0 %v7057_v33 }
 0x356   :  { %6446 = vmatpush3.bf16.msra.mxu1 %v6941_v11  ;;  %6461 = vmatprep.mubr.msk.bf16.mxu1 %vm7058_vm0, %v7057_v33  ;;  %v6970_v11 = vld [vmem:[%s8645_s4 + $0x630] sm:$0xff]  }
 0x357   :  { %6402 = vmatmul.mubr.bf16.vlgmr.msra.gmra.mrb[72].mxu0 %v2869_v14  ;;  %6447 = vmatprep.subr.bf16.mxu1 %v7057_v33  ;;  %v6971_v14 = vld [vmem:[%s8645_s4 + $0x678] sm:$0xff]  }
 0x358   :  { %6426 = vmatpush3.bf16.msra.mxu0 %v6942_v13  ;;  %6441 = vmatprep.mubr.msk.bf16.mxu0 %vm7058_vm0, %v7057_v33 }
 0x359   :  { %6427 = vmatprep.subr.bf16.mxu0 %v7057_v33 }
 0x35a   :  { %6448 = vmatpush3.bf16.msra.mxu1 %v6943_v15  ;;  %v6972_v15 = vld [vmem:[%s8645_s4 + $0x638] sm:$0xff]  }
 0x35b   :  { %6449 = vmatprep.subr.bf16.mxu1 %v7057_v33 }
 0x35c   :  { %6428 = vmatpush3.bf16.msra.mxu0 %v6944_v40  ;;  %v6973_v40 = vld [vmem:[%s8645_s4 + $0x6c0] sm:$0xff]  }
 0x35d   :  { %6429 = vmatprep.subr.bf16.mxu0 %v7057_v33 }
 0x35e   :  { %6450 = vmatpush3.bf16.msra.mxu1 %v6945_v37  ;;  %v3404_v37 = vpack.c.bf16 %v7539_v51, %v7539_v51  ;;  %v6976_v51 = vld [vmem:[%s8645_s4 + $0x688] sm:$0xff]  }
 0x35f   :  { %6451 = vmatprep.subr.bf16.mxu1 %v7057_v33 }
 0x360   :  { %6430 = vmatpush3.bf16.msra.mxu0 %v6946_v16  ;;  %v6974_v16 = vld [vmem:[%s8645_s4 + $0x680] sm:$0xff]  }
 0x361   :  { %6431 = vmatprep.subr.bf16.mxu0 %v7057_v33 }
 0x362   :  { %6452 = vmatpush3.bf16.msra.mxu1 %v6947_v17  ;;  %v3297_v17 = vpack.c.bf16 %v7529_v47, %v7529_v47  ;;  %v6977_v47 = vld [vmem:[%s8645_s4 + $0x6d0] sm:$0xff]  }
 0x363   :  { %6453 = vmatprep.subr.bf16.mxu1 %v7057_v33 }
 0x364   :  { %6432 = vmatpush3.bf16.msra.mxu0 %v6948_v18  ;;  %v6975_v18 = vld [vmem:[%s8645_s4 + $0x6c8] sm:$0xff]  }
 0x365   :  { %6433 = vmatprep.subr.bf16.mxu0 %v7057_v33 }
 0x366   :  { %6454 = vmatpush3.bf16.msra.mxu1 %v6949_v20  ;;  %v6978_v20 = vld [vmem:[%s8645_s4 + $0x690] sm:$0xff]  }
 0x367   :  { %6455 = vmatprep.subr.bf16.mxu1 %v7057_v33 }
 0x368   :  { %v1792_v23 = vpop.f32.mrb[52].mxu1  ;;  %6434 = vmatpush3.bf16.msra.mxu0 %v6950_v4  ;;  %v6979_v4 = vld [vmem:[%s8645_s4 + $0x6d8] sm:$0xff]  }
 0x369   :  { %v6183_v22 = vpop.f32.mrb[53].mxu1  ;;  %6435 = vmatprep.subr.bf16.mxu0 %v7057_v33 }
 0x36a   :  { %v1685_v19 = vpop.f32.mrb[48].mxu0  ;;  %v1795_v57 = vpop.f32.mrb[54].mxu1  ;;  %6456 = vmatpush3.bf16.msra.mxu1 %v6951_v1  ;;  %v6980_v1 = vld [vmem:[%s8645_s4 + $0x698] sm:$0xff]   ;;  %v6983_v22 = vld [vmem:[%s8645_s4 + $0x6e8] sm:$0xff]  }
 0x36b   :  { %v1691_v25 = vadd.f32 %v1685_v19, %v1584_v28  ;;  %v6163_v27 = vpop.f32.mrb[49].mxu0  ;;  %v6184_v30 = vpop.f32.mrb[55].mxu1  ;;  %6457 = vmatprep.subr.bf16.mxu1 %v7057_v33  ;;  %v6984_v57 = vld [vmem:[%s8645_s4 + $0x6a8] sm:$0xff]  }
 0x36c   :  { %v1688_v32 = vpop.f32.mrb[50].mxu0  ;;  %6436 = vmatpush3.bf16.msra.mxu0 %v6952_v60  ;;  %v6982_v60 = vld [vmem:[%s8645_s4 + $0x6a0] sm:$0xff]   ;;  %v6985_v30 = vld [vmem:[%s8645_s4 + $0x6f0] sm:$0xff]  }
 0x36d   :  { %v6164_v36 = vpop.f32.mrb[51].mxu0  ;;  %6437 = vmatprep.subr.bf16.mxu0 %v7057_v33  ;;  %v1798_v39 = vadd.f32 %v1792_v23, %v1691_v25  ;;  %v6981_v23 = vld [vmem:[%s8645_s4 + $0x6e0] sm:$0xff]  }
 0x36e   :  { %6458 = vmatpush3.bf16.msra.mxu1 %v6953_v24 }
 0x36f   :  { %6459 = vmatprep.subr.bf16.mxu1 %v7057_v33 }
 0x370   :  { %6438 = vmatpush3.bf16.msra.mxu0 %v6954_v34 }
 0x371   :  { %6439 = vmatprep.subr.bf16.mxu0 %v7057_v33 }
 0x372   :  { %6460 = vmatpush3.bf16.msra.mxu1 %v6955_v29  ;;  %v6986_v29 = vld [vmem:[%s8645_s4 + $0x6b0] sm:$0xff]  }
 0x373   :  { %6485 = vmatprep.subr.bf16.mxu1 %v7057_v33 }
 0x374   :  { %6440 = vmatpush3.bf16.msra.mxu0 %v6956_v26 }
 0x375   :  { %6462 = vmatmul.mubr.bf16.vlgmr.msra.gmra.mrb[80].mxu1 %v3190_v43  ;;  %6465 = vmatprep.subr.bf16.mxu0 %v7057_v33  ;;  %v6987_v43 = vld [vmem:[%s8645_s4 + $0x6f8] sm:$0xff]  }
 0x376   :  { %6486 = vmatpush3.bf16.msra.mxu1 %v6957_v42  ;;  %6501 = vmatprep.mubr.msk.bf16.mxu1 %vm7058_vm0, %v7057_v33 }
 0x377   :  { %6442 = vmatmul.mubr.bf16.vlgmr.msra.gmra.mrb[76].mxu0 %v3083_v46  ;;  %6487 = vmatprep.subr.bf16.mxu1 %v7057_v33  ;;  %v6989_v46 = vld [vmem:[%s8645_s4 + $0x740] sm:$0xff]  }
 0x378   :  { %6466 = vmatpush3.bf16.msra.mxu0 %v6958_v45  ;;  %6481 = vmatprep.mubr.msk.bf16.mxu0 %vm7058_vm0, %v7057_v33  ;;  %v6988_v45 = vld [vmem:[%s8645_s4 + $0x6b8] sm:$0xff]  }
 0x379   :  { %6467 = vmatprep.subr.bf16.mxu0 %v7057_v33 }
 0x37a   :  { %6488 = vmatpush3.bf16.msra.mxu1 %v6959_v48  ;;  %v3618_v48 = vpack.c.bf16 %v7534_v49, %v7534_v49  ;;  %v6992_v49 = vld [vmem:[%s8645_s4 + $0x708] sm:$0xff]  }
 0x37b   :  { %6489 = vmatprep.subr.bf16.mxu1 %v7057_v33 }
 0x37c   :  { %6468 = vmatpush3.bf16.msra.mxu0 %v6960_v38  ;;  %v6990_v38 = vld [vmem:[%s8645_s4 + $0x700] sm:$0xff]  }
 0x37d   :  { %6469 = vmatprep.subr.bf16.mxu0 %v7057_v33 }
 0x37e   :  { %6490 = vmatpush3.bf16.msra.mxu1 %v6961_v35  ;;  %v3511_v35 = vpack.c.bf16 %v7521_v44, %v7521_v44  ;;  %v6993_v44 = vld [vmem:[%s8645_s4 + $0x750] sm:$0xff]  }
 0x37f   :  { %6491 = vmatprep.subr.bf16.mxu1 %v7057_v33 }
 0x380   :  { %6470 = vmatpush3.bf16.msra.mxu0 %v6962_v41  ;;  %v6991_v41 = vld [vmem:[%s8645_s4 + $0x748] sm:$0xff]  }
 0x381   :  { %6471 = vmatprep.subr.bf16.mxu0 %v7057_v33 }
 0x382   :  { %6492 = vmatpush3.bf16.msra.mxu1 %v6963_v21  ;;  %v6994_v21 = vld [vmem:[%s8645_s4 + $0x710] sm:$0xff]  }
 0x383   :  { %6493 = vmatprep.subr.bf16.mxu1 %v7057_v33 }
 0x384   :  { %6472 = vmatpush3.bf16.msra.mxu0 %v6964_v50  ;;  %v6995_v50 = vld [vmem:[%s8645_s4 + $0x758] sm:$0xff]  }
 0x385   :  { %6473 = vmatprep.subr.bf16.mxu0 %v7057_v33 }
 0x386   :  { %6494 = vmatpush3.bf16.msra.mxu1 %v6965_v52  ;;  %v6996_v52 = vld [vmem:[%s8645_s4 + $0x718] sm:$0xff]  }
 0x387   :  { %6495 = vmatprep.subr.bf16.mxu1 %v7057_v33 }
 0x388   :  { %v2006_v53 = vpop.f32.mrb[56].mxu1  ;;  %6474 = vmatpush3.bf16.msra.mxu0 %v6966_v6  ;;  %v6997_v6 = vld [vmem:[%s8645_s4 + $0x760] sm:$0xff]  }
 0x389   :  { %v6223_v59 = vpop.f32.mrb[57].mxu1  ;;  %6475 = vmatprep.subr.bf16.mxu0 %v7057_v33 }
 0x38a   :  { %v1899_v62 = vpop.f32.mrb[52].mxu0  ;;  %v2009_v63 = vpop.f32.mrb[58].mxu1  ;;  %6496 = vmatpush3.bf16.msra.mxu1 %v6967_v3  ;;  %v6998_v3 = vld [vmem:[%s8645_s4 + $0x720] sm:$0xff]   ;;  %v7000_v59 = vld [vmem:[%s8645_s4 + $0x728] sm:$0xff]  }
 0x38b   :  { %v1905_v31 = vadd.f32 %v1899_v62, %v1798_v39  ;;  %v6203_v28 = vpop.f32.mrb[53].mxu0  ;;  %v6224_v8 = vpop.f32.mrb[59].mxu1  ;;  %6497 = vmatprep.subr.bf16.mxu1 %v7057_v33 }
 0x38c   :  { %v1902_v10 = vpop.f32.mrb[54].mxu0  ;;  %6476 = vmatpush3.bf16.msra.mxu0 %v6968_v55 }
 0x38d   :  { %v6204_v12 = vpop.f32.mrb[55].mxu0  ;;  %6477 = vmatprep.subr.bf16.mxu0 %v7057_v33  ;;  %v2012_v13 = vadd.f32 %v2006_v53, %v1905_v31  ;;  %v6999_v53 = vld [vmem:[%s8645_s4 + $0x768] sm:$0xff]   ;;  %v7001_v31 = vld [vmem:[%s8645_s4 + $0x770] sm:$0xff]  }
 0x38e   :  { %6498 = vmatpush3.bf16.msra.mxu1 %v6969_v2  ;;  %v7002_v12 = vld [vmem:[%s8645_s4 + $0x730] sm:$0xff]  }
 0x38f   :  { %6499 = vmatprep.subr.bf16.mxu1 %v7057_v33 }
 0x390   :  { %6478 = vmatpush3.bf16.msra.mxu0 %v6970_v11 }
 0x391   :  { %6479 = vmatprep.subr.bf16.mxu0 %v7057_v33 }
 0x392   :  { %6500 = vmatpush3.bf16.msra.mxu1 %v6971_v14 }
 0x393   :  { %6525 = vmatprep.subr.bf16.mxu1 %v7057_v33 }
 0x394   :  { %6480 = vmatpush3.bf16.msra.mxu0 %v6972_v15  ;;  %v7003_v15 = vld [vmem:[%s8645_s4 + $0x778] sm:$0xff]  }
 0x395   :  { %6502 = vmatmul.mubr.bf16.vlgmr.msra.gmra.mrb[84].mxu1 %v3404_v37  ;;  %6505 = vmatprep.subr.bf16.mxu0 %v7057_v33  ;;  %v7005_v37 = vld [vmem:[%s8645_s4 + $0x7c0] sm:$0xff]  }
 0x396   :  { %6526 = vmatpush3.bf16.msra.mxu1 %v6973_v40  ;;  %6541 = vmatprep.mubr.msk.bf16.mxu1 %vm7058_vm0, %v7057_v33  ;;  %v7004_v40 = vld [vmem:[%s8645_s4 + $0x738] sm:$0xff]  }
 0x397   :  { %6482 = vmatmul.mubr.bf16.vlgmr.msra.gmra.mrb[80].mxu0 %v3297_v17  ;;  %6527 = vmatprep.subr.bf16.mxu1 %v7057_v33  ;;  %v7006_v17 = vld [vmem:[%s8645_s4 + $0x780] sm:$0xff]  }
 0x398   :  { %6506 = vmatpush3.bf16.msra.mxu0 %v6974_v16  ;;  %6521 = vmatprep.mubr.msk.bf16.mxu0 %vm7058_vm0, %v7057_v33  ;;  %v3832_v16 = vpack.c.bf16 %v7567_v61, %v7567_v61  ;;  %v7008_v61 = vld [vmem:[%s8645_s4 + $0x788] sm:$0xff]  }
 0x399   :  { %6507 = vmatprep.subr.bf16.mxu0 %v7057_v33 }
 0x39a   :  { %6528 = vmatpush3.bf16.msra.mxu1 %v6975_v18  ;;  %v3725_v18 = vpack.c.bf16 %v7559_v56, %v7559_v56  ;;  %v7009_v56 = vld [vmem:[%s8645_s4 + $0x7d0] sm:$0xff]  }
 0x39b   :  { %6529 = vmatprep.subr.bf16.mxu1 %v7057_v33 }
 0x39c   :  { %6508 = vmatpush3.bf16.msra.mxu0 %v6976_v51  ;;  %v7007_v51 = vld [vmem:[%s8645_s4 + $0x7c8] sm:$0xff]  }
 0x39d   :  { %6509 = vmatprep.subr.bf16.mxu0 %v7057_v33 }
 0x39e   :  { %6530 = vmatpush3.bf16.msra.mxu1 %v6977_v47  ;;  %v7010_v47 = vld [vmem:[%s8645_s4 + $0x790] sm:$0xff]  }
 0x39f   :  { %6531 = vmatprep.subr.bf16.mxu1 %v7057_v33 }
 0x3a0   :  { %6510 = vmatpush3.bf16.msra.mxu0 %v6978_v20  ;;  %v7011_v20 = vld [vmem:[%s8645_s4 + $0x7d8] sm:$0xff]  }
 0x3a1   :  { %6511 = vmatprep.subr.bf16.mxu0 %v7057_v33 }
 0x3a2   :  { %6532 = vmatpush3.bf16.msra.mxu1 %v6979_v4  ;;  %v7012_v4 = vld [vmem:[%s8645_s4 + $0x798] sm:$0xff]  }
 0x3a3   :  { %6533 = vmatprep.subr.bf16.mxu1 %v7057_v33 }
 0x3a4   :  { %6512 = vmatpush3.bf16.msra.mxu0 %v6980_v1  ;;  %v7013_v1 = vld [vmem:[%s8645_s4 + $0x7e0] sm:$0xff]  }
 0x3a5   :  { %6513 = vmatprep.subr.bf16.mxu0 %v7057_v33 }
 0x3a6   :  { %6534 = vmatpush3.bf16.msra.mxu1 %v6981_v23  ;;  %v7014_v23 = vld [vmem:[%s8645_s4 + $0x7a0] sm:$0xff]  }
 0x3a7   :  { %6535 = vmatprep.subr.bf16.mxu1 %v7057_v33 }
 0x3a8   :  { %v2220_v19 = vpop.f32.mrb[60].mxu1  ;;  %6514 = vmatpush3.bf16.msra.mxu0 %v6982_v60  ;;  %v7015_v60 = vld [vmem:[%s8645_s4 + $0x7e8] sm:$0xff]  }
 0x3a9   :  { %v6263_v24 = vpop.f32.mrb[61].mxu1  ;;  %6515 = vmatprep.subr.bf16.mxu0 %v7057_v33 }
 0x3aa   :  { %v2113_v25 = vpop.f32.mrb[56].mxu0  ;;  %v2223_v27 = vpop.f32.mrb[62].mxu1  ;;  %6536 = vmatpush3.bf16.msra.mxu1 %v6983_v22 }
 0x3ab   :  { %v2119_v32 = vadd.f32 %v2113_v25, %v2012_v13  ;;  %v6243_v34 = vpop.f32.mrb[57].mxu0  ;;  %v6264_v36 = vpop.f32.mrb[63].mxu1  ;;  %6537 = vmatprep.subr.bf16.mxu1 %v7057_v33  ;;  %v7017_v27 = vld [vmem:[%s8645_s4 + $0x7f0] sm:$0xff]  }
 0x3ac   :  { %v2116_v39 = vpop.f32.mrb[58].mxu0  ;;  %6516 = vmatpush3.bf16.msra.mxu0 %v6984_v57 }
 0x3ad   :  { %v6244_v26 = vpop.f32.mrb[59].mxu0  ;;  %6517 = vmatprep.subr.bf16.mxu0 %v7057_v33  ;;  %v2226_v42 = vadd.f32 %v2220_v19, %v2119_v32  ;;  %v7016_v19 = vld [vmem:[%s8645_s4 + $0x7a8] sm:$0xff]   ;;  %v7018_v39 = vld [vmem:[%s8645_s4 + $0x7b0] sm:$0xff]  }
 0x3ae   :  { %6538 = vmatpush3.bf16.msra.mxu1 %v6985_v30 }
 0x3af   :  { %6539 = vmatprep.subr.bf16.mxu1 %v7057_v33 }
 0x3b0   :  { %6518 = vmatpush3.bf16.msra.mxu0 %v6986_v29 }
 0x3b1   :  { %6519 = vmatprep.subr.bf16.mxu0 %v7057_v33 }
 0x3b2   :  { %6540 = vmatpush3.bf16.msra.mxu1 %v6987_v43  ;;  %v7020_v43 = vld [vmem:[%s8645_s4 + $0x7b8] sm:$0xff]  }
 0x3b3   :  { %6565 = vmatprep.subr.bf16.mxu1 %v7057_v33 }
 0x3b4   :  { %6520 = vmatpush3.bf16.msra.mxu0 %v6988_v45  ;;  %v7021_v45 = vld [vmem:[%s8645_s4 + $0x840] sm:$0xff]  }
 0x3b5   :  { %6542 = vmatmul.mubr.bf16.vlgmr.msra.gmra.mrb[88].mxu1 %v3618_v48  ;;  %6545 = vmatprep.subr.bf16.mxu0 %v7057_v33  ;;  %v7022_v48 = vld [vmem:[%s8645_s4 + $0x800] sm:$0xff]  }
 0x3b6   :  { %6566 = vmatpush3.bf16.msra.mxu1 %v6989_v46  ;;  %6581 = vmatprep.mubr.msk.bf16.mxu1 %vm7058_vm0, %v7057_v33  ;;  %v4046_v46 = vpack.c.bf16 %v7562_v58, %v7562_v58  ;;  %v7024_v58 = vld [vmem:[%s8645_s4 + $0x808] sm:$0xff]  }
 0x3b7   :  { %6522 = vmatmul.mubr.bf16.vlgmr.msra.gmra.mrb[84].mxu0 %v3511_v35  ;;  %6567 = vmatprep.subr.bf16.mxu1 %v7057_v33  ;;  %v7023_v35 = vld [vmem:[%s8645_s4 + $0x848] sm:$0xff]  }
 0x3b8   :  { %6546 = vmatpush3.bf16.msra.mxu0 %v6990_v38  ;;  %6561 = vmatprep.mubr.msk.bf16.mxu0 %vm7058_vm0, %v7057_v33  ;;  %v3939_v38 = vpack.c.bf16 %v7553_v54, %v7553_v54  ;;  %v7025_v54 = vld [vmem:[%s8645_s4 + $0x850] sm:$0xff]  }
 0x3b9   :  { %6547 = vmatprep.subr.bf16.mxu0 %v7057_v33 }
 0x3ba   :  { %6568 = vmatpush3.bf16.msra.mxu1 %v6991_v41  ;;  %v7026_v41 = vld [vmem:[%s8645_s4 + $0x810] sm:$0xff]  }
 0x3bb   :  { %6569 = vmatprep.subr.bf16.mxu1 %v7057_v33 }
 0x3bc   :  { %6548 = vmatpush3.bf16.msra.mxu0 %v6992_v49  ;;  %v7027_v49 = vld [vmem:[%s8645_s4 + $0x858] sm:$0xff]  }
 0x3bd   :  { %6549 = vmatprep.subr.bf16.mxu0 %v7057_v33 }
 0x3be   :  { %6570 = vmatpush3.bf16.msra.mxu1 %v6993_v44  ;;  %v7028_v44 = vld [vmem:[%s8645_s4 + $0x818] sm:$0xff]  }
 0x3bf   :  { %6571 = vmatprep.subr.bf16.mxu1 %v7057_v33 }
 0x3c0   :  { %6550 = vmatpush3.bf16.msra.mxu0 %v6994_v21  ;;  %v7029_v21 = vld [vmem:[%s8645_s4 + $0x860] sm:$0xff]  }
 0x3c1   :  { %6551 = vmatprep.subr.bf16.mxu0 %v7057_v33 }
 0x3c2   :  { %6572 = vmatpush3.bf16.msra.mxu1 %v6995_v50  ;;  %v7030_v50 = vld [vmem:[%s8645_s4 + $0x820] sm:$0xff]  }
 0x3c3   :  { %6573 = vmatprep.subr.bf16.mxu1 %v7057_v33 }
 0x3c4   :  { %6552 = vmatpush3.bf16.msra.mxu0 %v6996_v52  ;;  %v7031_v52 = vld [vmem:[%s8645_s4 + $0x868] sm:$0xff]  }
 0x3c5   :  { %6553 = vmatprep.subr.bf16.mxu0 %v7057_v33 }
 0x3c6   :  { %6574 = vmatpush3.bf16.msra.mxu1 %v6997_v6 }
 0x3c7   :  { %6575 = vmatprep.subr.bf16.mxu1 %v7057_v33 }
 0x3c8   :  { %v2434_v55 = vpop.f32.mrb[64].mxu1  ;;  %6554 = vmatpush3.bf16.msra.mxu0 %v6998_v3  ;;  %v7032_v3 = vld [vmem:[%s8645_s4 + $0x828] sm:$0xff]  }
 0x3c9   :  { %v6303_v62 = vpop.f32.mrb[65].mxu1  ;;  %6555 = vmatprep.subr.bf16.mxu0 %v7057_v33 }
 0x3ca   :  { %v2327_v63 = vpop.f32.mrb[60].mxu0  ;;  %v2437_v2 = vpop.f32.mrb[66].mxu1  ;;  %6576 = vmatpush3.bf16.msra.mxu1 %v6999_v53  ;;  %v7033_v62 = vld [vmem:[%s8645_s4 + $0x870] sm:$0xff]  }
 0x3cb   :  { %v2333_v28 = vadd.f32 %v2327_v63, %v2226_v42  ;;  %v6283_v8 = vpop.f32.mrb[61].mxu0  ;;  %v6304_v10 = vpop.f32.mrb[67].mxu1  ;;  %6577 = vmatprep.subr.bf16.mxu1 %v7057_v33  ;;  %v7019_v42 = vld [vmem:[%s8645_s4 + $0x7f8] sm:$0xff]  }
 0x3cc   :  { %v2330_v11 = vpop.f32.mrb[62].mxu0  ;;  %6556 = vmatpush3.bf16.msra.mxu0 %v7000_v59  ;;  %v7034_v8 = vld [vmem:[%s8645_s4 + $0x830] sm:$0xff]  }
 0x3cd   :  { %v6284_v13 = vpop.f32.mrb[63].mxu0  ;;  %6557 = vmatprep.subr.bf16.mxu0 %v7057_v33  ;;  %v2440_v14 = vadd.f32 %v2434_v55, %v2333_v28 }
 0x3ce   :  { %6578 = vmatpush3.bf16.msra.mxu1 %v7001_v31  ;;  %v7036_v13 = vld [vmem:[%s8645_s4 + $0x838] sm:$0xff]  }
 0x3cf   :  { %6579 = vmatprep.subr.bf16.mxu1 %v7057_v33 }
 0x3d0   :  { %6558 = vmatpush3.bf16.msra.mxu0 %v7002_v12  ;;  %v7035_v12 = vld [vmem:[%s8645_s4 + $0x878] sm:$0xff]  }
 0x3d1   :  { %6559 = vmatprep.subr.bf16.mxu0 %v7057_v33 }
 0x3d2   :  { %6580 = vmatpush3.bf16.msra.mxu1 %v7003_v15  ;;  %v4260_v15 = vpack.c.bf16 %v7591_v9, %v7591_v9  ;;  %v7040_v9 = vld [vmem:[%s8645_s4 + $0x888] sm:$0xff]  }
 0x3d3   :  { %6605 = vmatprep.subr.bf16.mxu1 %v7057_v33 }
 0x3d4   :  { %6560 = vmatpush3.bf16.msra.mxu0 %v7004_v40  ;;  %v7038_v40 = vld [vmem:[%s8645_s4 + $0x880] sm:$0xff]  }
 0x3d5   :  { %6582 = vmatmul.mubr.bf16.vlgmr.msra.gmra.mrb[92].mxu1 %v3832_v16  ;;  %6585 = vmatprep.subr.bf16.mxu0 %v7057_v33  ;;  %v7039_v16 = vld [vmem:[%s8645_s4 + $0x8c8] sm:$0xff]  }
 0x3d6   :  { %6606 = vmatpush3.bf16.msra.mxu1 %v7005_v37  ;;  %6621 = vmatprep.mubr.msk.bf16.mxu1 %vm7058_vm0, %v7057_v33  ;;  %v4153_v37 = vpack.c.bf16 %v7583_v5, %v7583_v5  ;;  %v7041_v5 = vld [vmem:[%s8645_s4 + $0x8d0] sm:$0xff]  }
 0x3d7   :  { %6562 = vmatmul.mubr.bf16.vlgmr.msra.gmra.mrb[88].mxu0 %v3725_v18  ;;  %6607 = vmatprep.subr.bf16.mxu1 %v7057_v33  ;;  %v7043_v18 = vld [vmem:[%s8645_s4 + $0x8d8] sm:$0xff]  }
 0x3d8   :  { %6586 = vmatpush3.bf16.msra.mxu0 %v7006_v17  ;;  %6601 = vmatprep.mubr.msk.bf16.mxu0 %vm7058_vm0, %v7057_v33  ;;  %v7042_v17 = vld [vmem:[%s8645_s4 + $0x890] sm:$0xff]  }
 0x3d9   :  { %6587 = vmatprep.subr.bf16.mxu0 %v7057_v33 }
 0x3da   :  { %6608 = vmatpush3.bf16.msra.mxu1 %v7007_v51  ;;  %v7044_v51 = vld [vmem:[%s8645_s4 + $0x898] sm:$0xff]  }
 0x3db   :  { %6609 = vmatprep.subr.bf16.mxu1 %v7057_v33 }
 0x3dc   :  { %6588 = vmatpush3.bf16.msra.mxu0 %v7008_v61  ;;  %v7045_v61 = vld [vmem:[%s8645_s4 + $0x8e0] sm:$0xff]  }
 0x3dd   :  { %6589 = vmatprep.subr.bf16.mxu0 %v7057_v33 }
 0x3de   :  { %6610 = vmatpush3.bf16.msra.mxu1 %v7009_v56  ;;  %v7046_v56 = vld [vmem:[%s8645_s4 + $0x8a0] sm:$0xff]  }
 0x3df   :  { %6611 = vmatprep.subr.bf16.mxu1 %v7057_v33 }
 0x3e0   :  { %6590 = vmatpush3.bf16.msra.mxu0 %v7010_v47  ;;  %v7047_v47 = vld [vmem:[%s8645_s4 + $0x8e8] sm:$0xff]  }
 0x3e1   :  { %6591 = vmatprep.subr.bf16.mxu0 %v7057_v33 }
 0x3e2   :  { %6612 = vmatpush3.bf16.msra.mxu1 %v7011_v20 }
 0x3e3   :  { %6613 = vmatprep.subr.bf16.mxu1 %v7057_v33 }
 0x3e4   :  { %6592 = vmatpush3.bf16.msra.mxu0 %v7012_v4  ;;  %v7048_v4 = vld [vmem:[%s8645_s4 + $0x8a8] sm:$0xff]  }
 0x3e5   :  { %6593 = vmatprep.subr.bf16.mxu0 %v7057_v33 }
 0x3e6   :  { %6614 = vmatpush3.bf16.msra.mxu1 %v7013_v1 }
 0x3e7   :  { %6615 = vmatprep.subr.bf16.mxu1 %v7057_v33 }
 0x3e8   :  { %v2648_v22 = vpop.f32.mrb[68].mxu1  ;;  %6594 = vmatpush3.bf16.msra.mxu0 %v7014_v23 }
 0x3e9   :  { %v6343_v57 = vpop.f32.mrb[69].mxu1  ;;  %6595 = vmatprep.subr.bf16.mxu0 %v7057_v33 }
 0x3ea   :  { %v2541_v24 = vpop.f32.mrb[64].mxu0  ;;  %v2651_v25 = vpop.f32.mrb[70].mxu1  ;;  %6616 = vmatpush3.bf16.msra.mxu1 %v7015_v60 }
 0x3eb   :  { %v2547_v30 = vadd.f32 %v2541_v24, %v2440_v14  ;;  %v6323_v32 = vpop.f32.mrb[65].mxu0  ;;  %v6344_v34 = vpop.f32.mrb[71].mxu1  ;;  %6617 = vmatprep.subr.bf16.mxu1 %v7057_v33  ;;  %v7037_v14 = vld [vmem:[%s8645_s4 + $0x8c0] sm:$0xff]  }
 0x3ec   :  { %v2544_v36 = vpop.f32.mrb[66].mxu0  ;;  %6596 = vmatpush3.bf16.msra.mxu0 %v7016_v19  ;;  %v7051_v34 = vld [vmem:[%s8645_s4 + $0x8f8] sm:$0xff]  }
 0x3ed   :  { %v6324_v29 = vpop.f32.mrb[67].mxu0  ;;  %6597 = vmatprep.subr.bf16.mxu0 %v7057_v33  ;;  %v2654_v26 = vadd.f32 %v2648_v22, %v2547_v30  ;;  %v7049_v22 = vld [vmem:[%s8645_s4 + $0x8f0] sm:$0xff]   ;;  %v7052_v36 = vld [vmem:[%s8645_s4 + $0x8b8] sm:$0xff]  }
 0x3ee   :  { %6618 = vmatpush3.bf16.msra.mxu1 %v7017_v27  ;;  %v7050_v27 = vld [vmem:[%s8645_s4 + $0x8b0] sm:$0xff]   ;;  %v4367_v29 = vpack.c.bf16 %v7577_v0, %v7577_v0 }
 0x3ef   :  { %6619 = vmatprep.subr.bf16.mxu1 %v7057_v33 }
 0x3f0   :  { %6598 = vmatpush3.bf16.msra.mxu0 %v7018_v39  ;;  %v4474_v39 = vpack.c.bf16 %v7586_v7, %v7586_v7 }
 0x3f1   :  { %6599 = vmatprep.subr.bf16.mxu0 %v7057_v33 }
 0x3f2   :  { %6620 = vmatpush3.bf16.msra.mxu1 %v7019_v42 }
 0x3f3   :  { %6645 = vmatprep.subr.bf16.mxu1 %v7057_v33 }
 0x3f4   :  { %6600 = vmatpush3.bf16.msra.mxu0 %v7020_v43 }
 0x3f5   :  { %6622 = vmatmul.mubr.bf16.vlgmr.msra.gmra.mrb[96].mxu1 %v4046_v46  ;;  %6625 = vmatprep.subr.bf16.mxu0 %v7057_v33 }
 0x3f6   :  { %6646 = vmatpush3.bf16.msra.mxu1 %v7021_v45  ;;  %6661 = vmatprep.mubr.msk.bf16.mxu1 %vm7058_vm0, %v7057_v33 }
 0x3f7   :  { %6602 = vmatmul.mubr.bf16.vlgmr.msra.gmra.mrb[92].mxu0 %v3939_v38  ;;  %6647 = vmatprep.subr.bf16.mxu1 %v7057_v33 }
 0x3f8   :  { %6626 = vmatpush3.bf16.msra.mxu0 %v7022_v48  ;;  %6641 = vmatprep.mubr.msk.bf16.mxu0 %vm7058_vm0, %v7057_v33 }
 0x3f9   :  { %6627 = vmatprep.subr.bf16.mxu0 %v7057_v33 }
 0x3fa   :  { %6648 = vmatpush3.bf16.msra.mxu1 %v7023_v35 }
 0x3fb   :  { %6649 = vmatprep.subr.bf16.mxu1 %v7057_v33 }
 0x3fc   :  { %6628 = vmatpush3.bf16.msra.mxu0 %v7024_v58 }
 0x3fd   :  { %6629 = vmatprep.subr.bf16.mxu0 %v7057_v33 }
 0x3fe   :  { %6650 = vmatpush3.bf16.msra.mxu1 %v7025_v54 }
 0x3ff   :  { %6651 = vmatprep.subr.bf16.mxu1 %v7057_v33 }
 0x400   :  { %6630 = vmatpush3.bf16.msra.mxu0 %v7026_v41 }
 0x401   :  { %6631 = vmatprep.subr.bf16.mxu0 %v7057_v33 }
 0x402   :  { %6652 = vmatpush3.bf16.msra.mxu1 %v7027_v49 }
 0x403   :  { %6653 = vmatprep.subr.bf16.mxu1 %v7057_v33 }
 0x404   :  { %6632 = vmatpush3.bf16.msra.mxu0 %v7028_v44 }
 0x405   :  { %6633 = vmatprep.subr.bf16.mxu0 %v7057_v33 }
 0x406   :  { %6654 = vmatpush3.bf16.msra.mxu1 %v7029_v21 }
 0x407   :  { %6655 = vmatprep.subr.bf16.mxu1 %v7057_v33 }
 0x408   :  { %v2862_v6 = vpop.f32.mrb[72].mxu1  ;;  %6634 = vmatpush3.bf16.msra.mxu0 %v7030_v50 }
 0x409   :  { %v6383_v53 = vpop.f32.mrb[73].mxu1  ;;  %6635 = vmatprep.subr.bf16.mxu0 %v7057_v33 }
 0x40a   :  { %v2755_v55 = vpop.f32.mrb[68].mxu0  ;;  %v2865_v59 = vpop.f32.mrb[74].mxu1  ;;  %6656 = vmatpush3.bf16.msra.mxu1 %v7031_v52 }
 0x40b   :  { %v2761_v63 = vadd.f32 %v2755_v55, %v2654_v26  ;;  %v6363_v2 = vpop.f32.mrb[69].mxu0  ;;  %v6384_v31 = vpop.f32.mrb[75].mxu1  ;;  %6657 = vmatprep.subr.bf16.mxu1 %v7057_v33 }
 0x40c   :  { %v2758_v28 = vpop.f32.mrb[70].mxu0  ;;  %6636 = vmatpush3.bf16.msra.mxu0 %v7032_v3 }
 0x40d   :  { %v6364_v10 = vpop.f32.mrb[71].mxu0  ;;  %6637 = vmatprep.subr.bf16.mxu0 %v7057_v33  ;;  %v2868_v11 = vadd.f32 %v2862_v6, %v2761_v63 }
 0x40e   :  { %6658 = vmatpush3.bf16.msra.mxu1 %v7033_v62 }
 0x40f   :  { %6659 = vmatprep.subr.bf16.mxu1 %v7057_v33 }
 0x410   :  { %6638 = vmatpush3.bf16.msra.mxu0 %v7034_v8 }
 0x411   :  { %6639 = vmatprep.subr.bf16.mxu0 %v7057_v33 }
 0x412   :  { %6660 = vmatpush3.bf16.msra.mxu1 %v7035_v12 }
 0x413   :  { %6685 = vmatprep.subr.bf16.mxu1 %v7057_v33 }
 0x414   :  { %6640 = vmatpush3.bf16.msra.mxu0 %v7036_v13 }
 0x415   :  { %6662 = vmatmul.mubr.bf16.vlgmr.msra.gmra.mrb[100].mxu1 %v4260_v15  ;;  %6665 = vmatprep.subr.bf16.mxu0 %v7057_v33 }
 0x416   :  { %6686 = vmatpush3.bf16.msra.mxu1 %v7037_v14  ;;  %6701 = vmatprep.mubr.msk.bf16.mxu1 %vm7058_vm0, %v7057_v33 }
 0x417   :  { %6642 = vmatmul.mubr.bf16.vlgmr.msra.gmra.mrb[96].mxu0 %v4153_v37  ;;  %6687 = vmatprep.subr.bf16.mxu1 %v7057_v33 }
 0x418   :  { %6666 = vmatpush3.bf16.msra.mxu0 %v7038_v40  ;;  %6681 = vmatprep.mubr.msk.bf16.mxu0 %vm7058_vm0, %v7057_v33 }
 0x419   :  { %6667 = vmatprep.subr.bf16.mxu0 %v7057_v33 }
 0x41a   :  { %6688 = vmatpush3.bf16.msra.mxu1 %v7039_v16 }
 0x41b   :  { %6689 = vmatprep.subr.bf16.mxu1 %v7057_v33 }
 0x41c   :  { %6668 = vmatpush3.bf16.msra.mxu0 %v7040_v9 }
 0x41d   :  { %6669 = vmatprep.subr.bf16.mxu0 %v7057_v33 }
 0x41e   :  { %6690 = vmatpush3.bf16.msra.mxu1 %v7041_v5 }
 0x41f   :  { %6691 = vmatprep.subr.bf16.mxu1 %v7057_v33 }
 0x420   :  { %6670 = vmatpush3.bf16.msra.mxu0 %v7042_v17 }
 0x421   :  { %6671 = vmatprep.subr.bf16.mxu0 %v7057_v33 }
 0x422   :  { %6692 = vmatpush3.bf16.msra.mxu1 %v7043_v18 }
 0x423   :  { %6693 = vmatprep.subr.bf16.mxu1 %v7057_v33 }
 0x424   :  { %6672 = vmatpush3.bf16.msra.mxu0 %v7044_v51 }
 0x425   :  { %6673 = vmatprep.subr.bf16.mxu0 %v7057_v33 }
 0x426   :  { %6694 = vmatpush3.bf16.msra.mxu1 %v7045_v61 }
 0x427   :  { %6695 = vmatprep.subr.bf16.mxu1 %v7057_v33 }
 0x428   :  { %v3076_v20 = vpop.f32.mrb[76].mxu1  ;;  %6674 = vmatpush3.bf16.msra.mxu0 %v7046_v56 }
 0x429   :  { %v6423_v1 = vpop.f32.mrb[77].mxu1  ;;  %6675 = vmatprep.subr.bf16.mxu0 %v7057_v33 }
 0x42a   :  { %v2969_v23 = vpop.f32.mrb[72].mxu0  ;;  %v3079_v60 = vpop.f32.mrb[78].mxu1  ;;  %6696 = vmatpush3.bf16.msra.mxu1 %v7047_v47 }
 0x42b   :  { %v2975_v19 = vadd.f32 %v2969_v23, %v2868_v11  ;;  %v6403_v57 = vpop.f32.mrb[73].mxu0  ;;  %v6424_v24 = vpop.f32.mrb[79].mxu1  ;;  %6697 = vmatprep.subr.bf16.mxu1 %v7057_v33 }
 0x42c   :  { %v2972_v25 = vpop.f32.mrb[74].mxu0  ;;  %6676 = vmatpush3.bf16.msra.mxu0 %v7048_v4 }
 0x42d   :  { %v6404_v30 = vpop.f32.mrb[75].mxu0  ;;  %6677 = vmatprep.subr.bf16.mxu0 %v7057_v33  ;;  %v3082_v32 = vadd.f32 %v3076_v20, %v2975_v19 }
 0x42e   :  { %6698 = vmatpush3.bf16.msra.mxu1 %v7049_v22 }
 0x42f   :  { %6699 = vmatprep.subr.bf16.mxu1 %v7057_v33 }
 0x430   :  { %6678 = vmatpush3.bf16.msra.mxu0 %v7050_v27 }
 0x431   :  { %6679 = vmatprep.subr.bf16.mxu0 %v7057_v33 }
 0x432   :  { %6700 = vmatpush3.bf16.msra.mxu1 %v7051_v34 }
 0x434   :  { %6680 = vmatpush3.bf16.msra.mxu0 %v7052_v36 }
 0x435   :  { %6702 = vmatmul.mubr.bf16.vlgmr.msra.gmra.mrb[104].mxu1 %v4474_v39 }
 0x437   :  { %6682 = vmatmul.mubr.bf16.vlgmr.msra.gmra.mrb[100].mxu0 %v4367_v29 }
 0x448   :  { %v3290_v26 = vpop.f32.mrb[80].mxu1 }
 0x449   :  { %v6463_v42 = vpop.f32.mrb[81].mxu1 }
 0x44a   :  { %v3183_v43 = vpop.f32.mrb[76].mxu0  ;;  %v3293_v45 = vpop.f32.mrb[82].mxu1 }
 0x44b   :  { %v3189_v46 = vadd.f32 %v3183_v43, %v3082_v32  ;;  %v6443_v48 = vpop.f32.mrb[77].mxu0  ;;  %v6464_v38 = vpop.f32.mrb[83].mxu1  ;;  %v5518_v45 = vld [vmem:[%s8647_s5] ss:$0 sm:$0xff] }
 0x44c   :  { %v3186_v35 = vpop.f32.mrb[78].mxu0 }
 0x44d   :  { %v6444_v58 = vpop.f32.mrb[79].mxu0  ;;  %v3296_v33 = vadd.f32 %v3290_v26, %v3189_v46 }
 0x468   :  { %v3504_v54 = vpop.f32.mrb[84].mxu1 }
 0x469   :  { %v6503_v41 = vpop.f32.mrb[85].mxu1 }
 0x46a   :  { %v3397_v49 = vpop.f32.mrb[80].mxu0  ;;  %v3507_v7 = vpop.f32.mrb[86].mxu1 }
 0x46b   :  { %v3403_v44 = vadd.f32 %v3397_v49, %v3296_v33  ;;  %v6483_v21 = vpop.f32.mrb[81].mxu0  ;;  %v6504_v50 = vpop.f32.mrb[87].mxu1  ;;  %v4592_v33 = vld [vmem:[%s8648_s6] sm:$0xff] }
 0x46c   :  { %v3400_v0 = vpop.f32.mrb[82].mxu0 }
 0x46d   :  { %v6484_v52 = vpop.f32.mrb[83].mxu0  ;;  %v3510_v6 = vadd.f32 %v3504_v54, %v3403_v44 }
 0x488   :  { %v3718_v3 = vpop.f32.mrb[88].mxu1 }
 0x489   :  { %v6543_v53 = vpop.f32.mrb[89].mxu1 }
 0x48a   :  { %v3611_v55 = vpop.f32.mrb[84].mxu0  ;;  %v3721_v59 = vpop.f32.mrb[90].mxu1 }
 0x48b   :  { %v3617_v62 = vadd.f32 %v3611_v55, %v3510_v6  ;;  %v6523_v63 = vpop.f32.mrb[85].mxu0  ;;  %v6544_v2 = vpop.f32.mrb[91].mxu1 }
 0x48c   :  { %v3614_v31 = vpop.f32.mrb[86].mxu0 }
 0x48d   :  { %v6524_v28 = vpop.f32.mrb[87].mxu0  ;;  %v3724_v8 = vadd.f32 %v3718_v3, %v3617_v62 }
 0x4a8   :  { %v3932_v10 = vpop.f32.mrb[92].mxu1 }
 0x4a9   :  { %v6583_v11 = vpop.f32.mrb[93].mxu1 }
 0x4aa   :  { %v3825_v12 = vpop.f32.mrb[88].mxu0  ;;  %v3935_v13 = vpop.f32.mrb[94].mxu1 }
 0x4ab   :  { %v3831_v14 = vadd.f32 %v3825_v12, %v3724_v8  ;;  %v6563_v15 = vpop.f32.mrb[89].mxu0  ;;  %v6584_v40 = vpop.f32.mrb[95].mxu1 }
 0x4ac   :  { %v3828_v37 = vpop.f32.mrb[90].mxu0 }
 0x4ad   :  { %v6564_v16 = vpop.f32.mrb[91].mxu0  ;;  %v3938_v9 = vadd.f32 %v3932_v10, %v3831_v14 }
 0x4c8   :  { %v4146_v5 = vpop.f32.mrb[96].mxu1 }
 0x4c9   :  { %v6623_v17 = vpop.f32.mrb[97].mxu1 }
 0x4ca   :  { %v4039_v18 = vpop.f32.mrb[92].mxu0  ;;  %v4149_v51 = vpop.f32.mrb[98].mxu1 }
 0x4cb   :  { %v4045_v61 = vadd.f32 %v4039_v18, %v3938_v9  ;;  %v6603_v56 = vpop.f32.mrb[93].mxu0  ;;  %v6624_v47 = vpop.f32.mrb[99].mxu1 }
 0x4cc   :  { %v4042_v20 = vpop.f32.mrb[94].mxu0 }
 0x4cd   :  { %v6604_v4 = vpop.f32.mrb[95].mxu0  ;;  %v4152_v1 = vadd.f32 %v4146_v5, %v4045_v61 }
 0x4e8   :  { %v4360_v23 = vpop.f32.mrb[100].mxu1 }
 0x4e9   :  { %v6663_v60 = vpop.f32.mrb[101].mxu1 }
 0x4ea   :  { %v4253_v22 = vpop.f32.mrb[96].mxu0  ;;  %v4363_v19 = vpop.f32.mrb[102].mxu1 }
 0x4eb   :  { %v4259_v57 = vadd.f32 %v4253_v22, %v4152_v1  ;;  %v6643_v24 = vpop.f32.mrb[97].mxu0  ;;  %v6664_v25 = vpop.f32.mrb[103].mxu1 }
 0x4ec   :  { %v4256_v27 = vpop.f32.mrb[98].mxu0 }
 0x4ed   :  { %v6644_v30 = vpop.f32.mrb[99].mxu0  ;;  %v4366_v32 = vadd.f32 %v4360_v23, %v4259_v57 }
 0x508   :  { %v4574_v34 = vpop.f32.mrb[104].mxu1 }
 0x509   :  { %v6703_v36 = vpop.f32.mrb[105].mxu1 }
 0x50a   :  { %v4467_v39 = vpop.f32.mrb[100].mxu0  ;;  %v4577_v29 = vpop.f32.mrb[106].mxu1 }
 0x50b   :  { %v4473_v26 = vadd.f32 %v4467_v39, %v4366_v32  ;;  %v6683_v42 = vpop.f32.mrb[101].mxu0  ;;  %v6704_v43 = vpop.f32.mrb[107].mxu1 }
 0x50c   :  { %v4470_v46 = vpop.f32.mrb[102].mxu0 }
 0x50d   :  { %v4580_v48 = vadd.f32 %v4574_v34, %v4473_v26  ;;  %v6684_v38 = vpop.f32.mrb[103].mxu0 }
 0x50f   :  { %v4588_v35 = vadd.f32 %v5518_v45, %v4580_v48 }
 0x511   :  { %vm4589_vm1 = vcmp.ge.f32.partialorder %v4588_v35, 0.0  ;;  %v4590_v58 = vmul.f32 0.2, %v4588_v35 }
 0x513   :  { %v4591_v54 = vsel %vm4589_vm1, %v4588_v35, %v4590_v58 }
 0x514   :  { %v4593_v41 = vmul.f32 %v4592_v33, %v4591_v54 }
 0x516   :  { %v4595_v49 = vrot.slane %v4593_v41, 2  ;;  %v4598_v44 = vrot.slane %v4593_v41, 4  ;;  %v4601_v50 = vrot.slane %v4593_v41, 6 }
 0x518   :  { %v4597_v7 = vadd.f32 %v4595_v49, %v4593_v41 }
 0x51a   :  { %v4600_v21 = vadd.f32 %v4598_v44, %v4597_v7 }
 0x51c   :  { %v4603_v0 = vadd.f32 %v4601_v50, %v4600_v21 }
 0x51e   :  { %v4605_v52 = vsel %vm4604_vm2, %v4603_v0, 0.0 }
 0x51f   :  { %4606 = vadd.xlane.f32.xlu0 %v4605_v52 }
 0x5ac   :  { %v4607_v6 = vpop.xlane.xlu0 %4606 }
 0x5ad   :  { %v4608_v3 = vsub.f32 0.0, %v4607_v6 }
 0x5af   :  { %v4609_v53 = vmul.f32 1.442695, %v4608_v3 }
 0x5b1   :  { %7053 = vpow2.f32 %v4609_v53 }
 0x5bb   :  { %v7054_v55 = vpop.eup %7053 }
 0x5bc   :  { %v4611_v59 = vadd.f32 1.0, %v7054_v55 }
 0x5be   :  { %7055 = vrcp.f32 %v4611_v59 }
 0x5c8   :  { %v7056_v62 = vpop.eup %7055 }
 0x5c9   :  { %4614 = vst.msk [vmem:[%s8649_s7] sm:$0x3] %vm4613_vm3, %v7056_v62 }

</bundles_post_ra>
